<compile_context>
chip_gen: v5e
topology: v5e:2x2
jax: 0.10.0
libtpu: 0.0.40
codegen_flags: <defaults>
</compile_context>

<pallas_src>
import functools

import jax
import jax.numpy as jnp
from jax.experimental import pallas as pl
from jax.experimental.pallas import tpu as pltpu


# ----------------------------------------------------------------------------
# Constants / helpers
# ----------------------------------------------------------------------------
_NEG_INF = -1e30
_VMEM_LIMIT = 48 * 1024 * 1024   # <= v7x physical (64 MiB), generous on v5e/v6e
_SEQ_ALIGN = 64                  # token axis padded once to a multiple of this
_FULL_K_MAX = 2048               # single full-K block up to this contraction size

_ROW_TILES = (512, 256, 128, 64, 32, 16, 8)
_COL_TILES = (512, 256, 128)


def _round_up(v, m):
    return ((v + m - 1) // m) * m


def _pick_tile(dim, candidates):
    """Largest candidate that divides `dim`; falls back to the full extent
    (a full-dim block is always a legal block shape)."""
    for c in candidates:
        if dim % c == 0:
            return c
    return dim


# ----------------------------------------------------------------------------
# Linear kernels: y = x @ w + b  (+ optional GELU, + optional fused residual)
# ----------------------------------------------------------------------------
def _linear_fullk_kernel(*refs, activation, has_residual):
    if has_residual:
        x_ref, w_ref, b_ref, r_ref, o_ref = refs
    else:
        x_ref, w_ref, b_ref, o_ref = refs
        r_ref = None
    y = jnp.dot(x_ref[...], w_ref[...], preferred_element_type=jnp.float32)
    y = y + b_ref[...].astype(jnp.float32)
    if activation == "gelu":
        y = jax.nn.gelu(y, approximate=True)
    if r_ref is not None:
        y = y + r_ref[...].astype(jnp.float32)
    o_ref[...] = y.astype(o_ref.dtype)


def _linear_tiledk_kernel(*refs, activation, has_residual):
    if has_residual:
        x_ref, w_ref, b_ref, r_ref, o_ref, acc_ref = refs
    else:
        x_ref, w_ref, b_ref, o_ref, acc_ref = refs
        r_ref = None
    k = pl.program_id(2)

    @pl.when(k == 0)
    def _():
        acc_ref[...] = jnp.zeros_like(acc_ref)

    acc_ref[...] += jnp.dot(x_ref[...], w_ref[...],
                            preferred_element_type=jnp.float32)

    @pl.when(k == pl.num_programs(2) - 1)
    def _():
        y = acc_ref[...] + b_ref[...].astype(jnp.float32)
        if activation == "gelu":
            y = jax.nn.gelu(y, approximate=True)
        if r_ref is not None:
            y = y + r_ref[...].astype(jnp.float32)
        o_ref[...] = y.astype(o_ref.dtype)


def pallas_linear(x, w, b, residual=None, activation=None,
                  out_dtype=jnp.bfloat16):
    """y = x @ w + b.  x:(M,K) bf16, w:(K,N) bf16, b:(N,) f32."""
    M, K = x.shape
    K2, N = w.shape
    assert K == K2
    tm = _pick_tile(M, _ROW_TILES)
    tn = _pick_tile(N, _COL_TILES)
    bias = b.reshape(1, N)
    has_res = residual is not None

    if K <= _FULL_K_MAX:
        in_specs = [
            pl.BlockSpec((tm, K), lambda i, j: (i, 0)),
            pl.BlockSpec((K, tn), lambda i, j: (0, j)),
            pl.BlockSpec((1, tn), lambda i, j: (0, j)),
        ]
        args = [x, w, bias]
        if has_res:
            in_specs.append(pl.BlockSpec((tm, tn), lambda i, j: (i, j)))
            args.append(residual)
        kern = functools.partial(_linear_fullk_kernel, activation=activation,
                                 has_residual=has_res)
        return pl.pallas_call(
            kern,
            out_shape=jax.ShapeDtypeStruct((M, N), out_dtype),
            grid=(M // tm, N // tn),
            in_specs=in_specs,
            out_specs=pl.BlockSpec((tm, tn), lambda i, j: (i, j)),
            compiler_params=pltpu.CompilerParams(
                dimension_semantics=("parallel", "parallel"),
                vmem_limit_bytes=_VMEM_LIMIT),
        )(*args)

    # Large-K fallback: accumulate over a K grid axis with an f32 scratch.
    tk = _pick_tile(K, _COL_TILES)
    in_specs = [
        pl.BlockSpec((tm, tk), lambda i, j, k: (i, k)),
        pl.BlockSpec((tk, tn), lambda i, j, k: (k, j)),
        pl.BlockSpec((1, tn), lambda i, j, k: (0, j)),
    ]
    args = [x, w, bias]
    if has_res:
        in_specs.append(pl.BlockSpec((tm, tn), lambda i, j, k: (i, j)))
        args.append(residual)
    kern = functools.partial(_linear_tiledk_kernel, activation=activation,
                             has_residual=has_res)
    return pl.pallas_call(
        kern,
        out_shape=jax.ShapeDtypeStruct((M, N), out_dtype),
        grid=(M // tm, N // tn, K // tk),
        in_specs=in_specs,
        out_specs=pl.BlockSpec((tm, tn), lambda i, j, k: (i, j)),
        scratch_shapes=[pltpu.VMEM((tm, tn), jnp.float32)],
        compiler_params=pltpu.CompilerParams(
            dimension_semantics=("parallel", "parallel", "arbitrary"),
            vmem_limit_bytes=_VMEM_LIMIT),
    )(*args)


# ----------------------------------------------------------------------------
# Fused LayerNorm + linear: y = LN(x) @ w + b  (+ optional GELU)
# ----------------------------------------------------------------------------
def _ln_linear_kernel(x_ref, g_ref, b_ref, w_ref, bias_ref, o_ref, xn_ref, *,
                      activation, eps):
    j = pl.program_id(1)

    # Normalize once per row tile (j == 0); the bf16 result stays in VMEM and
    # is reused for every output-column tile (j innermost, "arbitrary").
    @pl.when(j == 0)
    def _():
        x = x_ref[...].astype(jnp.float32)
        mean = jnp.mean(x, axis=-1, keepdims=True)
        xc = x - mean
        var = jnp.mean(xc * xc, axis=-1, keepdims=True)
        y = xc * jax.lax.rsqrt(var + eps)
        y = y * g_ref[...].astype(jnp.float32) + b_ref[...].astype(jnp.float32)
        xn_ref[...] = y.astype(xn_ref.dtype)

    acc = jnp.dot(xn_ref[...], w_ref[...], preferred_element_type=jnp.float32)
    acc = acc + bias_ref[...].astype(jnp.float32)
    if activation == "gelu":
        acc = jax.nn.gelu(acc, approximate=True)
    o_ref[...] = acc.astype(o_ref.dtype)


def pallas_ln_linear(x, gamma, beta, w, b, activation=None, eps=1e-6,
                     out_dtype=jnp.bfloat16):
    """y = LayerNorm(x) @ w + b.  x:(M,D) bf16, w:(D,N) bf16."""
    M, D = x.shape
    D2, N = w.shape
    assert D == D2
    tm = _pick_tile(M, _ROW_TILES)
    tn = _pick_tile(N, _COL_TILES)
    kern = functools.partial(_ln_linear_kernel, activation=activation, eps=eps)
    return pl.pallas_call(
        kern,
        out_shape=jax.ShapeDtypeStruct((M, N), out_dtype),
        grid=(M // tm, N // tn),
        in_specs=[
            pl.BlockSpec((tm, D), lambda i, j: (i, 0)),
            pl.BlockSpec((1, D), lambda i, j: (0, 0)),
            pl.BlockSpec((1, D), lambda i, j: (0, 0)),
            pl.BlockSpec((D, tn), lambda i, j: (0, j)),
            pl.BlockSpec((1, tn), lambda i, j: (0, j)),
        ],
        out_specs=pl.BlockSpec((tm, tn), lambda i, j: (i, j)),
        scratch_shapes=[pltpu.VMEM((tm, D), jnp.bfloat16)],
        compiler_params=pltpu.CompilerParams(
            dimension_semantics=("parallel", "arbitrary"),
            vmem_limit_bytes=_VMEM_LIMIT),
    )(x, gamma.reshape(1, D), beta.reshape(1, D), w, b.reshape(1, N))


# ----------------------------------------------------------------------------
# Attention: one-shot softmax over the full (short) ViT sequence.
# Reads the fused (tokens, 3D) QKV slab directly (no host-side head split),
# handles heads via static lane slices, writes the output lane-dense in D.
# Scale is pre-folded into the Q projection weights.
# ----------------------------------------------------------------------------
def _attn_kernel(q_ref, k_ref, v_ref, o_ref, *, nh, dh, t_real, t_pad):
    ts = q_ref.shape[0]
    need_mask = t_real < t_pad
    if need_mask:
        kv_valid = jax.lax.broadcasted_iota(jnp.int32, (ts, t_pad), 1) < t_real

    outs = []
    for h in range(nh):
        sl = slice(h * dh, (h + 1) * dh)
        qh = q_ref[:, sl]                                    # (ts, dh) bf16
        kh = k_ref[:, sl]                                    # (Tp, dh) bf16
        vh = v_ref[:, sl]
        s = jax.lax.dot_general(qh, kh, (((1,), (1,)), ((), ())),
                                preferred_element_type=jnp.float32)  # (ts, Tp)
        if need_mask:
            s = jnp.where(kv_valid, s, _NEG_INF)
        m = jnp.max(s, axis=-1, keepdims=True)
        p = jnp.exp(s - m)
        l = jnp.sum(p, axis=-1, keepdims=True)
        oh = jnp.dot(p.astype(vh.dtype), vh, preferred_element_type=jnp.float32)
        outs.append(oh * pl.reciprocal(l, approx=False))
    o_ref[...] = jnp.concatenate(outs, axis=-1).astype(o_ref.dtype)


def pallas_attention(qkv, nh, dh, t_real):
    """qkv: (B, Tp, 3*D) bf16 with columns [Q | K | V]; returns (B, Tp, D)."""
    B, Tp, threeD = qkv.shape
    D = threeD // 3
    assert D == nh * dh
    assert D % 128 == 0, "model width must be lane aligned"
    ts = _pick_tile(Tp, (256, 128, 64, 32, 16, 8))
    kern = functools.partial(_attn_kernel, nh=nh, dh=dh, t_real=t_real, t_pad=Tp)
    return pl.pallas_call(
        kern,
        out_shape=jax.ShapeDtypeStruct((B, Tp, D), jnp.bfloat16),
        grid=(B, Tp // ts),
        in_specs=[
            pl.BlockSpec((None, ts, D), lambda b, qi: (b, qi, 0)),  # Q rows
            pl.BlockSpec((None, Tp, D), lambda b, qi: (b, 0, 1)),   # full K
            pl.BlockSpec((None, Tp, D), lambda b, qi: (b, 0, 2)),   # full V
        ],
        out_specs=pl.BlockSpec((None, ts, D), lambda b, qi: (b, qi, 0)),
        compiler_params=pltpu.CompilerParams(
            dimension_semantics=("parallel", "parallel"),
            vmem_limit_bytes=_VMEM_LIMIT),
    )(qkv, qkv, qkv)


# ----------------------------------------------------------------------------
# EVA ViT forward (parameters + orchestration)
# ----------------------------------------------------------------------------
def init_params(config, key):
    C = config["in_chans"]
    P = config["patch_size"]
    D = config["width"]
    L = config["layers"]
    Hd = config["mlp_hidden"]
    NH = config["heads"]
    DH = D // NH
    T = (config["image_size"] // P) ** 2 + 1  # patches + CLS
    scale = DH ** -0.5

    def normal(k, shape, std=0.02):
        return std * jax.random.normal(k, shape, dtype=jnp.float32)

    keys = iter(jax.random.split(key, 8 + 8 * L))
    params = {
        "patch_w": normal(next(keys), (C * P * P, D)).astype(jnp.bfloat16),
        "patch_b": jnp.zeros((D,), jnp.float32),
        "cls": normal(next(keys), (1, 1, D)).astype(jnp.bfloat16),
        "pos": normal(next(keys), (1, T, D)).astype(jnp.bfloat16),
        "blocks": [],
    }
    for _ in range(L):
        qkv_w = normal(next(keys), (D, 3 * D))
        qkv_b = normal(next(keys), (3 * D,))
        # Fold the attention softmax scale into the Q projection (free at runtime).
        qkv_w = qkv_w.at[:, :D].multiply(scale)
        qkv_b = qkv_b.at[:D].multiply(scale)
        blk = {
            "ln1_g": jnp.ones((D,), jnp.float32),
            "ln1_b": jnp.zeros((D,), jnp.float32),
            "qkv_w": qkv_w.astype(jnp.bfloat16),
            "qkv_b": qkv_b,
            "proj_w": normal(next(keys), (D, D)).astype(jnp.bfloat16),
            "proj_b": jnp.zeros((D,), jnp.float32),
            "ln2_g": jnp.ones((D,), jnp.float32),
            "ln2_b": jnp.zeros((D,), jnp.float32),
            "fc1_w": normal(next(keys), (D, Hd)).astype(jnp.bfloat16),
            "fc1_b": jnp.zeros((Hd,), jnp.float32),
            "fc2_w": normal(next(keys), (Hd, D)).astype(jnp.bfloat16),
            "fc2_b": jnp.zeros((D,), jnp.float32),
        }
        params["blocks"].append(blk)
    return params


def eva_forward(images, params, config):
    """images: (B, C, H, W) NCHW -> (B, num_patches, D) patch features."""
    B, C, H, W = images.shape
    P = config["patch_size"]
    D = config["width"]
    NH = config["heads"]
    DH = D // NH
    Hp, Wp = H // P, W // P
    Np = Hp * Wp
    T = Np + 1
    Tp = _round_up(T, _SEQ_ALIGN)          # pad the token axis ONCE

    # Patchify: Conv2d(C, D, kernel=P, stride=P) expressed as a matmul.
    x = images.astype(jnp.float32)
    x = x.reshape(B, C, Hp, P, Wp, P).transpose(0, 2, 4, 1, 3, 5)
    x = x.reshape(B * Np, C * P * P).astype(jnp.bfloat16)
    x = pallas_linear(x, params["patch_w"], params["patch_b"])   # (B*Np, D) bf16
    x = x.reshape(B, Np, D)

    cls = jnp.broadcast_to(params["cls"], (B, 1, D))
    x = jnp.concatenate([cls, x], axis=1) + params["pos"]        # (B, T, D) bf16
    x = jnp.pad(x, ((0, 0), (0, Tp - T), (0, 0)))                # single pad
    x = x.reshape(B * Tp, D)                                     # bf16 residual

    for blk in params["blocks"]:
        # Attention sub-block: pre-LN fused into the QKV projection (eps=1e-6,
        # the EVA-CLIP value; nn.LayerNorm default would be 1e-5).
        qkv = pallas_ln_linear(x, blk["ln1_g"], blk["ln1_b"],
                               blk["qkv_w"], blk["qkv_b"])       # (B*Tp, 3D)
        o = pallas_attention(qkv.reshape(B, Tp, 3 * D), NH, DH, T)
        o = o.reshape(B * Tp, D)                                 # pure reshape
        x = pallas_linear(o, blk["proj_w"], blk["proj_b"], residual=x)
        # MLP sub-block: pre-LN fused into fc1, residual fused into fc2.
        h = pallas_ln_linear(x, blk["ln2_g"], blk["ln2_b"],
                             blk["fc1_w"], blk["fc1_b"], activation="gelu")
        x = pallas_linear(h, blk["fc2_w"], blk["fc2_b"], residual=x)

    x = x.reshape(B, Tp, D)
    # EVAEncoderWrapper drops the CLS token and returns the patch features.
    return x[:, 1:T, :]


class EvaClipVisionTowerPallas:
    """Pallas analogue of EvaClipVisionTower (synthetic weights)."""

    def __init__(self, config, key):
        self.config = config
        self.params = init_params(config, key)
        self.is_loaded = True
        self._forward = jax.jit(functools.partial(eva_forward, config=config))

    @property
    def hidden_size(self):
        return self.config["width"]

    @property
    def num_patches_per_side(self):
        return self.config["image_size"] // self.config["patch_size"]

    @property
    def num_patches(self):
        return self.num_patches_per_side ** 2

    @property
    def image_size(self):
        return self.config["image_size"]

    def forward(self, images):
        if isinstance(images, list):
            feats = []
            for image in images:
                f = self._forward(image[None], self.params)
                feats.append(f.astype(image.dtype))
            return feats
        f = self._forward(images, self.params)
        return f.astype(images.dtype)


# ----------------------------------------------------------------------------
if __name__ == "__main__":
    config = dict(
        image_size=16,    # small synthetic config (lane-aligned width)
        patch_size=8,
        in_chans=3,
        width=128,
        heads=4,
        layers=2,
        mlp_hidden=512,
    )

    key = jax.random.PRNGKey(0)
    k_img, k_params = jax.random.split(key)
    images = jax.random.normal(
        k_img,
        (2, config["in_chans"], config["image_size"], config["image_size"]),
        dtype=jnp.float32)  # NCHW, matching the PyTorch module's input layout

    tower = EvaClipVisionTowerPallas(config, k_params)
    feats = tower.forward(images)
    feats = jax.block_until_ready(feats)

    expected = (2, tower.num_patches, tower.hidden_size)
    assert feats.shape == expected, (feats.shape, expected)
    assert feats.dtype == images.dtype
    assert bool(jnp.all(jnp.isfinite(feats)))
    print("KERNEL_OK")
</pallas_src>

<mosaic_0001>
module attributes {stable_mosaic.version = 11 : i64} {
  func.func @_linear_fullk_kernel(%arg0: i32, %arg1: i32, %arg2: memref<8x192xbf16, #tpu.memory_space<vmem>>, %arg3: memref<192x128xbf16, #tpu.memory_space<vmem>>, %arg4: memref<1x128xf32, #tpu.memory_space<vmem>>, %arg5: memref<8x128xbf16, #tpu.memory_space<vmem>>) attributes {dimension_semantics = [#tpu.dimension_semantics<parallel>, #tpu.dimension_semantics<parallel>], iteration_bounds = array<i64: 1, 1>, scalar_prefetch = 0 : i64, scratch_operands = 0 : i64, tpu.core_type = #tpu.core_type<tc>, window_params = [{transform_indices = @transform_0, window_bounds = array<i64: 8, 192>}, {transform_indices = @transform_1, window_bounds = array<i64: 192, 128>}, {transform_indices = @transform_2, window_bounds = array<i64: 1, 128>}, {transform_indices = @transform_3, window_bounds = array<i64: 8, 128>}]} {
    %c0 = arith.constant 0 : index
    %c0_0 = arith.constant 0 : index
    %0 = vector.load %arg2[%c0, %c0_0] : memref<8x192xbf16, #tpu.memory_space<vmem>>, vector<8x192xbf16>
    %c0_1 = arith.constant 0 : index
    %c0_2 = arith.constant 0 : index
    %1 = vector.load %arg3[%c0_1, %c0_2] : memref<192x128xbf16, #tpu.memory_space<vmem>>, vector<192x128xbf16>
    %cst = arith.constant dense<0.000000e+00> : vector<8x128xf32>
    %2 = tpu.matmul %0, %1, %cst {dimension_numbers = #tpu.dot_dimension_numbers<[1], [0], [0], [1], [0, 0, 1, 1], [], []>} : vector<8x192xbf16>, vector<192x128xbf16>, vector<8x128xf32> -> vector<8x128xf32>
    %c0_3 = arith.constant 0 : index
    %c0_4 = arith.constant 0 : index
    %3 = vector.load %arg4[%c0_3, %c0_4] : memref<1x128xf32, #tpu.memory_space<vmem>>, vector<1x128xf32>
    %4 = vector.broadcast %3 : vector<1x128xf32> to vector<8x128xf32>
    %5 = arith.addf %2, %4 : vector<8x128xf32>
    %6 = arith.truncf %5 : vector<8x128xf32> to vector<8x128xbf16>
    %c0_5 = arith.constant 0 : index
    %c0_6 = arith.constant 0 : index
    %7 = vector.load %arg5[%c0_5, %c0_6] : memref<8x128xbf16, #tpu.memory_space<vmem>>, vector<8x128xbf16>
    tpu.vector_store %arg5[%c0_5, %c0_6], %6 {strides = array<i32>} : memref<8x128xbf16, #tpu.memory_space<vmem>>, vector<8x128xbf16>,
    return
  }
  func.func @transform_0(%arg0: i32, %arg1: i32) -> (i32, i32) {
    %c0_i32 = arith.constant 0 : i32
    %c0_i32_0 = arith.constant 0 : i32
    return %arg0, %c0_i32 : i32, i32
  }
  func.func @transform_1(%arg0: i32, %arg1: i32) -> (i32, i32) {
    %c0_i32 = arith.constant 0 : i32
    %c0_i32_0 = arith.constant 0 : i32
    return %c0_i32, %arg1 : i32, i32
  }
  func.func @transform_2(%arg0: i32, %arg1: i32) -> (i32, i32) {
    %c0_i32 = arith.constant 0 : i32
    %c0_i32_0 = arith.constant 0 : i32
    return %c0_i32, %arg1 : i32, i32
  }
  func.func @transform_3(%arg0: i32, %arg1: i32) -> (i32, i32) {
    %c0_i32 = arith.constant 0 : i32
    return %arg0, %arg1 : i32, i32
  }
}

module attributes {stable_mosaic.version = 11 : i64} {
  func.func @_ln_linear_kernel(%arg0: i32, %arg1: i32, %arg2: memref<128x128xbf16, #tpu.memory_space<vmem>>, %arg3: memref<1x128xf32, #tpu.memory_space<vmem>>, %arg4: memref<1x128xf32, #tpu.memory_space<vmem>>, %arg5: memref<128x128xbf16, #tpu.memory_space<vmem>>, %arg6: memref<1x128xf32, #tpu.memory_space<vmem>>, %arg7: memref<128x128xbf16, #tpu.memory_space<vmem>>, %arg8: memref<128x128xbf16, #tpu.memory_space<vmem>>) attributes {dimension_semantics = [#tpu.dimension_semantics<parallel>, #tpu.dimension_semantics<arbitrary>], iteration_bounds = array<i64: 1, 3>, scalar_prefetch = 0 : i64, scratch_operands = 1 : i64, tpu.core_type = #tpu.core_type<tc>, window_params = [{transform_indices = @transform_0, window_bounds = array<i64: 128, 128>}, {pipeline_mode = #tpu.pipeline_mode<synchronous>, transform_indices = @transform_1, window_bounds = array<i64: 1, 128>}, {pipeline_mode = #tpu.pipeline_mode<synchronous>, transform_indices = @transform_2, window_bounds = array<i64: 1, 128>}, {transform_indices = @transform_3, window_bounds = array<i64: 128, 128>}, {transform_indices = @transform_4, window_bounds = array<i64: 1, 128>}, {transform_indices = @transform_5, window_bounds = array<i64: 128, 128>}]} {
    %c0_i32 = arith.constant 0 : i32
    %0 = arith.cmpi eq, %arg1, %c0_i32 : i32
    %1 = arith.extui %0 : i1 to i32
    %c0_i32_0 = arith.constant 0 : i32
    %2 = arith.cmpi ne, %1, %c0_i32_0 : i32
    scf.if %2 {
      %c0_8 = arith.constant 0 : index
      %c0_9 = arith.constant 0 : index
      %11 = vector.load %arg2[%c0_8, %c0_9] : memref<128x128xbf16, #tpu.memory_space<vmem>>, vector<128x128xbf16>
      %12 = arith.extf %11 : vector<128x128xbf16> to vector<128x128xf32>
      %cst_10 = arith.constant dense<0.000000e+00> : vector<128xf32>
      %13 = vector.multi_reduction <add>, %12, %cst_10 [1] : vector<128x128xf32> to vector<128xf32>
      %14 = vector.shape_cast %13 : vector<128xf32> to vector<128x1xf32>
      %cst_11 = arith.constant 1.280000e+02 : f32
      %15 = vector.broadcast %cst_11 : f32 to vector<128x1xf32>
      %16 = arith.divf %14, %15 : vector<128x1xf32>
      %17 = vector.broadcast %16 : vector<128x1xf32> to vector<128x128xf32>
      %18 = arith.subf %12, %17 : vector<128x128xf32>
      %19 = arith.mulf %18, %18 : vector<128x128xf32>
      %cst_12 = arith.constant dense<0.000000e+00> : vector<128xf32>
      %20 = vector.multi_reduction <add>, %19, %cst_12 [1] : vector<128x128xf32> to vector<128xf32>
      %21 = vector.shape_cast %20 : vector<128xf32> to vector<128x1xf32>
      %cst_13 = arith.constant 1.280000e+02 : f32
      %22 = vector.broadcast %cst_13 : f32 to vector<128x1xf32>
      %23 = arith.divf %21, %22 : vector<128x1xf32>
      %cst_14 = arith.constant 9.99999997E-7 : f32
      %24 = vector.broadcast %cst_14 : f32 to vector<128x1xf32>
      %25 = arith.addf %23, %24 : vector<128x1xf32>
      %26 = math.rsqrt %25 : vector<128x1xf32>
      %27 = vector.broadcast %26 : vector<128x1xf32> to vector<128x128xf32>
      %28 = arith.mulf %18, %27 : vector<128x128xf32>
      %c0_15 = arith.constant 0 : index
      %c0_16 = arith.constant 0 : index
      %29 = vector.load %arg3[%c0_15, %c0_16] : memref<1x128xf32, #tpu.memory_space<vmem>>, vector<1x128xf32>
      %30 = vector.broadcast %29 : vector<1x128xf32> to vector<128x128xf32>
      %31 = arith.mulf %28, %30 : vector<128x128xf32>
      %c0_17 = arith.constant 0 : index
      %c0_18 = arith.constant 0 : index
      %32 = vector.load %arg4[%c0_17, %c0_18] : memref<1x128xf32, #tpu.memory_space<vmem>>, vector<1x128xf32>
      %33 = vector.broadcast %32 : vector<1x128xf32> to vector<128x128xf32>
      %34 = arith.addf %31, %33 : vector<128x128xf32>
      %35 = arith.truncf %34 : vector<128x128xf32> to vector<128x128xbf16>
      %c0_19 = arith.constant 0 : index
      %c0_20 = arith.constant 0 : index
      %36 = vector.load %arg8[%c0_19, %c0_20] : memref<128x128xbf16, #tpu.memory_space<vmem>>, vector<128x128xbf16>
      tpu.vector_store %arg8[%c0_19, %c0_20], %35 {strides = array<i32>} : memref<128x128xbf16, #tpu.memory_space<vmem>>, vector<128x128xbf16>,
    } else {
    }
    %c0 = arith.constant 0 : index
    %c0_1 = arith.constant 0 : index
    %3 = vector.load %arg8[%c0, %c0_1] : memref<128x128xbf16, #tpu.memory_space<vmem>>, vector<128x128xbf16>
    %c0_2 = arith.constant 0 : index
    %c0_3 = arith.constant 0 : index
    %4 = vector.load %arg5[%c0_2, %c0_3] : memref<128x128xbf16, #tpu.memory_space<vmem>>, vector<128x128xbf16>
    %cst = arith.constant dense<0.000000e+00> : vector<128x128xf32>
    %5 = tpu.matmul %3, %4, %cst {dimension_numbers = #tpu.dot_dimension_numbers<[1], [0], [0], [1], [0, 0, 1, 1], [], []>} : vector<128x128xbf16>, vector<128x128xbf16>, vector<128x128xf32> -> vector<128x128xf32>
    %c0_4 = arith.constant 0 : index
    %c0_5 = arith.constant 0 : index
    %6 = vector.load %arg6[%c0_4, %c0_5] : memref<1x128xf32, #tpu.memory_space<vmem>>, vector<1x128xf32>
    %7 = vector.broadcast %6 : vector<1x128xf32> to vector<128x128xf32>
    %8 = arith.addf %5, %7 : vector<128x128xf32>
    %9 = arith.truncf %8 : vector<128x128xf32> to vector<128x128xbf16>
    %c0_6 = arith.constant 0 : index
    %c0_7 = arith.constant 0 : index
    %10 = vector.load %arg7[%c0_6, %c0_7] : memref<128x128xbf16, #tpu.memory_space<vmem>>, vector<128x128xbf16>
    tpu.vector_store %arg7[%c0_6, %c0_7], %9 {strides = array<i32>} : memref<128x128xbf16, #tpu.memory_space<vmem>>, vector<128x128xbf16>,
    return
  }
  func.func @transform_0(%arg0: i32, %arg1: i32) -> (i32, i32) {
    %c0_i32 = arith.constant 0 : i32
    %c0_i32_0 = arith.constant 0 : i32
    return %arg0, %c0_i32 : i32, i32
  }
  func.func @transform_1(%arg0: i32, %arg1: i32) -> (i32, i32) {
    %c0_i32 = arith.constant 0 : i32
    %c0_i32_0 = arith.constant 0 : i32
    %c0_i32_1 = arith.constant 0 : i32
    return %c0_i32, %c0_i32_0 : i32, i32
  }
  func.func @transform_2(%arg0: i32, %arg1: i32) -> (i32, i32) {
    %c0_i32 = arith.constant 0 : i32
    %c0_i32_0 = arith.constant 0 : i32
    %c0_i32_1 = arith.constant 0 : i32
    return %c0_i32, %c0_i32_0 : i32, i32
  }
  func.func @transform_3(%arg0: i32, %arg1: i32) -> (i32, i32) {
    %c0_i32 = arith.constant 0 : i32
    %c0_i32_0 = arith.constant 0 : i32
    return %c0_i32, %arg1 : i32, i32
  }
  func.func @transform_4(%arg0: i32, %arg1: i32) -> (i32, i32) {
    %c0_i32 = arith.constant 0 : i32
    %c0_i32_0 = arith.constant 0 : i32
    return %c0_i32, %arg1 : i32, i32
  }
  func.func @transform_5(%arg0: i32, %arg1: i32) -> (i32, i32) {
    %c0_i32 = arith.constant 0 : i32
    return %arg0, %arg1 : i32, i32
  }
}

module attributes {stable_mosaic.version = 11 : i64} {
  func.func @_linear_fullk_kernel(%arg0: i32, %arg1: i32, %arg2: memref<128x128xbf16, #tpu.memory_space<vmem>>, %arg3: memref<128x128xbf16, #tpu.memory_space<vmem>>, %arg4: memref<1x128xf32, #tpu.memory_space<vmem>>, %arg5: memref<128x128xbf16, #tpu.memory_space<vmem>>, %arg6: memref<128x128xbf16, #tpu.memory_space<vmem>>) attributes {dimension_semantics = [#tpu.dimension_semantics<parallel>, #tpu.dimension_semantics<parallel>], iteration_bounds = array<i64: 1, 1>, scalar_prefetch = 0 : i64, scratch_operands = 0 : i64, tpu.core_type = #tpu.core_type<tc>, window_params = [{transform_indices = @transform_0, window_bounds = array<i64: 128, 128>}, {transform_indices = @transform_1, window_bounds = array<i64: 128, 128>}, {transform_indices = @transform_2, window_bounds = array<i64: 1, 128>}, {transform_indices = @transform_3, window_bounds = array<i64: 128, 128>}, {transform_indices = @transform_4, window_bounds = array<i64: 128, 128>}]} {
    %c0 = arith.constant 0 : index
    %c0_0 = arith.constant 0 : index
    %0 = vector.load %arg2[%c0, %c0_0] : memref<128x128xbf16, #tpu.memory_space<vmem>>, vector<128x128xbf16>
    %c0_1 = arith.constant 0 : index
    %c0_2 = arith.constant 0 : index
    %1 = vector.load %arg3[%c0_1, %c0_2] : memref<128x128xbf16, #tpu.memory_space<vmem>>, vector<128x128xbf16>
    %cst = arith.constant dense<0.000000e+00> : vector<128x128xf32>
    %2 = tpu.matmul %0, %1, %cst {dimension_numbers = #tpu.dot_dimension_numbers<[1], [0], [0], [1], [0, 0, 1, 1], [], []>} : vector<128x128xbf16>, vector<128x128xbf16>, vector<128x128xf32> -> vector<128x128xf32>
    %c0_3 = arith.constant 0 : index
    %c0_4 = arith.constant 0 : index
    %3 = vector.load %arg4[%c0_3, %c0_4] : memref<1x128xf32, #tpu.memory_space<vmem>>, vector<1x128xf32>
    %4 = vector.broadcast %3 : vector<1x128xf32> to vector<128x128xf32>
    %5 = arith.addf %2, %4 : vector<128x128xf32>
    %c0_5 = arith.constant 0 : index
    %c0_6 = arith.constant 0 : index
    %6 = vector.load %arg5[%c0_5, %c0_6] : memref<128x128xbf16, #tpu.memory_space<vmem>>, vector<128x128xbf16>
    %7 = arith.extf %6 : vector<128x128xbf16> to vector<128x128xf32>
    %8 = arith.addf %5, %7 : vector<128x128xf32>
    %9 = arith.truncf %8 : vector<128x128xf32> to vector<128x128xbf16>
    %c0_7 = arith.constant 0 : index
    %c0_8 = arith.constant 0 : index
    %10 = vector.load %arg6[%c0_7, %c0_8] : memref<128x128xbf16, #tpu.memory_space<vmem>>, vector<128x128xbf16>
    tpu.vector_store %arg6[%c0_7, %c0_8], %9 {strides = array<i32>} : memref<128x128xbf16, #tpu.memory_space<vmem>>, vector<128x128xbf16>,
    return
  }
  func.func @transform_0(%arg0: i32, %arg1: i32) -> (i32, i32) {
    %c0_i32 = arith.constant 0 : i32
    %c0_i32_0 = arith.constant 0 : i32
    return %arg0, %c0_i32 : i32, i32
  }
  func.func @transform_1(%arg0: i32, %arg1: i32) -> (i32, i32) {
    %c0_i32 = arith.constant 0 : i32
    %c0_i32_0 = arith.constant 0 : i32
    return %c0_i32, %arg1 : i32, i32
  }
  func.func @transform_2(%arg0: i32, %arg1: i32) -> (i32, i32) {
    %c0_i32 = arith.constant 0 : i32
    %c0_i32_0 = arith.constant 0 : i32
    return %c0_i32, %arg1 : i32, i32
  }
  func.func @transform_3(%arg0: i32, %arg1: i32) -> (i32, i32) {
    %c0_i32 = arith.constant 0 : i32
    return %arg0, %arg1 : i32, i32
  }
  func.func @transform_4(%arg0: i32, %arg1: i32) -> (i32, i32) {
    %c0_i32 = arith.constant 0 : i32
    return %arg0, %arg1 : i32, i32
  }
}

module attributes {stable_mosaic.version = 11 : i64} {
  func.func @_attn_kernel(%arg0: i32, %arg1: i32, %arg2: memref<1x64x128xbf16, #tpu.memory_space<vmem>>, %arg3: memref<1x64x128xbf16, #tpu.memory_space<vmem>>, %arg4: memref<1x64x128xbf16, #tpu.memory_space<vmem>>, %arg5: memref<1x64x128xbf16, #tpu.memory_space<vmem>>) attributes {dimension_semantics = [#tpu.dimension_semantics<parallel>, #tpu.dimension_semantics<parallel>], iteration_bounds = array<i64: 2, 1>, scalar_prefetch = 0 : i64, scratch_operands = 0 : i64, tpu.core_type = #tpu.core_type<tc>, window_params = [{transform_indices = @transform_0, window_bounds = array<i64: 1, 64, 128>}, {transform_indices = @transform_1, window_bounds = array<i64: 1, 64, 128>}, {transform_indices = @transform_2, window_bounds = array<i64: 1, 64, 128>}, {transform_indices = @transform_3, window_bounds = array<i64: 1, 64, 128>}]} {
    %0 = tpu.iota {dimensions = array<i32: 1>} : vector<64x64xi32>
    %c5_i32 = arith.constant 5 : i32
    %1 = vector.broadcast %c5_i32 : i32 to vector<64x64xi32>
    %2 = arith.cmpi slt, %0, %1 : vector<64x64xi32>
    %c0 = arith.constant 0 : index
    %c0_0 = arith.constant 0 : index
    %c0_1 = arith.constant 0 : index
    %3 = vector.load %arg2[%c0, %c0_0, %c0_1] : memref<1x64x128xbf16, #tpu.memory_space<vmem>>, vector<1x64x32xbf16>
    %4 = vector.shape_cast %3 : vector<1x64x32xbf16> to vector<64x32xbf16>
    %c0_2 = arith.constant 0 : index
    %c0_3 = arith.constant 0 : index
    %c0_4 = arith.constant 0 : index
    %5 = vector.load %arg3[%c0_2, %c0_3, %c0_4] : memref<1x64x128xbf16, #tpu.memory_space<vmem>>, vector<1x64x32xbf16>
    %6 = vector.shape_cast %5 : vector<1x64x32xbf16> to vector<64x32xbf16>
    %c0_5 = arith.constant 0 : index
    %c0_6 = arith.constant 0 : index
    %c0_7 = arith.constant 0 : index
    %7 = vector.load %arg4[%c0_5, %c0_6, %c0_7] : memref<1x64x128xbf16, #tpu.memory_space<vmem>>, vector<1x64x32xbf16>
    %8 = vector.shape_cast %7 : vector<1x64x32xbf16> to vector<64x32xbf16>
    %cst = arith.constant dense<0.000000e+00> : vector<64x64xf32>
    %9 = tpu.matmul %4, %6, %cst {dimension_numbers = #tpu.dot_dimension_numbers<[1], [1], [0], [0], [0, 0, 1, 0], [], []>} : vector<64x32xbf16>, vector<64x32xbf16>, vector<64x64xf32> -> vector<64x64xf32>
    %cst_8 = arith.constant -1.000000e+30 : f32
    %10 = vector.broadcast %cst_8 : f32 to vector<64x64xf32>
    %11 = arith.select %2, %9, %10 : vector<64x64xi1>, vector<64x64xf32>
    %cst_9 = arith.constant dense<0xFF800000> : vector<64xf32>
    %12 = vector.multi_reduction <maximumf>, %11, %cst_9 [1] : vector<64x64xf32> to vector<64xf32>
    %13 = vector.shape_cast %12 : vector<64xf32> to vector<64x1xf32>
    %14 = vector.broadcast %13 : vector<64x1xf32> to vector<64x64xf32>
    %15 = arith.subf %11, %14 : vector<64x64xf32>
    %16 = math.exp %15 : vector<64x64xf32>
    %cst_10 = arith.constant dense<0.000000e+00> : vector<64xf32>
    %17 = vector.multi_reduction <add>, %16, %cst_10 [1] : vector<64x64xf32> to vector<64xf32>
    %18 = vector.shape_cast %17 : vector<64xf32> to vector<64x1xf32>
    %19 = arith.truncf %16 : vector<64x64xf32> to vector<64x64xbf16>
    %cst_11 = arith.constant dense<0.000000e+00> : vector<64x32xf32>
    %20 = tpu.matmul %19, %8, %cst_11 {dimension_numbers = #tpu.dot_dimension_numbers<[1], [0], [0], [1], [0, 0, 1, 1], [], []>} : vector<64x64xbf16>, vector<64x32xbf16>, vector<64x32xf32> -> vector<64x32xf32>
    %21 = tpu.reciprocal %18 : vector<64x1xf32> -> vector<64x1xf32>
    %22 = vector.broadcast %21 : vector<64x1xf32> to vector<64x32xf32>
    %23 = arith.mulf %20, %22 : vector<64x32xf32>
    %c0_12 = arith.constant 0 : index
    %c0_13 = arith.constant 0 : index
    %c32 = arith.constant 32 : index
    %24 = vector.load %arg2[%c0_12, %c0_13, %c32] : memref<1x64x128xbf16, #tpu.memory_space<vmem>>, vector<1x64x32xbf16>
    %25 = vector.shape_cast %24 : vector<1x64x32xbf16> to vector<64x32xbf16>
    %c0_14 = arith.constant 0 : index
    %c0_15 = arith.constant 0 : index
    %c32_16 = arith.constant 32 : index
    %26 = vector.load %arg3[%c0_14, %c0_15, %c32_16] : memref<1x64x128xbf16, #tpu.memory_space<vmem>>, vector<1x64x32xbf16>
    %27 = vector.shape_cast %26 : vector<1x64x32xbf16> to vector<64x32xbf16>
    %c0_17 = arith.constant 0 : index
    %c0_18 = arith.constant 0 : index
    %c32_19 = arith.constant 32 : index
    %28 = vector.load %arg4[%c0_17, %c0_18, %c32_19] : memref<1x64x128xbf16, #tpu.memory_space<vmem>>, vector<1x64x32xbf16>
    %29 = vector.shape_cast %28 : vector<1x64x32xbf16> to vector<64x32xbf16>
    %cst_20 = arith.constant dense<0.000000e+00> : vector<64x64xf32>
    %30 = tpu.matmul %25, %27, %cst_20 {dimension_numbers = #tpu.dot_dimension_numbers<[1], [1], [0], [0], [0, 0, 1, 0], [], []>} : vector<64x32xbf16>, vector<64x32xbf16>, vector<64x64xf32> -> vector<64x64xf32>
    %cst_21 = arith.constant -1.000000e+30 : f32
    %31 = vector.broadcast %cst_21 : f32 to vector<64x64xf32>
    %32 = arith.select %2, %30, %31 : vector<64x64xi1>, vector<64x64xf32>
    %cst_22 = arith.constant dense<0xFF800000> : vector<64xf32>
    %33 = vector.multi_reduction <maximumf>, %32, %cst_22 [1] : vector<64x64xf32> to vector<64xf32>
    %34 = vector.shape_cast %33 : vector<64xf32> to vector<64x1xf32>
    %35 = vector.broadcast %34 : vector<64x1xf32> to vector<64x64xf32>
    %36 = arith.subf %32, %35 : vector<64x64xf32>
    %37 = math.exp %36 : vector<64x64xf32>
    %cst_23 = arith.constant dense<0.000000e+00> : vector<64xf32>
    %38 = vector.multi_reduction <add>, %37, %cst_23 [1] : vector<64x64xf32> to vector<64xf32>
    %39 = vector.shape_cast %38 : vector<64xf32> to vector<64x1xf32>
    %40 = arith.truncf %37 : vector<64x64xf32> to vector<64x64xbf16>
    %cst_24 = arith.constant dense<0.000000e+00> : vector<64x32xf32>
    %41 = tpu.matmul %40, %29, %cst_24 {dimension_numbers = #tpu.dot_dimension_numbers<[1], [0], [0], [1], [0, 0, 1, 1], [], []>} : vector<64x64xbf16>, vector<64x32xbf16>, vector<64x32xf32> -> vector<64x32xf32>
    %42 = tpu.reciprocal %39 : vector<64x1xf32> -> vector<64x1xf32>
    %43 = vector.broadcast %42 : vector<64x1xf32> to vector<64x32xf32>
    %44 = arith.mulf %41, %43 : vector<64x32xf32>
    %c0_25 = arith.constant 0 : index
    %c0_26 = arith.constant 0 : index
    %c64 = arith.constant 64 : index
    %45 = vector.load %arg2[%c0_25, %c0_26, %c64] : memref<1x64x128xbf16, #tpu.memory_space<vmem>>, vector<1x64x32xbf16>
    %46 = vector.shape_cast %45 : vector<1x64x32xbf16> to vector<64x32xbf16>
    %c0_27 = arith.constant 0 : index
    %c0_28 = arith.constant 0 : index
    %c64_29 = arith.constant 64 : index
    %47 = vector.load %arg3[%c0_27, %c0_28, %c64_29] : memref<1x64x128xbf16, #tpu.memory_space<vmem>>, vector<1x64x32xbf16>
    %48 = vector.shape_cast %47 : vector<1x64x32xbf16> to vector<64x32xbf16>
    %c0_30 = arith.constant 0 : index
    %c0_31 = arith.constant 0 : index
    %c64_32 = arith.constant 64 : index
    %49 = vector.load %arg4[%c0_30, %c0_31, %c64_32] : memref<1x64x128xbf16, #tpu.memory_space<vmem>>, vector<1x64x32xbf16>
    %50 = vector.shape_cast %49 : vector<1x64x32xbf16> to vector<64x32xbf16>
    %cst_33 = arith.constant dense<0.000000e+00> : vector<64x64xf32>
    %51 = tpu.matmul %46, %48, %cst_33 {dimension_numbers = #tpu.dot_dimension_numbers<[1], [1], [0], [0], [0, 0, 1, 0], [], []>} : vector<64x32xbf16>, vector<64x32xbf16>, vector<64x64xf32> -> vector<64x64xf32>
    %cst_34 = arith.constant -1.000000e+30 : f32
    %52 = vector.broadcast %cst_34 : f32 to vector<64x64xf32>
    %53 = arith.select %2, %51, %52 : vector<64x64xi1>, vector<64x64xf32>
    %cst_35 = arith.constant dense<0xFF800000> : vector<64xf32>
    %54 = vector.multi_reduction <maximumf>, %53, %cst_35 [1] : vector<64x64xf32> to vector<64xf32>
    %55 = vector.shape_cast %54 : vector<64xf32> to vector<64x1xf32>
    %56 = vector.broadcast %55 : vector<64x1xf32> to vector<64x64xf32>
    %57 = arith.subf %53, %56 : vector<64x64xf32>
    %58 = math.exp %57 : vector<64x64xf32>
    %cst_36 = arith.constant dense<0.000000e+00> : vector<64xf32>
    %59 = vector.multi_reduction <add>, %58, %cst_36 [1] : vector<64x64xf32> to vector<64xf32>
    %60 = vector.shape_cast %59 : vector<64xf32> to vector<64x1xf32>
    %61 = arith.truncf %58 : vector<64x64xf32> to vector<64x64xbf16>
    %cst_37 = arith.constant dense<0.000000e+00> : vector<64x32xf32>
    %62 = tpu.matmul %61, %50, %cst_37 {dimension_numbers = #tpu.dot_dimension_numbers<[1], [0], [0], [1], [0, 0, 1, 1], [], []>} : vector<64x64xbf16>, vector<64x32xbf16>, vector<64x32xf32> -> vector<64x32xf32>
    %63 = tpu.reciprocal %60 : vector<64x1xf32> -> vector<64x1xf32>
    %64 = vector.broadcast %63 : vector<64x1xf32> to vector<64x32xf32>
    %65 = arith.mulf %62, %64 : vector<64x32xf32>
    %c0_38 = arith.constant 0 : index
    %c0_39 = arith.constant 0 : index
    %c96 = arith.constant 96 : index
    %66 = vector.load %arg2[%c0_38, %c0_39, %c96] : memref<1x64x128xbf16, #tpu.memory_space<vmem>>, vector<1x64x32xbf16>
    %67 = vector.shape_cast %66 : vector<1x64x32xbf16> to vector<64x32xbf16>
    %c0_40 = arith.constant 0 : index
    %c0_41 = arith.constant 0 : index
    %c96_42 = arith.constant 96 : index
    %68 = vector.load %arg3[%c0_40, %c0_41, %c96_42] : memref<1x64x128xbf16, #tpu.memory_space<vmem>>, vector<1x64x32xbf16>
    %69 = vector.shape_cast %68 : vector<1x64x32xbf16> to vector<64x32xbf16>
    %c0_43 = arith.constant 0 : index
    %c0_44 = arith.constant 0 : index
    %c96_45 = arith.constant 96 : index
    %70 = vector.load %arg4[%c0_43, %c0_44, %c96_45] : memref<1x64x128xbf16, #tpu.memory_space<vmem>>, vector<1x64x32xbf16>
    %71 = vector.shape_cast %70 : vector<1x64x32xbf16> to vector<64x32xbf16>
    %cst_46 = arith.constant dense<0.000000e+00> : vector<64x64xf32>
    %72 = tpu.matmul %67, %69, %cst_46 {dimension_numbers = #tpu.dot_dimension_numbers<[1], [1], [0], [0], [0, 0, 1, 0], [], []>} : vector<64x32xbf16>, vector<64x32xbf16>, vector<64x64xf32> -> vector<64x64xf32>
    %cst_47 = arith.constant -1.000000e+30 : f32
    %73 = vector.broadcast %cst_47 : f32 to vector<64x64xf32>
    %74 = arith.select %2, %72, %73 : vector<64x64xi1>, vector<64x64xf32>
    %cst_48 = arith.constant dense<0xFF800000> : vector<64xf32>
    %75 = vector.multi_reduction <maximumf>, %74, %cst_48 [1] : vector<64x64xf32> to vector<64xf32>
    %76 = vector.shape_cast %75 : vector<64xf32> to vector<64x1xf32>
    %77 = vector.broadcast %76 : vector<64x1xf32> to vector<64x64xf32>
    %78 = arith.subf %74, %77 : vector<64x64xf32>
    %79 = math.exp %78 : vector<64x64xf32>
    %cst_49 = arith.constant dense<0.000000e+00> : vector<64xf32>
    %80 = vector.multi_reduction <add>, %79, %cst_49 [1] : vector<64x64xf32> to vector<64xf32>
    %81 = vector.shape_cast %80 : vector<64xf32> to vector<64x1xf32>
    %82 = arith.truncf %79 : vector<64x64xf32> to vector<64x64xbf16>
    %cst_50 = arith.constant dense<0.000000e+00> : vector<64x32xf32>
    %83 = tpu.matmul %82, %71, %cst_50 {dimension_numbers = #tpu.dot_dimension_numbers<[1], [0], [0], [1], [0, 0, 1, 1], [], []>} : vector<64x64xbf16>, vector<64x32xbf16>, vector<64x32xf32> -> vector<64x32xf32>
    %84 = tpu.reciprocal %81 : vector<64x1xf32> -> vector<64x1xf32>
    %85 = vector.broadcast %84 : vector<64x1xf32> to vector<64x32xf32>
    %86 = arith.mulf %83, %85 : vector<64x32xf32>
    %87 = tpu.concatenate %23, %44, %65, %86 in 1 : vector<64x32xf32>, vector<64x32xf32>, vector<64x32xf32>, vector<64x32xf32> -> vector<64x128xf32>
    %88 = arith.truncf %87 : vector<64x128xf32> to vector<64x128xbf16>
    %c0_51 = arith.constant 0 : index
    %c0_52 = arith.constant 0 : index
    %c0_53 = arith.constant 0 : index
    %89 = vector.load %arg5[%c0_51, %c0_52, %c0_53] : memref<1x64x128xbf16, #tpu.memory_space<vmem>>, vector<1x64x128xbf16>
    %90 = vector.shape_cast %89 : vector<1x64x128xbf16> to vector<64x128xbf16>
    %91 = vector.shape_cast %88 : vector<64x128xbf16> to vector<1x64x128xbf16>
    tpu.vector_store %arg5[%c0_51, %c0_52, %c0_53], %91 {strides = array<i32>} : memref<1x64x128xbf16, #tpu.memory_space<vmem>>, vector<1x64x128xbf16>,
    return
  }
  func.func @transform_0(%arg0: i32, %arg1: i32) -> (i32, i32, i32) {
    %c0_i32 = arith.constant 0 : i32
    %c0_i32_0 = arith.constant 0 : i32
    return %arg0, %arg1, %c0_i32 : i32, i32, i32
  }
  func.func @transform_1(%arg0: i32, %arg1: i32) -> (i32, i32, i32) {
    %c0_i32 = arith.constant 0 : i32
    %c1_i32 = arith.constant 1 : i32
    %c0_i32_0 = arith.constant 0 : i32
    return %arg0, %c0_i32, %c1_i32 : i32, i32, i32
  }
  func.func @transform_2(%arg0: i32, %arg1: i32) -> (i32, i32, i32) {
    %c0_i32 = arith.constant 0 : i32
    %c2_i32 = arith.constant 2 : i32
    %c0_i32_0 = arith.constant 0 : i32
    return %arg0, %c0_i32, %c2_i32 : i32, i32, i32
  }
  func.func @transform_3(%arg0: i32, %arg1: i32) -> (i32, i32, i32) {
    %c0_i32 = arith.constant 0 : i32
    %c0_i32_0 = arith.constant 0 : i32
    return %arg0, %arg1, %c0_i32 : i32, i32, i32
  }
}

module attributes {stable_mosaic.version = 11 : i64} {
  func.func @_ln_linear_kernel(%arg0: i32, %arg1: i32, %arg2: memref<128x128xbf16, #tpu.memory_space<vmem>>, %arg3: memref<1x128xf32, #tpu.memory_space<vmem>>, %arg4: memref<1x128xf32, #tpu.memory_space<vmem>>, %arg5: memref<128x512xbf16, #tpu.memory_space<vmem>>, %arg6: memref<1x512xf32, #tpu.memory_space<vmem>>, %arg7: memref<128x512xbf16, #tpu.memory_space<vmem>>, %arg8: memref<128x128xbf16, #tpu.memory_space<vmem>>) attributes {dimension_semantics = [#tpu.dimension_semantics<parallel>, #tpu.dimension_semantics<arbitrary>], iteration_bounds = array<i64: 1, 1>, scalar_prefetch = 0 : i64, scratch_operands = 1 : i64, tpu.core_type = #tpu.core_type<tc>, window_params = [{transform_indices = @transform_0, window_bounds = array<i64: 128, 128>}, {pipeline_mode = #tpu.pipeline_mode<synchronous>, transform_indices = @transform_1, window_bounds = array<i64: 1, 128>}, {pipeline_mode = #tpu.pipeline_mode<synchronous>, transform_indices = @transform_2, window_bounds = array<i64: 1, 128>}, {transform_indices = @transform_3, window_bounds = array<i64: 128, 512>}, {transform_indices = @transform_4, window_bounds = array<i64: 1, 512>}, {transform_indices = @transform_5, window_bounds = array<i64: 128, 512>}]} {
    %c0_i32 = arith.constant 0 : i32
    %0 = arith.cmpi eq, %arg1, %c0_i32 : i32
    %1 = arith.extui %0 : i1 to i32
    %c0_i32_0 = arith.constant 0 : i32
    %2 = arith.cmpi ne, %1, %c0_i32_0 : i32
    scf.if %2 {
      %c0_12 = arith.constant 0 : index
      %c0_13 = arith.constant 0 : index
      %24 = vector.load %arg2[%c0_12, %c0_13] : memref<128x128xbf16, #tpu.memory_space<vmem>>, vector<128x128xbf16>
      %25 = arith.extf %24 : vector<128x128xbf16> to vector<128x128xf32>
      %cst_14 = arith.constant dense<0.000000e+00> : vector<128xf32>
      %26 = vector.multi_reduction <add>, %25, %cst_14 [1] : vector<128x128xf32> to vector<128xf32>
      %27 = vector.shape_cast %26 : vector<128xf32> to vector<128x1xf32>
      %cst_15 = arith.constant 1.280000e+02 : f32
      %28 = vector.broadcast %cst_15 : f32 to vector<128x1xf32>
      %29 = arith.divf %27, %28 : vector<128x1xf32>
      %30 = vector.broadcast %29 : vector<128x1xf32> to vector<128x128xf32>
      %31 = arith.subf %25, %30 : vector<128x128xf32>
      %32 = arith.mulf %31, %31 : vector<128x128xf32>
      %cst_16 = arith.constant dense<0.000000e+00> : vector<128xf32>
      %33 = vector.multi_reduction <add>, %32, %cst_16 [1] : vector<128x128xf32> to vector<128xf32>
      %34 = vector.shape_cast %33 : vector<128xf32> to vector<128x1xf32>
      %cst_17 = arith.constant 1.280000e+02 : f32
      %35 = vector.broadcast %cst_17 : f32 to vector<128x1xf32>
      %36 = arith.divf %34, %35 : vector<128x1xf32>
      %cst_18 = arith.constant 9.99999997E-7 : f32
      %37 = vector.broadcast %cst_18 : f32 to vector<128x1xf32>
      %38 = arith.addf %36, %37 : vector<128x1xf32>
      %39 = math.rsqrt %38 : vector<128x1xf32>
      %40 = vector.broadcast %39 : vector<128x1xf32> to vector<128x128xf32>
      %41 = arith.mulf %31, %40 : vector<128x128xf32>
      %c0_19 = arith.constant 0 : index
      %c0_20 = arith.constant 0 : index
      %42 = vector.load %arg3[%c0_19, %c0_20] : memref<1x128xf32, #tpu.memory_space<vmem>>, vector<1x128xf32>
      %43 = vector.broadcast %42 : vector<1x128xf32> to vector<128x128xf32>
      %44 = arith.mulf %41, %43 : vector<128x128xf32>
      %c0_21 = arith.constant 0 : index
      %c0_22 = arith.constant 0 : index
      %45 = vector.load %arg4[%c0_21, %c0_22] : memref<1x128xf32, #tpu.memory_space<vmem>>, vector<1x128xf32>
      %46 = vector.broadcast %45 : vector<1x128xf32> to vector<128x128xf32>
      %47 = arith.addf %44, %46 : vector<128x128xf32>
      %48 = arith.truncf %47 : vector<128x128xf32> to vector<128x128xbf16>
      %c0_23 = arith.constant 0 : index
      %c0_24 = arith.constant 0 : index
      %49 = vector.load %arg8[%c0_23, %c0_24] : memref<128x128xbf16, #tpu.memory_space<vmem>>, vector<128x128xbf16>
      tpu.vector_store %arg8[%c0_23, %c0_24], %48 {strides = array<i32>} : memref<128x128xbf16, #tpu.memory_space<vmem>>, vector<128x128xbf16>,
    } else {
    }
    %c0 = arith.constant 0 : index
    %c0_1 = arith.constant 0 : index
    %3 = vector.load %arg8[%c0, %c0_1] : memref<128x128xbf16, #tpu.memory_space<vmem>>, vector<128x128xbf16>
    %c0_2 = arith.constant 0 : index
    %c0_3 = arith.constant 0 : index
    %4 = vector.load %arg5[%c0_2, %c0_3] : memref<128x512xbf16, #tpu.memory_space<vmem>>, vector<128x512xbf16>
    %cst = arith.constant dense<0.000000e+00> : vector<128x512xf32>
    %5 = tpu.matmul %3, %4, %cst {dimension_numbers = #tpu.dot_dimension_numbers<[1], [0], [0], [1], [0, 0, 1, 1], [], []>} : vector<128x128xbf16>, vector<128x512xbf16>, vector<128x512xf32> -> vector<128x512xf32>
    %c0_4 = arith.constant 0 : index
    %c0_5 = arith.constant 0 : index
    %6 = vector.load %arg6[%c0_4, %c0_5] : memref<1x512xf32, #tpu.memory_space<vmem>>, vector<1x512xf32>
    %7 = vector.broadcast %6 : vector<1x512xf32> to vector<128x512xf32>
    %8 = arith.addf %5, %7 : vector<128x512xf32>
    %9 = arith.mulf %8, %8 : vector<128x512xf32>
    %10 = arith.mulf %8, %9 : vector<128x512xf32>
    %cst_6 = arith.constant 4.471500e-02 : f32
    %11 = vector.broadcast %cst_6 : f32 to vector<128x512xf32>
    %12 = arith.mulf %11, %10 : vector<128x512xf32>
    %13 = arith.addf %8, %12 : vector<128x512xf32>
    %cst_7 = arith.constant 0.797884583 : f32
    %14 = vector.broadcast %cst_7 : f32 to vector<128x512xf32>
    %15 = arith.mulf %14, %13 : vector<128x512xf32>
    %16 = math.tanh %15 : vector<128x512xf32>
    %cst_8 = arith.constant 1.000000e+00 : f32
    %17 = vector.broadcast %cst_8 : f32 to vector<128x512xf32>
    %18 = arith.addf %17, %16 : vector<128x512xf32>
    %cst_9 = arith.constant 5.000000e-01 : f32
    %19 = vector.broadcast %cst_9 : f32 to vector<128x512xf32>
    %20 = arith.mulf %19, %18 : vector<128x512xf32>
    %21 = arith.mulf %8, %20 : vector<128x512xf32>
    %22 = arith.truncf %21 : vector<128x512xf32> to vector<128x512xbf16>
    %c0_10 = arith.constant 0 : index
    %c0_11 = arith.constant 0 : index
    %23 = vector.load %arg7[%c0_10, %c0_11] : memref<128x512xbf16, #tpu.memory_space<vmem>>, vector<128x512xbf16>
    tpu.vector_store %arg7[%c0_10, %c0_11], %22 {strides = array<i32>} : memref<128x512xbf16, #tpu.memory_space<vmem>>, vector<128x512xbf16>,
    return
  }
  func.func @transform_0(%arg0: i32, %arg1: i32) -> (i32, i32) {
    %c0_i32 = arith.constant 0 : i32
    %c0_i32_0 = arith.constant 0 : i32
    return %arg0, %c0_i32 : i32, i32
  }
  func.func @transform_1(%arg0: i32, %arg1: i32) -> (i32, i32) {
    %c0_i32 = arith.constant 0 : i32
    %c0_i32_0 = arith.constant 0 : i32
    %c0_i32_1 = arith.constant 0 : i32
    return %c0_i32, %c0_i32_0 : i32, i32
  }
  func.func @transform_2(%arg0: i32, %arg1: i32) -> (i32, i32) {
    %c0_i32 = arith.constant 0 : i32
    %c0_i32_0 = arith.constant 0 : i32
    %c0_i32_1 = arith.constant 0 : i32
    return %c0_i32, %c0_i32_0 : i32, i32
  }
  func.func @transform_3(%arg0: i32, %arg1: i32) -> (i32, i32) {
    %c0_i32 = arith.constant 0 : i32
    %c0_i32_0 = arith.constant 0 : i32
    return %c0_i32, %arg1 : i32, i32
  }
  func.func @transform_4(%arg0: i32, %arg1: i32) -> (i32, i32) {
    %c0_i32 = arith.constant 0 : i32
    %c0_i32_0 = arith.constant 0 : i32
    return %c0_i32, %arg1 : i32, i32
  }
  func.func @transform_5(%arg0: i32, %arg1: i32) -> (i32, i32) {
    %c0_i32 = arith.constant 0 : i32
    return %arg0, %arg1 : i32, i32
  }
}

module attributes {stable_mosaic.version = 11 : i64} {
  func.func @_linear_fullk_kernel(%arg0: i32, %arg1: i32, %arg2: memref<128x512xbf16, #tpu.memory_space<vmem>>, %arg3: memref<512x128xbf16, #tpu.memory_space<vmem>>, %arg4: memref<1x128xf32, #tpu.memory_space<vmem>>, %arg5: memref<128x128xbf16, #tpu.memory_space<vmem>>, %arg6: memref<128x128xbf16, #tpu.memory_space<vmem>>) attributes {dimension_semantics = [#tpu.dimension_semantics<parallel>, #tpu.dimension_semantics<parallel>], iteration_bounds = array<i64: 1, 1>, scalar_prefetch = 0 : i64, scratch_operands = 0 : i64, tpu.core_type = #tpu.core_type<tc>, window_params = [{transform_indices = @transform_0, window_bounds = array<i64: 128, 512>}, {transform_indices = @transform_1, window_bounds = array<i64: 512, 128>}, {transform_indices = @transform_2, window_bounds = array<i64: 1, 128>}, {transform_indices = @transform_3, window_bounds = array<i64: 128, 128>}, {transform_indices = @transform_4, window_bounds = array<i64: 128, 128>}]} {
    %c0 = arith.constant 0 : index
    %c0_0 = arith.constant 0 : index
    %0 = vector.load %arg2[%c0, %c0_0] : memref<128x512xbf16, #tpu.memory_space<vmem>>, vector<128x512xbf16>
    %c0_1 = arith.constant 0 : index
    %c0_2 = arith.constant 0 : index
    %1 = vector.load %arg3[%c0_1, %c0_2] : memref<512x128xbf16, #tpu.memory_space<vmem>>, vector<512x128xbf16>
    %cst = arith.constant dense<0.000000e+00> : vector<128x128xf32>
    %2 = tpu.matmul %0, %1, %cst {dimension_numbers = #tpu.dot_dimension_numbers<[1], [0], [0], [1], [0, 0, 1, 1], [], []>} : vector<128x512xbf16>, vector<512x128xbf16>, vector<128x128xf32> -> vector<128x128xf32>
    %c0_3 = arith.constant 0 : index
    %c0_4 = arith.constant 0 : index
    %3 = vector.load %arg4[%c0_3, %c0_4] : memref<1x128xf32, #tpu.memory_space<vmem>>, vector<1x128xf32>
    %4 = vector.broadcast %3 : vector<1x128xf32> to vector<128x128xf32>
    %5 = arith.addf %2, %4 : vector<128x128xf32>
    %c0_5 = arith.constant 0 : index
    %c0_6 = arith.constant 0 : index
    %6 = vector.load %arg5[%c0_5, %c0_6] : memref<128x128xbf16, #tpu.memory_space<vmem>>, vector<128x128xbf16>
    %7 = arith.extf %6 : vector<128x128xbf16> to vector<128x128xf32>
    %8 = arith.addf %5, %7 : vector<128x128xf32>
    %9 = arith.truncf %8 : vector<128x128xf32> to vector<128x128xbf16>
    %c0_7 = arith.constant 0 : index
    %c0_8 = arith.constant 0 : index
    %10 = vector.load %arg6[%c0_7, %c0_8] : memref<128x128xbf16, #tpu.memory_space<vmem>>, vector<128x128xbf16>
    tpu.vector_store %arg6[%c0_7, %c0_8], %9 {strides = array<i32>} : memref<128x128xbf16, #tpu.memory_space<vmem>>, vector<128x128xbf16>,
    return
  }
  func.func @transform_0(%arg0: i32, %arg1: i32) -> (i32, i32) {
    %c0_i32 = arith.constant 0 : i32
    %c0_i32_0 = arith.constant 0 : i32
    return %arg0, %c0_i32 : i32, i32
  }
  func.func @transform_1(%arg0: i32, %arg1: i32) -> (i32, i32) {
    %c0_i32 = arith.constant 0 : i32
    %c0_i32_0 = arith.constant 0 : i32
    return %c0_i32, %arg1 : i32, i32
  }
  func.func @transform_2(%arg0: i32, %arg1: i32) -> (i32, i32) {
    %c0_i32 = arith.constant 0 : i32
    %c0_i32_0 = arith.constant 0 : i32
    return %c0_i32, %arg1 : i32, i32
  }
  func.func @transform_3(%arg0: i32, %arg1: i32) -> (i32, i32) {
    %c0_i32 = arith.constant 0 : i32
    return %arg0, %arg1 : i32, i32
  }
  func.func @transform_4(%arg0: i32, %arg1: i32) -> (i32, i32) {
    %c0_i32 = arith.constant 0 : i32
    return %arg0, %arg1 : i32, i32
  }
}

module attributes {stable_mosaic.version = 11 : i64} {
  func.func @_ln_linear_kernel(%arg0: i32, %arg1: i32, %arg2: memref<128x128xbf16, #tpu.memory_space<vmem>>, %arg3: memref<1x128xf32, #tpu.memory_space<vmem>>, %arg4: memref<1x128xf32, #tpu.memory_space<vmem>>, %arg5: memref<128x512xbf16, #tpu.memory_space<vmem>>, %arg6: memref<1x512xf32, #tpu.memory_space<vmem>>, %arg7: memref<128x512xbf16, #tpu.memory_space<vmem>>, %arg8: memref<128x128xbf16, #tpu.memory_space<vmem>>) attributes {dimension_semantics = [#tpu.dimension_semantics<parallel>, #tpu.dimension_semantics<arbitrary>], iteration_bounds = array<i64: 1, 1>, scalar_prefetch = 0 : i64, scratch_operands = 1 : i64, tpu.core_type = #tpu.core_type<tc>, window_params = [{transform_indices = @transform_0, window_bounds = array<i64: 128, 128>}, {pipeline_mode = #tpu.pipeline_mode<synchronous>, transform_indices = @transform_1, window_bounds = array<i64: 1, 128>}, {pipeline_mode = #tpu.pipeline_mode<synchronous>, transform_indices = @transform_2, window_bounds = array<i64: 1, 128>}, {transform_indices = @transform_3, window_bounds = array<i64: 128, 512>}, {transform_indices = @transform_4, window_bounds = array<i64: 1, 512>}, {transform_indices = @transform_5, window_bounds = array<i64: 128, 512>}]} {
    %c0_i32 = arith.constant 0 : i32
    %0 = arith.cmpi eq, %arg1, %c0_i32 : i32
    %1 = arith.extui %0 : i1 to i32
    %c0_i32_0 = arith.constant 0 : i32
    %2 = arith.cmpi ne, %1, %c0_i32_0 : i32
    scf.if %2 {
      %c0_12 = arith.constant 0 : index
      %c0_13 = arith.constant 0 : index
      %24 = vector.load %arg2[%c0_12, %c0_13] : memref<128x128xbf16, #tpu.memory_space<vmem>>, vector<128x128xbf16>
      %25 = arith.extf %24 : vector<128x128xbf16> to vector<128x128xf32>
      %cst_14 = arith.constant dense<0.000000e+00> : vector<128xf32>
      %26 = vector.multi_reduction <add>, %25, %cst_14 [1] : vector<128x128xf32> to vector<128xf32>
      %27 = vector.shape_cast %26 : vector<128xf32> to vector<128x1xf32>
      %cst_15 = arith.constant 1.280000e+02 : f32
      %28 = vector.broadcast %cst_15 : f32 to vector<128x1xf32>
      %29 = arith.divf %27, %28 : vector<128x1xf32>
      %30 = vector.broadcast %29 : vector<128x1xf32> to vector<128x128xf32>
      %31 = arith.subf %25, %30 : vector<128x128xf32>
      %32 = arith.mulf %31, %31 : vector<128x128xf32>
      %cst_16 = arith.constant dense<0.000000e+00> : vector<128xf32>
      %33 = vector.multi_reduction <add>, %32, %cst_16 [1] : vector<128x128xf32> to vector<128xf32>
      %34 = vector.shape_cast %33 : vector<128xf32> to vector<128x1xf32>
      %cst_17 = arith.constant 1.280000e+02 : f32
      %35 = vector.broadcast %cst_17 : f32 to vector<128x1xf32>
      %36 = arith.divf %34, %35 : vector<128x1xf32>
      %cst_18 = arith.constant 9.99999997E-7 : f32
      %37 = vector.broadcast %cst_18 : f32 to vector<128x1xf32>
      %38 = arith.addf %36, %37 : vector<128x1xf32>
      %39 = math.rsqrt %38 : vector<128x1xf32>
      %40 = vector.broadcast %39 : vector<128x1xf32> to vector<128x128xf32>
      %41 = arith.mulf %31, %40 : vector<128x128xf32>
      %c0_19 = arith.constant 0 : index
      %c0_20 = arith.constant 0 : index
      %42 = vector.load %arg3[%c0_19, %c0_20] : memref<1x128xf32, #tpu.memory_space<vmem>>, vector<1x128xf32>
      %43 = vector.broadcast %42 : vector<1x128xf32> to vector<128x128xf32>
      %44 = arith.mulf %41, %43 : vector<128x128xf32>
      %c0_21 = arith.constant 0 : index
      %c0_22 = arith.constant 0 : index
      %45 = vector.load %arg4[%c0_21, %c0_22] : memref<1x128xf32, #tpu.memory_space<vmem>>, vector<1x128xf32>
      %46 = vector.broadcast %45 : vector<1x128xf32> to vector<128x128xf32>
      %47 = arith.addf %44, %46 : vector<128x128xf32>
      %48 = arith.truncf %47 : vector<128x128xf32> to vector<128x128xbf16>
      %c0_23 = arith.constant 0 : index
      %c0_24 = arith.constant 0 : index
      %49 = vector.load %arg8[%c0_23, %c0_24] : memref<128x128xbf16, #tpu.memory_space<vmem>>, vector<128x128xbf16>
      tpu.vector_store %arg8[%c0_23, %c0_24], %48 {strides = array<i32>} : memref<128x128xbf16, #tpu.memory_space<vmem>>, vector<128x128xbf16>,
    } else {
    }
    %c0 = arith.constant 0 : index
    %c0_1 = arith.constant 0 : index
    %3 = vector.load %arg8[%c0, %c0_1] : memref<128x128xbf16, #tpu.memory_space<vmem>>, vector<128x128xbf16>
    %c0_2 = arith.constant 0 : index
    %c0_3 = arith.constant 0 : index
    %4 = vector.load %arg5[%c0_2, %c0_3] : memref<128x512xbf16, #tpu.memory_space<vmem>>, vector<128x512xbf16>
    %cst = arith.constant dense<0.000000e+00> : vector<128x512xf32>
    %5 = tpu.matmul %3, %4, %cst {dimension_numbers = #tpu.dot_dimension_numbers<[1], [0], [0], [1], [0, 0, 1, 1], [], []>} : vector<128x128xbf16>, vector<128x512xbf16>, vector<128x512xf32> -> vector<128x512xf32>
    %c0_4 = arith.constant 0 : index
    %c0_5 = arith.constant 0 : index
    %6 = vector.load %arg6[%c0_4, %c0_5] : memref<1x512xf32, #tpu.memory_space<vmem>>, vector<1x512xf32>
    %7 = vector.broadcast %6 : vector<1x512xf32> to vector<128x512xf32>
    %8 = arith.addf %5, %7 : vector<128x512xf32>
    %9 = arith.mulf %8, %8 : vector<128x512xf32>
    %10 = arith.mulf %8, %9 : vector<128x512xf32>
    %cst_6 = arith.constant 4.471500e-02 : f32
    %11 = vector.broadcast %cst_6 : f32 to vector<128x512xf32>
    %12 = arith.mulf %11, %10 : vector<128x512xf32>
    %13 = arith.addf %8, %12 : vector<128x512xf32>
    %cst_7 = arith.constant 0.797884583 : f32
    %14 = vector.broadcast %cst_7 : f32 to vector<128x512xf32>
    %15 = arith.mulf %14, %13 : vector<128x512xf32>
    %16 = math.tanh %15 : vector<128x512xf32>
    %cst_8 = arith.constant 1.000000e+00 : f32
    %17 = vector.broadcast %cst_8 : f32 to vector<128x512xf32>
    %18 = arith.addf %17, %16 : vector<128x512xf32>
    %cst_9 = arith.constant 5.000000e-01 : f32
    %19 = vector.broadcast %cst_9 : f32 to vector<128x512xf32>
    %20 = arith.mulf %19, %18 : vector<128x512xf32>
    %21 = arith.mulf %8, %20 : vector<128x512xf32>
    %22 = arith.truncf %21 : vector<128x512xf32> to vector<128x512xbf16>
    %c0_10 = arith.constant 0 : index
    %c0_11 = arith.constant 0 : index
    %23 = vector.load %arg7[%c0_10, %c0_11] : memref<128x512xbf16, #tpu.memory_space<vmem>>, vector<128x512xbf16>
    tpu.vector_store %arg7[%c0_10, %c0_11], %22 {strides = array<i32>} : memref<128x512xbf16, #tpu.memory_space<vmem>>, vector<128x512xbf16>,
    return
  }
  func.func @transform_0(%arg0: i32, %arg1: i32) -> (i32, i32) {
    %c0_i32 = arith.constant 0 : i32
    %c0_i32_0 = arith.constant 0 : i32
    return %arg0, %c0_i32 : i32, i32
  }
  func.func @transform_1(%arg0: i32, %arg1: i32) -> (i32, i32) {
    %c0_i32 = arith.constant 0 : i32
    %c0_i32_0 = arith.constant 0 : i32
    %c0_i32_1 = arith.constant 0 : i32
    return %c0_i32, %c0_i32_0 : i32, i32
  }
  func.func @transform_2(%arg0: i32, %arg1: i32) -> (i32, i32) {
    %c0_i32 = arith.constant 0 : i32
    %c0_i32_0 = arith.constant 0 : i32
    %c0_i32_1 = arith.constant 0 : i32
    return %c0_i32, %c0_i32_0 : i32, i32
  }
  func.func @transform_3(%arg0: i32, %arg1: i32) -> (i32, i32) {
    %c0_i32 = arith.constant 0 : i32
    %c0_i32_0 = arith.constant 0 : i32
    return %c0_i32, %arg1 : i32, i32
  }
  func.func @transform_4(%arg0: i32, %arg1: i32) -> (i32, i32) {
    %c0_i32 = arith.constant 0 : i32
    %c0_i32_0 = arith.constant 0 : i32
    return %c0_i32, %arg1 : i32, i32
  }
  func.func @transform_5(%arg0: i32, %arg1: i32) -> (i32, i32) {
    %c0_i32 = arith.constant 0 : i32
    return %arg0, %arg1 : i32, i32
  }
}

module attributes {stable_mosaic.version = 11 : i64} {
  func.func @_linear_fullk_kernel(%arg0: i32, %arg1: i32, %arg2: memref<128x512xbf16, #tpu.memory_space<vmem>>, %arg3: memref<512x128xbf16, #tpu.memory_space<vmem>>, %arg4: memref<1x128xf32, #tpu.memory_space<vmem>>, %arg5: memref<128x128xbf16, #tpu.memory_space<vmem>>, %arg6: memref<128x128xbf16, #tpu.memory_space<vmem>>) attributes {dimension_semantics = [#tpu.dimension_semantics<parallel>, #tpu.dimension_semantics<parallel>], iteration_bounds = array<i64: 1, 1>, scalar_prefetch = 0 : i64, scratch_operands = 0 : i64, tpu.core_type = #tpu.core_type<tc>, window_params = [{transform_indices = @transform_0, window_bounds = array<i64: 128, 512>}, {transform_indices = @transform_1, window_bounds = array<i64: 512, 128>}, {transform_indices = @transform_2, window_bounds = array<i64: 1, 128>}, {transform_indices = @transform_3, window_bounds = array<i64: 128, 128>}, {transform_indices = @transform_4, window_bounds = array<i64: 128, 128>}]} {
    %c0 = arith.constant 0 : index
    %c0_0 = arith.constant 0 : index
    %0 = vector.load %arg2[%c0, %c0_0] : memref<128x512xbf16, #tpu.memory_space<vmem>>, vector<128x512xbf16>
    %c0_1 = arith.constant 0 : index
    %c0_2 = arith.constant 0 : index
    %1 = vector.load %arg3[%c0_1, %c0_2] : memref<512x128xbf16, #tpu.memory_space<vmem>>, vector<512x128xbf16>
    %cst = arith.constant dense<0.000000e+00> : vector<128x128xf32>
    %2 = tpu.matmul %0, %1, %cst {dimension_numbers = #tpu.dot_dimension_numbers<[1], [0], [0], [1], [0, 0, 1, 1], [], []>} : vector<128x512xbf16>, vector<512x128xbf16>, vector<128x128xf32> -> vector<128x128xf32>
    %c0_3 = arith.constant 0 : index
    %c0_4 = arith.constant 0 : index
    %3 = vector.load %arg4[%c0_3, %c0_4] : memref<1x128xf32, #tpu.memory_space<vmem>>, vector<1x128xf32>
    %4 = vector.broadcast %3 : vector<1x128xf32> to vector<128x128xf32>
    %5 = arith.addf %2, %4 : vector<128x128xf32>
    %c0_5 = arith.constant 0 : index
    %c0_6 = arith.constant 0 : index
    %6 = vector.load %arg5[%c0_5, %c0_6] : memref<128x128xbf16, #tpu.memory_space<vmem>>, vector<128x128xbf16>
    %7 = arith.extf %6 : vector<128x128xbf16> to vector<128x128xf32>
    %8 = arith.addf %5, %7 : vector<128x128xf32>
    %9 = arith.truncf %8 : vector<128x128xf32> to vector<128x128xbf16>
    %c0_7 = arith.constant 0 : index
    %c0_8 = arith.constant 0 : index
    %10 = vector.load %arg6[%c0_7, %c0_8] : memref<128x128xbf16, #tpu.memory_space<vmem>>, vector<128x128xbf16>
    tpu.vector_store %arg6[%c0_7, %c0_8], %9 {strides = array<i32>} : memref<128x128xbf16, #tpu.memory_space<vmem>>, vector<128x128xbf16>,
    return
  }
  func.func @transform_0(%arg0: i32, %arg1: i32) -> (i32, i32) {
    %c0_i32 = arith.constant 0 : i32
    %c0_i32_0 = arith.constant 0 : i32
    return %arg0, %c0_i32 : i32, i32
  }
  func.func @transform_1(%arg0: i32, %arg1: i32) -> (i32, i32) {
    %c0_i32 = arith.constant 0 : i32
    %c0_i32_0 = arith.constant 0 : i32
    return %c0_i32, %arg1 : i32, i32
  }
  func.func @transform_2(%arg0: i32, %arg1: i32) -> (i32, i32) {
    %c0_i32 = arith.constant 0 : i32
    %c0_i32_0 = arith.constant 0 : i32
    return %c0_i32, %arg1 : i32, i32
  }
  func.func @transform_3(%arg0: i32, %arg1: i32) -> (i32, i32) {
    %c0_i32 = arith.constant 0 : i32
    return %arg0, %arg1 : i32, i32
  }
  func.func @transform_4(%arg0: i32, %arg1: i32) -> (i32, i32) {
    %c0_i32 = arith.constant 0 : i32
    return %arg0, %arg1 : i32, i32
  }
}

</mosaic_0001>

<bundles_post_ra>
// kernel: eva_forward.11
= control target key start
LH: loop header
LB: loop body
LE: loop exit
PB: predicated region body
PF: predicated region fallthrough
CT: control target
= control target key end

     0   :  { %8 = vsyncpa [#allocation3], 0  ;;  %s266_s15 = smov [#allocation2]   ;;  %s267_s17 = smov 64   ;;  %s301_s0 = inlined_call_operand.vmem [shape: bf16[8,192], index: 0, kind: input, shape index: {}]   ;;  %s302_s1 = inlined_call_operand.hbm [shape: bf16[192,128], index: 1, kind: input, shape index: {}]   ;;  %s303_s2 = inlined_call_operand.vmem [shape: f32[1,128], index: 2, kind: input, shape index: {}]   ;;  %s304_s3 = inlined_call_operand.vmem [shape: bf16[8,128], index: 3, kind: output, shape index: {}]  }
   0x1   :  { %s15_s14 = sshll.u32 %s302_s1, 4  ;;  %s17_s16 = sshll.u32 %s266_s15, 4  ;;  %s16_s14 = int_to_ptr.hbm [resolvable:$true] %s15_s14  ;;  %s18_s16 = int_to_ptr.vmem [resolvable:$true] %s17_s16 }
   0x2   :  { %s268_s18 = smov 4  }
   0x3   :  { %23 = dma.hbm_to_vmem [thread:$0]  %s16_s14, 1536, %s18_s16, [#allocation3], %s267_s17, %s267_s17, %s268_s18  }
   0x4   :  { %264 = dma.done.wait [#allocation3], 1536  }
   0x5   :  { %265 = vsyncadd [#allocation3], 4294965760  ;;  %v231_v0 = vld [vmem:[#allocation2 + $0x38] sm:$0xff]  ;;  %v230_v2 = vld [vmem:[#allocation2 + $0x30] sm:$0xff]  ;;  %vm138_vm0 = vcmask 523264  }
   0x6   :  { %v235_v1 = vld [vmem:[#allocation2 + $0x58] sm:$0xff]  ;;  %142 = vmatpush.bf16.msra.mxu0 %v231_v0  ;;  %v234_v3 = vld [vmem:[#allocation2 + $0x50] sm:$0xff]  ;;  %v229_v4 = vld [vmem:[#allocation2 + $0x28] sm:$0xff] }
   0x7   :  { %159 = vmatpush.bf16.msra.mxu1 %v235_v1  ;;  %v233_v5 = vld [vmem:[#allocation2 + $0x48] sm:$0xff]  ;;  %v31_v6 = vld [vmem:[%s301_s0] sm:$0xff]  ;;  %v227_v10 = vld [vmem:[#allocation2 + $0x18] sm:$0xff] }
   0x8   :  { %v228_v7 = vld [vmem:[#allocation2 + $0x20] sm:$0xff]  ;;  %v62_v8 = vunpack.c.h.b16 %v31_v6  ;;  %v226_v12 = vld [vmem:[#allocation2 + $0x10] sm:$0xff]  ;;  %v225_v13 = vld [vmem:[#allocation2 + $0x8] sm:$0xff]  ;;  %v61_v14 = vunpack.c.l.b16 %v31_v6 }
   0x9   :  { %v232_v9 = vld [vmem:[#allocation2 + $0x40] sm:$0xff] }
   0xa   :  { %143 = vmatpush.bf16.msra.mxu0 %v230_v2  ;;  %v64_v11 = vpack.c.b16 %v62_v8, %v62_v8  ;;  %v224_v15 = vld [vmem:[#allocation2] sm:$0xff]  ;;  %v63_v16 = vpack.c.b16 %v61_v14, %v61_v14 }
   0xb   :  { %160 = vmatpush.bf16.msra.mxu1 %v234_v3  ;;  %v239_v19 = vld [vmem:[%s303_s2] ss:$0 sm:$0xff] }
   0xe   :  { %144 = vmatpush.bf16.msra.mxu0 %v229_v4 }
   0xf   :  { %161 = vmatpush.bf16.msra.mxu1 %v233_v5 }
  0x12   :  { %145 = vmatpush.bf16.msra.mxu0 %v228_v7 }
  0x13   :  { %162 = vmatpush.bf16.msra.mxu1 %v232_v9 }
  0x16   :  { %146 = vmatpush.bf16.msra.mxu0 %v227_v10  ;;  %223 = vmatmul.msk.bf16.vlgmr.msra.gmra.mxu1 %vm138_vm0, %v64_v11 }
  0x1a   :  { %147 = vmatpush.bf16.msra.mxu0 %v226_v12 }
  0x1e   :  { %148 = vmatpush.bf16.msra.mxu0 %v225_v13 }
  0x22   :  { %149 = vmatpush.bf16.msra.mxu0 %v224_v15 }
  0x25   :  { %150 = vmatmul.bf16.vlgmr.msra.gmra.mxu0 %v63_v16 }
  0x93   :  { %v164_v17 = vpop.f32.mrf.mxu1 }
  0x9b   :  { %v166_v18 = vpop.f32.mrf.mxu1 }
  0xa2   :  { %v151_v20 = vpop.f32.mrf.mxu0 }
  0xa3   :  { %v152_v21 = vadd.f32 %v239_v19, %v151_v20 }
  0xa5   :  { %v165_v22 = vadd.f32 %v164_v17, %v152_v21 }
  0xa7   :  { %v168_v23 = vpack.c.bf16 %v165_v22, %v165_v22 }
  0xa9   :  { %169 = vst [vmem:[%s304_s3] sm:$0xf] %v168_v23 }
  0xaa   :  { %v153_v24 = vpop.f32.mrf.mxu0 }
  0xab   :  { %174 = vsyncpa [#allocation3], 1 }

// kernel: eva_forward.14
= control target key start
LH: loop header
LB: loop body
LE: loop exit
PB: predicated region body
PF: predicated region fallthrough
CT: control target
= control target key end

     0   :  { %s615_s1 = inlined_call_operand.vmem [shape: bf16[128,128], index: 1, kind: input, shape index: {}]   ;;  %s616_s2 = inlined_call_operand.vmem [shape: f32[1,128], index: 2, kind: input, shape index: {}]   ;;  %s617_s0 = inlined_call_operand.vmem [shape: bf16[128,128], index: 0, kind: input, shape index: {}]   ;;  %s618_s3 = inlined_call_operand.vmem [shape: bf16[128,128], index: 3, kind: input, shape index: {}]   ;;  %s619_s4 = inlined_call_operand.vmem [shape: bf16[128,128], index: 4, kind: output, shape index: {}]  }
   0x1   :  { %v361_v0 = vld [vmem:[%s615_s1 + $0x38] sm:$0xff]  ;;  %v360_v1 = vld [vmem:[%s615_s1 + $0x30] sm:$0xff]  ;;  %v359_v2 = vld [vmem:[%s615_s1 + $0x28] sm:$0xff] }
   0x2   :  { %149 = vmatpush.bf16.msra.mxu0 %v361_v0  ;;  %448 = vmatpush.bf16.msra.mxu1 %v361_v0  ;;  %v358_v3 = vld [vmem:[%s615_s1 + $0x20] sm:$0xff]  ;;  %v357_v4 = vld [vmem:[%s615_s1 + $0x18] sm:$0xff]  ;;  %v356_v5 = vld [vmem:[%s615_s1 + $0x10] sm:$0xff] }
   0x3   :  { %449 = vmatpush.bf16.msra.mxu2 %v361_v0  ;;  %450 = vmatpush.bf16.msra.mxu3 %v361_v0  ;;  %v355_v6 = vld [vmem:[%s615_s1 + $0x8] sm:$0xff]  ;;  %v354_v7 = vld [vmem:[%s615_s1] sm:$0xff]  ;;  %v348_v9 = vld [vmem:[%s617_s0 + $0x10] sm:$0xff] }
   0x4   :  { %v346_v8 = vld [vmem:[%s617_s0] sm:$0xff]  ;;  %v352_v11 = vld [vmem:[%s617_s0 + $0x30] sm:$0xff]  ;;  %v347_v12 = vld [vmem:[%s617_s0 + $0x8] sm:$0xff] }
   0x5   :  { %v350_v10 = vld [vmem:[%s617_s0 + $0x20] sm:$0xff]  ;;  %v349_v13 = vld [vmem:[%s617_s0 + $0x18] sm:$0xff]  ;;  %v351_v14 = vld [vmem:[%s617_s0 + $0x28] sm:$0xff] }
   0x6   :  { %150 = vmatpush.bf16.msra.mxu0 %v360_v1  ;;  %451 = vmatpush.bf16.msra.mxu1 %v360_v1  ;;  %v353_v15 = vld [vmem:[%s617_s0 + $0x38] sm:$0xff]  ;;  %v549_v18 = vld [vmem:[%s616_s2] ss:$0 sm:$0xff]  ;;  %v435_v20 = vld [vmem:[%s618_s3 + $0x10] sm:$0xff]  }
   0x7   :  { %452 = vmatpush.bf16.msra.mxu2 %v360_v1  ;;  %453 = vmatpush.bf16.msra.mxu3 %v360_v1  ;;  %v363_v19 = vld [vmem:[%s618_s3] sm:$0xff]   ;;  %v372_v22 = vunpack.c.l.bf16 %v435_v20  ;;  %v373_v28 = vunpack.c.h.bf16 %v435_v20  ;;  %v439_v34 = vld [vmem:[%s618_s3 + $0x30] sm:$0xff]   ;;  %v434_v57 = vld [vmem:[%s618_s3 + $0x8] sm:$0xff]  }
   0x8   :  { %v364_v21 = vunpack.c.l.bf16 %v363_v19  ;;  %v365_v27 = vunpack.c.h.bf16 %v363_v19  ;;  %v437_v33 = vld [vmem:[%s618_s3 + $0x20] sm:$0xff]   ;;  %v388_v40 = vunpack.c.l.bf16 %v439_v34  ;;  %v389_v46 = vunpack.c.h.bf16 %v439_v34  ;;  %v436_v58 = vld [vmem:[%s618_s3 + $0x18] sm:$0xff]  }
   0x9   :  { %v380_v39 = vunpack.c.l.bf16 %v437_v33  ;;  %v381_v45 = vunpack.c.h.bf16 %v437_v33  ;;  %v368_v61 = vunpack.c.l.bf16 %v434_v57  ;;  %v376_v62 = vunpack.c.l.bf16 %v436_v58 }
   0xa   :  { %151 = vmatpush.bf16.msra.mxu0 %v359_v2  ;;  %454 = vmatpush.bf16.msra.mxu1 %v359_v2 }
   0xb   :  { %455 = vmatpush.bf16.msra.mxu2 %v359_v2  ;;  %456 = vmatpush.bf16.msra.mxu3 %v359_v2 }
   0xe   :  { %152 = vmatpush.bf16.msra.mxu0 %v358_v3  ;;  %457 = vmatpush.bf16.msra.mxu1 %v358_v3 }
   0xf   :  { %458 = vmatpush.bf16.msra.mxu2 %v358_v3  ;;  %459 = vmatpush.bf16.msra.mxu3 %v358_v3  ;;  %v369_v3 = vunpack.c.h.bf16 %v434_v57 }
  0x12   :  { %153 = vmatpush.bf16.msra.mxu0 %v357_v4  ;;  %460 = vmatpush.bf16.msra.mxu1 %v357_v4 }
  0x13   :  { %461 = vmatpush.bf16.msra.mxu2 %v357_v4  ;;  %462 = vmatpush.bf16.msra.mxu3 %v357_v4  ;;  %v377_v4 = vunpack.c.h.bf16 %v436_v58 }
  0x16   :  { %154 = vmatpush.bf16.msra.mxu0 %v356_v5  ;;  %463 = vmatpush.bf16.msra.mxu1 %v356_v5 }
  0x17   :  { %464 = vmatpush.bf16.msra.mxu2 %v356_v5  ;;  %465 = vmatpush.bf16.msra.mxu3 %v356_v5 }
  0x1a   :  { %155 = vmatpush.bf16.msra.mxu0 %v355_v6  ;;  %466 = vmatpush.bf16.msra.mxu1 %v355_v6 }
  0x1b   :  { %467 = vmatpush.bf16.msra.mxu2 %v355_v6  ;;  %468 = vmatpush.bf16.msra.mxu3 %v355_v6 }
  0x1e   :  { %156 = vmatpush.bf16.msra.mxu0 %v354_v7  ;;  %469 = vmatpush.bf16.msra.mxu1 %v354_v7 }
  0x1f   :  { %470 = vmatpush.bf16.msra.mxu2 %v354_v7  ;;  %471 = vmatpush.bf16.msra.mxu3 %v354_v7 }
  0x21   :  { %157 = vmatmul.bf16.vlgmr.msra.gmra.mxu0 %v346_v8  ;;  %167 = vmatmul.bf16.vlgmr.msra.gmra.mxu1 %v348_v9  ;;  %v438_v9 = vld [vmem:[%s618_s3 + $0x28] sm:$0xff]  }
  0x22   :  { %177 = vmatmul.bf16.vlgmr.msra.gmra.mxu2 %v350_v10  ;;  %187 = vmatmul.bf16.vlgmr.msra.gmra.mxu3 %v352_v11  ;;  %v440_v10 = vld [vmem:[%s618_s3 + $0x38] sm:$0xff]  }
  0x31   :  { %162 = vmatmul.bf16.gmra.mxu0 %v347_v12  ;;  %172 = vmatmul.bf16.gmra.mxu1 %v349_v13 }
  0x32   :  { %182 = vmatmul.bf16.gmra.mxu2 %v351_v14  ;;  %192 = vmatmul.bf16.gmra.mxu3 %v353_v15  ;;  %v384_v15 = vunpack.c.l.bf16 %v438_v9 }
  0x9e   :  { %v158_v16 = vpop.f32.mrf.mxu0  ;;  %v168_v17 = vpop.f32.mrf.mxu1 }
  0x9f   :  { %v159_v23 = vadd.f32 %v549_v18, %v158_v16  ;;  %v169_v24 = vadd.f32 %v549_v18, %v168_v17  ;;  %v392_v16 = vunpack.c.l.bf16 %v440_v10 }
  0xa1   :  { %v230_v35 = vadd.f32 %v364_v21, %v159_v23  ;;  %v234_v36 = vadd.f32 %v372_v22, %v169_v24  ;;  %v385_v22 = vunpack.c.h.bf16 %v438_v9  ;;  %v393_v23 = vunpack.c.h.bf16 %v440_v10 }
  0xa5   :  { %v178_v25 = vpop.f32.mrf.mxu2  ;;  %v188_v26 = vpop.f32.mrf.mxu3 }
  0xa6   :  { %v160_v29 = vpop.f32.mrf.mxu0  ;;  %v170_v30 = vpop.f32.mrf.mxu1  ;;  %v179_v43 = vadd.f32 %v549_v18, %v178_v25  ;;  %v189_v44 = vadd.f32 %v549_v18, %v188_v26 }
  0xa7   :  { %v161_v31 = vadd.f32 %v549_v18, %v160_v29  ;;  %v171_v32 = vadd.f32 %v549_v18, %v170_v30 }
  0xa8   :  { %v238_v53 = vadd.f32 %v380_v39, %v179_v43  ;;  %v242_v54 = vadd.f32 %v388_v40, %v189_v44 }
  0xa9   :  { %v231_v37 = vadd.f32 %v365_v27, %v161_v31  ;;  %v235_v38 = vadd.f32 %v373_v28, %v171_v32 }
  0xab   :  { %v397_v41 = vpack.c.bf16 %v231_v37, %v230_v35  ;;  %v407_v42 = vpack.c.bf16 %v235_v38, %v234_v36 }
  0xad   :  { %398 = vst [vmem:[%s619_s4] sm:$0xff] %v397_v41   ;;  %v180_v47 = vpop.f32.mrf.mxu2  ;;  %v190_v48 = vpop.f32.mrf.mxu3 }
  0xae   :  { %442 = vst [vmem:[%s619_s4 + $0x10] sm:$0xff] %v407_v42   ;;  %v181_v49 = vadd.f32 %v549_v18, %v180_v47  ;;  %v191_v50 = vadd.f32 %v549_v18, %v190_v48  ;;  %v163_v51 = vpop.f32.mrf.mxu0  ;;  %v173_v52 = vpop.f32.mrf.mxu1 }
  0xaf   :  { %v164_v63 = vadd.f32 %v549_v18, %v163_v51  ;;  %v174_v0 = vadd.f32 %v549_v18, %v173_v52 }
  0xb0   :  { %v239_v55 = vadd.f32 %v381_v45, %v181_v49  ;;  %v243_v56 = vadd.f32 %v389_v46, %v191_v50 }
  0xb1   :  { %v232_v11 = vadd.f32 %v368_v61, %v164_v63  ;;  %v236_v12 = vadd.f32 %v376_v62, %v174_v0 }
  0xb2   :  { %v417_v59 = vpack.c.bf16 %v239_v55, %v238_v53  ;;  %v427_v60 = vpack.c.bf16 %v243_v56, %v242_v54 }
  0xb4   :  { %444 = vst [vmem:[%s619_s4 + $0x20] sm:$0xff] %v417_v59  }
  0xb5   :  { %446 = vst [vmem:[%s619_s4 + $0x30] sm:$0xff] %v427_v60   ;;  %v183_v1 = vpop.f32.mrf.mxu2  ;;  %v193_v2 = vpop.f32.mrf.mxu3 }
  0xb6   :  { %v165_v5 = vpop.f32.mrf.mxu0  ;;  %v175_v6 = vpop.f32.mrf.mxu1  ;;  %v184_v20 = vadd.f32 %v549_v18, %v183_v1  ;;  %v194_v21 = vadd.f32 %v549_v18, %v193_v2 }
  0xb7   :  { %v166_v7 = vadd.f32 %v549_v18, %v165_v5  ;;  %v176_v8 = vadd.f32 %v549_v18, %v175_v6 }
  0xb8   :  { %v240_v28 = vadd.f32 %v384_v15, %v184_v20  ;;  %v244_v29 = vadd.f32 %v392_v16, %v194_v21 }
  0xb9   :  { %v233_v13 = vadd.f32 %v369_v3, %v166_v7  ;;  %v237_v14 = vadd.f32 %v377_v4, %v176_v8 }
  0xbb   :  { %v402_v17 = vpack.c.bf16 %v233_v13, %v232_v11  ;;  %v412_v19 = vpack.c.bf16 %v237_v14, %v236_v12 }
  0xbd   :  { %441 = vst [vmem:[%s619_s4 + $0x8] sm:$0xff] %v402_v17   ;;  %v185_v24 = vpop.f32.mrf.mxu2  ;;  %v195_v25 = vpop.f32.mrf.mxu3 }
  0xbe   :  { %443 = vst [vmem:[%s619_s4 + $0x18] sm:$0xff] %v412_v19   ;;  %v186_v26 = vadd.f32 %v549_v18, %v185_v24  ;;  %v196_v27 = vadd.f32 %v549_v18, %v195_v25 }
  0xc0   :  { %v241_v30 = vadd.f32 %v385_v22, %v186_v26  ;;  %v245_v31 = vadd.f32 %v393_v23, %v196_v27 }
  0xc2   :  { %v422_v32 = vpack.c.bf16 %v241_v30, %v240_v28  ;;  %v432_v33 = vpack.c.bf16 %v245_v31, %v244_v29 }
  0xc4   :  { %445 = vst [vmem:[%s619_s4 + $0x28] sm:$0xff] %v422_v32  }
  0xc5   :  { %447 = vst [vmem:[%s619_s4 + $0x38] sm:$0xff] %v432_v33  }

// kernel: eva_forward.12
= control target key start
LH: loop header
LB: loop body
LE: loop exit
PB: predicated region body
PF: predicated region fallthrough
CT: control target
= control target key end

     0   :  { %10 = vsyncpa [#allocation4], 0  ;;  %s2180_s0 = inlined_call_operand.vmem [shape: bf16[128,128], index: 0, kind: input, shape index: {}]   ;;  %s2181_s1 = inlined_call_operand.vmem [shape: f32[1,128], index: 1, kind: input, shape index: {}]   ;;  %s2182_s2 = inlined_call_operand.vmem [shape: f32[1,128], index: 2, kind: input, shape index: {}]   ;;  %s2183_s3 = inlined_call_operand.hbm [shape: bf16[128,384], index: 3, kind: input, shape index: {}]   ;;  %s2184_s4 = inlined_call_operand.vmem [shape: f32[1,384], index: 4, kind: input, shape index: {}]   ;;  %s2185_s5 = inlined_call_operand.vmem [shape: bf16[128,384], index: 5, kind: output, shape index: {}]  }
   0x1   :  { %12 = vsyncpa [#allocation4 + $0x1], 0  ;;  %s1612_s18 = smov 0   ;;  %s1614_s19 = smov 0  }
   0x2   :  { %s1616_s20 = smov 0   ;;  %s1618_s21 = smov 0  }
   0x3   :  { %s1620_s22 = smov 0   ;;  %s1622_s23 = smov 0  }
   0x4 LB: > { %s1148_s24 = sadd.s32 4294967295, %s1576_s23   ;;  %s27_s25 = sadd.s32 1, %s1572_s22  ;;  %s1576_s23 = sphi %s1622_s23, %s18_s23   ;;  %s1572_s22 = sphi %s1620_s22, %s2201_s22   ;;  %s1568_s21 = sphi %s1618_s21, %s2200_s21   ;;  %s1564_s20 = sphi %s1616_s20, %s2199_s20   ;;  %s1560_s19 = sphi %s1614_s19, %s2198_s19   ;;  %s1556_s18 = sphi %s1612_s18, %s2197_s18  }
   0x5   : > { %p28_p0 = scmp.ge.s32.totalorder %s27_s25, 3  ;;  %s105_s26 = sadd.s32 1, %s1564_s20 }
   0x6   : > { %p112_p1 = scmp.ne.s32.totalorder %s1564_s20, %s1560_s19  ;;  %p113_p2 = scmp.eq.s32.totalorder %s1576_s23, 0 }
   0x7   : > { %s2203_s25 = smov (%p28_p0, %s27_s25), 0  ;;  %p118_p4 = scmp.ne.s32.totalorder %s1560_s19, %s1556_s18 }
   0x8   : > { %p1648_p3 = por %p113_p2, %p112_p1  ;;  %s102_s28 = ssub.s32 %s1572_s22, %s2203_s25 }
   0x9   : > { %p119_p5 = scmp.eq.s32.totalorder %s1148_s24, 0  ;;  %p103_p6 = scmp.eq.s32.totalorder %s102_s28, 0 }
   0xa   : > { %p170_p7 = scmp.eq.s32.totalorder %s1148_s24, 2  ;;  %p1406_p10 = scmp.lt.s32.totalorder %s1576_s23, 3 }
   0xb   : > { %p1655_p8 = por %p119_p5, %p118_p4  ;;  %s211_s7 = sand.u32 1, %s1564_s20  }
   0xc   : > { %s1660_s30 = scalar_select %p103_p6, %s1564_s20, %s105_s26  }
   0xd   : > { %p1662_p9 = por %p170_p7, %p112_p1  ;;  %s1154_s8 = sshll.u32 %s1572_s22, 2 }
   0xe   : > { %s1153_s9 = sshll.u32 %s211_s7, 6  ;;  %s219_s12 = scalar_lea.hbm %s2183_s3, %s1154_s8 }
   0xf   : > { %s220_s13 = sshll.u32 %s219_s12, 4  ;;  %s215_s14 = scalar_lea.vmem [#allocation3], %s1153_s9  ;;  %s221_s13 = int_to_ptr.hbm [resolvable:$true] %s220_s13 }
  0x10   : > { %s222_s15 = sshll.u32 %s215_s14, 4  ;;  %p1403_p11 = pnand %p1406_p10, %p1648_p3  ;;  %s223_s15 = int_to_ptr.vmem [resolvable:$true] %s222_s15 }
  0x11   : > { %p1155_p12 = scmp.ge.s32.totalorder %s1576_s23, 1  ;;  %s212_s16 = scalar_lea.sflag [#allocation4], %s211_s7 }
  0x12   : > { %s1578_s17 = smov 192   ;;  %s1579_s18 = smov 64  }
  0x13   : > { %s1580_s24 = smov 4   ;;  %p236_p13 = scmp.lt.s32.totalorder %s1576_s23, 4 }
  0x14   : > { %1405 = dma.hbm_to_vmem [thread:$0]  (!%p1403_p11), %s221_s13, 1024, %s223_s15, %s212_s16, %s1578_s17, %s1579_s18, %s1580_s24  }
  0x15   : > { %p237_p0 = pnand %p1155_p12, %p236_p13 }
  0x16   : > { %s242_s26 = sand.u32 (!%p237_p0), 1, %s1560_s19  }
  0x17   : > { %240 = sbr.rel (%p237_p0) target bundleno = 563 (0x233), region = 40  ;;  %s1156_s28 = sshll.u32 (!%p237_p0), %s242_s26, 6 }
  0x18   : > { %s243_s8 = scalar_lea.sflag (!%p237_p0), [#allocation4], %s242_s26  ;;  %s1677_s9 = scalar_lea.vmem (!%p237_p0), [#allocation3], %s1156_s28 }
  0x1c   : > { %1551 = dma.done.wait (%p1655_p8), %s243_s8, 1024  }
  0x1d   : > { %1553 = vsyncadd (%p1655_p8), %s243_s8, 4294966272  ;;  %p287_p1 = scmp.lt.s32.totalorder %s1568_s21, 2  ;;  %s1691_s12 = scalar_lea.vmem [#allocation5], %s1156_s28 }
  0x1e   : > { %p1158_p2 = scmp.ne.s32.totalorder %s1568_s21, 0 }
  0x1f   : > { %s1685_s27 = scalar_select %p287_p1, %s1568_s21, 2 }
  0x20   : > { %294 = sbr.rel (%p1158_p2) target bundleno = 358 (0x166), region = 48 }
  0x21   : > { %s289_s11 = scalar_lea.vmem %s2184_s4, %s1685_s27 }
  0x25   : > { %v1697_v0 = vld [vmem:[%s2180_s0 + $0x10] sm:$0xff]   ;;  %v1702_v1 = vld [vmem:[%s2180_s0 + $0x8] sm:$0xff]   ;;  %v1707_v2 = vld [vmem:[%s2180_s0] sm:$0xff]   ;;  %v1581_v24 = vmov 128.0  }
  0x26   : > { %v1253_v3 = vunpack.c.l.bf16 %v1697_v0  ;;  %v1249_v4 = vunpack.c.l.bf16 %v1702_v1  ;;  %v1245_v5 = vunpack.c.l.bf16 %v1707_v2  ;;  %v1254_v6 = vunpack.c.h.bf16 %v1697_v0  ;;  %v1720_v9 = vld [vmem:[%s2180_s0 + $0x20] sm:$0xff]   ;;  %v1725_v10 = vld [vmem:[%s2180_s0 + $0x18] sm:$0xff]   ;;  %v1739_v14 = vld [vmem:[%s2180_s0 + $0x28] sm:$0xff]  }
  0x27   : > { %v1250_v7 = vunpack.c.h.bf16 %v1702_v1  ;;  %v1246_v8 = vunpack.c.h.bf16 %v1707_v2  ;;  %v1261_v11 = vunpack.c.l.bf16 %v1720_v9  ;;  %v1258_v12 = vunpack.c.h.bf16 %v1725_v10  ;;  %v1753_v18 = vld [vmem:[%s2180_s0 + $0x38] sm:$0xff]   ;;  %v1758_v19 = vld [vmem:[%s2180_s0 + $0x30] sm:$0xff]  }
  0x28   : > { %335 = vadd.xlane.f32.xlu2 %v1253_v3  ;;  %331 = vadd.xlane.f32.xlu1 %v1249_v4  ;;  %v1257_v13 = vunpack.c.l.bf16 %v1725_v10  ;;  %v1266_v15 = vunpack.c.h.bf16 %v1739_v14  ;;  %v1265_v16 = vunpack.c.l.bf16 %v1739_v14  ;;  %v1262_v17 = vunpack.c.h.bf16 %v1720_v9 }
  0x29   : > { %327 = vadd.xlane.f32.xlu0 %v1245_v5  ;;  %v1273_v20 = vunpack.c.l.bf16 %v1753_v18  ;;  %v1270_v21 = vunpack.c.h.bf16 %v1758_v19  ;;  %v1269_v22 = vunpack.c.l.bf16 %v1758_v19  ;;  %v1274_v23 = vunpack.c.h.bf16 %v1753_v18 }
  0x2a   : > { %1461 = vrcp.f32 %v1581_v24 }
  0x30   : > { %337 = vadd.xlane.f32.xlu2 %v1254_v6  ;;  %333 = vadd.xlane.f32.xlu1 %v1250_v7  ;;  %v1462_v25 = vpop.eup %1461 }
  0x31   : > { %329 = vadd.xlane.f32.xlu0 %v1246_v8  ;;  %v360_v26 = vmul.f32 128.0, %v1462_v25  ;;  %vm364_vm0 = vweird.f32 %v1462_v25 }
  0x33   : > { %v361_v27 = vsub.f32 1.0, %v360_v26 }
  0x35   : > { %v362_v28 = vmul.f32 %v1462_v25, %v361_v27 }
  0x37   : > { %v363_v29 = vadd.f32 %v1462_v25, %v362_v28 }
  0x38   : > { %343 = vadd.xlane.f32.xlu2 %v1261_v11  ;;  %341 = vadd.xlane.f32.xlu1 %v1258_v12 }
  0x39   : > { %339 = vadd.xlane.f32.xlu0 %v1257_v13  ;;  %v1772_v30 = vsel %vm364_vm0, %v1462_v25, %v363_v29 }
  0x40   : > { %349 = vadd.xlane.f32.xlu2 %v1266_v15  ;;  %347 = vadd.xlane.f32.xlu1 %v1265_v16 }
  0x41   : > { %345 = vadd.xlane.f32.xlu0 %v1262_v17 }
  0x48   : > { %355 = vadd.xlane.f32.xlu2 %v1273_v20  ;;  %353 = vadd.xlane.f32.xlu1 %v1270_v21 }
  0x49   : > { %351 = vadd.xlane.f32.xlu0 %v1269_v22 }
  0x51   : > { %357 = vadd.xlane.f32.xlu0 %v1274_v23 }
  0x9b   : > { %v336_v31 = vpop.xlane.xlu2 %335  ;;  %v332_v32 = vpop.xlane.xlu1 %331 }
  0x9c   : > { %v368_v33 = vmul.f32 %v1772_v30, %v332_v32  ;;  %v328_v34 = vpop.xlane.xlu0 %327  ;;  %v370_v51 = vmul.f32 %v1772_v30, %v336_v31 }
  0x9d   : > { %v366_v35 = vmul.f32 %v1772_v30, %v328_v34 }
  0x9e   : > { %v1776_v36 = vsub.f32 %v1249_v4, %v368_v33  ;;  %v1803_v57 = vsub.f32 %v1253_v3, %v370_v51 }
  0x9f   : > { %v1778_v37 = vsub.f32 %v1245_v5, %v366_v35 }
  0xa0   : > { %v400_v38 = vmul.f32 %v1776_v36, %v1776_v36  ;;  %v402_v63 = vmul.f32 %v1803_v57, %v1803_v57 }
  0xa1   : > { %v398_v39 = vmul.f32 %v1778_v37, %v1778_v37 }
  0xa2   : > { %418 = vadd.xlane.f32.xlu0 %v400_v38 }
  0xa3   : > { %414 = vadd.xlane.f32.xlu1 %v398_v39  ;;  %v338_v40 = vpop.xlane.xlu2 %337  ;;  %v334_v41 = vpop.xlane.xlu1 %333 }
  0xa4   : > { %v371_v42 = vmul.f32 %v1772_v30, %v338_v40  ;;  %v369_v43 = vmul.f32 %v1772_v30, %v334_v41  ;;  %v330_v44 = vpop.xlane.xlu0 %329 }
  0xa5   : > { %v367_v45 = vmul.f32 %v1772_v30, %v330_v44 }
  0xa6   : > { %v1787_v46 = vsub.f32 %v1254_v6, %v371_v42  ;;  %v1789_v47 = vsub.f32 %v1250_v7, %v369_v43 }
  0xa7   : > { %v1791_v48 = vsub.f32 %v1246_v8, %v367_v45 }
  0xa8   : > { %v403_v49 = vmul.f32 %v1787_v46, %v1787_v46  ;;  %v401_v50 = vmul.f32 %v1789_v47, %v1789_v47 }
  0xa9   : > { %v399_v52 = vmul.f32 %v1791_v48, %v1791_v48 }
  0xaa   : > { %424 = vadd.xlane.f32.xlu0 %v403_v49 }
  0xab   : > { %420 = vadd.xlane.f32.xlu1 %v401_v50  ;;  %416 = vadd.xlane.f32.xlu2 %v399_v52  ;;  %v344_v53 = vpop.xlane.xlu2 %343  ;;  %v342_v54 = vpop.xlane.xlu1 %341 }
  0xac   : > { %v374_v55 = vmul.f32 %v1772_v30, %v344_v53  ;;  %v340_v56 = vpop.xlane.xlu0 %339  ;;  %v373_v61 = vmul.f32 %v1772_v30, %v342_v54 }
  0xad   : > { %v372_v58 = vmul.f32 %v1772_v30, %v340_v56 }
  0xae   : > { %v1808_v59 = vsub.f32 %v1261_v11, %v374_v55  ;;  %v1823_v2 = vsub.f32 %v1258_v12, %v373_v61 }
  0xaf   : > { %v1812_v60 = vsub.f32 %v1257_v13, %v372_v58 }
  0xb0   : > { %v406_v62 = vmul.f32 %v1808_v59, %v1808_v59  ;;  %v405_v11 = vmul.f32 %v1823_v2, %v1823_v2 }
  0xb1   : > { %v404_v0 = vmul.f32 %v1812_v60, %v1812_v60 }
  0xb2   : > { %430 = vadd.xlane.f32.xlu0 %v406_v62 }
  0xb3   : > { %422 = vadd.xlane.f32.xlu2 %v402_v63  ;;  %426 = vadd.xlane.f32.xlu1 %v404_v0  ;;  %v350_v1 = vpop.xlane.xlu2 %349  ;;  %v348_v3 = vpop.xlane.xlu1 %347 }
  0xb4   : > { %v377_v4 = vmul.f32 %v1772_v30, %v350_v1  ;;  %v346_v5 = vpop.xlane.xlu0 %345  ;;  %v376_v10 = vmul.f32 %v1772_v30, %v348_v3 }
  0xb5   : > { %v375_v6 = vmul.f32 %v1772_v30, %v346_v5 }
  0xb6   : > { %v1829_v7 = vsub.f32 %v1266_v15, %v377_v4  ;;  %v1844_v9 = vsub.f32 %v1265_v16, %v376_v10 }
  0xb7   : > { %v1833_v8 = vsub.f32 %v1262_v17, %v375_v6 }
  0xb8   : > { %v409_v12 = vmul.f32 %v1829_v7, %v1829_v7  ;;  %v408_v29 = vmul.f32 %v1844_v9, %v1844_v9 }
  0xb9   : > { %v407_v13 = vmul.f32 %v1833_v8, %v1833_v8 }
  0xba   : > { %436 = vadd.xlane.f32.xlu0 %v409_v12 }
  0xbb   : > { %428 = vadd.xlane.f32.xlu2 %v405_v11  ;;  %432 = vadd.xlane.f32.xlu1 %v407_v13  ;;  %v356_v15 = vpop.xlane.xlu2 %355  ;;  %v354_v25 = vpop.xlane.xlu1 %353 }
  0xbc   : > { %v380_v17 = vmul.f32 %v1772_v30, %v356_v15  ;;  %v352_v24 = vpop.xlane.xlu0 %351  ;;  %v379_v14 = vmul.f32 %v1772_v30, %v354_v25 }
  0xbd   : > { %v378_v26 = vmul.f32 %v1772_v30, %v352_v24 }
  0xbe   : > { %v1850_v27 = vsub.f32 %v1273_v20, %v380_v17  ;;  %v1865_v20 = vsub.f32 %v1270_v21, %v379_v14 }
  0xbf   : > { %v1854_v28 = vsub.f32 %v1269_v22, %v378_v26 }
  0xc0   : > { %v412_v16 = vmul.f32 %v1850_v27, %v1850_v27  ;;  %v411_v34 = vmul.f32 %v1865_v20, %v1865_v20 }
  0xc1   : > { %v410_v31 = vmul.f32 %v1854_v28, %v1854_v28 }
  0xc2   : > { %442 = vadd.xlane.f32.xlu0 %v412_v16 }
  0xc3   : > { %434 = vadd.xlane.f32.xlu2 %v408_v29  ;;  %438 = vadd.xlane.f32.xlu1 %v410_v31 }
  0xc4   : > { %v358_v22 = vpop.xlane.xlu0 %357 }
  0xc5   : > { %v381_v32 = vmul.f32 %v1772_v30, %v358_v22 }
  0xc7   : > { %v1870_v33 = vsub.f32 %v1274_v23, %v381_v32 }
  0xc9   : > { %v413_v35 = vmul.f32 %v1870_v33, %v1870_v33 }
  0xcb   : > { %440 = vadd.xlane.f32.xlu2 %v411_v34  ;;  %444 = vadd.xlane.f32.xlu1 %v413_v35 }
 0x115   : > { %v419_v38 = vpop.xlane.xlu0 %418 }
 0x116   : > { %v415_v39 = vpop.xlane.xlu1 %414  ;;  %v448_v19 = vmul.f32 %v419_v38, %v1772_v30 }
 0x117   : > { %v446_v21 = vmul.f32 %v415_v39, %v1772_v30 }
 0x118   : > { %v464_v40 = vadd.f32 1e-06, %v448_v19  ;;  %v1922_v19 = vld [vmem:[%s2181_s1] ss:$0 sm:$0xff] }
 0x119   : > { %v462_v41 = vadd.f32 1e-06, %v446_v21 }
 0x11a   : > { %1463 = vrsqrt.f32 %v464_v40  ;;  %vm504_vm3 = vweird.f32 %v464_v40 }
 0x11b   : > { %1465 = vrsqrt.f32 %v462_v41  ;;  %vm484_vm4 = vweird.f32 %v462_v41 }
 0x11d   : > { %v425_v18 = vpop.xlane.xlu0 %424 }
 0x11e   : > { %v421_v23 = vpop.xlane.xlu1 %420  ;;  %v417_v42 = vpop.xlane.xlu2 %416  ;;  %v451_v43 = vmul.f32 %v425_v18, %v1772_v30 }
 0x11f   : > { %v449_v44 = vmul.f32 %v421_v23, %v1772_v30  ;;  %v447_v45 = vmul.f32 %v417_v42, %v1772_v30 }
 0x120   : > { %v1464_v49 = vpop.eup %1463  ;;  %v1881_v50 = vadd.f32 1e-06, %v451_v43 }
 0x121   : > { %v1466_v51 = vpop.eup %1465  ;;  %v499_v52 = vmul.f32 %v1464_v49, %v464_v40  ;;  %v1883_v53 = vadd.f32 1e-06, %v449_v44  ;;  %v1885_v54 = vadd.f32 1e-06, %v447_v45  ;;  %vm505_vm1 = vweird.f32 %v1464_v49 }
 0x122   : > { %v479_v55 = vmul.f32 %v1466_v51, %v462_v41  ;;  %1467 = vrsqrt.f32 %v1881_v50  ;;  %vm485_vm2 = vweird.f32 %v1466_v51  ;;  %vm1902_vm5 = vmor %vm504_vm3, %vm505_vm1  ;;  %vm534_vm7 = vweird.f32 %v1881_v50 }
 0x123   : > { %v500_v56 = vmul.f32 %v1464_v49, %v499_v52  ;;  %1469 = vrsqrt.f32 %v1883_v53  ;;  %vm486_vm6 = vmor %vm484_vm4, %vm485_vm2  ;;  %vm514_vm9 = vweird.f32 %v1883_v53  ;;  %vm494_vm11 = vweird.f32 %v1885_v54  ;;  %v1937_v52 = vld [vmem:[%s2182_s2] ss:$0 sm:$0xff] }
 0x124   : > { %v480_v58 = vmul.f32 %v1466_v51, %v479_v55  ;;  %1471 = vrsqrt.f32 %v1885_v54 }
 0x125   : > { %v501_v61 = vmul.f32 0.5, %v500_v56  ;;  %v431_v62 = vpop.xlane.xlu0 %430 }
 0x126   : > { %v481_v63 = vmul.f32 0.5, %v480_v58  ;;  %v423_v0 = vpop.xlane.xlu2 %422  ;;  %v427_v1 = vpop.xlane.xlu1 %426  ;;  %v454_v6 = vmul.f32 %v431_v62, %v1772_v30 }
 0x127   : > { %v502_v3 = vsub.f32 1.5, %v501_v61  ;;  %v450_v4 = vmul.f32 %v423_v0, %v1772_v30  ;;  %v452_v5 = vmul.f32 %v427_v1, %v1772_v30 }
 0x128   : > { %v1893_v11 = vpop.eup %1467  ;;  %v482_v10 = vsub.f32 1.5, %v481_v63  ;;  %v1914_v32 = vadd.f32 1e-06, %v454_v6 }
 0x129   : > { %v1470_v12 = vpop.eup %1469  ;;  %v503_v13 = vmul.f32 %v1464_v49, %v502_v3  ;;  %v529_v15 = vmul.f32 %v1893_v11, %v1881_v50  ;;  %v1897_v17 = vadd.f32 1e-06, %v450_v4  ;;  %v1907_v14 = vadd.f32 1e-06, %v452_v5 }
 0x12a   : > { %v1899_v24 = vpop.eup %1471  ;;  %v483_v25 = vmul.f32 %v1466_v51, %v482_v10  ;;  %v509_v29 = vmul.f32 %v1470_v12, %v1883_v53  ;;  %vm535_vm8 = vweird.f32 %v1893_v11  ;;  %vm515_vm10 = vweird.f32 %v1470_v12 }
 0x12b   : > { %v507_v16 = vsel %vm1902_vm5, %v1464_v49, %v503_v13  ;;  %v489_v31 = vmul.f32 %v1899_v24, %v1885_v54  ;;  %v530_v22 = vmul.f32 %v1893_v11, %v529_v15  ;;  %1473 = vrsqrt.f32 %v1897_v17  ;;  %vm1945_vm13 = vmor %vm534_vm7, %vm535_vm8 }
 0x12c   : > { %v487_v34 = vsel %vm486_vm6, %v1466_v51, %v483_v25  ;;  %v510_v35 = vmul.f32 %v1470_v12, %v509_v29  ;;  %v640_v40 = vmul.f32 %v507_v16, %v1776_v36  ;;  %1475 = vrsqrt.f32 %v1907_v14  ;;  %vm516_vm14 = vmor %vm514_vm9, %vm515_vm10 }
 0x12d   : > { %v490_v38 = vmul.f32 %v1899_v24, %v489_v31  ;;  %v531_v39 = vmul.f32 0.5, %v530_v22  ;;  %v638_v21 = vmul.f32 %v487_v34, %v1778_v37  ;;  %1477 = vrsqrt.f32 %v1914_v32  ;;  %v437_v49 = vpop.xlane.xlu0 %436 }
 0x12e   : > { %v511_v41 = vmul.f32 0.5, %v510_v35  ;;  %v429_v18 = vpop.xlane.xlu2 %428  ;;  %v433_v45 = vpop.xlane.xlu1 %432  ;;  %vm495_vm12 = vweird.f32 %v1899_v24  ;;  %v660_v56 = vmul.f32 %v1922_v19, %v640_v40  ;;  %vm524_vm15 = vweird.f32 %v1897_v17 }
 0x12f   : > { %v491_v23 = vmul.f32 0.5, %v490_v38  ;;  %v532_v42 = vsub.f32 1.5, %v531_v39  ;;  %v453_v44 = vmul.f32 %v429_v18, %v1772_v30  ;;  %v658_v55 = vmul.f32 %v1922_v19, %v638_v21  ;;  %vm496_vm0 = vmor %vm494_vm11, %vm495_vm12 }
 0x130   : > { %v512_v43 = vsub.f32 1.5, %v511_v41  ;;  %v455_v1 = vmul.f32 %v433_v45, %v1772_v30  ;;  %v457_v4 = vmul.f32 %v437_v49, %v1772_v30  ;;  %v680_v15 = vadd.f32 %v1937_v52, %v660_v56 }
 0x131   : > { %v492_v37 = vsub.f32 1.5, %v491_v23  ;;  %v533_v36 = vmul.f32 %v1893_v11, %v532_v42  ;;  %v1474_v51 = vpop.eup %1473  ;;  %v1949_v62 = vadd.f32 1e-06, %v453_v44  ;;  %v678_v54 = vadd.f32 %v1937_v52, %v658_v55 }
 0x132   : > { %v513_v58 = vmul.f32 %v1470_v12, %v512_v43  ;;  %v519_v0 = vmul.f32 %v1474_v51, %v1897_v17  ;;  %v1958_v3 = vpop.eup %1475  ;;  %vm525_vm1 = vweird.f32 %v1474_v51  ;;  %v1985_v34 = vadd.f32 1e-06, %v455_v1 }
 0x133   : > { %v493_v63 = vmul.f32 %v1899_v24, %v492_v37  ;;  %v537_v53 = vsel %vm1945_vm13, %v1893_v11, %v533_v36  ;;  %1479 = vrsqrt.f32 %v1949_v62  ;;  %v1969_v5 = vpop.eup %1477  ;;  %v539_v13 = vmul.f32 %v1958_v3, %v1907_v14  ;;  %vm526_vm3 = vmor %vm524_vm15, %vm525_vm1 }
 0x134   : > { %v517_v50 = vsel %vm516_vm14, %v1470_v12, %v513_v58  ;;  %v520_v12 = vmul.f32 %v1474_v51, %v519_v0  ;;  %v559_v25 = vmul.f32 %v1969_v5, %v1914_v32  ;;  %v643_v31 = vmul.f32 %v537_v53, %v1787_v46 }
 0x135   : > { %v641_v6 = vmul.f32 %v517_v50, %v1789_v47  ;;  %v497_v10 = vsel %vm496_vm0, %v1899_v24, %v493_v63  ;;  %v540_v47 = vmul.f32 %v1958_v3, %v539_v13  ;;  %v1988_v39 = vadd.f32 1e-06, %v457_v4 }
 0x136   : > { %v639_v11 = vmul.f32 %v497_v10, %v1791_v48  ;;  %v435_v26 = vpop.xlane.xlu2 %434  ;;  %v521_v16 = vmul.f32 0.5, %v520_v12  ;;  %v560_v22 = vmul.f32 %v1969_v5, %v559_v25  ;;  %vm545_vm2 = vweird.f32 %v1958_v3  ;;  %v439_v46 = vpop.xlane.xlu1 %438 }
 0x137   : > { %v661_v29 = vmul.f32 %v1922_v19, %v641_v6  ;;  %v541_v38 = vmul.f32 0.5, %v540_v47  ;;  %1481 = vrsqrt.f32 %v1985_v34  ;;  %vm544_vm4 = vweird.f32 %v1907_v14 }
 0x138   : > { %v659_v24 = vmul.f32 %v1922_v19, %v639_v11  ;;  %v522_v35 = vsub.f32 1.5, %v521_v16  ;;  %v561_v41 = vmul.f32 0.5, %v560_v22  ;;  %1483 = vrsqrt.f32 %v1988_v39  ;;  %vm2008_vm5 = vmor %vm544_vm4, %vm545_vm2 }
 0x139   : > { %v681_v48 = vadd.f32 %v1937_v52, %v661_v29  ;;  %v1990_v21 = vpop.eup %1479  ;;  %v542_v42 = vsub.f32 1.5, %v541_v38  ;;  %v663_v37 = vmul.f32 %v1922_v19, %v643_v31  ;;  %vm564_vm6 = vweird.f32 %v1914_v32 }
 0x13a   : > { %v679_v40 = vadd.f32 %v1937_v52, %v659_v24  ;;  %v523_v23 = vmul.f32 %v1474_v51, %v522_v35  ;;  %v549_v43 = vmul.f32 %v1990_v21, %v1949_v62  ;;  %v562_v45 = vsub.f32 1.5, %v561_v41 }
 0x13b   : > { %v1283_v18 = vpack.c.bf16 %v681_v48, %v680_v15  ;;  %v543_v49 = vmul.f32 %v1958_v3, %v542_v42  ;;  %v456_v14 = vmul.f32 %v435_v26, %v1772_v30  ;;  %vm565_vm7 = vweird.f32 %v1969_v5 }
 0x13c   : > { %v1278_v44 = vpack.c.bf16 %v679_v40, %v678_v54  ;;  %v527_v36 = vsel %vm526_vm3, %v1474_v51, %v523_v23  ;;  %v550_v55 = vmul.f32 %v1990_v21, %v549_v43  ;;  %vm554_vm8 = vweird.f32 %v1949_v62  ;;  %vm2037_vm10 = vmor %vm564_vm6, %vm565_vm7 }
 0x13d   : > { %1362 = vst [vmem:[#allocation2] sm:$0xff] %v1283_v18   ;;  %v642_v56 = vmul.f32 %v527_v36, %v1803_v57  ;;  %v547_v51 = vsel %vm2008_vm5, %v1958_v3, %v543_v49  ;;  %v443_v57 = vpop.xlane.xlu0 %442  ;;  %v1482_v61 = vpop.eup %1481  ;;  %v563_v0 = vmul.f32 %v1969_v5, %v562_v45  ;;  %v2021_v1 = vadd.f32 1e-06, %v456_v14 }
 0x13e   : > { %1279 = vst [vmem:[#allocation2 + $0x30] sm:$0xff] %v1278_v44   ;;  %v551_v58 = vmul.f32 0.5, %v550_v55  ;;  %v458_v50 = vmul.f32 %v439_v46, %v1772_v30  ;;  %v441_v53 = vpop.xlane.xlu2 %440  ;;  %v683_v4 = vadd.f32 %v1937_v52, %v663_v37  ;;  %vm555_vm9 = vweird.f32 %v1990_v21  ;;  %v2027_v10 = vpop.eup %1483 }
 0x13f   : > { %v662_v63 = vmul.f32 %v1922_v19, %v642_v56  ;;  %v569_v3 = vmul.f32 %v1482_v61, %v1985_v34  ;;  %v644_v13 = vmul.f32 %v547_v51, %v1812_v60  ;;  %1485 = vrsqrt.f32 %v2021_v1  ;;  %vm556_vm11 = vmor %vm554_vm8, %vm555_vm9  ;;  %v445_v47 = vpop.xlane.xlu1 %444 }
 0x140   : > { %v552_v6 = vsub.f32 1.5, %v551_v58  ;;  %v460_v54 = vmul.f32 %v443_v57, %v1772_v30  ;;  %v589_v26 = vmul.f32 %v2027_v10, %v1988_v39  ;;  %v459_v60 = vmul.f32 %v441_v53, %v1772_v30 }
 0x141   : > { %v682_v12 = vadd.f32 %v1937_v52, %v662_v63  ;;  %v570_v25 = vmul.f32 %v1482_v61, %v569_v3  ;;  %v567_v16 = vsel %vm2037_vm10, %v1969_v5, %v563_v0  ;;  %vm574_vm12 = vweird.f32 %v1985_v34 }
 0x142   : > { %v553_v11 = vmul.f32 %v1990_v21, %v552_v6  ;;  %v2051_v32 = vadd.f32 1e-06, %v458_v50  ;;  %vm575_vm13 = vweird.f32 %v1482_v61  ;;  %v590_v22 = vmul.f32 %v2027_v10, %v589_v26 }
 0x143   : > { %v1288_v29 = vpack.c.bf16 %v683_v4, %v682_v12  ;;  %v571_v31 = vmul.f32 0.5, %v570_v25  ;;  %v664_v48 = vmul.f32 %v1922_v19, %v644_v13  ;;  %v2058_v62 = vadd.f32 1e-06, %v460_v54  ;;  %vm576_vm0 = vmor %vm574_vm12, %vm575_vm13 }
 0x144   : > { %v557_v24 = vsel %vm556_vm11, %v1990_v21, %v553_v11  ;;  %1487 = vrsqrt.f32 %v2051_v32  ;;  %v591_v38 = vmul.f32 0.5, %v590_v22  ;;  %v2060_v40 = vadd.f32 1e-06, %v459_v60 }
 0x145   : > { %1363 = vst [vmem:[#allocation2 + $0x18] sm:$0xff] %v1288_v29   ;;  %v645_v35 = vmul.f32 %v557_v24, %v1823_v2  ;;  %v572_v5 = vsub.f32 1.5, %v571_v31  ;;  %v461_v41 = vmul.f32 %v445_v47, %v1772_v30  ;;  %v1486_v21 = vpop.eup %1485  ;;  %v646_v46 = vmul.f32 %v567_v16, %v1808_v59 }
 0x146   : > { %vm594_vm14 = vweird.f32 %v1988_v39  ;;  %1489 = vrsqrt.f32 %v2058_v62  ;;  %v592_v23 = vsub.f32 1.5, %v591_v38  ;;  %vm595_vm15 = vweird.f32 %v2027_v10 }
 0x147   : > { %v665_v18 = vmul.f32 %v1922_v19, %v645_v35  ;;  %v573_v2 = vmul.f32 %v1482_v61, %v572_v5  ;;  %v579_v42 = vmul.f32 %v1486_v21, %v2021_v1  ;;  %v684_v43 = vadd.f32 %v1937_v52, %v664_v48  ;;  %vm596_vm1 = vmor %vm594_vm14, %vm595_vm15 }
 0x148   : > { %1491 = vrsqrt.f32 %v2060_v40  ;;  %v2075_v30 = vadd.f32 1e-06, %v461_v41  ;;  %v593_v45 = vmul.f32 %v2027_v10, %v592_v23  ;;  %v666_v49 = vmul.f32 %v1922_v19, %v646_v46 }
 0x149   : > { %v685_v44 = vadd.f32 %v1937_v52, %v665_v18  ;;  %v577_v59 = vsel %vm576_vm0, %v1482_v61, %v573_v2  ;;  %v580_v37 = vmul.f32 %v1486_v21, %v579_v42  ;;  %vm585_vm2 = vweird.f32 %v1486_v21 }
 0x14a   : > { %v1488_v36 = vpop.eup %1487  ;;  %v647_v56 = vmul.f32 %v577_v59, %v1833_v8  ;;  %1493 = vrsqrt.f32 %v2075_v30  ;;  %v597_v34 = vsel %vm596_vm1, %v2027_v10, %v593_v45  ;;  %v686_v39 = vadd.f32 %v1937_v52, %v666_v49 }
 0x14b   : > { %v1293_v55 = vpack.c.bf16 %v685_v44, %v684_v43  ;;  %v581_v17 = vmul.f32 0.5, %v580_v37  ;;  %v599_v14 = vmul.f32 %v1488_v36, %v2051_v32  ;;  %v649_v50 = vmul.f32 %v597_v34, %v1829_v7 }
 0x14c   : > { %v1490_v51 = vpop.eup %1489  ;;  %v667_v58 = vmul.f32 %v1922_v19, %v647_v56  ;;  %vm584_vm3 = vweird.f32 %v2021_v1  ;;  %vm604_vm5 = vweird.f32 %v2051_v32  ;;  %vm605_vm6 = vweird.f32 %v1488_v36 }
 0x14d   : > { %1364 = vst [vmem:[#allocation2 + $0x10] sm:$0xff] %v1293_v55   ;;  %v582_v57 = vsub.f32 1.5, %v581_v17  ;;  %v600_v61 = vmul.f32 %v1488_v36, %v599_v14  ;;  %v619_v63 = vmul.f32 %v1490_v51, %v2058_v62  ;;  %vm586_vm4 = vmor %vm584_vm3, %vm585_vm2  ;;  %v669_v7 = vmul.f32 %v1922_v19, %v649_v50 }
 0x14e   : > { %v1492_v8 = vpop.eup %1491  ;;  %v687_v0 = vadd.f32 %v1937_v52, %v667_v58  ;;  %vm624_vm7 = vweird.f32 %v2058_v62  ;;  %vm625_vm8 = vweird.f32 %v1490_v51  ;;  %vm606_vm9 = vmor %vm604_vm5, %vm605_vm6  ;;  %vm614_vm12 = vweird.f32 %v2060_v40 }
 0x14f   : > { %v583_v53 = vmul.f32 %v1486_v21, %v582_v57  ;;  %v601_v4 = vmul.f32 0.5, %v600_v61  ;;  %v620_v6 = vmul.f32 %v1490_v51, %v619_v63  ;;  %v609_v3 = vmul.f32 %v1492_v8, %v2060_v40  ;;  %vm626_vm11 = vmor %vm624_vm7, %vm625_vm8 }
 0x150   : > { %v1494_v10 = vpop.eup %1493  ;;  %v1298_v12 = vpack.c.bf16 %v687_v0, %v686_v39  ;;  %vm615_vm10 = vweird.f32 %v1492_v8  ;;  %vm634_vm15 = vweird.f32 %v2075_v30 }
 0x151   : > { %v587_v13 = vsel %vm586_vm4, %v1486_v21, %v583_v53  ;;  %v602_v54 = vsub.f32 1.5, %v601_v4  ;;  %v621_v15 = vmul.f32 0.5, %v620_v6  ;;  %v610_v11 = vmul.f32 %v1492_v8, %v609_v3  ;;  %vm616_vm13 = vmor %vm614_vm12, %vm615_vm10 }
 0x152   : > { %1365 = vst [vmem:[#allocation2 + $0x8] sm:$0xff] %v1298_v12   ;;  %v648_v1 = vmul.f32 %v587_v13, %v1844_v9  ;;  %v629_v25 = vmul.f32 %v1494_v10, %v2075_v30  ;;  %v689_v9 = vadd.f32 %v1937_v52, %v669_v7  ;;  %vm635_vm14 = vweird.f32 %v1494_v10 }
 0x153   : > { %v603_v26 = vmul.f32 %v1488_v36, %v602_v54  ;;  %v622_v60 = vsub.f32 1.5, %v621_v15  ;;  %v611_v29 = vmul.f32 0.5, %v610_v11  ;;  %vm636_vm0 = vmor %vm634_vm15, %vm635_vm14 }
 0x154   : > { %v668_v16 = vmul.f32 %v1922_v19, %v648_v1  ;;  %v630_v47 = vmul.f32 %v1494_v10, %v629_v25 }
 0x155   : > { %v607_v24 = vsel %vm606_vm9, %v1488_v36, %v603_v26  ;;  %v623_v31 = vmul.f32 %v1490_v51, %v622_v60  ;;  %v612_v22 = vsub.f32 1.5, %v611_v29 }
 0x156   : > { %v688_v48 = vadd.f32 %v1937_v52, %v668_v16  ;;  %v650_v35 = vmul.f32 %v607_v24, %v1854_v28  ;;  %v631_v5 = vmul.f32 0.5, %v630_v47 }
 0x157   : > { %v627_v38 = vsel %vm626_vm11, %v1490_v51, %v623_v31  ;;  %v613_v41 = vmul.f32 %v1492_v8, %v612_v22 }
 0x158   : > { %v1303_v32 = vpack.c.bf16 %v689_v9, %v688_v48  ;;  %v632_v21 = vsub.f32 1.5, %v631_v5  ;;  %v652_v46 = vmul.f32 %v627_v38, %v1850_v27  ;;  %v670_v2 = vmul.f32 %v1922_v19, %v650_v35 }
 0x159   : > { %v617_v18 = vsel %vm616_vm13, %v1492_v8, %v613_v41 }
 0x15a   : > { %1366 = vst [vmem:[#allocation2 + $0x20] sm:$0xff] %v1303_v32   ;;  %v651_v28 = vmul.f32 %v617_v18, %v1865_v20  ;;  %v633_v23 = vmul.f32 %v1494_v10, %v632_v21  ;;  %v672_v40 = vmul.f32 %v1922_v19, %v652_v46  ;;  %v690_v44 = vadd.f32 %v1937_v52, %v670_v2 }
 0x15c   : > { %v671_v62 = vmul.f32 %v1922_v19, %v651_v28  ;;  %v637_v42 = vsel %vm636_vm0, %v1494_v10, %v633_v23  ;;  %v692_v20 = vadd.f32 %v1937_v52, %v672_v40 }
 0x15d   : > { %v653_v43 = vmul.f32 %v637_v42, %v1870_v33 }
 0x15e   : > { %v691_v27 = vadd.f32 %v1937_v52, %v671_v62 }
 0x15f   : > { %v673_v59 = vmul.f32 %v1922_v19, %v653_v43 }
 0x160   : > { %v1308_v45 = vpack.c.bf16 %v691_v27, %v690_v44 }
 0x161   : > { %v693_v37 = vadd.f32 %v1937_v52, %v673_v59 }
 0x162   : > { %1367 = vst [vmem:[#allocation2 + $0x28] sm:$0xff] %v1308_v45  }
 0x163   : > { %v1313_v30 = vpack.c.bf16 %v693_v37, %v692_v20 }
 0x165   : > { %1368 = vst [vmem:[#allocation2 + $0x38] sm:$0xff] %v1313_v30  }
 0x166 PF: > { %v1242_v33 = vld [vmem:[%s1677_s9 + $0x38] sm:$0xff]  ;;  %v1241_v36 = vld [vmem:[%s1677_s9 + $0x30] sm:$0xff]  ;;  %v1240_v19 = vld [vmem:[%s1677_s9 + $0x28] sm:$0xff]  ;;  %s1224_s27 = sshll.u32 (%p1662_p9), %s1568_s21, 2 }
 0x167   : > { %858 = vmatpush.bf16.msra.mxu0 %v1242_v33  ;;  %1376 = vmatpush.bf16.msra.mxu1 %v1242_v33  ;;  %v1239_v52 = vld [vmem:[%s1677_s9 + $0x20] sm:$0xff]  ;;  %v1238_v49 = vld [vmem:[%s1677_s9 + $0x18] sm:$0xff]  ;;  %v1237_v55 = vld [vmem:[%s1677_s9 + $0x10] sm:$0xff]  ;;  %s950_s28 = scalar_lea.vmem (%p1662_p9), %s2185_s5, %s1224_s27 }
 0x168   : > { %1377 = vmatpush.bf16.msra.mxu2 %v1242_v33  ;;  %1378 = vmatpush.bf16.msra.mxu3 %v1242_v33  ;;  %v1236_v56 = vld [vmem:[%s1677_s9 + $0x8] sm:$0xff]  ;;  %v1235_v34 = vld [vmem:[%s1677_s9] sm:$0xff]  ;;  %v1227_v17 = vld [vmem:[#allocation2 + $0x30] sm:$0xff] }
 0x169   : > { %v1229_v14 = vld [vmem:[#allocation2 + $0x18] sm:$0xff]  ;;  %v1231_v51 = vld [vmem:[#allocation2 + $0x8] sm:$0xff]  ;;  %v1228_v57 = vld [vmem:[#allocation2] sm:$0xff] }
 0x16a   : > { %v1233_v58 = vld [vmem:[#allocation2 + $0x28] sm:$0xff]  ;;  %v1230_v61 = vld [vmem:[#allocation2 + $0x10] sm:$0xff]  ;;  %v1232_v63 = vld [vmem:[#allocation2 + $0x20] sm:$0xff] }
 0x16b   : > { %859 = vmatpush.bf16.msra.mxu0 %v1241_v36  ;;  %1379 = vmatpush.bf16.msra.mxu1 %v1241_v36  ;;  %v1495_v50 = vld [vmem:[%s289_s11] ss:$0 sm:$0xff] }
 0x16c   : > { %1380 = vmatpush.bf16.msra.mxu2 %v1241_v36  ;;  %1381 = vmatpush.bf16.msra.mxu3 %v1241_v36  ;;  %v1234_v8 = vld [vmem:[#allocation2 + $0x38] sm:$0xff] }
 0x16f   : > { %860 = vmatpush.bf16.msra.mxu0 %v1240_v19  ;;  %1382 = vmatpush.bf16.msra.mxu1 %v1240_v19 }
 0x170   : > { %1383 = vmatpush.bf16.msra.mxu2 %v1240_v19  ;;  %1384 = vmatpush.bf16.msra.mxu3 %v1240_v19 }
 0x173   : > { %861 = vmatpush.bf16.msra.mxu0 %v1239_v52  ;;  %1385 = vmatpush.bf16.msra.mxu1 %v1239_v52 }
 0x174   : > { %1386 = vmatpush.bf16.msra.mxu2 %v1239_v52  ;;  %1387 = vmatpush.bf16.msra.mxu3 %v1239_v52 }
 0x177   : > { %862 = vmatpush.bf16.msra.mxu0 %v1238_v49  ;;  %1388 = vmatpush.bf16.msra.mxu1 %v1238_v49 }
 0x178   : > { %1389 = vmatpush.bf16.msra.mxu2 %v1238_v49  ;;  %1390 = vmatpush.bf16.msra.mxu3 %v1238_v49 }
 0x17b   : > { %863 = vmatpush.bf16.msra.mxu0 %v1237_v55  ;;  %1391 = vmatpush.bf16.msra.mxu1 %v1237_v55 }
 0x17c   : > { %1392 = vmatpush.bf16.msra.mxu2 %v1237_v55  ;;  %1393 = vmatpush.bf16.msra.mxu3 %v1237_v55 }
 0x17f   : > { %864 = vmatpush.bf16.msra.mxu0 %v1236_v56  ;;  %1394 = vmatpush.bf16.msra.mxu1 %v1236_v56 }
 0x180   : > { %1395 = vmatpush.bf16.msra.mxu2 %v1236_v56  ;;  %1396 = vmatpush.bf16.msra.mxu3 %v1236_v56 }
 0x183   : > { %865 = vmatpush.bf16.msra.mxu0 %v1235_v34  ;;  %1397 = vmatpush.bf16.msra.mxu1 %v1235_v34 }
 0x184   : > { %1398 = vmatpush.bf16.msra.mxu2 %v1235_v34  ;;  %1399 = vmatpush.bf16.msra.mxu3 %v1235_v34 }
 0x186   : > { %866 = vmatmul.bf16.vlgmr.msra.gmra.mxu0 %v1227_v17  ;;  %876 = vmatmul.bf16.vlgmr.msra.gmra.mxu1 %v1229_v14 }
 0x187   : > { %886 = vmatmul.bf16.vlgmr.msra.gmra.mxu2 %v1231_v51  ;;  %896 = vmatmul.bf16.vlgmr.msra.gmra.mxu3 %v1233_v58 }
 0x196   : > { %871 = vmatmul.bf16.gmra.mxu0 %v1228_v57  ;;  %881 = vmatmul.bf16.gmra.mxu1 %v1230_v61 }
 0x197   : > { %891 = vmatmul.bf16.gmra.mxu2 %v1232_v63  ;;  %901 = vmatmul.bf16.gmra.mxu3 %v1234_v8 }
 0x203   : > { %v867_v39 = vpop.f32.mrf.mxu0  ;;  %v877_v0 = vpop.f32.mrf.mxu1 }
 0x204   : > { %v868_v10 = vadd.f32 %v1495_v50, %v867_v39  ;;  %v878_v12 = vadd.f32 %v1495_v50, %v877_v0 }
 0x20a   : > { %v887_v53 = vpop.f32.mrf.mxu2  ;;  %v897_v4 = vpop.f32.mrf.mxu3 }
 0x20b   : > { %v869_v6 = vpop.f32.mrf.mxu0  ;;  %v879_v3 = vpop.f32.mrf.mxu1  ;;  %v888_v25 = vadd.f32 %v1495_v50, %v887_v53  ;;  %v898_v26 = vadd.f32 %v1495_v50, %v897_v4 }
 0x20c   : > { %v870_v13 = vadd.f32 %v1495_v50, %v869_v6  ;;  %v880_v54 = vadd.f32 %v1495_v50, %v879_v3 }
 0x20e   : > { %v1318_v15 = vpack.c.bf16 %v870_v13, %v868_v10  ;;  %v1328_v11 = vpack.c.bf16 %v880_v54, %v878_v12 }
 0x210   : > { %1319 = vst [vmem:[%s1691_s12] sm:$0xff] %v1318_v15  }
 0x211   : > { %1370 = vst [vmem:[%s1691_s12 + $0x10] sm:$0xff] %v1328_v11  }
 0x212   : > { %v889_v7 = vpop.f32.mrf.mxu2  ;;  %v899_v1 = vpop.f32.mrf.mxu3 }
 0x213   : > { %v890_v60 = vadd.f32 %v1495_v50, %v889_v7  ;;  %v900_v29 = vadd.f32 %v1495_v50, %v899_v1  ;;  %v872_v16 = vpop.f32.mrf.mxu0  ;;  %v882_v47 = vpop.f32.mrf.mxu1 }
 0x214   : > { %v873_v5 = vadd.f32 %v1495_v50, %v872_v16  ;;  %v883_v38 = vadd.f32 %v1495_v50, %v882_v47 }
 0x215   : > { %v1338_v24 = vpack.c.bf16 %v890_v60, %v888_v25  ;;  %v1348_v31 = vpack.c.bf16 %v900_v29, %v898_v26 }
 0x217   : > { %1372 = vst [vmem:[%s1691_s12 + $0x20] sm:$0xff] %v1338_v24   ;;  %v967_v44 = vld [vmem:[%s1691_s12] sm:$0xf] (%p1662_p9)  ;;  %v969_v27 = vld [vmem:[%s1691_s12 + $0x4] sm:$0xf] (%p1662_p9) }
 0x218   : > { %1374 = vst [vmem:[%s1691_s12 + $0x30] sm:$0xff] %v1348_v31   ;;  %v975_v20 = vld [vmem:[%s1691_s12 + $0x10] sm:$0xf] (%p1662_p9)  ;;  %v977_v37 = vld [vmem:[%s1691_s12 + $0x14] sm:$0xf] (%p1662_p9) }
 0x219   : > { %968 = vst [vmem:[%s950_s28] sm:$0xf] (%p1662_p9), %v967_v44 }
 0x21a   : > { %v892_v22 = vpop.f32.mrf.mxu2  ;;  %v902_v9 = vpop.f32.mrf.mxu3  ;;  %970 = vst [vmem:[%s950_s28 + $0xc] sm:$0xf] (%p1662_p9), %v969_v27 }
 0x21b   : > { %v874_v48 = vpop.f32.mrf.mxu0  ;;  %v884_v35 = vpop.f32.mrf.mxu1  ;;  %v893_v28 = vadd.f32 %v1495_v50, %v892_v22  ;;  %v903_v23 = vadd.f32 %v1495_v50, %v902_v9  ;;  %976 = vst [vmem:[%s950_s28 + $0x30] sm:$0xf] (%p1662_p9), %v975_v20 }
 0x21c   : > { %v875_v41 = vadd.f32 %v1495_v50, %v874_v48  ;;  %v885_v32 = vadd.f32 %v1495_v50, %v884_v35  ;;  %978 = vst [vmem:[%s950_s28 + $0x3c] sm:$0xf] (%p1662_p9), %v977_v37 }
 0x21e   : > { %v1323_v21 = vpack.c.bf16 %v875_v41, %v873_v5  ;;  %v1333_v46 = vpack.c.bf16 %v885_v32, %v883_v38  ;;  %v983_v36 = vld [vmem:[%s1691_s12 + $0x20] sm:$0xf] (%p1662_p9)  ;;  %v985_v19 = vld [vmem:[%s1691_s12 + $0x24] sm:$0xf] (%p1662_p9) }
 0x21f   : > { %984 = vst [vmem:[%s950_s28 + $0x60] sm:$0xf] (%p1662_p9), %v983_v36  ;;  %v991_v55 = vld [vmem:[%s1691_s12 + $0x30] sm:$0xf] (%p1662_p9)  ;;  %v993_v56 = vld [vmem:[%s1691_s12 + $0x34] sm:$0xf] (%p1662_p9) }
 0x220   : > { %1369 = vst [vmem:[%s1691_s12 + $0x8] sm:$0xff] %v1323_v21  }
 0x221   : > { %1371 = vst [vmem:[%s1691_s12 + $0x18] sm:$0xff] %v1333_v46  }
 0x222   : > { %v894_v18 = vpop.f32.mrf.mxu2  ;;  %v904_v2 = vpop.f32.mrf.mxu3  ;;  %986 = vst [vmem:[%s950_s28 + $0x6c] sm:$0xf] (%p1662_p9), %v985_v19 }
 0x223   : > { %v895_v62 = vadd.f32 %v1495_v50, %v894_v18  ;;  %v905_v42 = vadd.f32 %v1495_v50, %v904_v2  ;;  %992 = vst [vmem:[%s950_s28 + $0x90] sm:$0xf] (%p1662_p9), %v991_v55 }
 0x224   : > { %945 = sbr.rel (!%p1662_p9) target bundleno = 563 (0x233), region = 52  ;;  %994 = vst [vmem:[%s950_s28 + $0x9c] sm:$0xf] (%p1662_p9), %v993_v56 }
 0x225   : > { %v1343_v40 = vpack.c.bf16 %v895_v62, %v893_v28  ;;  %v1353_v43 = vpack.c.bf16 %v905_v42, %v903_v23 }
 0x227   : > { %1373 = vst [vmem:[%s1691_s12 + $0x28] sm:$0xff] %v1343_v40   ;;  %v971_v59 = vld [vmem:[%s1691_s12 + $0x8] sm:$0xf] (%p1662_p9)  ;;  %v973_v45 = vld [vmem:[%s1691_s12 + $0xc] sm:$0xf] (%p1662_p9) }
 0x228   : > { %1375 = vst [vmem:[%s1691_s12 + $0x38] sm:$0xff] %v1353_v43   ;;  %v979_v30 = vld [vmem:[%s1691_s12 + $0x18] sm:$0xf] (%p1662_p9)  ;;  %v981_v33 = vld [vmem:[%s1691_s12 + $0x1c] sm:$0xf] (%p1662_p9) }
 0x229   : > { %972 = vst [vmem:[%s950_s28 + $0x18] sm:$0xf] %v971_v59 }
 0x22a   : > { %974 = vst [vmem:[%s950_s28 + $0x24] sm:$0xf] %v973_v45 }
 0x22b   : > { %980 = vst [vmem:[%s950_s28 + $0x48] sm:$0xf] %v979_v30 }
 0x22c   : > { %982 = vst [vmem:[%s950_s28 + $0x54] sm:$0xf] %v981_v33 }
 0x22e   : > { %v987_v52 = vld [vmem:[%s1691_s12 + $0x28] sm:$0xf]  ;;  %v989_v49 = vld [vmem:[%s1691_s12 + $0x2c] sm:$0xf] }
 0x22f   : > { %988 = vst [vmem:[%s950_s28 + $0x78] sm:$0xf] %v987_v52  ;;  %v995_v34 = vld [vmem:[%s1691_s12 + $0x38] sm:$0xf]  ;;  %v997_v17 = vld [vmem:[%s1691_s12 + $0x3c] sm:$0xf] }
 0x230   : > { %990 = vst [vmem:[%s950_s28 + $0x84] sm:$0xf] %v989_v49 }
 0x231   : > { %996 = vst [vmem:[%s950_s28 + $0xa8] sm:$0xf] %v995_v34 }
 0x232   : > { %998 = vst [vmem:[%s950_s28 + $0xb4] sm:$0xf] %v997_v17 }
 0x233 PF: > { %s18_s23 = sadd.s32 1, %s1576_s23   ;;  %s2197_s18 = smov %s1560_s19 }
 0x234   : > { %p15_p3 = scmp.ge.s32.totalorder %s18_s23, 5   ;;  %s2198_s19 = smov %s1564_s20 }
 0x235   : > { %s2199_s20 = smov %s1660_s30  ;;  %s2200_s21 = smov %s1572_s22 }
 0x236   : > { %s2201_s22 = smov %s2203_s25  ;;  %17 = sbr.rel (!%p15_p3) target bundleno = 4 (0x4), region = 131 }
 0x23b   :  { %1064 = vsyncpa [#allocation4], 1 }
 0x23c   :  { %1066 = vsyncpa [#allocation4 + $0x1], 1 }

// kernel: eva_forward.13
= control target key start
LH: loop header
LB: loop body
LE: loop exit
PB: predicated region body
PF: predicated region fallthrough
CT: control target
= control target key end

     0   :  { %s2540_s12 = smov 0   ;;  %s2542_s13 = smov 0   ;;  %s3758_s0 = inlined_call_operand.vmem [shape: bf16[2,64,384], index: 0, kind: input, shape index: {}, may-alias: {0,1,2}]   ;;  %s3759_s1 = inlined_call_operand.vmem [shape: bf16[2,64,384], index: 1, kind: input, shape index: {}, may-alias: {0,1,2}]   ;;  %s3760_s2 = inlined_call_operand.vmem [shape: bf16[2,64,384], index: 2, kind: input, shape index: {}, may-alias: {0,1,2}]   ;;  %s3761_s3 = inlined_call_operand.vmem [shape: bf16[2,64,128], index: 3, kind: output, shape index: {}]  }
   0x1   :  { %s2544_s14 = smov 0   ;;  %s2546_s15 = smov 0  }
   0x2   :  { %s2548_s16 = smov 0  }
   0x3 LB: > { %s25_s17 = sadd.s32 1, %s2511_s15  ;;  %p41_p1 = scmp.ne.s32.totalorder %s2503_s13, %s2499_s12  ;;  %s2515_s16 = sphi %s2548_s16, %s13_s16   ;;  %s2511_s15 = sphi %s2546_s15, %s3804_s15   ;;  %s2507_s14 = sphi %s2544_s14, %s3803_s14   ;;  %s2503_s13 = sphi %s2542_s13, %s3802_s13   ;;  %s2499_s12 = sphi %s2540_s12, %s3801_s12  }
   0x4   : > { %p27_p0 = scmp.ge.s32.totalorder %s25_s17, 2  ;;  %p42_p2 = scmp.eq.s32.totalorder %s2515_s16, 0 }
   0x5   : > { %s34_s20 = sadd.s32 1, %s2503_s13  ;;  %p2098_p5 = scmp.ge.s32.totalorder %s2515_s16, 2 }
   0x6   : > { %s3806_s17 = smov (%p27_p0, %s25_s17), 0  ;;  %p2571_p3 = por %p42_p2, %p41_p1 }
   0x7   : > { %s29_s19 = ssub.s32 %s2511_s15, %s3806_s17  ;;  %147 = sbr.rel (%p2098_p5) target bundleno = 51 (0x33), region = 16 }
   0x8   : > { %p32_p4 = scmp.eq.s32.totalorder %s29_s19, 0 }
   0xa   : > { %s2579_s21 = scalar_select %p32_p4, %s2503_s13, %s34_s20  }
   0xc   : > { %150 = sbr.rel (!%p2571_p3) target bundleno = 25 (0x19), region = 20  ;;  %s152_s22 = sand.u32 (%p2571_p3), 1, %s2503_s13  }
   0xd   : > { %s2245_s23 = smul.u32 (%p2571_p3), 96, %s2511_s15  ;;  %s2099_s24 = sshll.u32 (%p2571_p3), %s152_s22, 5 }
   0xe   : > { %s154_s28 = scalar_lea.vmem (%p2571_p3), [#allocation2], %s2099_s24 }
   0xf   : > { %s160_s27 = scalar_lea.vmem (%p2571_p3), %s3758_s0, %s2245_s23 }
  0x10   : > { %v177_v0 = vld [vmem:[%s160_s27] sm:$0xf] (%p2571_p3)  ;;  %v179_v1 = vld [vmem:[%s160_s27 + $0xc] sm:$0xf] (%p2571_p3)  ;;  %v181_v2 = vld [vmem:[%s160_s27 + $0x18] sm:$0xf] (%p2571_p3) }
  0x11   : > { %178 = vst [vmem:[%s154_s28] sm:$0xf] %v177_v0  ;;  %v183_v3 = vld [vmem:[%s160_s27 + $0x24] sm:$0xf]  ;;  %v185_v4 = vld [vmem:[%s160_s27 + $0x30] sm:$0xf] }
  0x12   : > { %180 = vst [vmem:[%s154_s28 + $0x4] sm:$0xf] %v179_v1  ;;  %v187_v5 = vld [vmem:[%s160_s27 + $0x3c] sm:$0xf]  ;;  %v189_v6 = vld [vmem:[%s160_s27 + $0x48] sm:$0xf] }
  0x13   : > { %182 = vst [vmem:[%s154_s28 + $0x8] sm:$0xf] %v181_v2  ;;  %v191_v7 = vld [vmem:[%s160_s27 + $0x54] sm:$0xf] }
  0x14   : > { %184 = vst [vmem:[%s154_s28 + $0xc] sm:$0xf] %v183_v3 }
  0x15   : > { %186 = vst [vmem:[%s154_s28 + $0x10] sm:$0xf] %v185_v4 }
  0x16   : > { %188 = vst [vmem:[%s154_s28 + $0x14] sm:$0xf] %v187_v5 }
  0x17   : > { %190 = vst [vmem:[%s154_s28 + $0x18] sm:$0xf] %v189_v6 }
  0x18   : > { %192 = vst [vmem:[%s154_s28 + $0x1c] sm:$0xf] %v191_v7 }
  0x19 PF: > { %232 = sbr.rel (!%p2571_p3) target bundleno = 38 (0x26), region = 61  ;;  %s234_s29 = sand.u32 (%p2571_p3), 1, %s2503_s13  }
  0x1a   : > { %s2102_s30 = smul.u32 (%p2571_p3), 96, %s2511_s15  ;;  %s2101_s4 = sshll.u32 (%p2571_p3), %s234_s29, 5 }
  0x1b   : > { %s236_s8 = scalar_lea.vmem (%p2571_p3), [#allocation3], %s2101_s4 }
  0x1c   : > { %s2006_s7 = scalar_lea.vmem (%p2571_p3), %s3759_s1, %s2102_s30 }
  0x1d   : > { %v2103_v8 = vld [vmem:[%s2006_s7 + $0x4] sm:$0xf] (%p2571_p3)  ;;  %v2104_v9 = vld [vmem:[%s2006_s7 + $0x10] sm:$0xf] (%p2571_p3)  ;;  %v2105_v10 = vld [vmem:[%s2006_s7 + $0x1c] sm:$0xf] (%p2571_p3) }
  0x1e   : > { %258 = vst [vmem:[%s236_s8] sm:$0xf] %v2103_v8  ;;  %v2106_v11 = vld [vmem:[%s2006_s7 + $0x28] sm:$0xf]  ;;  %v2107_v12 = vld [vmem:[%s2006_s7 + $0x34] sm:$0xf] }
  0x1f   : > { %260 = vst [vmem:[%s236_s8 + $0x4] sm:$0xf] %v2104_v9  ;;  %v2108_v13 = vld [vmem:[%s2006_s7 + $0x40] sm:$0xf]  ;;  %v2109_v14 = vld [vmem:[%s2006_s7 + $0x4c] sm:$0xf] }
  0x20   : > { %262 = vst [vmem:[%s236_s8 + $0x8] sm:$0xf] %v2105_v10  ;;  %v2110_v15 = vld [vmem:[%s2006_s7 + $0x58] sm:$0xf] }
  0x21   : > { %264 = vst [vmem:[%s236_s8 + $0xc] sm:$0xf] %v2106_v11 }
  0x22   : > { %266 = vst [vmem:[%s236_s8 + $0x10] sm:$0xf] %v2107_v12 }
  0x23   : > { %268 = vst [vmem:[%s236_s8 + $0x14] sm:$0xf] %v2108_v13 }
  0x24   : > { %270 = vst [vmem:[%s236_s8 + $0x18] sm:$0xf] %v2109_v14 }
  0x25   : > { %272 = vst [vmem:[%s236_s8 + $0x1c] sm:$0xf] %v2110_v15 }
  0x26 PF: > { %312 = sbr.rel (!%p2571_p3) target bundleno = 51 (0x33), region = 102  ;;  %s314_s9 = sand.u32 (%p2571_p3), 1, %s2503_s13  }
  0x27   : > { %s2112_s10 = smul.u32 (%p2571_p3), 96, %s2511_s15  ;;  %s2111_s11 = sshll.u32 (%p2571_p3), %s314_s9, 5 }
  0x28   : > { %s316_s23 = scalar_lea.vmem (%p2571_p3), [#allocation4], %s2111_s11 }
  0x29   : > { %s2012_s22 = scalar_lea.vmem (%p2571_p3), %s3760_s2, %s2112_s10 }
  0x2a   : > { %v2113_v16 = vld [vmem:[%s2012_s22 + $0x8] sm:$0xf] (%p2571_p3)  ;;  %v2114_v17 = vld [vmem:[%s2012_s22 + $0x14] sm:$0xf] (%p2571_p3)  ;;  %v2115_v18 = vld [vmem:[%s2012_s22 + $0x20] sm:$0xf] (%p2571_p3) }
  0x2b   : > { %338 = vst [vmem:[%s316_s23] sm:$0xf] %v2113_v16  ;;  %v2116_v19 = vld [vmem:[%s2012_s22 + $0x2c] sm:$0xf]  ;;  %v2117_v20 = vld [vmem:[%s2012_s22 + $0x38] sm:$0xf] }
  0x2c   : > { %340 = vst [vmem:[%s316_s23 + $0x4] sm:$0xf] %v2114_v17  ;;  %v2118_v21 = vld [vmem:[%s2012_s22 + $0x44] sm:$0xf]  ;;  %v2119_v22 = vld [vmem:[%s2012_s22 + $0x50] sm:$0xf] }
  0x2d   : > { %342 = vst [vmem:[%s316_s23 + $0x8] sm:$0xf] %v2115_v18  ;;  %v2120_v23 = vld [vmem:[%s2012_s22 + $0x5c] sm:$0xf] }
  0x2e   : > { %344 = vst [vmem:[%s316_s23 + $0xc] sm:$0xf] %v2116_v19 }
  0x2f   : > { %346 = vst [vmem:[%s316_s23 + $0x10] sm:$0xf] %v2117_v20 }
  0x30   : > { %348 = vst [vmem:[%s316_s23 + $0x14] sm:$0xf] %v2118_v21 }
  0x31   : > { %350 = vst [vmem:[%s316_s23 + $0x18] sm:$0xf] %v2119_v22 }
  0x32   : > { %352 = vst [vmem:[%s316_s23 + $0x1c] sm:$0xf] %v2120_v23 }
  0x33 PF: > { %p2121_p6 = scmp.ge.s32.totalorder %s2515_s16, 1  ;;  %p391_p7 = scmp.lt.s32.totalorder %s2515_s16, 3 }
  0x35   : > { %p392_p8 = pnand %p2121_p6, %p391_p7 }
  0x36   : > { %s398_s18 = sand.u32 (!%p392_p8), 1, %s2499_s12   ;;  %s2517_s26 = smov (!%p392_p8), 96  }
  0x37   : > { %395 = sbr.rel (%p392_p8) target bundleno = 1128 (0x468), region = 143  ;;  %s2606_s24 = sshll.u32 (!%p392_p8), %s398_s18, 5 }
  0x38   : > { %s407_s25 = scalar_lea.vmem (!%p392_p8), [#allocation3], %s2606_s24  ;;  %s400_s12 = scalar_lea.vmem (!%p392_p8), [#allocation2], %s2606_s24 }
  0x39   : > { %s2518_s27 = smov (!%p392_p8), 32   ;;  %s2519_s28 = smov (!%p392_p8), 64  }
  0x3a   : > { %s414_s29 = scalar_lea.vmem (!%p392_p8), [#allocation4], %s2606_s24  ;;  %p449_p9 = scmp.lt.s32.totalorder (!%p392_p8), %s2507_s14, 1 }
  0x3c   : > { %vm526_vm0 = vcmask 261120   ;;  %v2217_v24 = vld [vmem:[%s407_s25 + $0x18] sm:$0xff]  ;;  %v2609_v25 = vld [vmem:[%s407_s25 + $0x8] sm:$0xff]  ;;  %v2214_v26 = vld [vmem:[%s407_s25] sm:$0xff]  ;;  %v459_v45 = vlaneseq  ;;  %vm588_vm2 = vcmask 523264   ;;  %s3808_s14 = smov (!%p449_p9, %s2507_s14), 1 }
  0x3d   : > { %864 = vrot.lane.b32.xlu0 %v2217_v24, %s2517_s26  ;;  %v549_v27 = vsel %vm526_vm0, %v2217_v24, 0  ;;  %860 = vrot.lane.b32.xlu1 %v2609_v25, %s2517_s26  ;;  %v2216_v28 = vld [vmem:[%s407_s25 + $0x10] sm:$0xff]  ;;  %v2617_v29 = vld [vmem:[%s400_s12 + $0x8] sm:$0xff]  ;;  %v543_v32 = vsel %vm526_vm0, %v2609_v25, 0  ;;  %v540_v34 = vsel %vm526_vm0, %v2214_v26, 0  ;;  %s2209_s30 = sshll.u32 %s3808_s14, 5 }
  0x3e   : > { %555 = vmatpush.bf16.xpose.msra.mxu0 %v549_v27  ;;  %858 = vrot.lane.b32.xlu2 %v2214_v26, %s2517_s26  ;;  %v546_v30 = vsel %vm526_vm0, %v2216_v28, 0  ;;  %v2624_v31 = vld [vmem:[%s400_s12] sm:$0xff]  ;;  %v2632_v33 = vld [vmem:[%s400_s12 + $0x10] sm:$0xff]  ;;  %v2640_v35 = vld [vmem:[%s400_s12 + $0x18] sm:$0xff]  ;;  %v2659_v46 = vand.u32 127, %v459_v45  ;;  %s3636_s5 = scalar_lea.vmem %s3761_s3, %s2209_s30 }
  0x3f   : > { %v2662_v47 = vld [vmem:[%s414_s29 + $0x18] sm:$0xff]  ;;  %v2670_v52 = vld [vmem:[%s414_s29 + $0x10] sm:$0xff]  ;;  %v2675_v54 = vld [vmem:[%s414_s29 + $0x8] sm:$0xff] }
  0x40   : > { %vm461_vm1 = vcmp.lt.s32.totalorder %v2659_v46, 5  ;;  %705 = vmatpush.bf16.msra.mxu1 %v2662_v47  ;;  %v2680_v57 = vld [vmem:[%s414_s29] sm:$0xff] }
  0x44   : > { %706 = vmatpush.bf16.msra.mxu1 %v2670_v52 }
  0x45   : > { %862 = vrot.lane.b32.xlu0 %v2216_v28, %s2517_s26  ;;  %852 = vrot.lane.b32.xlu1 %v2617_v29, %s2517_s26 }
  0x46   : > { %556 = vmatpush.bf16.xpose.msra.mxu0 %v546_v30  ;;  %1516 = vrot.lane.b32.xlu2 %v2217_v24, %s2518_s27 }
  0x48   : > { %707 = vmatpush.bf16.msra.mxu1 %v2675_v54 }
  0x4c   : > { %708 = vmatpush.bf16.msra.mxu1 %v2680_v57 }
  0x4d   : > { %850 = vrot.lane.b32.xlu0 %v2624_v31, %s2517_s26  ;;  %1190 = vrot.lane.b32.xlu1 %v2217_v24, %s2519_s28 }
  0x4e   : > { %557 = vmatpush.bf16.xpose.msra.mxu0 %v543_v32  ;;  %1188 = vrot.lane.b32.xlu2 %v2216_v28, %s2519_s28 }
  0x55   : > { %854 = vrot.lane.b32.xlu0 %v2632_v33, %s2517_s26 }
  0x56   : > { %558 = vmatpush.bf16.xpose.msra.mxu0 %v540_v34  ;;  %1514 = vrot.lane.b32.xlu2 %v2216_v28, %s2518_s27 }
  0x5d   : > { %2159 = vmatmul.msk.bf16.vlgmr.msra.gmra.mxu0 %vm526_vm0, %v2624_v31  ;;  %1184 = vrot.lane.b32.xlu0 %v2214_v26, %s2519_s28 }
  0x5e   : > { %856 = vrot.lane.b32.xlu2 %v2640_v35, %s2517_s26 }
  0x66   : > { %1512 = vrot.lane.b32.xlu2 %v2609_v25, %s2518_s27 }
  0x6d   : > { %2160 = vmatmul.msk.bf16.gmra.mxu0 %vm526_vm0, %v2617_v29 }
  0x6e   : > { %1510 = vrot.lane.b32.xlu2 %v2214_v26, %s2518_s27 }
  0x7d   : > { %2161 = vmatmul.msk.bf16.gmra.mxu0 %vm526_vm0, %v2632_v33 }
  0x8d   : > { %2162 = vmatmul.msk.bf16.gmra.mxu0 %vm526_vm0, %v2640_v35 }
  0x98   : > { %v859_v42 = vpop.permute.xlu2 %858 }
  0x99   : > { %v879_v43 = vsel %vm526_vm0, %v859_v42, 0 }
  0xa0   : > { %v1517_v50 = vpop.permute.xlu2 %1516 }
  0xa1   : > { %v1540_v56 = vsel %vm526_vm0, %v1517_v50, 0 }
  0xa2   : > { %1546 = vmatpush.bf16.xpose.msrb.mxu0 %v1540_v56 }
  0xa8   : > { %v1189_v62 = vpop.permute.xlu2 %1188 }
  0xa9   : > { %v1211_v3 = vsel %vm526_vm0, %v1189_v62, 0 }
  0xaf   : > { %v865_v36 = vpop.permute.xlu0 %864  ;;  %v861_v40 = vpop.permute.xlu1 %860 }
  0xb0   : > { %v888_v37 = vsel %vm526_vm0, %v865_v36, 0  ;;  %v882_v41 = vsel %vm526_vm0, %v861_v40, 0  ;;  %v1515_v4 = vpop.permute.xlu2 %1514 }
  0xb1   : > { %894 = vmatpush.bf16.xpose.msra.mxu2 %v888_v37  ;;  %v1537_v5 = vsel %vm526_vm0, %v1515_v4, 0 }
  0xb2   : > { %1547 = vmatpush.bf16.xpose.msrb.mxu0 %v1537_v5 }
  0xb7   : > { %v863_v38 = vpop.permute.xlu0 %862  ;;  %v853_v48 = vpop.permute.xlu1 %852 }
  0xb8   : > { %v885_v39 = vsel %vm526_vm0, %v863_v38, 0  ;;  %v857_v9 = vpop.permute.xlu2 %856 }
  0xb9   : > { %895 = vmatpush.bf16.xpose.msra.mxu2 %v885_v39 }
  0xbf   : > { %v851_v44 = vpop.permute.xlu0 %850  ;;  %v1191_v55 = vpop.permute.xlu1 %1190 }
  0xc0   : > { %v1214_v60 = vsel %vm526_vm0, %v1191_v55, 0  ;;  %v1513_v13 = vpop.permute.xlu2 %1512 }
  0xc1   : > { %896 = vmatpush.bf16.xpose.msra.mxu2 %v882_v41  ;;  %1220 = vmatpush.bf16.xpose.msrb.mxu1 %v1214_v60  ;;  %v1534_v14 = vsel %vm526_vm0, %v1513_v13, 0 }
  0xc2   : > { %1548 = vmatpush.bf16.xpose.msrb.mxu0 %v1534_v14 }
  0xc7   : > { %v855_v2 = vpop.permute.xlu0 %854 }
  0xc8   : > { %v1511_v15 = vpop.permute.xlu2 %1510 }
  0xc9   : > { %897 = vmatpush.bf16.xpose.msra.mxu2 %v879_v43  ;;  %1221 = vmatpush.bf16.xpose.msrb.mxu1 %v1211_v3  ;;  %v1531_v16 = vsel %vm526_vm0, %v1511_v15, 0 }
  0xca   : > { %1549 = vmatpush.bf16.xpose.msrb.mxu0 %v1531_v16 }
  0xcf   : > { %v1185_v32 = vpop.permute.xlu0 %1184 }
  0xd0   : > { %2183 = vmatmul.msk.bf16.vlgmr.msra.gmra.mxu2 %vm526_vm0, %v851_v44 }
  0xda   : > { %v560_v49 = vpop.f32.mrf.mxu0 }
  0xdb   : > { %v2668_v51 = vsel %vm461_vm1, %v560_v49, -1e+30 }
  0xdc   : > { %v589_v53 = vsel %vm588_vm2, %v2668_v51, -inf }
  0xdd   : > { %590 = vmax.xlane.f32.xlu1 %v589_v53  ;;  %v1205_v53 = vsel %vm526_vm0, %v1185_v32, 0 }
  0xe0   : > { %2184 = vmatmul.msk.bf16.gmra.mxu2 %vm526_vm0, %v853_v48 }
  0xe2   : > { %v562_v58 = vpop.f32.mrf.mxu0 }
  0xe3   : > { %v581_v59 = vsel %vm461_vm1, %v562_v58, -1e+30 }
  0xe4   : > { %v592_v61 = vsel %vm588_vm2, %v581_v59, -inf }
  0xe5   : > { %593 = vmax.xlane.f32.xlu2 %v592_v61 }
  0xea   : > { %v565_v63 = vpop.f32.mrf.mxu0 }
  0xeb   : > { %v2689_v0 = vsel %vm461_vm1, %v565_v63, -1e+30 }
  0xec   : > { %v595_v1 = vsel %vm588_vm2, %v2689_v0, -inf }
  0xed   : > { %596 = vmax.xlane.f32.xlu0 %v595_v1 }
  0xf0   : > { %2185 = vmatmul.msk.bf16.gmra.mxu2 %vm526_vm0, %v855_v2 }
  0xf2   : > { %v567_v6 = vpop.f32.mrf.mxu0 }
  0xf3   : > { %v583_v7 = vsel %vm461_vm1, %v567_v6, -1e+30 }
  0xf4   : > { %v598_v8 = vsel %vm588_vm2, %v583_v7, -inf }
  0xf5   : > { %599 = vmax.xlane.f32.xlu2 %v598_v8 }
  0xf6   : > { %1186 = vrot.lane.b32.xlu1 %v2609_v25, %s2519_s28 }
  0xfa   : > { %v570_v10 = vpop.f32.mrf.mxu0 }
  0xfb   : > { %v2703_v11 = vsel %vm461_vm1, %v570_v10, -1e+30 }
  0xfc   : > { %v601_v12 = vsel %vm588_vm2, %v2703_v11, -inf }
  0xfd   : > { %602 = vmax.xlane.f32.xlu0 %v601_v12 }
 0x100   : > { %2186 = vmatmul.msk.bf16.gmra.mxu2 %vm526_vm0, %v857_v9 }
 0x102   : > { %v572_v17 = vpop.f32.mrf.mxu0 }
 0x103   : > { %v2722_v21 = vsel %vm461_vm1, %v572_v17, -1e+30 }
 0x104   : > { %v604_v23 = vsel %vm588_vm2, %v2722_v21, -inf }
 0x10a   : > { %v575_v18 = vpop.f32.mrf.mxu0 }
 0x10b   : > { %v2716_v19 = vsel %vm461_vm1, %v575_v18, -1e+30 }
 0x10c   : > { %v607_v20 = vsel %vm588_vm2, %v2716_v19, -inf }
 0x10d   : > { %1176 = vrot.lane.b32.xlu2 %v2624_v31, %s2519_s28 }
 0x111   : > { %1504 = vrot.lane.b32.xlu0 %v2617_v29, %s2518_s27 }
 0x112   : > { %v577_v22 = vpop.f32.mrf.mxu0 }
 0x113   : > { %v2728_v24 = vsel %vm461_vm1, %v577_v22, -1e+30 }
 0x114   : > { %v610_v25 = vsel %vm588_vm2, %v2728_v24, -inf }
 0x120   : > { %608 = vmax.xlane.f32.xlu1 %v607_v20 }
 0x136   : > { %605 = vmax.xlane.f32.xlu2 %v604_v23 }
 0x139   : > { %1502 = vrot.lane.b32.xlu1 %v2624_v31, %s2518_s27 }
 0x13b   : > { %611 = vmax.xlane.f32.xlu0 %v610_v25 }
 0x141   : > { %1180 = vrot.lane.b32.xlu1 %v2632_v33, %s2519_s28 }
 0x149   : > { %1508 = vrot.lane.b32.xlu1 %v2640_v35, %s2518_s27 }
 0x14e   : > { %1178 = vrot.lane.b32.xlu2 %v2617_v29, %s2519_s28 }
 0x14f   : > { %1182 = vrot.lane.b32.xlu0 %v2640_v35, %s2519_s28 }
 0x150   : > { %v591_v26 = vpop.xlane.xlu1 %590 }
 0x151   : > { %v613_v28 = vsub.f32 %v2668_v51, %v591_v26 }
 0x153   : > { %v899_v27 = vpop.f32.mrf.mxu2  ;;  %v621_v30 = vmul.f32 1.442695, %v613_v28 }
 0x154   : > { %v2773_v58 = vsel %vm461_vm1, %v899_v27, -1e+30 }
 0x155   : > { %2349 = vpow2.f32 %v621_v30  ;;  %v927_v62 = vsel %vm588_vm2, %v2773_v58, -inf }
 0x156   : > { %1506 = vrot.lane.b32.xlu2 %v2632_v33, %s2518_s27 }
 0x158   : > { %v594_v31 = vpop.xlane.xlu2 %593 }
 0x159   : > { %v614_v34 = vsub.f32 %v581_v59, %v594_v31 }
 0x15b   : > { %v623_v36 = vmul.f32 1.442695, %v614_v34  ;;  %v901_v37 = vpop.f32.mrf.mxu2  ;;  %v2747_v35 = vpop.eup %2349 }
 0x15c   : > { %v2760_v50 = vsel %vm461_vm1, %v901_v37, -1e+30 }
 0x15d   : > { %2351 = vpow2.f32 %v623_v36  ;;  %v930_v51 = vsel %vm588_vm2, %v2760_v50, -inf }
 0x15e   : > { %1009 = vrot.lane.b32.xlu2 %v2662_v47, %s2517_s26 }
 0x160   : > { %v597_v29 = vpop.xlane.xlu0 %596 }
 0x161   : > { %v615_v40 = vsub.f32 %v2689_v0, %v597_v29 }
 0x163   : > { %v2749_v38 = vpop.eup %2351  ;;  %v904_v39 = vpop.f32.mrf.mxu2  ;;  %v625_v41 = vmul.f32 1.442695, %v615_v40 }
 0x164   : > { %v661_v33 = vpack.c.bf16 %v2749_v38, %v2747_v35  ;;  %v2808_v8 = vsel %vm461_vm1, %v904_v39, -1e+30 }
 0x165   : > { %2353 = vpow2.f32 %v625_v41  ;;  %v933_v9 = vsel %vm588_vm2, %v2808_v8, -inf }
 0x166   : > { %2179 = vmatmul.msk.bf16.vlgmr.msra.gmra.mxu1 %vm588_vm2, %v661_v33  ;;  %1007 = vrot.lane.b32.xlu2 %v2670_v52, %s2517_s26 }
 0x168   : > { %v1187_v42 = vpop.permute.xlu1 %1186  ;;  %v600_v43 = vpop.xlane.xlu2 %599 }
 0x169   : > { %v616_v44 = vsub.f32 %v583_v7, %v600_v43  ;;  %v1208_v45 = vsel %vm526_vm0, %v1187_v42, 0 }
 0x16a   : > { %1222 = vmatpush.bf16.xpose.msrb.mxu1 %v1208_v45 }
 0x16b   : > { %v627_v48 = vmul.f32 1.442695, %v616_v44  ;;  %v906_v49 = vpop.f32.mrf.mxu2  ;;  %v2767_v55 = vpop.eup %2353 }
 0x16c   : > { %v2790_v0 = vsel %vm461_vm1, %v906_v49, -1e+30 }
 0x16d   : > { %2355 = vpow2.f32 %v627_v48  ;;  %v936_v2 = vsel %vm588_vm2, %v2790_v0, -inf }
 0x16e   : > { %1005 = vrot.lane.b32.xlu2 %v2675_v54, %s2517_s26 }
 0x170   : > { %v603_v10 = vpop.xlane.xlu0 %602  ;;  %v1177_v12 = vpop.permute.xlu2 %1176 }
 0x171   : > { %v617_v14 = vsub.f32 %v2703_v11, %v603_v10 }
 0x172   : > { %1223 = vmatpush.bf16.xpose.msrb.mxu1 %v1205_v53 }
 0x173   : > { %v2769_v56 = vpop.eup %2355  ;;  %v909_v59 = vpop.f32.mrf.mxu2  ;;  %931 = vmax.xlane.f32.xlu1 %v930_v51  ;;  %v629_v15 = vmul.f32 1.442695, %v617_v14 }
 0x174   : > { %v662_v60 = vpack.c.bf16 %v2769_v56, %v2767_v55  ;;  %v2779_v61 = vsel %vm461_vm1, %v909_v59, -1e+30 }
 0x175   : > { %v939_v63 = vsel %vm588_vm2, %v2779_v61, -inf  ;;  %2357 = vpow2.f32 %v629_v15 }
 0x176   : > { %2180 = vmatmul.msk.bf16.gmra.mxu1 %vm588_vm2, %v662_v60  ;;  %1003 = vrot.lane.b32.xlu2 %v2680_v57, %s2517_s26 }
 0x179   : > { %928 = vmax.xlane.f32.xlu0 %v927_v62 }
 0x17b   : > { %v911_v1 = vpop.f32.mrf.mxu2  ;;  %940 = vmax.xlane.f32.xlu1 %v939_v63  ;;  %v2823_v11 = vpop.eup %2357 }
 0x17c   : > { %v2796_v3 = vsel %vm461_vm1, %v911_v1, -1e+30 }
 0x17d   : > { %v942_v7 = vsel %vm588_vm2, %v2796_v3, -inf }
 0x181   : > { %937 = vmax.xlane.f32.xlu0 %v936_v2 }
 0x183   : > { %v914_v4 = vpop.f32.mrf.mxu2  ;;  %v1505_v16 = vpop.permute.xlu0 %1504 }
 0x184   : > { %v2800_v5 = vsel %vm461_vm1, %v914_v4, -1e+30 }
 0x185   : > { %v945_v6 = vsel %vm588_vm2, %v2800_v5, -inf }
 0x186   : > { %946 = vmax.xlane.f32.xlu1 %v945_v6 }
 0x189   : > { %943 = vmax.xlane.f32.xlu0 %v942_v7 }
 0x18b   : > { %v916_v29 = vpop.f32.mrf.mxu2 }
 0x18c   : > { %v2846_v40 = vsel %vm461_vm1, %v916_v29, -1e+30 }
 0x18d   : > { %v948_v41 = vsel %vm588_vm2, %v2846_v40, -inf }
 0x193   : > { %v609_v13 = vpop.xlane.xlu1 %608 }
 0x194   : > { %v619_v27 = vsub.f32 %v2716_v19, %v609_v13 }
 0x196   : > { %v633_v31 = vmul.f32 1.442695, %v619_v27 }
 0x19d   : > { %1661 = vrot.lane.b32.xlu0 %v2662_v47, %s2518_s27 }
 0x19f   : > { %934 = vmax.xlane.f32.xlu2 %v933_v9  ;;  %1335 = vrot.lane.b32.xlu1 %v2662_v47, %s2519_s28 }
 0x1a5   : > { %1659 = vrot.lane.b32.xlu0 %v2670_v52, %s2518_s27 }
 0x1a9   : > { %v606_v17 = vpop.xlane.xlu2 %605 }
 0x1aa   : > { %v618_v18 = vsub.f32 %v2722_v21, %v606_v17 }
 0x1ab   : > { %v1503_v20 = vpop.permute.xlu1 %1502 }
 0x1ac   : > { %v631_v22 = vmul.f32 1.442695, %v618_v18  ;;  %2199 = vmatmul.msk.bf16.vlgmr.msrb.gmra.mxu0 %vm526_vm0, %v1503_v20 }
 0x1ad   : > { %1331 = vrot.lane.b32.xlu0 %v2675_v54, %s2519_s28 }
 0x1ae   : > { %2359 = vpow2.f32 %v631_v22  ;;  %v612_v47 = vpop.xlane.xlu0 %611 }
 0x1af   : > { %v620_v26 = vsub.f32 %v2728_v24, %v612_v47 }
 0x1b1   : > { %v1179_v23 = vpop.permute.xlu2 %1178  ;;  %v635_v28 = vmul.f32 1.442695, %v620_v26 }
 0x1b3   : > { %2361 = vpow2.f32 %v635_v28  ;;  %v1181_v36 = vpop.permute.xlu1 %1180 }
 0x1b4   : > { %v2825_v25 = vpop.eup %2359  ;;  %2363 = vpow2.f32 %v633_v31 }
 0x1b5   : > { %1657 = vrot.lane.b32.xlu0 %v2675_v54, %s2518_s27  ;;  %v663_v21 = vpack.c.bf16 %v2825_v25, %v2823_v11 }
 0x1b7   : > { %2181 = vmatmul.msk.bf16.gmra.mxu1 %vm588_vm2, %v663_v21 }
 0x1b9   : > { %v1507_v30 = vpop.permute.xlu2 %1506  ;;  %v2835_v34 = vpop.eup %2361 }
 0x1ba   : > { %v2837_v24 = vpop.eup %2363 }
 0x1bb   : > { %v664_v54 = vpack.c.bf16 %v2835_v34, %v2837_v24  ;;  %v1509_v33 = vpop.permute.xlu1 %1508 }
 0x1bc   : > { %2200 = vmatmul.msk.bf16.gmra.mxu0 %vm526_vm0, %v1505_v16 }
 0x1c1   : > { %v1010_v32 = vpop.permute.xlu2 %1009  ;;  %v1183_v42 = vpop.permute.xlu0 %1182 }
 0x1c2   : > { %1031 = vmatpush.bf16.msra.mxu3 %v1010_v32 }
 0x1c7   : > { %2182 = vmatmul.msk.bf16.gmra.mxu1 %vm588_vm2, %v664_v54 }
 0x1c9   : > { %v1008_v19 = vpop.permute.xlu2 %1007 }
 0x1ca   : > { %1032 = vmatpush.bf16.msra.mxu3 %v1008_v19 }
 0x1cc   : > { %2201 = vmatmul.msk.bf16.gmra.mxu0 %vm526_vm0, %v1507_v30 }
 0x1d1   : > { %v1006_v37 = vpop.permute.xlu2 %1005 }
 0x1d2   : > { %1033 = vmatpush.bf16.msra.mxu3 %v1006_v37 }
 0x1d7   : > { %2191 = vmatmul.msk.bf16.vlgmr.msrb.gmra.mxu1 %vm526_vm0, %v1177_v12 }
 0x1d9   : > { %v1004_v39 = vpop.permute.xlu2 %1003 }
 0x1da   : > { %1034 = vmatpush.bf16.msra.mxu3 %v1004_v39 }
 0x1dc   : > { %2202 = vmatmul.msk.bf16.gmra.mxu0 %vm526_vm0, %v1509_v33 }
 0x1df   : > { %949 = vmax.xlane.f32.xlu0 %v948_v41 }
 0x1e3   : > { %v2863_v63 = vpop.f32.mrf.mxu1 }
 0x1e6   : > { %v932_v43 = vpop.xlane.xlu1 %931 }
 0x1e7   : > { %2192 = vmatmul.msk.bf16.gmra.mxu1 %vm526_vm0, %v1179_v23  ;;  %v952_v44 = vsub.f32 %v2760_v50, %v932_v43 }
 0x1e9   : > { %v961_v45 = vmul.f32 1.442695, %v952_v44 }
 0x1eb   : > { %2365 = vpow2.f32 %v961_v45  ;;  %v2867_v9 = vpop.f32.mrf.mxu1 }
 0x1ec   : > { %v929_v48 = vpop.xlane.xlu0 %928 }
 0x1ed   : > { %v951_v49 = vsub.f32 %v2773_v58, %v929_v48 }
 0x1ee   : > { %v941_v13 = vpop.xlane.xlu1 %940 }
 0x1ef   : > { %v959_v51 = vmul.f32 1.442695, %v951_v49 }
 0x1f1   : > { %2367 = vpow2.f32 %v959_v51  ;;  %v2854_v53 = vpop.eup %2365 }
 0x1f3   : > { %v2878_v17 = vpop.f32.mrf.mxu1 }
 0x1f4   : > { %v938_v62 = vpop.xlane.xlu0 %937 }
 0x1f5   : > { %v954_v58 = vsub.f32 %v2790_v0, %v938_v62 }
 0x1f7   : > { %v2856_v59 = vpop.eup %2367  ;;  %2193 = vmatmul.msk.bf16.gmra.mxu1 %vm526_vm0, %v1181_v36  ;;  %v965_v1 = vmul.f32 1.442695, %v954_v58 }
 0x1f8   : > { %v999_v60 = vpack.c.bf16 %v2854_v53, %v2856_v59 }
 0x1f9   : > { %2369 = vpow2.f32 %v965_v1 }
 0x1fa   : > { %2187 = vmatmul.msk.bf16.vlgmr.msra.gmra.mxu3 %vm588_vm2, %v999_v60 }
 0x1fb   : > { %v2890_v26 = vpop.f32.mrf.mxu1 }
 0x1fc   : > { %v944_v50 = vpop.xlane.xlu0 %943 }
 0x1fd   : > { %v956_v0 = vsub.f32 %v2796_v3, %v944_v50 }
 0x1ff   : > { %v2869_v12 = vpop.eup %2369  ;;  %v969_v16 = vmul.f32 1.442695, %v956_v0 }
 0x207   : > { %2194 = vmatmul.msk.bf16.gmra.mxu1 %vm526_vm0, %v1183_v42  ;;  %v947_v42 = vpop.xlane.xlu1 %946 }
 0x208   : > { %v957_v44 = vsub.f32 %v2800_v5, %v947_v42 }
 0x20a   : > { %v971_v45 = vmul.f32 1.442695, %v957_v44 }
 0x20f   : > { %v1662_v4 = vpop.permute.xlu0 %1661 }
 0x210   : > { %1683 = vmatpush.bf16.msrb.mxu2 %v1662_v4 }
 0x212   : > { %v935_v2 = vpop.xlane.xlu2 %934 }
 0x213   : > { %v953_v6 = vsub.f32 %v2808_v8, %v935_v2  ;;  %v955_v8 = vsub.f32 %v2779_v61, %v941_v13 }
 0x215   : > { %v963_v7 = vmul.f32 1.442695, %v953_v6  ;;  %v967_v20 = vmul.f32 1.442695, %v955_v8 }
 0x217   : > { %2371 = vpow2.f32 %v963_v7  ;;  %v1660_v10 = vpop.permute.xlu0 %1659 }
 0x218   : > { %1684 = vmatpush.bf16.msrb.mxu2 %v1660_v10  ;;  %2373 = vpow2.f32 %v969_v16 }
 0x219   : > { %2375 = vpow2.f32 %v967_v20  ;;  %v1336_v20 = vpop.permute.xlu1 %1335 }
 0x21a   : > { %2377 = vpow2.f32 %v971_v45  ;;  %1357 = vmatpush.bf16.msrb.mxu3 %v1336_v20 }
 0x21d   : > { %v2871_v14 = vpop.eup %2371 }
 0x21e   : > { %v1000_v15 = vpack.c.bf16 %v2869_v12, %v2871_v14  ;;  %v2886_v23 = vpop.eup %2373 }
 0x21f   : > { %v2880_v18 = vpop.permute.xlu0 %1331  ;;  %v2892_v21 = vpop.eup %2375 }
 0x220   : > { %2188 = vmatmul.msk.bf16.gmra.mxu3 %vm588_vm2, %v1000_v15  ;;  %v1001_v27 = vpack.c.bf16 %v2886_v23, %v2892_v21  ;;  %v2933_v50 = vpop.eup %2377 }
 0x227   : > { %v1658_v3 = vpop.permute.xlu0 %1657 }
 0x228   : > { %1685 = vmatpush.bf16.msrb.mxu2 %v1658_v3 }
 0x229   : > { %v1551_v22 = vpop.f32.mrf.mxu0 }
 0x22a   : > { %v2884_v47 = vsel %vm461_vm1, %v1551_v22, -1e+30 }
 0x22b   : > { %v1579_v61 = vsel %vm588_vm2, %v2884_v47, -inf }
 0x22c   : > { %1580 = vmax.xlane.f32.xlu2 %v1579_v61 }
 0x230   : > { %2189 = vmatmul.msk.bf16.gmra.mxu3 %vm588_vm2, %v1001_v27 }
 0x231   : > { %v1553_v28 = vpop.f32.mrf.mxu0 }
 0x232   : > { %v2899_v30 = vsel %vm461_vm1, %v1553_v28, -1e+30 }
 0x233   : > { %v1582_v31 = vsel %vm588_vm2, %v2899_v30, -inf }
 0x234   : > { %v2903_v32 = vpop.f32.mrf.mxu1  ;;  %1583 = vmax.xlane.f32.xlu1 %v1582_v31 }
 0x239   : > { %v1556_v54 = vpop.f32.mrf.mxu0 }
 0x23a   : > { %v2907_v19 = vsel %vm461_vm1, %v1556_v54, -1e+30 }
 0x23b   : > { %v1585_v36 = vsel %vm588_vm2, %v2907_v19, -inf }
 0x23c   : > { %v2911_v37 = vpop.f32.mrf.mxu1  ;;  %1586 = vmax.xlane.f32.xlu1 %v1585_v36 }
 0x241   : > { %v1558_v29 = vpop.f32.mrf.mxu0 }
 0x242   : > { %v2915_v39 = vsel %vm461_vm1, %v1558_v29, -1e+30 }
 0x243   : > { %v1588_v33 = vsel %vm588_vm2, %v2915_v39, -inf }
 0x244   : > { %1333 = vrot.lane.b32.xlu2 %v2670_v52, %s2519_s28  ;;  %1589 = vmax.xlane.f32.xlu1 %v1588_v33  ;;  %v2921_v41 = vpop.f32.mrf.mxu1 }
 0x249   : > { %v1561_v7 = vpop.f32.mrf.mxu0 }
 0x24a   : > { %v2962_v3 = vsel %vm461_vm1, %v1561_v7, -1e+30 }
 0x24b   : > { %v1591_v61 = vsel %vm588_vm2, %v2962_v3, -inf }
 0x24c   : > { %v2923_v43 = vpop.f32.mrf.mxu1 }
 0x251   : > { %v1563_v15 = vpop.f32.mrf.mxu0 }
 0x252   : > { %v950_v48 = vpop.xlane.xlu0 %949 }
 0x253   : > { %v958_v49 = vsub.f32 %v2846_v40, %v950_v48  ;;  %v981_v48 = vsel %vm588_vm2, %v2871_v14, 0.0 }
 0x254   : > { %v1225_v51 = vpop.f32.mrf.mxu1 }
 0x255   : > { %v973_v60 = vmul.f32 1.442695, %v958_v49  ;;  %v2929_v62 = vsel %vm461_vm1, %v1225_v51, -1e+30  ;;  %v978_v51 = vsel %vm588_vm2, %v2854_v53, 0.0  ;;  %v987_v53 = vsel %vm588_vm2, %v2892_v21, 0.0 }
 0x256   : > { %v1253_v52 = vsel %vm588_vm2, %v2929_v62, -inf }
 0x257   : > { %2379 = vpow2.f32 %v973_v60  ;;  %1254 = vmax.xlane.f32.xlu0 %v1253_v52  ;;  %v990_v60 = vsel %vm588_vm2, %v2886_v23, 0.0 }
 0x259   : > { %v1566_v27 = vpop.f32.mrf.mxu0 }
 0x25a   : > { %v2988_v44 = vsel %vm461_vm1, %v1566_v27, -1e+30 }
 0x25b   : > { %v1597_v45 = vsel %vm588_vm2, %v2988_v44, -inf }
 0x25c   : > { %v1227_v58 = vpop.f32.mrf.mxu1 }
 0x25d   : > { %v2935_v5 = vpop.eup %2379  ;;  %v2942_v2 = vsel %vm461_vm1, %v1227_v58, -1e+30 }
 0x25e   : > { %v1002_v40 = vpack.c.bf16 %v2935_v5, %v2933_v50  ;;  %v1256_v6 = vsel %vm588_vm2, %v2942_v2, -inf }
 0x260   : > { %2190 = vmatmul.msk.bf16.gmra.mxu3 %vm588_vm2, %v1002_v40 }
 0x261   : > { %v1568_v36 = vpop.f32.mrf.mxu0 }
 0x262   : > { %v2980_v33 = vsel %vm461_vm1, %v1568_v36, -1e+30  ;;  %v984_v36 = vsel %vm588_vm2, %v2869_v12, 0.0 }
 0x263   : > { %v1600_v42 = vsel %vm588_vm2, %v2980_v33, -inf }
 0x264   : > { %v1230_v1 = vpop.f32.mrf.mxu1 }
 0x26b   : > { %1655 = vrot.lane.b32.xlu0 %v2680_v57, %s2518_s27 }
 0x26c   : > { %v1232_v4 = vpop.f32.mrf.mxu1 }
 0x26d   : > { %1257 = vmax.xlane.f32.xlu2 %v1256_v6  ;;  %v2976_v29 = vsel %vm461_vm1, %v1232_v4, -1e+30  ;;  %v3001_v4 = vsel %vm461_vm1, %v1230_v1, -1e+30  ;;  %v3011_v1 = vsel %vm461_vm1, %v1563_v15, -1e+30 }
 0x26e   : > { %v1259_v23 = vsel %vm588_vm2, %v3001_v4, -inf  ;;  %v1594_v21 = vsel %vm588_vm2, %v3011_v1, -inf }
 0x274   : > { %v1235_v10 = vpop.f32.mrf.mxu1 }
 0x275   : > { %v2950_v13 = vsel %vm461_vm1, %v1235_v10, -1e+30 }
 0x276   : > { %v1265_v0 = vsel %vm588_vm2, %v2950_v13, -inf }
 0x277   : > { %1266 = vmax.xlane.f32.xlu1 %v1265_v0 }
 0x27c   : > { %v1237_v8 = vpop.f32.mrf.mxu1 }
 0x27d   : > { %v2956_v16 = vsel %vm461_vm1, %v1237_v8, -1e+30 }
 0x27e   : > { %v1268_v22 = vsel %vm588_vm2, %v2956_v16, -inf }
 0x27f   : > { %1269 = vmax.xlane.f32.xlu1 %v1268_v22 }
 0x284   : > { %v1240_v28 = vpop.f32.mrf.mxu1 }
 0x285   : > { %1329 = vrot.lane.b32.xlu2 %v2680_v57, %s2519_s28  ;;  %v2970_v31 = vsel %vm461_vm1, %v1240_v28, -1e+30  ;;  %v1262_v57 = vsel %vm588_vm2, %v2976_v29, -inf }
 0x286   : > { %v1271_v54 = vsel %vm588_vm2, %v2970_v31, -inf }
 0x287   : > { %1592 = vmax.xlane.f32.xlu1 %v1591_v61 }
 0x28c   : > { %v1242_v0 = vpop.f32.mrf.mxu1 }
 0x28d   : > { %v3021_v15 = vsel %vm461_vm1, %v1242_v0, -1e+30 }
 0x28f   : > { %1272 = vmax.xlane.f32.xlu1 %v1271_v54 }
 0x295   : > { %1263 = vmax.xlane.f32.xlu0 %v1262_v57 }
 0x297   : > { %1601 = vmax.xlane.f32.xlu1 %v1600_v42 }
 0x29d   : > { %1598 = vmax.xlane.f32.xlu0 %v1597_v45  ;;  %v993_v45 = vsel %vm588_vm2, %v2933_v50, 0.0 }
 0x29f   : > { %v1581_v49 = vpop.xlane.xlu2 %1580  ;;  %982 = vadd.xlane.f32.xlu1 %v981_v48 }
 0x2a0   : > { %v1603_v6 = vsub.f32 %v2884_v47, %v1581_v49 }
 0x2a5   : > { %979 = vadd.xlane.f32.xlu0 %v978_v51 }
 0x2a7   : > { %v1334_v52 = vpop.permute.xlu2 %1333  ;;  %v1584_v58 = vpop.xlane.xlu1 %1583  ;;  %991 = vadd.xlane.f32.xlu1 %v990_v60 }
 0x2a8   : > { %v1604_v40 = vsub.f32 %v2899_v30, %v1584_v58  ;;  %1358 = vmatpush.bf16.msrb.mxu3 %v1334_v52  ;;  %v1611_v30 = vmul.f32 1.442695, %v1603_v6 }
 0x2aa   : > { %v1613_v14 = vmul.f32 1.442695, %v1604_v40 }
 0x2ac   : > { %2381 = vpow2.f32 %v1613_v14  ;;  %1359 = vmatpush.bf16.msrb.mxu3 %v2880_v18  ;;  %v996_v18 = vsel %vm588_vm2, %v2935_v5, 0.0  ;;  %v1274_v5 = vsel %vm588_vm2, %v3021_v15, -inf }
 0x2ad   : > { %988 = vadd.xlane.f32.xlu0 %v987_v53  ;;  %2383 = vpow2.f32 %v1611_v30 }
 0x2ae   : > { %1260 = vmax.xlane.f32.xlu2 %v1259_v23 }
 0x2af   : > { %v1587_v7 = vpop.xlane.xlu1 %1586 }
 0x2b0   : > { %v1605_v46 = vsub.f32 %v2907_v19, %v1587_v7 }
 0x2b2   : > { %v2382_v10 = vpop.eup %2381  ;;  %v1615_v57 = vmul.f32 1.442695, %v1605_v46 }
 0x2b3   : > { %v1630_v47 = vsel %vm588_vm2, %v2382_v10, 0.0  ;;  %v2384_v22 = vpop.eup %2383 }
 0x2b4   : > { %1631 = vadd.xlane.f32.xlu1 %v1630_v47  ;;  %v1627_v27 = vsel %vm588_vm2, %v2384_v22, 0.0  ;;  %v1651_v19 = vpack.c.bf16 %v2382_v10, %v2384_v22 }
 0x2b5   : > { %997 = vadd.xlane.f32.xlu0 %v996_v18 }
 0x2b6   : > { %1595 = vmax.xlane.f32.xlu2 %v1594_v21 }
 0x2b7   : > { %v1590_v8 = vpop.xlane.xlu1 %1589 }
 0x2b8   : > { %v1606_v20 = vsub.f32 %v2915_v39, %v1590_v8  ;;  %v975_v39 = vsel %vm588_vm2, %v2856_v59, 0.0 }
 0x2ba   : > { %v1617_v61 = vmul.f32 1.442695, %v1606_v20 }
 0x2bc   : > { %2385 = vpow2.f32 %v1617_v61 }
 0x2bd   : > { %1628 = vadd.xlane.f32.xlu0 %v1627_v27  ;;  %2387 = vpow2.f32 %v1615_v57 }
 0x2be   : > { %1275 = vmax.xlane.f32.xlu2 %v1274_v5 }
 0x2c2   : > { %v2386_v28 = vpop.eup %2385 }
 0x2c3   : > { %v1636_v54 = vsel %vm588_vm2, %v2386_v28, 0.0  ;;  %v2388_v48 = vpop.eup %2387 }
 0x2c4   : > { %v1633_v59 = vsel %vm588_vm2, %v2388_v48, 0.0  ;;  %v1652_v53 = vpack.c.bf16 %v2386_v28, %v2388_v48  ;;  %v3057_v28 = vpop.f32.mrf.mxu3  ;;  %v640_v48 = vsel %vm588_vm2, %v2749_v38, 0.0 }
 0x2c5   : > { %1637 = vadd.xlane.f32.xlu0 %v1636_v54 }
 0x2c6   : > { %976 = vadd.xlane.f32.xlu2 %v975_v39 }
 0x2ca   : > { %v1255_v42 = vpop.xlane.xlu0 %1254 }
 0x2cb   : > { %v1277_v49 = vsub.f32 %v2929_v62, %v1255_v42 }
 0x2cc   : > { %v3067_v42 = vpop.f32.mrf.mxu3 }
 0x2cd   : > { %v1285_v60 = vmul.f32 1.442695, %v1277_v49 }
 0x2ce   : > { %985 = vadd.xlane.f32.xlu2 %v984_v36 }
 0x2cf   : > { %2389 = vpow2.f32 %v1285_v60 }
 0x2d5   : > { %v3038_v40 = vpop.eup %2389 }
 0x2d6   : > { %994 = vadd.xlane.f32.xlu2 %v993_v45 }
 0x2dd   : > { %v1656_v51 = vpop.permute.xlu0 %1655 }
 0x2de   : > { %1634 = vadd.xlane.f32.xlu2 %v1633_v59  ;;  %1686 = vmatpush.bf16.msrb.mxu2 %v1656_v51 }
 0x2e0   : > { %v1258_v52 = vpop.xlane.xlu2 %1257 }
 0x2e1   : > { %v1278_v12 = vsub.f32 %v2942_v2, %v1258_v52  ;;  %2203 = vmatmul.msk.bf16.vlgmr.msrb.gmra.mxu2 %vm588_vm2, %v1651_v19 }
 0x2e3   : > { %v1287_v58 = vmul.f32 1.442695, %v1278_v12  ;;  %v3081_v12 = vpop.f32.mrf.mxu3 }
 0x2e5   : > { %2391 = vpow2.f32 %v1287_v58 }
 0x2e8   : > { %v1330_v50 = vpop.permute.xlu2 %1329 }
 0x2e9   : > { %1360 = vmatpush.bf16.msrb.mxu3 %v1330_v50 }
 0x2ea   : > { %v1267_v62 = vpop.xlane.xlu1 %1266 }
 0x2eb   : > { %v3040_v14 = vpop.eup %2391 }
 0x2ec   : > { %v1325_v6 = vpack.c.bf16 %v3040_v14, %v3038_v40 }
 0x2ee   : > { %2195 = vmatmul.msk.bf16.vlgmr.msrb.gmra.mxu3 %vm588_vm2, %v1325_v6 }
 0x2f1   : > { %2204 = vmatmul.msk.bf16.gmra.mxu2 %vm588_vm2, %v1652_v53 }
 0x2f2   : > { %v1270_v2 = vpop.xlane.xlu1 %1269 }
 0x2f3   : > { %v1282_v59 = vsub.f32 %v2956_v16, %v1270_v2  ;;  %v1301_v16 = vsel %vm588_vm2, %v3038_v40, 0.0  ;;  %v658_v2 = vsel %vm588_vm2, %v2835_v34, 0.0 }
 0x2fa   : > { %v1593_v23 = vpop.xlane.xlu1 %1592 }
 0x2fb   : > { %v1607_v30 = vsub.f32 %v2962_v3, %v1593_v23 }
 0x2fd   : > { %v1619_v7 = vmul.f32 1.442695, %v1607_v30  ;;  %v3098_v30 = vpop.f32.mrf.mxu3 }
 0x2ff   : > { %2393 = vpow2.f32 %v1619_v7 }
 0x302   : > { %v1273_v10 = vpop.xlane.xlu1 %1272 }
 0x303   : > { %v1283_v38 = vsub.f32 %v2970_v31, %v1273_v10 }
 0x305   : > { %v3047_v47 = vpop.eup %2393  ;;  %v1297_v6 = vmul.f32 1.442695, %v1283_v38 }
 0x306   : > { %v1639_v18 = vsel %vm588_vm2, %v3047_v47, 0.0 }
 0x307   : > { %1640 = vadd.xlane.f32.xlu1 %v1639_v18 }
 0x308   : > { %v1264_v21 = vpop.xlane.xlu0 %1263 }
 0x309   : > { %v1280_v39 = vsub.f32 %v2976_v29, %v1264_v21  ;;  %v652_v29 = vsel %vm588_vm2, %v2825_v25, 0.0  ;;  %v649_v25 = vsel %vm588_vm2, %v2823_v11, 0.0 }
 0x30a   : > { %v1602_v0 = vpop.xlane.xlu1 %1601 }
 0x30b   : > { %v1610_v8 = vsub.f32 %v2980_v33, %v1602_v0  ;;  %v1291_v46 = vmul.f32 1.442695, %v1280_v39 }
 0x30d   : > { %v1625_v20 = vmul.f32 1.442695, %v1610_v8 }
 0x30f   : > { %2395 = vpow2.f32 %v1625_v20 }
 0x310   : > { %v1599_v22 = vpop.xlane.xlu0 %1598 }
 0x311   : > { %v1609_v61 = vsub.f32 %v2988_v44, %v1599_v22  ;;  %v643_v44 = vsel %vm588_vm2, %v2767_v55, 0.0  ;;  %v1281_v55 = vsub.f32 %v2950_v13, %v1267_v62  ;;  %v1295_v62 = vmul.f32 1.442695, %v1282_v59 }
 0x312   : > { %v3076_v51 = vpop.xlane.xlu1 %982 }
 0x313   : > { %v1623_v27 = vmul.f32 1.442695, %v1609_v61  ;;  %v1293_v50 = vmul.f32 1.442695, %v1281_v55 }
 0x315   : > { %v3053_v3 = vpop.eup %2395  ;;  %2397 = vpow2.f32 %v1623_v27 }
 0x316   : > { %v1648_v5 = vsel %vm588_vm2, %v3053_v3, 0.0  ;;  %2399 = vpow2.f32 %v1291_v46 }
 0x317   : > { %1649 = vadd.xlane.f32.xlu1 %v1648_v5  ;;  %v637_v5 = vsel %vm588_vm2, %v2747_v35, 0.0  ;;  %v3135_v35 = vpop.f32.mrf.mxu3 }
 0x318   : > { %v3073_v49 = vpop.xlane.xlu0 %979 }
 0x319   : > { %vm1075_vm3 = vweird.f32 %v3073_v49 }
 0x31a   : > { %v3090_v53 = vpop.xlane.xlu1 %991 }
 0x31b   : > { %v3059_v54 = vpop.eup %2397  ;;  %vm1131_vm11 = vweird.f32 %v3090_v53 }
 0x31c   : > { %v1645_v33 = vsel %vm588_vm2, %v3059_v54, 0.0  ;;  %v2400_v60 = vpop.eup %2399 }
 0x31d   : > { %1646 = vadd.xlane.f32.xlu0 %v1645_v33  ;;  %v1310_v7 = vsel %vm588_vm2, %v2400_v60, 0.0 }
 0x31f   : > { %644 = vadd.xlane.f32.xlu1 %v643_v44 }
 0x320   : > { %v3088_v31 = vpop.xlane.xlu0 %988 }
 0x321   : > { %v1261_v36 = vpop.xlane.xlu2 %1260  ;;  %vm1117_vm9 = vweird.f32 %v3088_v31 }
 0x322   : > { %v1279_v57 = vsub.f32 %v3001_v4, %v1261_v36 }
 0x324   : > { %v1289_v45 = vmul.f32 1.442695, %v1279_v57 }
 0x325   : > { %641 = vadd.xlane.f32.xlu0 %v640_v48 }
 0x326   : > { %2401 = vpow2.f32 %v1289_v45 }
 0x327   : > { %653 = vadd.xlane.f32.xlu1 %v652_v29 }
 0x328   : > { %v3114_v8 = vpop.xlane.xlu0 %997 }
 0x329   : > { %v1596_v4 = vpop.xlane.xlu2 %1595 }
 0x32a   : > { %v1608_v19 = vsub.f32 %v3011_v1, %v1596_v4 }
 0x32c   : > { %v2402_v52 = vpop.eup %2401  ;;  %v1621_v58 = vmul.f32 1.442695, %v1608_v19 }
 0x32d   : > { %650 = vadd.xlane.f32.xlu0 %v649_v25  ;;  %v1326_v13 = vpack.c.bf16 %v2400_v60, %v2402_v52  ;;  %v1307_v61 = vsel %vm588_vm2, %v2402_v52, 0.0  ;;  %v646_v52 = vsel %vm588_vm2, %v2769_v56, 0.0 }
 0x32e   : > { %2403 = vpow2.f32 %v1621_v58  ;;  %v1654_v58 = vpack.c.bf16 %v3053_v3, %v3059_v54  ;;  %v1121_v3 = vand.u32 2147483647, %v3088_v31 }
 0x32f   : > { %1302 = vadd.xlane.f32.xlu1 %v1301_v16  ;;  %2196 = vmatmul.msk.bf16.gmra.mxu3 %vm588_vm2, %v1326_v13  ;;  %2405 = vpow2.f32 %v1293_v50  ;;  %v655_v50 = vsel %vm588_vm2, %v2837_v24, 0.0  ;;  %v1079_v13 = vand.u32 2147483647, %v3073_v49 }
 0x330   : > { %2407 = vpow2.f32 %v1295_v62  ;;  %v1081_v62 = vand.u32 2147483648, %v3073_v49  ;;  %vm1122_vm15 = vcmp.eq.f32.partialorder %v1121_v3, 8.507059e+37 }
 0x331   : > { %v1276_v1 = vpop.xlane.xlu2 %1275  ;;  %2409 = vpow2.f32 %v1297_v6  ;;  %v1123_v6 = vand.u32 2147483648, %v3088_v31 }
 0x332   : > { %2411 = vrcp.f32 %v3088_v31  ;;  %v1284_v22 = vsub.f32 %v3021_v15, %v1276_v1 }
 0x333   : > { %2413 = vrcp.f32 %v3073_v49 }
 0x334   : > { %v2404_v11 = vpop.eup %2403  ;;  %2415 = vrcp.f32 %v3090_v53  ;;  %v1299_v36 = vmul.f32 1.442695, %v1284_v22 }
 0x335   : > { %659 = vadd.xlane.f32.xlu0 %v658_v2  ;;  %v1642_v40 = vsel %vm588_vm2, %v2404_v11, 0.0  ;;  %v1653_v23 = vpack.c.bf16 %v2404_v11, %v3047_v47  ;;  %v3102_v10 = vpop.eup %2405 }
 0x336   : > { %1643 = vadd.xlane.f32.xlu2 %v1642_v40  ;;  %v2408_v34 = vpop.eup %2407  ;;  %v1048_v40 = vpop.f32.mrf.mxu3 }
 0x337   : > { %2205 = vmatmul.msk.bf16.gmra.mxu2 %vm588_vm2, %v1653_v23  ;;  %1311 = vadd.xlane.f32.xlu1 %v1310_v7  ;;  %v3105_v18 = vpop.eup %2409  ;;  %v1327_v33 = vpack.c.bf16 %v2408_v34, %v3102_v10  ;;  %v1316_v19 = vsel %vm588_vm2, %v2408_v34, 0.0 }
 0x338   : > { %v3109_v0 = vpop.eup %2411  ;;  %v1319_v15 = vsel %vm588_vm2, %v3105_v18, 0.0 }
 0x339   : > { %v3107_v21 = vpop.xlane.xlu2 %976  ;;  %v3112_v47 = vpop.eup %2413  ;;  %v1113_v27 = vmul.f32 %v3109_v0, %v3088_v31  ;;  %vm1118_vm6 = vweird.f32 %v3109_v0 }
 0x33a   : > { %2417 = vrcp.f32 %v3107_v21  ;;  %v3116_v20 = vpop.eup %2415  ;;  %v1071_v39 = vmul.f32 %v3112_v47, %v3073_v49  ;;  %vm1076_vm4 = vweird.f32 %v3112_v47  ;;  %v1067_v1 = vand.u32 2147483648, %v3107_v21  ;;  %vm3189_vm12 = vmor %vm1117_vm9, %vm1118_vm6 }
 0x33b   : > { %2419 = vrcp.f32 %v3114_v8  ;;  %v1127_v44 = vmul.f32 %v3116_v20, %v3090_v53  ;;  %v1114_v57 = vsub.f32 1.0, %v1113_v27  ;;  %vm1061_vm7 = vweird.f32 %v3107_v21  ;;  %vm3202_vm13 = vmor %vm1075_vm3, %vm1076_vm4 }
 0x33c   : > { %v1072_v29 = vsub.f32 1.0, %v1071_v39  ;;  %2421 = vpow2.f32 %v1299_v36  ;;  %v1065_v7 = vand.u32 2147483647, %v3107_v21  ;;  %vm1132_vm8 = vweird.f32 %v3116_v20 }
 0x33d   : > { %1308 = vadd.xlane.f32.xlu0 %v1307_v61  ;;  %v1128_v55 = vsub.f32 1.0, %v1127_v44  ;;  %v1115_v60 = vmul.f32 %v3109_v0, %v1114_v57  ;;  %v1082_v27 = vor.u32 1.1754944e-38, %v1081_v62  ;;  %v3207_v44 = vpop.xlane.xlu0 %1628  ;;  %v1068_v36 = vor.u32 1.1754944e-38, %v1067_v1  ;;  %vm3216_vm14 = vmor %vm1131_vm11, %vm1132_vm8 }
 0x33e   : > { %638 = vadd.xlane.f32.xlu2 %v637_v5  ;;  %v1073_v25 = vmul.f32 %v3112_v47, %v1072_v29  ;;  %vm1066_vm1 = vcmp.eq.f32.partialorder %v1065_v7, 8.507059e+37  ;;  %vm1080_vm3 = vcmp.eq.f32.partialorder %v1079_v13, 8.507059e+37  ;;  %vm1159_vm6 = vweird.f32 %v3114_v8 }
 0x33f   : > { %2197 = vmatmul.msk.bf16.gmra.mxu3 %vm588_vm2, %v1327_v33  ;;  %1320 = vadd.xlane.f32.xlu1 %v1319_v15  ;;  %v1129_v16 = vmul.f32 %v3116_v20, %v1128_v55  ;;  %v1116_v24 = vadd.f32 %v3109_v0, %v1115_v60  ;;  %v3193_v33 = vpop.xlane.xlu1 %1631  ;;  %v1135_v15 = vand.u32 2147483647, %v3090_v53 }
 0x340   : > { %v3133_v46 = vpop.eup %2417  ;;  %v1074_v23 = vadd.f32 %v3112_v47, %v1073_v25 }
 0x341   : > { %v1057_v45 = vmul.f32 %v3133_v46, %v3107_v21  ;;  %v3139_v48 = vpop.xlane.xlu2 %985  ;;  %v3141_v59 = vpop.eup %2419  ;;  %vm1062_vm5 = vweird.f32 %v3133_v46  ;;  %v1130_v34 = vadd.f32 %v3116_v20, %v1129_v16  ;;  %v1137_v21 = vand.u32 2147483648, %v3090_v53 }
 0x342   : > { %v1155_v56 = vmul.f32 %v3141_v59, %v3114_v8  ;;  %v3170_v2 = vpop.eup %2421  ;;  %vm3181_vm10 = vmor %vm1061_vm7, %vm1062_vm5  ;;  %v1078_v53 = vsel %vm3202_vm13, %v3112_v47, %v1074_v23  ;;  %vm1136_vm4 = vcmp.eq.f32.partialorder %v1135_v15, 8.507059e+37  ;;  %vm1160_vm5 = vweird.f32 %v3141_v59 }
 0x343   : > { %v1058_v4 = vsub.f32 1.0, %v1057_v45  ;;  %v1328_v57 = vpack.c.bf16 %v3170_v2, %v3105_v18  ;;  %v1124_v45 = vor.u32 1.1754944e-38, %v1123_v6  ;;  %v1134_v29 = vsel %vm3216_vm14, %v3116_v20, %v1130_v34  ;;  %vm3249_vm8 = vmor %vm1159_vm6, %vm1160_vm5 }
 0x344   : > { %v1156_v22 = vsub.f32 1.0, %v1155_v56  ;;  %v1083_v60 = vsel %vm1080_vm3, %v1082_v27, %v1078_v53  ;;  %v1165_v16 = vand.u32 2147483648, %v3114_v8 }
 0x345   : > { %v1059_v38 = vmul.f32 %v3133_v46, %v1058_v4  ;;  %1317 = vadd.xlane.f32.xlu0 %v1316_v19  ;;  %v1138_v4 = vor.u32 1.1754944e-38, %v1137_v21  ;;  %v1169_v3 = vmul.f32 %v1083_v60, %v3067_v42 }
 0x346   : > { %647 = vadd.xlane.f32.xlu2 %v646_v52  ;;  %v1157_v18 = vmul.f32 %v3141_v59, %v1156_v22  ;;  %v1163_v52 = vand.u32 2147483647, %v3114_v8  ;;  %v1166_v22 = vor.u32 1.1754944e-38, %v1165_v16 }
 0x347   : > { %2206 = vmatmul.msk.bf16.gmra.mxu2 %vm588_vm2, %v1654_v58  ;;  %v1060_v54 = vadd.f32 %v3133_v46, %v1059_v38  ;;  %v1051_v38 = vpop.f32.mrf.mxu3  ;;  %v1304_v58 = vsel %vm588_vm2, %v3040_v14, 0.0 }
 0x348   : > { %v1158_v20 = vadd.f32 %v3141_v59, %v1157_v18  ;;  %vm3253_vm9 = vcmp.eq.f32.partialorder %v1163_v52, 8.507059e+37 }
 0x349   : > { %v3168_v11 = vpop.xlane.xlu2 %994  ;;  %v1064_v31 = vsel %vm3181_vm10, %v3133_v46, %v1060_v54  ;;  %v1120_v46 = vsel %vm3189_vm12, %v3109_v0, %v1116_v24 }
 0x34a   : > { %2423 = vrcp.f32 %v3168_v11  ;;  %v1069_v0 = vsel %vm1066_vm1, %v1068_v36, %v1064_v31  ;;  %v1125_v19 = vsel %vm1122_vm15, %v1124_v45, %v1120_v46  ;;  %v1151_v56 = vand.u32 2147483648, %v3168_v11 }
 0x34b   : > { %2425 = vrcp.f32 %v3193_v33  ;;  %v1168_v25 = vmul.f32 %v1069_v0, %v3057_v28  ;;  %v1172_v62 = vmul.f32 %v1125_v19, %v3135_v35  ;;  %v1149_v28 = vand.u32 2147483647, %v3168_v11 }
 0x34c   : > { %2427 = vrcp.f32 %v3207_v44  ;;  %vm1145_vm10 = vweird.f32 %v3168_v11  ;;  %v1152_v61 = vor.u32 1.1754944e-38, %v1151_v56  ;;  %v1313_v36 = vsel %vm588_vm2, %v3102_v10, 0.0 }
 0x34d   : > { %v2289_v42 = vpack.i.bf16 %v1169_v3, %v1168_v25  ;;  %vm1150_vm12 = vcmp.eq.f32.partialorder %v1149_v28, 8.507059e+37  ;;  %vm1727_vm15 = vweird.f32 %v3193_v33  ;;  %v1733_v25 = vand.u32 2147483648, %v3193_v33 }
 0x34e   : > { %656 = vadd.xlane.f32.xlu2 %v655_v50  ;;  %v1139_v50 = vsel %vm1136_vm4, %v1138_v4, %v1134_v29  ;;  %vm1713_vm1 = vweird.f32 %v3207_v44 }
 0x34f   : > { %2198 = vmatmul.msk.bf16.gmra.mxu3 %vm588_vm2, %v1328_v57  ;;  %v1173_v6 = vmul.f32 %v1139_v50, %v1048_v40  ;;  %v1162_v40 = vsel %vm3249_vm8, %v3141_v59, %v1158_v20  ;;  %v1053_v31 = vpop.f32.mrf.mxu3  ;;  %v1717_v50 = vand.u32 2147483647, %v3207_v44 }
 0x350   : > { %v2424_v55 = vpop.eup %2423  ;;  %v1167_v21 = vsel %vm3253_vm9, %v1166_v22, %v1162_v40 }
 0x351   : > { %v1141_v47 = vmul.f32 %v2424_v55, %v3168_v11  ;;  %v3242_v54 = vpop.eup %2425  ;;  %vm1146_vm7 = vweird.f32 %v2424_v55  ;;  %v3245_v24 = vpop.xlane.xlu2 %1634  ;;  %v2299_v7 = vpack.i.bf16 %v1173_v6, %v1172_v62  ;;  %v1175_v57 = vmul.f32 %v1167_v21, %v1053_v31 }
 0x352   : > { %v3247_v1 = vpop.eup %2427  ;;  %v1723_v34 = vmul.f32 %v3242_v54, %v3193_v33  ;;  %vm1147_vm11 = vmor %vm1145_vm10, %vm1146_vm7  ;;  %2429 = vrcp.f32 %v3245_v24  ;;  %vm1728_vm13 = vweird.f32 %v3242_v54  ;;  %vm1718_vm5 = vcmp.eq.f32.partialorder %v1717_v50, 8.507059e+37 }
 0x353   : > { %v1142_v13 = vsub.f32 1.0, %v1141_v47  ;;  %v1709_v27 = vmul.f32 %v3247_v1, %v3207_v44  ;;  %2431 = vrcp.f32 %v3139_v48  ;;  %vm1714_vm14 = vweird.f32 %v3247_v1  ;;  %vm3301_vm3 = vmor %vm1727_vm15, %vm1728_vm13 }
 0x354   : > { %2433 = vrcp.f32 %v3076_v51  ;;  %v1724_v39 = vsub.f32 1.0, %v1723_v34  ;;  %vm1715_vm4 = vmor %vm1713_vm1, %vm1714_vm14  ;;  %vm1741_vm9 = vweird.f32 %v3245_v24  ;;  %v1745_v34 = vand.u32 2147483647, %v3245_v24 }
 0x355   : > { %v1143_v14 = vmul.f32 %v2424_v55, %v1142_v13  ;;  %v1710_v15 = vsub.f32 1.0, %v1709_v27  ;;  %v1731_v13 = vand.u32 2147483647, %v3193_v33  ;;  %v1095_v27 = vand.u32 2147483648, %v3076_v51 }
 0x356   : > { %1305 = vadd.xlane.f32.xlu2 %v1304_v58  ;;  %v1725_v53 = vmul.f32 %v3242_v54, %v1724_v39  ;;  %v1719_v58 = vand.u32 2147483648, %v3207_v44  ;;  %v1734_v44 = vor.u32 1.1754944e-38, %v1733_v25  ;;  %vm1089_vm14 = vweird.f32 %v3076_v51 }
 0x357   : > { %v1144_v23 = vadd.f32 %v2424_v55, %v1143_v14  ;;  %v1711_v29 = vmul.f32 %v3247_v1, %v1710_v15  ;;  %vm1732_vm6 = vcmp.eq.f32.partialorder %v1731_v13, 8.507059e+37  ;;  %vm1746_vm1 = vcmp.eq.f32.partialorder %v1745_v34, 8.507059e+37 }
 0x358   : > { %2290 = vrot.lane.b32.xlu1 %v2289_v42, %s2518_s27  ;;  %v3275_v46 = vpop.eup %2429  ;;  %v1726_v19 = vadd.f32 %v3242_v54, %v1725_v53  ;;  %v1720_v14 = vor.u32 1.1754944e-38, %v1719_v58 }
 0x359   : > { %2300 = vrot.lane.b32.xlu0 %v2299_v7, %s2518_s27  ;;  %v1148_v59 = vsel %vm1147_vm11, %v2424_v55, %v1144_v23  ;;  %v3277_v49 = vpop.eup %2431  ;;  %v1737_v0 = vmul.f32 %v3275_v46, %v3245_v24  ;;  %v1712_v60 = vadd.f32 %v3247_v1, %v1711_v29  ;;  %vm1742_vm7 = vweird.f32 %v3275_v46  ;;  %v3345_v29 = vpop.xlane.xlu0 %1637 }
 0x35a   : > { %v1153_v11 = vsel %vm1150_vm12, %v1152_v61, %v1148_v59  ;;  %v3280_v18 = vpop.eup %2433  ;;  %v1099_v10 = vmul.f32 %v3277_v49, %v3139_v48  ;;  %v1730_v16 = vsel %vm3301_vm3, %v3242_v54, %v1726_v19  ;;  %vm1104_vm8 = vweird.f32 %v3277_v49  ;;  %vm1743_vm12 = vmor %vm1741_vm9, %vm1742_vm7 }
 0x35b   : > { %v1174_v5 = vmul.f32 %v1153_v11, %v1051_v38  ;;  %v1085_v55 = vmul.f32 %v3280_v18, %v3076_v51  ;;  %v1738_v47 = vsub.f32 1.0, %v1737_v0  ;;  %v1322_v38 = vsel %vm588_vm2, %v3170_v2, 0.0 }
 0x35c   : > { %v1100_v52 = vsub.f32 1.0, %v1099_v10  ;;  %v1716_v2 = vsel %vm1715_vm4, %v3247_v1, %v1712_v60  ;;  %v1735_v35 = vsel %vm1732_vm6, %v1734_v44, %v1730_v16  ;;  %v1747_v23 = vand.u32 2147483648, %v3245_v24 }
 0x35d   : > { %v2304_v45 = vpack.i.bf16 %v1175_v57, %v1174_v5  ;;  %v1086_v62 = vsub.f32 1.0, %v1085_v55  ;;  %v1739_v56 = vmul.f32 %v3275_v46, %v1738_v47  ;;  %v1721_v6 = vsel %vm1718_vm5, %v1720_v14, %v1716_v2 }
 0x35e   : > { %1314 = vadd.xlane.f32.xlu2 %v1313_v36  ;;  %v1101_v3 = vmul.f32 %v3277_v49, %v1100_v52  ;;  %v1109_v7 = vand.u32 2147483648, %v3139_v48  ;;  %vm1090_vm10 = vweird.f32 %v3280_v18  ;;  %vm1103_vm11 = vweird.f32 %v3139_v48 }
 0x35f   : > { %v1087_v28 = vmul.f32 %v3280_v18, %v1086_v62  ;;  %v1740_v1 = vadd.f32 %v3275_v46, %v1739_v56  ;;  %v1107_v61 = vand.u32 2147483647, %v3139_v48  ;;  %vm3326_vm13 = vmor %vm1103_vm11, %vm1104_vm8  ;;  %v1093_v24 = vand.u32 2147483647, %v3076_v51 }
 0x360   : > { %v1102_v54 = vadd.f32 %v3277_v49, %v1101_v3  ;;  %v1748_v21 = vor.u32 1.1754944e-38, %v1747_v23  ;;  %vm1091_vm15 = vmor %vm1089_vm14, %vm1090_vm10  ;;  %v1110_v5 = vor.u32 1.1754944e-38, %v1109_v7  ;;  %v1096_v36 = vor.u32 1.1754944e-38, %v1095_v27 }
 0x361   : > { %2305 = vrot.lane.b32.xlu0 %v2304_v45, %s2518_s27  ;;  %v1088_v22 = vadd.f32 %v3280_v18, %v1087_v28  ;;  %v1744_v11 = vsel %vm1743_vm12, %v3275_v46, %v1740_v1  ;;  %vm1108_vm3 = vcmp.eq.f32.partialorder %v1107_v61, 8.507059e+37  ;;  %vm1094_vm4 = vcmp.eq.f32.partialorder %v1093_v24, 8.507059e+37 }
 0x362   : > { %v1106_v48 = vsel %vm3326_vm13, %v3277_v49, %v1102_v54  ;;  %v1749_v39 = vsel %vm1746_vm1, %v1748_v21, %v1744_v11 }
 0x363   : > { %v1092_v15 = vsel %vm1091_vm15, %v3280_v18, %v1088_v22  ;;  %v1111_v46 = vsel %vm1108_vm3, %v1110_v5, %v1106_v48 }
 0x364   : > { %v1688_v4 = vpop.f32.mrf.mxu2  ;;  %v1097_v45 = vsel %vm1094_vm4, %v1096_v36, %v1092_v15  ;;  %v1171_v51 = vmul.f32 %v1111_v46, %v3098_v30 }
 0x365   : > { %v1820_v8 = vmul.f32 %v1721_v6, %v1688_v4  ;;  %v1170_v53 = vmul.f32 %v1097_v45, %v3081_v12 }
 0x366   : > { %1323 = vadd.xlane.f32.xlu2 %v1322_v38 }
 0x367   : > { %v2294_v0 = vpack.i.bf16 %v1171_v51, %v1170_v53 }
 0x36c   : > { %v1690_v33 = vpop.f32.mrf.mxu2 }
 0x36d   : > { %v1821_v42 = vmul.f32 %v1735_v35, %v1690_v33 }
 0x36f   : > { %v2309_v40 = vpack.i.bf16 %v1821_v42, %v1820_v8 }
 0x371   : > { %2310 = vrot.lane.b32.xlu1 %v2309_v40, %s2517_s26  ;;  %v3361_v47 = vpop.f32.mrf.mxu3 }
 0x374   : > { %v1693_v31 = vpop.f32.mrf.mxu2 }
 0x375   : > { %v3338_v57 = vmul.f32 %v1749_v39, %v1693_v31 }
 0x379   : > { %v3371_v25 = vpop.f32.mrf.mxu3 }
 0x37a   : > { %v3343_v49 = vpop.xlane.xlu1 %1640 }
 0x37b   : > { %2435 = vrcp.f32 %v3343_v49  ;;  %vm1769_vm5 = vweird.f32 %v3343_v49  ;;  %v1773_v54 = vand.u32 2147483647, %v3343_v49  ;;  %v1775_v23 = vand.u32 2147483648, %v3343_v49 }
 0x37c   : > { %v3380_v56 = vpop.f32.mrf.mxu2 }
 0x37e   : > { %2295 = vrot.lane.b32.xlu2 %v2294_v0, %s2518_s27 }
 0x381   : > { %v3368_v52 = vpop.eup %2435 }
 0x382   : > { %v1765_v50 = vmul.f32 %v3368_v52, %v3343_v49  ;;  %vm1770_vm7 = vweird.f32 %v3368_v52 }
 0x383   : > { %vm3414_vm12 = vmor %vm1769_vm5, %vm1770_vm7  ;;  %vm1774_vm5 = vcmp.eq.f32.partialorder %v1773_v54, 8.507059e+37 }
 0x384   : > { %v1766_v62 = vsub.f32 1.0, %v1765_v50 }
 0x386   : > { %v1767_v33 = vmul.f32 %v3368_v52, %v1766_v62 }
 0x388   : > { %v1768_v22 = vadd.f32 %v3368_v52, %v1767_v33  ;;  %v1776_v33 = vor.u32 1.1754944e-38, %v1775_v23 }
 0x38a   : > { %v3347_v10 = vpop.xlane.xlu1 %1649 }
 0x38b   : > { %v1817_v45 = vand.u32 2147483648, %v3347_v10 }
 0x390   : > { %v3349_v18 = vpop.xlane.xlu0 %1646 }
 0x391   : > { %v1803_v0 = vand.u32 2147483648, %v3349_v18 }
 0x392   : > { %v3351_v55 = vpop.xlane.xlu1 %644 }
 0x398   : > { %v3353_v4 = vpop.xlane.xlu0 %641 }
 0x39a   : > { %v3355_v19 = vpop.xlane.xlu1 %653 }
 0x3a0   : > { %v3357_v30 = vpop.xlane.xlu0 %650 }
 0x3a2   : > { %v3359_v12 = vpop.xlane.xlu1 %1302 }
 0x3a8   : > { %v3364_v60 = vpop.xlane.xlu0 %659 }
 0x3a9   : > { %v3366_v38 = vpop.xlane.xlu2 %1643 }
 0x3aa   : > { %v1312_v58 = vpop.xlane.xlu1 %1311  ;;  %2437 = vrcp.f32 %v3366_v38  ;;  %vm1783_vm13 = vweird.f32 %v3366_v38  ;;  %v1789_v51 = vand.u32 2147483648, %v3366_v38 }
 0x3ab   : > { %2439 = vrcp.f32 %v1312_v58  ;;  %v1435_v34 = vand.u32 2147483648, %v1312_v58  ;;  %v1433_v59 = vand.u32 2147483647, %v1312_v58  ;;  %vm1429_vm8 = vweird.f32 %v1312_v58 }
 0x3ac   : > { %2441 = vrcp.f32 %v3347_v10 }
 0x3ad   : > { %v1436_v46 = vor.u32 1.1754944e-38, %v1435_v34  ;;  %vm1434_vm15 = vcmp.eq.f32.partialorder %v1433_v59, 8.507059e+37 }
 0x3b0   : > { %v1309_v20 = vpop.xlane.xlu0 %1308  ;;  %v3376_v13 = vpop.eup %2437 }
 0x3b1   : > { %2443 = vrcp.f32 %v1309_v20  ;;  %v3378_v2 = vpop.xlane.xlu2 %638  ;;  %v2440_v16 = vpop.eup %2439  ;;  %v1779_v3 = vmul.f32 %v3376_v13, %v3366_v38  ;;  %v1421_v24 = vand.u32 2147483648, %v1309_v20  ;;  %vm1784_vm9 = vweird.f32 %v3376_v13 }
 0x3b2   : > { %v1425_v14 = vmul.f32 %v2440_v16, %v1312_v58  ;;  %v1367_v6 = vpop.f32.mrf.mxu3  ;;  %v3385_v35 = vpop.eup %2441  ;;  %2445 = vrcp.f32 %v3349_v18  ;;  %vm1430_vm6 = vweird.f32 %v2440_v16  ;;  %v1419_v31 = vand.u32 2147483647, %v1309_v20  ;;  %vm3422_vm1 = vmor %vm1783_vm13, %vm1784_vm9 }
 0x3b3   : > { %v1780_v44 = vsub.f32 1.0, %v1779_v3  ;;  %v1807_v61 = vmul.f32 %v3385_v35, %v3347_v10  ;;  %2447 = vrcp.f32 %v3359_v12  ;;  %vm3403_vm11 = vmor %vm1429_vm8, %vm1430_vm6  ;;  %vm1415_vm14 = vweird.f32 %v1309_v20  ;;  %v3459_v39 = vpop.xlane.xlu1 %1320 }
 0x3b4   : > { %v1426_v28 = vsub.f32 1.0, %v1425_v14  ;;  %v1787_v58 = vand.u32 2147483647, %v3366_v38  ;;  %v1422_v50 = vor.u32 1.1754944e-38, %v1421_v24  ;;  %vm1420_vm4 = vcmp.eq.f32.partialorder %v1419_v31, 8.507059e+37 }
 0x3b5   : > { %v1781_v7 = vmul.f32 %v3376_v13, %v1780_v44  ;;  %v1772_v44 = vsel %vm3414_vm12, %v3368_v52, %v1768_v22  ;;  %vm1812_vm7 = vweird.f32 %v3385_v35  ;;  %vm1811_vm9 = vweird.f32 %v3347_v10 }
 0x3b6   : > { %v1427_v42 = vmul.f32 %v2440_v16, %v1426_v28  ;;  %vm1788_vm6 = vcmp.eq.f32.partialorder %v1787_v58, 8.507059e+37  ;;  %v1777_v24 = vsel %vm1774_vm5, %v1776_v33, %v1772_v44  ;;  %v1815_v58 = vand.u32 2147483647, %v3347_v10 }
 0x3b7   : > { %v2444_v8 = vpop.eup %2443  ;;  %v1782_v15 = vadd.f32 %v3376_v13, %v1781_v7  ;;  %v1808_v7 = vsub.f32 1.0, %v1807_v61  ;;  %v1818_v44 = vor.u32 1.1754944e-38, %v1817_v45 }
 0x3b8   : > { %v1411_v1 = vmul.f32 %v2444_v8, %v1309_v20  ;;  %v1428_v21 = vadd.f32 %v2440_v16, %v1427_v42  ;;  %v3400_v48 = vpop.eup %2445  ;;  %vm1416_vm10 = vweird.f32 %v2444_v8  ;;  %v3432_v14 = vpop.xlane.xlu0 %1317  ;;  %vm1816_vm13 = vcmp.eq.f32.partialorder %v1815_v58, 8.507059e+37 }
 0x3b9   : > { %v3392_v40 = vpop.xlane.xlu2 %647  ;;  %v1793_v49 = vmul.f32 %v3400_v48, %v3349_v18  ;;  %vm1417_vm3 = vmor %vm1415_vm14, %vm1416_vm10  ;;  %v3430_v3 = vpop.eup %2447  ;;  %v1786_v38 = vsel %vm3422_vm1, %v3376_v13, %v1782_v15  ;;  %2449 = vrcp.f32 %v3432_v14  ;;  %vm1798_vm8 = vweird.f32 %v3400_v48 }
 0x3ba   : > { %v1412_v27 = vsub.f32 1.0, %v1411_v1  ;;  %v1698_v11 = vpop.f32.mrf.mxu2  ;;  %v1432_v36 = vsel %vm3403_vm11, %v2440_v16, %v1428_v21  ;;  %v1369_v62 = vpop.f32.mrf.mxu3  ;;  %v1790_v1 = vor.u32 1.1754944e-38, %v1789_v51  ;;  %v1383_v54 = vmul.f32 %v3430_v3, %v3359_v12  ;;  %vm1813_vm11 = vmor %vm1811_vm9, %vm1812_vm7 }
 0x3bb   : > { %v1437_v16 = vsel %vm1434_vm15, %v1436_v46, %v1432_v36  ;;  %v1794_v59 = vsub.f32 1.0, %v1793_v49  ;;  %v3443_v21 = vmul.f32 %v1777_v24, %v1698_v11  ;;  %2451 = vrcp.f32 %v3345_v29 }
 0x3bc   : > { %v1413_v5 = vmul.f32 %v2444_v8, %v1412_v27  ;;  %v1791_v52 = vsel %vm1788_vm6, %v1790_v1, %v1786_v38  ;;  %v1384_v31 = vsub.f32 1.0, %v1383_v54  ;;  %vm1797_vm10 = vweird.f32 %v3349_v18 }
 0x3bd   : > { %v1795_v61 = vmul.f32 %v3400_v48, %v1794_v59  ;;  %vm3480_vm12 = vmor %vm1797_vm10, %vm1798_vm8  ;;  %vm1388_vm15 = vweird.f32 %v3430_v3  ;;  %v1393_v59 = vand.u32 2147483648, %v3359_v12  ;;  %vm1387_vm1 = vweird.f32 %v3359_v12 }
 0x3be   : > { %v1414_v53 = vadd.f32 %v2444_v8, %v1413_v5  ;;  %vm1457_vm10 = vweird.f32 %v3432_v14 }
 0x3bf   : > { %v3455_v5 = vpop.eup %2449  ;;  %v1796_v46 = vadd.f32 %v3400_v48, %v1795_v61  ;;  %v1394_v58 = vor.u32 1.1754944e-38, %v1393_v59 }
 0x3c0   : > { %v1418_v20 = vsel %vm1417_vm3, %v2444_v8, %v1414_v53  ;;  %v1497_v8 = vmul.f32 %v1437_v16, %v1369_v62  ;;  %v1453_v51 = vmul.f32 %v3455_v5, %v3432_v14  ;;  %v1385_v62 = vmul.f32 %v3430_v3, %v1384_v31  ;;  %vm3502_vm3 = vmor %vm1387_vm1, %vm1388_vm15 }
 0x3c1   : > { %v1423_v28 = vsel %vm1420_vm4, %v1422_v50, %v1418_v20  ;;  %v3440_v42 = vpop.xlane.xlu2 %656  ;;  %v3474_v49 = vpop.eup %2451  ;;  %v1801_v50 = vand.u32 2147483647, %v3349_v18  ;;  %v1800_v10 = vsel %vm3480_vm12, %v3400_v48, %v1796_v46  ;;  %v1804_v18 = vor.u32 1.1754944e-38, %v1803_v0 }
 0x3c2   : > { %v1496_v34 = vmul.f32 %v1423_v28, %v1367_v6  ;;  %v1700_v27 = vpop.f32.mrf.mxu2  ;;  %v1809_v6 = vmul.f32 %v3385_v35, %v1808_v7  ;;  %v3469_v53 = vpop.f32.mrf.mxu3  ;;  %v1751_v28 = vmul.f32 %v3474_v49, %v3345_v29  ;;  %v1454_v33 = vsub.f32 1.0, %v1453_v51 }
 0x3c3   : > { %v3445_v13 = vmul.f32 %v1791_v52, %v1700_v27  ;;  %vm1802_vm14 = vcmp.eq.f32.partialorder %v1801_v50, 8.507059e+37  ;;  %vm1458_vm8 = vweird.f32 %v3455_v5  ;;  %vm1755_vm1 = vweird.f32 %v3345_v29 }
 0x3c4   : > { %v2319_v22 = vpack.i.bf16 %v1497_v8, %v1496_v34  ;;  %v1810_v36 = vadd.f32 %v3385_v35, %v1809_v6  ;;  %v1805_v8 = vsel %vm1802_vm14, %v1804_v18, %v1800_v10  ;;  %v1752_v54 = vsub.f32 1.0, %v1751_v28  ;;  %vm3534_vm12 = vmor %vm1457_vm10, %vm1458_vm8 }
 0x3c5   : > { %v2339_v23 = vpack.i.bf16 %v3445_v13, %v3443_v21  ;;  %v1391_v6 = vand.u32 2147483647, %v3359_v12  ;;  %v1455_v61 = vmul.f32 %v3455_v5, %v1454_v33 }
 0x3c6   : > { %2320 = vrot.lane.b32.xlu1 %v2319_v22, %s2519_s28  ;;  %v1814_v20 = vsel %vm1813_vm11, %v3385_v35, %v1810_v36  ;;  %v1386_v35 = vadd.f32 %v3430_v3, %v1385_v62  ;;  %v1753_v16 = vmul.f32 %v3474_v49, %v1752_v54  ;;  %vm1756_vm11 = vweird.f32 %v3474_v49 }
 0x3c7   : > { %v1819_v34 = vsel %vm1816_vm13, %v1818_v44, %v1814_v20  ;;  %vm1392_vm6 = vcmp.eq.f32.partialorder %v1391_v6, 8.507059e+37  ;;  %v1456_v10 = vadd.f32 %v3455_v5, %v1455_v61 }
 0x3c8   : > { %v1390_v12 = vsel %vm3502_vm3, %v3430_v3, %v1386_v35  ;;  %v1754_v54 = vadd.f32 %v3474_v49, %v1753_v16 }
 0x3c9   : > { %v3457_v11 = vpop.xlane.xlu2 %1305 }
 0x3ca   : > { %2453 = vrcp.f32 %v3457_v11  ;;  %v1703_v15 = vpop.f32.mrf.mxu2  ;;  %v1407_v46 = vand.u32 2147483648, %v3457_v11  ;;  %v1405_v51 = vand.u32 2147483647, %v3457_v11  ;;  %v1374_v0 = vpop.f32.mrf.mxu3  ;;  %vm1401_vm5 = vweird.f32 %v3457_v11 }
 0x3cb   : > { %2455 = vrcp.f32 %v3459_v39  ;;  %v1826_v52 = vmul.f32 %v1805_v8, %v1703_v15 }
 0x3cc   : > { %v1408_v44 = vor.u32 1.1754944e-38, %v1407_v46  ;;  %vm1406_vm9 = vcmp.eq.f32.partialorder %v1405_v51, 8.507059e+37 }
 0x3d0   : > { %v2454_v38 = vpop.eup %2453 }
 0x3d1   : > { %v1397_v1 = vmul.f32 %v2454_v38, %v3457_v11  ;;  %v3491_v7 = vpop.xlane.xlu2 %1314  ;;  %v3496_v27 = vpop.eup %2455  ;;  %vm1402_vm4 = vweird.f32 %v2454_v38  ;;  %v1395_v11 = vsel %vm1392_vm6, %v1394_v58, %v1390_v12  ;;  %v1761_v58 = vand.u32 2147483648, %v3345_v29 }
 0x3d2   : > { %2457 = vrcp.f32 %v3491_v7  ;;  %v1705_v48 = vpop.f32.mrf.mxu2  ;;  %v1467_v15 = vmul.f32 %v3496_v27, %v3459_v39  ;;  %vm3516_vm7 = vmor %vm1401_vm5, %vm1402_vm4  ;;  %v1494_v59 = vmul.f32 %v1395_v11, %v3361_v47  ;;  %vm1443_vm15 = vweird.f32 %v3491_v7  ;;  %v1377_v46 = vpop.f32.mrf.mxu3 }
 0x3d3   : > { %v1398_v24 = vsub.f32 1.0, %v1397_v1  ;;  %v1827_v22 = vmul.f32 %v1819_v34, %v1705_v48  ;;  %v1463_v1 = vand.u32 2147483648, %v3432_v14  ;;  %v1461_v34 = vand.u32 2147483647, %v3432_v14  ;;  %vm3552_vm4 = vmor %vm1755_vm1, %vm1756_vm11 }
 0x3d4   : > { %v1468_v18 = vsub.f32 1.0, %v1467_v15  ;;  %v1460_v14 = vsel %vm3534_vm12, %v3455_v5, %v1456_v10  ;;  %v1759_v15 = vand.u32 2147483647, %v3345_v29  ;;  %v1758_v12 = vsel %vm3552_vm4, %v3474_v49, %v1754_v54 }
 0x3d5   : > { %v1399_v36 = vmul.f32 %v2454_v38, %v1398_v24  ;;  %v2344_v45 = vpack.i.bf16 %v1827_v22, %v1826_v52  ;;  %v1447_v22 = vand.u32 2147483647, %v3491_v7  ;;  %v1464_v6 = vor.u32 1.1754944e-38, %v1463_v1 }
 0x3d6   : > { %v1469_v61 = vmul.f32 %v3496_v27, %v1468_v18  ;;  %vm1462_vm14 = vcmp.eq.f32.partialorder %v1461_v34, 8.507059e+37  ;;  %vm1472_vm6 = vweird.f32 %v3496_v27  ;;  %v1762_v18 = vor.u32 1.1754944e-38, %v1761_v58 }
 0x3d7   : > { %v1400_v50 = vadd.f32 %v2454_v38, %v1399_v36  ;;  %2345 = vrot.lane.b32.xlu1 %v2344_v45, %s2517_s26  ;;  %vm1448_vm5 = vcmp.eq.f32.partialorder %v1447_v22, 8.507059e+37  ;;  %vm1760_vm10 = vcmp.eq.f32.partialorder %v1759_v15, 8.507059e+37  ;;  %v753_v15 = vand.u32 2147483647, %v3353_v4 }
 0x3d8   : > { %v2458_v62 = vpop.eup %2457 }
 0x3d9   : > { %v1439_v3 = vmul.f32 %v2458_v62, %v3491_v7  ;;  %v3523_v28 = vpop.xlane.xlu2 %1323  ;;  %v1404_v33 = vsel %vm3516_vm7, %v2454_v38, %v1400_v50  ;;  %v1449_v38 = vand.u32 2147483648, %v3491_v7  ;;  %vm1444_vm13 = vweird.f32 %v2458_v62 }
 0x3da   : > { %2459 = vrcp.f32 %v3523_v28  ;;  %v1409_v8 = vsel %vm1406_vm9, %v1408_v44, %v1404_v33  ;;  %vm1445_vm3 = vmor %vm1443_vm15, %vm1444_vm13  ;;  %v1470_v50 = vadd.f32 %v3496_v27, %v1469_v61  ;;  %vm1471_vm7 = vweird.f32 %v3459_v39 }
 0x3db   : > { %v1440_v35 = vsub.f32 1.0, %v1439_v3  ;;  %v1495_v24 = vmul.f32 %v1409_v8, %v3371_v25  ;;  %v1465_v25 = vsel %vm1462_vm14, %v1464_v6, %v1460_v14  ;;  %v1450_v5 = vor.u32 1.1754944e-38, %v1449_v38  ;;  %vm1473_vm9 = vmor %vm1471_vm7, %vm1472_vm6  ;;  %v1379_v38 = vpop.f32.mrf.mxu3 }
 0x3dc   : > { %v1499_v20 = vmul.f32 %v1465_v25, %v1374_v0  ;;  %v1475_v3 = vand.u32 2147483647, %v3459_v39  ;;  %v1491_v11 = vand.u32 2147483648, %v3523_v28  ;;  %v1489_v29 = vand.u32 2147483647, %v3523_v28 }
 0x3dd   : > { %v1441_v52 = vmul.f32 %v2458_v62, %v1440_v35  ;;  %v2314_v31 = vpack.i.bf16 %v1495_v24, %v1494_v59  ;;  %v1474_v0 = vsel %vm1473_vm9, %v3496_v27, %v1470_v50  ;;  %vm1485_vm11 = vweird.f32 %v3523_v28 }
 0x3de   : > { %vm1476_vm13 = vcmp.eq.f32.partialorder %v1475_v3, 8.507059e+37  ;;  %vm1490_vm14 = vcmp.eq.f32.partialorder %v1489_v29, 8.507059e+37  ;;  %2461 = vrcp.f32 %v3353_v4  ;;  %v741_v25 = vand.u32 2147483648, %v3378_v2 }
 0x3df   : > { %v1442_v36 = vadd.f32 %v2458_v62, %v1441_v52  ;;  %2315 = vrot.lane.b32.xlu2 %v2314_v31, %s2519_s28  ;;  %2463 = vrcp.f32 %v3378_v2  ;;  %vm754_vm7 = vcmp.eq.f32.partialorder %v753_v15, 8.507059e+37  ;;  %vm1940_vm9 = vcmask 785408  }
 0x3e0   : > { %v2460_v47 = vpop.eup %2459  ;;  %2465 = vrcp.f32 %v3440_v42 }
 0x3e1   : > { %v1481_v7 = vmul.f32 %v2460_v47, %v3523_v28  ;;  %v1446_v51 = vsel %vm1445_vm3, %v2458_v62, %v1442_v36  ;;  %v1477_v62 = vand.u32 2147483648, %v3459_v39  ;;  %vm1486_vm8 = vweird.f32 %v2460_v47 }
 0x3e2   : > { %v1451_v16 = vsel %vm1448_vm5, %v1450_v5, %v1446_v51  ;;  %vm1487_vm12 = vmor %vm1485_vm11, %vm1486_vm8  ;;  %v1492_v39 = vor.u32 1.1754944e-38, %v1491_v11  ;;  %2467 = vrcp.f32 %v3364_v60  ;;  %vm749_vm3 = vweird.f32 %v3353_v4  ;;  %v3603_v51 = vpop.permute.xlu2 %2295 }
 0x3e3   : > { %v1482_v10 = vsub.f32 1.0, %v1481_v7  ;;  %v1498_v44 = vmul.f32 %v1451_v16, %v3469_v53  ;;  %v1763_v53 = vsel %vm1760_vm10, %v1762_v18, %v1758_v12  ;;  %v1478_v34 = vor.u32 1.1754944e-38, %v1477_v62  ;;  %v3619_v18 = vpop.permute.xlu0 %2300 }
 0x3e4   : > { %v1823_v35 = vmul.f32 %v1763_v53, %v3380_v56  ;;  %v2462_v56 = vpop.eup %2461  ;;  %vm735_vm5 = vweird.f32 %v3378_v2  ;;  %v739_v7 = vand.u32 2147483647, %v3378_v2  ;;  %2469 = vrcp.f32 %v3355_v19 }
 0x3e5   : > { %v1483_v49 = vmul.f32 %v2460_v47, %v1482_v10  ;;  %v2324_v33 = vpack.i.bf16 %v1499_v20, %v1498_v44  ;;  %v1479_v48 = vsel %vm1476_vm13, %v1478_v34, %v1474_v0  ;;  %v2464_v28 = vpop.eup %2463  ;;  %v745_v22 = vmul.f32 %v2462_v56, %v3353_v4 }
 0x3e6   : > { %v1500_v24 = vmul.f32 %v1479_v48, %v1377_v46  ;;  %v2334_v27 = vpack.i.bf16 %v1823_v35, %v3338_v57  ;;  %v731_v57 = vmul.f32 %v2464_v28, %v3378_v2  ;;  %v3587_v21 = vpop.eup %2465  ;;  %vm750_vm15 = vweird.f32 %v2462_v56  ;;  %v2291_v46 = vpop.permute.xlu1 %2290 }
 0x3e7   : > { %v1484_v1 = vadd.f32 %v2460_v47, %v1483_v49  ;;  %2325 = vrot.lane.b32.xlu0 %v2324_v33, %s2519_s28  ;;  %v746_v54 = vsub.f32 1.0, %v745_v22  ;;  %vm736_vm1 = vweird.f32 %v2464_v28  ;;  %v815_v5 = vmul.f32 %v3587_v21, %v3440_v42  ;;  %vm3596_vm4 = vmor %vm749_vm3, %vm750_vm15 }
 0x3e8   : > { %v732_v6 = vsub.f32 1.0, %v731_v57  ;;  %v3589_v13 = vpop.eup %2467  ;;  %vm737_vm6 = vmor %vm735_vm5, %vm736_vm1  ;;  %v742_v20 = vor.u32 1.1754944e-38, %v741_v25  ;;  %vm740_vm8 = vcmp.eq.f32.partialorder %v739_v7, 8.507059e+37  ;;  %v2293_v2 = vunpack.i.h.bf16 %v2291_v46 }
 0x3e9   : > { %v1488_v8 = vsel %vm1487_vm12, %v2460_v47, %v1484_v1  ;;  %v747_v61 = vmul.f32 %v2462_v56, %v746_v54  ;;  %v755_v47 = vand.u32 2147483648, %v3353_v4  ;;  %v829_v12 = vmul.f32 %v3589_v13, %v3364_v60 }
 0x3ea   : > { %v1493_v59 = vsel %vm1490_vm14, %v1492_v39, %v1488_v8  ;;  %v733_v31 = vmul.f32 %v2464_v28, %v732_v6  ;;  %v816_v10 = vsub.f32 1.0, %v815_v5  ;;  %v2292_v62 = vunpack.i.l.bf16 %v2291_v46 }
 0x3eb   : > { %v1501_v14 = vmul.f32 %v1493_v59, %v1379_v38  ;;  %v756_v16 = vor.u32 1.1754944e-38, %v755_v47  ;;  %v830_v44 = vsub.f32 1.0, %v829_v12  ;;  %2471 = vrcp.f32 %v3351_v55  ;;  %v3629_v59 = vpop.eup %2469  ;;  %v2306_v46 = vpop.permute.xlu0 %2305 }
 0x3ec   : > { %v734_v36 = vadd.f32 %v2464_v28, %v733_v31  ;;  %v817_v11 = vmul.f32 %v3587_v21, %v816_v10  ;;  %2473 = vrcp.f32 %v3357_v30  ;;  %vm820_vm10 = vweird.f32 %v3587_v21 }
 0x3ed   : > { %v2329_v52 = vpack.i.bf16 %v1501_v14, %v1500_v24  ;;  %v831_v1 = vmul.f32 %v3589_v13, %v830_v44  ;;  %vm834_vm11 = vweird.f32 %v3589_v13  ;;  %v825_v24 = vand.u32 2147483648, %v3440_v42 }
 0x3ee   : > { %v738_v50 = vsel %vm737_vm6, %v2464_v28, %v734_v36  ;;  %v2311_v49 = vpop.permute.xlu1 %2310  ;;  %v818_v38 = vadd.f32 %v3587_v21, %v817_v11  ;;  %vm819_vm12 = vweird.f32 %v3440_v42  ;;  %v823_v28 = vand.u32 2147483647, %v3440_v42 }
 0x3ef   : > { %2330 = vrot.lane.b32.xlu2 %v2329_v52, %s2519_s28  ;;  %2335 = vrot.lane.b32.xlu0 %v2334_v27, %s2517_s26  ;;  %v743_v3 = vsel %vm740_vm8, %v742_v20, %v738_v50  ;;  %v2313_v8 = vunpack.i.h.bf16 %v2311_v49  ;;  %v2312_v48 = vunpack.i.l.bf16 %v2311_v49  ;;  %v839_v54 = vand.u32 2147483648, %v3364_v60  ;;  %vm821_vm13 = vmor %vm819_vm12, %vm820_vm10 }
 0x3f0   : > { %v842_v29 = vmul.f32 %v743_v3, %v2863_v63  ;;  %2475 = vrcp.f32 %v3392_v40  ;;  %v801_v6 = vmul.f32 %v3629_v59, %v3355_v19  ;;  %vm833_vm14 = vweird.f32 %v3364_v60 }
 0x3f1   : > { %v3640_v52 = vpop.eup %2471  ;;  %v822_v31 = vsel %vm821_vm13, %v3587_v21, %v818_v38  ;;  %vm835_vm15 = vmor %vm833_vm14, %vm834_vm11  ;;  %vm824_vm1 = vcmp.eq.f32.partialorder %v823_v28, 8.507059e+37  ;;  %v840_v25 = vor.u32 1.1754944e-38, %v839_v54  ;;  %v2308_v12 = vunpack.i.h.bf16 %v2306_v46 }
 0x3f2   : > { %v1924_v39 = vsel %vm526_vm0, %v842_v29, %v2292_v62  ;;  %v3645_v57 = vpop.eup %2473  ;;  %v802_v45 = vsub.f32 1.0, %v801_v6  ;;  %v759_v50 = vmul.f32 %v3640_v52, %v3351_v55  ;;  %vm805_vm6 = vweird.f32 %v3355_v19 }
 0x3f3   : > { %v787_v36 = vmul.f32 %v3645_v57, %v3357_v30  ;;  %vm792_vm5 = vweird.f32 %v3645_v57  ;;  %v797_v38 = vand.u32 2147483648, %v3357_v30  ;;  %vm791_vm8 = vweird.f32 %v3357_v30 }
 0x3f4   : > { %vm793_vm10 = vmor %vm791_vm8, %vm792_vm5  ;;  %vm764_vm12 = vweird.f32 %v3640_v52 }
 0x3f5   : > { %v788_v15 = vsub.f32 1.0, %v787_v36  ;;  %v798_v28 = vor.u32 1.1754944e-38, %v797_v38  ;;  %v781_v36 = vand.u32 2147483647, %v3392_v40 }
 0x3f7   : > { %2340 = vrot.lane.b32.xlu2 %v2339_v23, %s2517_s26  ;;  %v748_v23 = vadd.f32 %v2462_v56, %v747_v61  ;;  %v837_v61 = vand.u32 2147483647, %v3364_v60  ;;  %v3664_v60 = vpop.eup %2475 }
 0x3f8   : > { %vm778_vm14 = vweird.f32 %v3664_v60 }
 0x3f9   : > { %v752_v58 = vsel %vm3596_vm4, %v2462_v56, %v748_v23  ;;  %v832_v56 = vadd.f32 %v3589_v13, %v831_v1  ;;  %v826_v23 = vor.u32 1.1754944e-38, %v825_v24  ;;  %vm838_vm3 = vcmp.eq.f32.partialorder %v837_v61, 8.507059e+37 }
 0x3fa   : > { %v757_v4 = vsel %vm754_vm7, %v756_v16, %v752_v58  ;;  %v2307_v58 = vunpack.i.l.bf16 %v2306_v46  ;;  %v803_v16 = vmul.f32 %v3629_v59, %v802_v45  ;;  %vm806_vm4 = vweird.f32 %v3629_v59 }
 0x3fb   : > { %v843_v33 = vmul.f32 %v757_v4, %v2867_v9  ;;  %v836_v47 = vsel %vm835_vm15, %v3589_v13, %v832_v56  ;;  %v827_v5 = vsel %vm824_vm1, %v826_v23, %v822_v31  ;;  %v773_v13 = vmul.f32 %v3664_v60, %v3392_v40  ;;  %vm807_vm7 = vmor %vm805_vm6, %vm806_vm4 }
 0x3fc   : > { %v841_v21 = vsel %vm838_vm3, %v840_v25, %v836_v47  ;;  %v848_v7 = vmul.f32 %v827_v5, %v2921_v41  ;;  %v789_v41 = vmul.f32 %v3645_v57, %v788_v15  ;;  %vm763_vm15 = vweird.f32 %v3351_v55 }
 0x3fd   : > { %v1925_v35 = vsel %vm526_vm0, %v843_v33, %v2293_v2  ;;  %v849_v20 = vmul.f32 %v841_v21, %v2923_v43  ;;  %v2302_v61 = vunpack.i.l.bf16 %v3619_v18  ;;  %vm3704_vm1 = vmor %vm763_vm15, %vm764_vm12  ;;  %v767_v23 = vand.u32 2147483647, %v3351_v55 }
 0x3fe   : > { %v1930_v49 = vsel %vm526_vm0, %v848_v7, %v2307_v58  ;;  %vm777_vm3 = vweird.f32 %v3392_v40  ;;  %vm782_vm6 = vcmp.eq.f32.partialorder %v781_v36, 8.507059e+37 }
 0x3ff   : > { %v1931_v11 = vsel %vm526_vm0, %v849_v20, %v2308_v12  ;;  %vm3714_vm4 = vmor %vm777_vm3, %vm778_vm14  ;;  %vm768_vm5 = vcmp.eq.f32.partialorder %v767_v23, 8.507059e+37 }
 0x438   : > { %v3656_v42 = vpop.permute.xlu1 %2320 }
 0x439   : > { %v2316_v0 = vpop.permute.xlu2 %2315 }
 0x43a   : > { %v2318_v53 = vunpack.i.h.bf16 %v2316_v0  ;;  %v2317_v34 = vunpack.i.l.bf16 %v2316_v0  ;;  %v760_v0 = vsub.f32 1.0, %v759_v50 }
 0x43c   : > { %v1932_v63 = vsel %vm588_vm2, %v1924_v39, %v2317_v34  ;;  %v1933_v9 = vsel %vm588_vm2, %v1925_v35, %v2318_v53  ;;  %v804_v53 = vadd.f32 %v3629_v59, %v803_v16  ;;  %v774_v34 = vsub.f32 1.0, %v773_v13 }
 0x43d   : > { %v1941_v14 = vsel %vm1940_vm9, %v1932_v63, %v2312_v48  ;;  %v1942_v27 = vsel %vm1940_vm9, %v1933_v9, %v2313_v8  ;;  %v811_v35 = vand.u32 2147483648, %v3355_v19  ;;  %v790_v8 = vadd.f32 %v3645_v57, %v789_v41 }
 0x43e   : > { %v2225_v22 = vpack.c.bf16 %v1942_v27, %v1941_v14  ;;  %v809_v48 = vand.u32 2147483647, %v3355_v19  ;;  %v761_v63 = vmul.f32 %v3640_v52, %v760_v0  ;;  %v795_v9 = vand.u32 2147483647, %v3357_v30 }
 0x43f   : > { %v808_v24 = vsel %vm807_vm7, %v3629_v59, %v804_v53  ;;  %v775_v14 = vmul.f32 %v3664_v60, %v774_v34  ;;  %v812_v27 = vor.u32 1.1754944e-38, %v811_v35  ;;  %v794_v56 = vsel %vm793_vm10, %v3645_v57, %v790_v8 }
 0x440   : > { %2226 = vst [vmem:[%s3636_s5] sm:$0xff] %v2225_v22   ;;  %v769_v19 = vand.u32 2147483648, %v3351_v55  ;;  %vm810_vm11 = vcmp.eq.f32.partialorder %v809_v48, 8.507059e+37  ;;  %v762_v22 = vadd.f32 %v3640_v52, %v761_v63  ;;  %vm796_vm13 = vcmp.eq.f32.partialorder %v795_v9, 8.507059e+37 }
 0x441   : > { %v813_v54 = vsel %vm810_vm11, %v812_v27, %v808_v24  ;;  %v799_v6 = vsel %vm796_vm13, %v798_v28, %v794_v56  ;;  %v776_v30 = vadd.f32 %v3664_v60, %v775_v14  ;;  %v783_v59 = vand.u32 2147483648, %v3392_v40 }
 0x442   : > { %v2303_v57 = vunpack.i.h.bf16 %v3619_v18  ;;  %v766_v25 = vsel %vm3704_vm1, %v3640_v52, %v762_v22  ;;  %v770_v5 = vor.u32 1.1754944e-38, %v769_v19  ;;  %v846_v18 = vmul.f32 %v799_v6, %v2903_v32 }
 0x443   : > { %v847_v45 = vmul.f32 %v813_v54, %v2911_v37  ;;  %v780_v55 = vsel %vm3714_vm4, %v3664_v60, %v776_v30  ;;  %v784_v40 = vor.u32 1.1754944e-38, %v783_v59 }
 0x444   : > { %v1928_v52 = vsel %vm526_vm0, %v846_v18, %v2302_v61  ;;  %v771_v16 = vsel %vm768_vm5, %v770_v5, %v766_v25 }
 0x445   : > { %v1929_v12 = vsel %vm526_vm0, %v847_v45, %v2303_v57  ;;  %v785_v13 = vsel %vm782_vm6, %v784_v40, %v780_v55  ;;  %v844_v41 = vmul.f32 %v771_v16, %v2878_v17 }
 0x449   : > { %v2331_v10 = vpop.permute.xlu2 %2330  ;;  %v2346_v4 = vpop.permute.xlu1 %2345 }
 0x44a   : > { %v2333_v44 = vunpack.i.h.bf16 %v2331_v10  ;;  %v2332_v3 = vunpack.i.l.bf16 %v2331_v10  ;;  %v2348_v2 = vunpack.i.h.bf16 %v2346_v4  ;;  %v2347_v62 = vunpack.i.l.bf16 %v2346_v4 }
 0x44b   : > { %v2298_v10 = vunpack.i.h.bf16 %v3603_v51  ;;  %v2297_v4 = vunpack.i.l.bf16 %v3603_v51 }
 0x44c   : > { %v1938_v29 = vsel %vm588_vm2, %v1930_v49, %v2332_v3  ;;  %v1939_v33 = vsel %vm588_vm2, %v1931_v11, %v2333_v44  ;;  %v2323_v3 = vunpack.i.h.bf16 %v3656_v42 }
 0x44d   : > { %v1947_v43 = vsel %vm1940_vm9, %v1938_v29, %v2347_v62  ;;  %v1948_v1 = vsel %vm1940_vm9, %v1939_v33, %v2348_v2  ;;  %v2322_v2 = vunpack.i.l.bf16 %v3656_v42  ;;  %v845_v62 = vmul.f32 %v785_v13, %v2890_v26 }
 0x44e   : > { %v2240_v39 = vpack.c.bf16 %v1948_v1, %v1947_v43  ;;  %v1926_v29 = vsel %vm526_vm0, %v844_v41, %v2297_v4 }
 0x44f   : > { %v1927_v49 = vsel %vm526_vm0, %v845_v62, %v2298_v10  ;;  %v1934_v43 = vsel %vm588_vm2, %v1926_v29, %v2322_v2 }
 0x450   : > { %2244 = vst [vmem:[%s3636_s5 + $0x18] sm:$0xff] %v2240_v39   ;;  %v1935_v51 = vsel %vm588_vm2, %v1927_v49, %v2323_v3 }
 0x451   : > { %v2341_v47 = vpop.permute.xlu2 %2340 }
 0x452   : > { %v2343_v58 = vunpack.i.h.bf16 %v2341_v47  ;;  %v2342_v50 = vunpack.i.l.bf16 %v2341_v47 }
 0x459   : > { %v2326_v21 = vpop.permute.xlu0 %2325 }
 0x45a   : > { %v2328_v15 = vunpack.i.h.bf16 %v2326_v21  ;;  %v2327_v7 = vunpack.i.l.bf16 %v2326_v21 }
 0x45c   : > { %v1936_v32 = vsel %vm588_vm2, %v1928_v52, %v2327_v7  ;;  %v1937_v37 = vsel %vm588_vm2, %v1929_v12, %v2328_v15 }
 0x45d   : > { %v1945_v60 = vsel %vm1940_vm9, %v1936_v32, %v2342_v50  ;;  %v1946_v20 = vsel %vm1940_vm9, %v1937_v37, %v2343_v58 }
 0x45e   : > { %v2235_v44 = vpack.c.bf16 %v1946_v20, %v1945_v60 }
 0x460   : > { %2243 = vst [vmem:[%s3636_s5 + $0x10] sm:$0xff] %v2235_v44  }
 0x461   : > { %v2336_v11 = vpop.permute.xlu0 %2335 }
 0x462   : > { %v2338_v33 = vunpack.i.h.bf16 %v2336_v11  ;;  %v2337_v0 = vunpack.i.l.bf16 %v2336_v11 }
 0x464   : > { %v1944_v1 = vsel %vm1940_vm9, %v1935_v51, %v2338_v33  ;;  %v1943_v42 = vsel %vm1940_vm9, %v1934_v43, %v2337_v0 }
 0x465   : > { %v2230_v53 = vpack.c.bf16 %v1944_v1, %v1943_v42 }
 0x467   : > { %2242 = vst [vmem:[%s3636_s5 + $0x8] sm:$0xff] %v2230_v53  }
 0x468 PF: > { %s13_s16 = sadd.s32 1, %s2515_s16   ;;  %s3801_s12 = smov %s2503_s13 }
 0x469   : > { %p10_p10 = scmp.ge.s32.totalorder %s13_s16, 4   ;;  %s3802_s13 = smov %s2579_s21 }
 0x46a   : > { %s3803_s14 = smov %s2511_s15  ;;  %s3804_s15 = smov %s3806_s17 }
 0x46b   :  { %12 = sbr.rel (!%p10_p10) target bundleno = 3 (0x3), region = 206 }

// kernel: eva_forward.16
= control target key start
LH: loop header
LB: loop body
LE: loop exit
PB: predicated region body
PF: predicated region fallthrough
CT: control target
= control target key end

     0   :  { %s1538_s1 = inlined_call_operand.vmem [shape: bf16[512,128], index: 1, kind: input, shape index: {}]   ;;  %s1539_s2 = inlined_call_operand.vmem [shape: f32[1,128], index: 2, kind: input, shape index: {}]   ;;  %s1540_s0 = inlined_call_operand.vmem [shape: bf16[128,512], index: 0, kind: input, shape index: {}]   ;;  %s1541_s3 = inlined_call_operand.vmem [shape: bf16[128,128], index: 3, kind: input, shape index: {}]   ;;  %s1542_s4 = inlined_call_operand.vmem [shape: bf16[128,128], index: 4, kind: output, shape index: {}]  }
   0x1   :  { %v1044_v0 = vld [vmem:[%s1538_s1 + $0x38] sm:$0xff]  ;;  %v1043_v4 = vld [vmem:[%s1538_s1 + $0x30] sm:$0xff]  ;;  %v1042_v8 = vld [vmem:[%s1538_s1 + $0x28] sm:$0xff] }
   0x2   :  { %v1052_v1 = vld [vmem:[%s1538_s1 + $0x78] sm:$0xff]  ;;  %469 = vmatpush.bf16.msra.mxu0 %v1044_v0  ;;  %v1051_v5 = vld [vmem:[%s1538_s1 + $0x70] sm:$0xff]  ;;  %v1050_v9 = vld [vmem:[%s1538_s1 + $0x68] sm:$0xff] }
   0x3   :  { %v1060_v2 = vld [vmem:[%s1538_s1 + $0xb8] sm:$0xff]  ;;  %518 = vmatpush.bf16.msra.mxu1 %v1052_v1  ;;  %v1059_v6 = vld [vmem:[%s1538_s1 + $0xb0] sm:$0xff]  ;;  %v1058_v10 = vld [vmem:[%s1538_s1 + $0xa8] sm:$0xff] }
   0x4   :  { %v1068_v3 = vld [vmem:[%s1538_s1 + $0xf8] sm:$0xff]  ;;  %567 = vmatpush.bf16.msra.mxu2 %v1060_v2  ;;  %v1067_v7 = vld [vmem:[%s1538_s1 + $0xf0] sm:$0xff]  ;;  %v1066_v11 = vld [vmem:[%s1538_s1 + $0xe8] sm:$0xff] }
   0x5   :  { %616 = vmatpush.bf16.msra.mxu3 %v1068_v3  ;;  %v1041_v12 = vld [vmem:[%s1538_s1 + $0x20] sm:$0xff]  ;;  %v1040_v16 = vld [vmem:[%s1538_s1 + $0x18] sm:$0xff]  ;;  %v1039_v20 = vld [vmem:[%s1538_s1 + $0x10] sm:$0xff] }
   0x6   :  { %470 = vmatpush.bf16.msra.mxu0 %v1043_v4  ;;  %v1049_v13 = vld [vmem:[%s1538_s1 + $0x60] sm:$0xff]  ;;  %v1048_v17 = vld [vmem:[%s1538_s1 + $0x58] sm:$0xff]  ;;  %v1047_v21 = vld [vmem:[%s1538_s1 + $0x50] sm:$0xff] }
   0x7   :  { %519 = vmatpush.bf16.msra.mxu1 %v1051_v5  ;;  %v1057_v14 = vld [vmem:[%s1538_s1 + $0xa0] sm:$0xff]  ;;  %v1056_v18 = vld [vmem:[%s1538_s1 + $0x98] sm:$0xff]  ;;  %v1055_v22 = vld [vmem:[%s1538_s1 + $0x90] sm:$0xff] }
   0x8   :  { %568 = vmatpush.bf16.msra.mxu2 %v1059_v6  ;;  %v1065_v15 = vld [vmem:[%s1538_s1 + $0xe0] sm:$0xff]  ;;  %v1064_v19 = vld [vmem:[%s1538_s1 + $0xd8] sm:$0xff]  ;;  %v1063_v23 = vld [vmem:[%s1538_s1 + $0xd0] sm:$0xff] }
   0x9   :  { %617 = vmatpush.bf16.msra.mxu3 %v1067_v7  ;;  %v1038_v24 = vld [vmem:[%s1538_s1 + $0x8] sm:$0xff]  ;;  %v1037_v28 = vld [vmem:[%s1538_s1] sm:$0xff]  ;;  %v1007_v33 = vld [vmem:[%s1540_s0 + $0xc] sm:$0xf0] }
   0xa   :  { %471 = vmatpush.bf16.msra.mxu0 %v1042_v8  ;;  %v1046_v25 = vld [vmem:[%s1538_s1 + $0x48] sm:$0xff]  ;;  %v1045_v29 = vld [vmem:[%s1538_s1 + $0x40] sm:$0xff]  ;;  %v753_v35 = vld [vmem:[%s1540_s0 + $0x10] sm:$0xf0] }
   0xb   :  { %520 = vmatpush.bf16.msra.mxu1 %v1050_v9  ;;  %v1054_v26 = vld [vmem:[%s1538_s1 + $0x88] sm:$0xff]  ;;  %v1053_v30 = vld [vmem:[%s1538_s1 + $0x80] sm:$0xff]  ;;  %v1008_v37 = vld [vmem:[%s1540_s0 + $0x14] sm:$0xf0] }
   0xc   :  { %569 = vmatpush.bf16.msra.mxu2 %v1058_v10  ;;  %v1062_v27 = vld [vmem:[%s1538_s1 + $0xc8] sm:$0xff]  ;;  %v1061_v31 = vld [vmem:[%s1538_s1 + $0xc0] sm:$0xff]  ;;  %v761_v39 = vld [vmem:[%s1540_s0 + $0x18] sm:$0xf0] }
   0xd   :  { %618 = vmatpush.bf16.msra.mxu3 %v1066_v11  ;;  %v751_v32 = vld [vmem:[%s1540_s0] sm:$0xf]  ;;  %v1005_v34 = vld [vmem:[%s1540_s0 + $0x4] sm:$0xf]  ;;  %v759_v36 = vld [vmem:[%s1540_s0 + $0x8] sm:$0xf] }
   0xe   :  { %472 = vmatpush.bf16.msra.mxu0 %v1041_v12  ;;  %v1006_v38 = vld [vmem:[%s1540_s0 + $0xc] sm:$0xf]  ;;  %v752_v40 = vor.u32 %v1007_v33, %v751_v32  ;;  %v756_v41 = vor.u32 %v1005_v34, %v753_v35  ;;  %v760_v42 = vor.u32 %v1008_v37, %v759_v36  ;;  %v767_v44 = vld [vmem:[%s1540_s0 + $0x20] sm:$0xf]  ;;  %v1011_v45 = vld [vmem:[%s1540_s0 + $0x2c] sm:$0xf0] }
   0xf   :  { %521 = vmatpush.bf16.msra.mxu1 %v1049_v13  ;;  %v764_v43 = vor.u32 %v1006_v38, %v761_v39  ;;  %v1009_v46 = vld [vmem:[%s1540_s0 + $0x24] sm:$0xf]  ;;  %v769_v47 = vld [vmem:[%s1540_s0 + $0x30] sm:$0xf0]  ;;  %v775_v48 = vld [vmem:[%s1540_s0 + $0x28] sm:$0xf]  ;;  %v768_v52 = vor.u32 %v1011_v45, %v767_v44 }
  0x10   :  { %570 = vmatpush.bf16.msra.mxu2 %v1057_v14  ;;  %v1012_v49 = vld [vmem:[%s1540_s0 + $0x34] sm:$0xf0]  ;;  %v1010_v50 = vld [vmem:[%s1540_s0 + $0x2c] sm:$0xf]  ;;  %v777_v51 = vld [vmem:[%s1540_s0 + $0x38] sm:$0xf0]  ;;  %v772_v53 = vor.u32 %v1009_v46, %v769_v47 }
  0x11   :  { %619 = vmatpush.bf16.msra.mxu3 %v1065_v15  ;;  %v776_v54 = vor.u32 %v1012_v49, %v775_v48  ;;  %v780_v55 = vor.u32 %v1010_v50, %v777_v51  ;;  %v783_v56 = vld [vmem:[%s1540_s0 + $0x40] sm:$0xf]  ;;  %v1015_v57 = vld [vmem:[%s1540_s0 + $0x4c] sm:$0xf0]  ;;  %v1013_v58 = vld [vmem:[%s1540_s0 + $0x44] sm:$0xf] }
  0x12   :  { %473 = vmatpush.bf16.msra.mxu0 %v1040_v16  ;;  %v785_v59 = vld [vmem:[%s1540_s0 + $0x50] sm:$0xf0]  ;;  %v791_v60 = vld [vmem:[%s1540_s0 + $0x48] sm:$0xf]  ;;  %v1016_v61 = vld [vmem:[%s1540_s0 + $0x54] sm:$0xf0]  ;;  %v784_v0 = vor.u32 %v1015_v57, %v783_v56 }
  0x13   :  { %522 = vmatpush.bf16.msra.mxu1 %v1048_v17  ;;  %v1014_v62 = vld [vmem:[%s1540_s0 + $0x4c] sm:$0xf]  ;;  %v793_v63 = vld [vmem:[%s1540_s0 + $0x58] sm:$0xf0]  ;;  %v788_v1 = vor.u32 %v1013_v58, %v785_v59  ;;  %v792_v2 = vor.u32 %v1016_v61, %v791_v60  ;;  %v799_v4 = vld [vmem:[%s1540_s0 + $0x60] sm:$0xf] }
  0x14   :  { %571 = vmatpush.bf16.msra.mxu2 %v1056_v18  ;;  %v796_v3 = vor.u32 %v1014_v62, %v793_v63  ;;  %v1019_v5 = vld [vmem:[%s1540_s0 + $0x6c] sm:$0xf0]  ;;  %v1017_v6 = vld [vmem:[%s1540_s0 + $0x64] sm:$0xf]  ;;  %v801_v7 = vld [vmem:[%s1540_s0 + $0x70] sm:$0xf0] }
  0x15   :  { %620 = vmatpush.bf16.msra.mxu3 %v1064_v19  ;;  %v807_v8 = vld [vmem:[%s1540_s0 + $0x68] sm:$0xf]  ;;  %v1020_v9 = vld [vmem:[%s1540_s0 + $0x74] sm:$0xf0]  ;;  %v1018_v10 = vld [vmem:[%s1540_s0 + $0x6c] sm:$0xf]  ;;  %v800_v12 = vor.u32 %v1019_v5, %v799_v4  ;;  %v804_v13 = vor.u32 %v1017_v6, %v801_v7 }
  0x16   :  { %474 = vmatpush.bf16.msra.mxu0 %v1039_v20  ;;  %v809_v11 = vld [vmem:[%s1540_s0 + $0x78] sm:$0xf0]  ;;  %v808_v14 = vor.u32 %v1020_v9, %v807_v8  ;;  %v815_v16 = vld [vmem:[%s1540_s0 + $0x80] sm:$0xf]  ;;  %v1023_v17 = vld [vmem:[%s1540_s0 + $0x8c] sm:$0xf0] }
  0x17   :  { %523 = vmatpush.bf16.msra.mxu1 %v1047_v21  ;;  %v812_v15 = vor.u32 %v1018_v10, %v809_v11  ;;  %v1021_v18 = vld [vmem:[%s1540_s0 + $0x84] sm:$0xf]  ;;  %v817_v19 = vld [vmem:[%s1540_s0 + $0x90] sm:$0xf0]  ;;  %v823_v20 = vld [vmem:[%s1540_s0 + $0x88] sm:$0xf] }
  0x18   :  { %572 = vmatpush.bf16.msra.mxu2 %v1055_v22  ;;  %v1024_v21 = vld [vmem:[%s1540_s0 + $0x94] sm:$0xf0]  ;;  %v1022_v22 = vld [vmem:[%s1540_s0 + $0x8c] sm:$0xf]  ;;  %v839_v32 = vld [vmem:[%s1540_s0 + $0xa8] sm:$0xf] }
  0x19   :  { %621 = vmatpush.bf16.msra.mxu3 %v1063_v23  ;;  %v825_v23 = vld [vmem:[%s1540_s0 + $0x98] sm:$0xf0]  ;;  %v1028_v33 = vld [vmem:[%s1540_s0 + $0xb4] sm:$0xf0]  ;;  %v1026_v34 = vld [vmem:[%s1540_s0 + $0xac] sm:$0xf] }
  0x1a   :  { %475 = vmatpush.bf16.msra.mxu0 %v1038_v24  ;;  %v816_v24 = vor.u32 %v1023_v17, %v815_v16  ;;  %v841_v35 = vld [vmem:[%s1540_s0 + $0xb8] sm:$0xf0]  ;;  %v840_v38 = vor.u32 %v1028_v33, %v839_v32  ;;  %v855_v44 = vld [vmem:[%s1540_s0 + $0xc8] sm:$0xf]  ;;  %v1032_v45 = vld [vmem:[%s1540_s0 + $0xd4] sm:$0xf0] }
  0x1b   :  { %524 = vmatpush.bf16.msra.mxu1 %v1046_v25  ;;  %v820_v25 = vor.u32 %v1021_v18, %v817_v19  ;;  %v844_v39 = vor.u32 %v1026_v34, %v841_v35  ;;  %v1030_v46 = vld [vmem:[%s1540_s0 + $0xcc] sm:$0xf]  ;;  %v857_v47 = vld [vmem:[%s1540_s0 + $0xd8] sm:$0xf0]  ;;  %v856_v50 = vor.u32 %v1032_v45, %v855_v44  ;;  %v871_v56 = vld [vmem:[%s1540_s0 + $0xe8] sm:$0xf] }
  0x1c   :  { %573 = vmatpush.bf16.msra.mxu2 %v1054_v26  ;;  %v824_v26 = vor.u32 %v1024_v21, %v823_v20  ;;  %v860_v51 = vor.u32 %v1030_v46, %v857_v47  ;;  %v1036_v57 = vld [vmem:[%s1540_s0 + $0xf4] sm:$0xf0]  ;;  %v1034_v58 = vld [vmem:[%s1540_s0 + $0xec] sm:$0xf]  ;;  %v873_v59 = vld [vmem:[%s1540_s0 + $0xf8] sm:$0xf0] }
  0x1d   :  { %622 = vmatpush.bf16.msra.mxu3 %v1062_v27  ;;  %v828_v27 = vor.u32 %v1022_v22, %v825_v23  ;;  %v872_v62 = vor.u32 %v1036_v57, %v871_v56  ;;  %v876_v63 = vor.u32 %v1034_v58, %v873_v59  ;;  %v1070_v11 = vld [vmem:[%s1541_s3] sm:$0xff]   ;;  %v1141_v33 = vld [vmem:[%s1541_s3 + $0x8] sm:$0xff]  }
  0x1e   :  { %476 = vmatpush.bf16.msra.mxu0 %v1037_v28  ;;  %v831_v28 = vld [vmem:[%s1540_s0 + $0xa0] sm:$0xf]  ;;  %v1071_v16 = vunpack.c.l.bf16 %v1070_v11  ;;  %v1072_v18 = vunpack.c.h.bf16 %v1070_v11 }
  0x1f   :  { %525 = vmatpush.bf16.msra.mxu1 %v1045_v29  ;;  %v1027_v29 = vld [vmem:[%s1540_s0 + $0xac] sm:$0xf0] }
  0x20   :  { %574 = vmatpush.bf16.msra.mxu2 %v1053_v30  ;;  %v1025_v30 = vld [vmem:[%s1540_s0 + $0xa4] sm:$0xf]  ;;  %v832_v36 = vor.u32 %v1027_v29, %v831_v28 }
  0x21   :  { %623 = vmatpush.bf16.msra.mxu3 %v1061_v31  ;;  %477 = vmatmul.bf16.vlgmr.msra.gmra.mxu0 %v752_v40  ;;  %v833_v31 = vld [vmem:[%s1540_s0 + $0xb0] sm:$0xf0]  ;;  %v847_v40 = vld [vmem:[%s1540_s0 + $0xc0] sm:$0xf] }
  0x22   :  { %526 = vmatmul.bf16.vlgmr.msra.gmra.mxu1 %v756_v41  ;;  %v836_v37 = vor.u32 %v1025_v30, %v833_v31  ;;  %v1031_v41 = vld [vmem:[%s1540_s0 + $0xcc] sm:$0xf0] }
  0x23   :  { %575 = vmatmul.bf16.vlgmr.msra.gmra.mxu2 %v760_v42  ;;  %v1029_v42 = vld [vmem:[%s1540_s0 + $0xc4] sm:$0xf]  ;;  %v848_v48 = vor.u32 %v1031_v41, %v847_v40  ;;  %v1076_v40 = vunpack.c.h.bf16 %v1141_v33 }
  0x24   :  { %624 = vmatmul.bf16.vlgmr.msra.gmra.mxu3 %v764_v43  ;;  %v849_v43 = vld [vmem:[%s1540_s0 + $0xd0] sm:$0xf0] }
  0x25   :  { %v852_v49 = vor.u32 %v1029_v42, %v849_v43 }
  0x31   :  { %482 = vmatmul.bf16.gmra.mxu0 %v768_v52  ;;  %v863_v52 = vld [vmem:[%s1540_s0 + $0xe0] sm:$0xf] }
  0x32   :  { %531 = vmatmul.bf16.gmra.mxu1 %v772_v53  ;;  %v1035_v53 = vld [vmem:[%s1540_s0 + $0xec] sm:$0xf0] }
  0x33   :  { %580 = vmatmul.bf16.gmra.mxu2 %v776_v54  ;;  %v1033_v54 = vld [vmem:[%s1540_s0 + $0xe4] sm:$0xf]  ;;  %v864_v60 = vor.u32 %v1035_v53, %v863_v52 }
  0x34   :  { %629 = vmatmul.bf16.gmra.mxu3 %v780_v55  ;;  %v865_v55 = vld [vmem:[%s1540_s0 + $0xf0] sm:$0xf0] }
  0x35   :  { %v868_v61 = vor.u32 %v1033_v54, %v865_v55  ;;  %v1142_v55 = vld [vmem:[%s1541_s3 + $0x10] sm:$0xff]  }
  0x41   :  { %487 = vmatmul.bf16.gmra.mxu0 %v784_v0  ;;  %v1472_v0 = vld [vmem:[%s1539_s2] ss:$0 sm:$0xff] }
  0x42   :  { %536 = vmatmul.bf16.gmra.mxu1 %v788_v1 }
  0x43   :  { %585 = vmatmul.bf16.gmra.mxu2 %v792_v2 }
  0x44   :  { %634 = vmatmul.bf16.gmra.mxu3 %v796_v3 }
  0x51   :  { %492 = vmatmul.bf16.gmra.mxu0 %v800_v12 }
  0x52   :  { %541 = vmatmul.bf16.gmra.mxu1 %v804_v13 }
  0x53   :  { %590 = vmatmul.bf16.gmra.mxu2 %v808_v14 }
  0x54   :  { %639 = vmatmul.bf16.gmra.mxu3 %v812_v15 }
  0x61   :  { %497 = vmatmul.bf16.gmra.mxu0 %v816_v24 }
  0x62   :  { %546 = vmatmul.bf16.gmra.mxu1 %v820_v25 }
  0x63   :  { %595 = vmatmul.bf16.gmra.mxu2 %v824_v26 }
  0x64   :  { %644 = vmatmul.bf16.gmra.mxu3 %v828_v27 }
  0x71   :  { %502 = vmatmul.bf16.gmra.mxu0 %v832_v36 }
  0x72   :  { %551 = vmatmul.bf16.gmra.mxu1 %v836_v37 }
  0x73   :  { %600 = vmatmul.bf16.gmra.mxu2 %v840_v38  ;;  %v1075_v38 = vunpack.c.l.bf16 %v1141_v33 }
  0x74   :  { %649 = vmatmul.bf16.gmra.mxu3 %v844_v39 }
  0x81   :  { %507 = vmatmul.bf16.gmra.mxu0 %v848_v48 }
  0x82   :  { %556 = vmatmul.bf16.gmra.mxu1 %v852_v49 }
  0x83   :  { %605 = vmatmul.bf16.gmra.mxu2 %v856_v50 }
  0x84   :  { %654 = vmatmul.bf16.gmra.mxu3 %v860_v51 }
  0x91   :  { %512 = vmatmul.bf16.gmra.mxu0 %v864_v60  ;;  %v1079_v60 = vunpack.c.l.bf16 %v1142_v55 }
  0x92   :  { %561 = vmatmul.bf16.gmra.mxu1 %v868_v61 }
  0x93   :  { %610 = vmatmul.bf16.gmra.mxu2 %v872_v62  ;;  %v1080_v62 = vunpack.c.h.bf16 %v1142_v55 }
  0x94   :  { %659 = vmatmul.bf16.gmra.mxu3 %v876_v63 }
  0x9e   :  { %v478_v1 = vpop.f32.mrf.mxu0 }
  0x9f   :  { %v527_v2 = vpop.f32.mrf.mxu1  ;;  %v479_v3 = vadd.f32 %v1472_v0, %v478_v1 }
  0xa1   :  { %v528_v6 = vadd.f32 %v527_v2, %v479_v3 }
  0xa6   :  { %v576_v4 = vpop.f32.mrf.mxu2  ;;  %v480_v7 = vpop.f32.mrf.mxu0 }
  0xa7   :  { %v625_v5 = vpop.f32.mrf.mxu3  ;;  %v529_v8 = vpop.f32.mrf.mxu1  ;;  %v481_v9 = vadd.f32 %v1472_v0, %v480_v7  ;;  %v577_v10 = vadd.f32 %v576_v4, %v528_v6 }
  0xa9   :  { %v530_v12 = vadd.f32 %v529_v8, %v481_v9  ;;  %v626_v15 = vadd.f32 %v625_v5, %v577_v10 }
  0xab   :  { %v697_v22 = vadd.f32 %v1071_v16, %v626_v15 }
  0xae   :  { %v578_v13 = vpop.f32.mrf.mxu2  ;;  %v483_v19 = vpop.f32.mrf.mxu0 }
  0xaf   :  { %v627_v14 = vpop.f32.mrf.mxu3  ;;  %v579_v17 = vadd.f32 %v578_v13, %v530_v12  ;;  %v532_v20 = vpop.f32.mrf.mxu1  ;;  %v484_v24 = vadd.f32 %v1472_v0, %v483_v19 }
  0xb1   :  { %v628_v21 = vadd.f32 %v627_v14, %v579_v17  ;;  %v533_v28 = vadd.f32 %v532_v20, %v484_v24  ;;  %v1143_v14 = vld [vmem:[%s1541_s3 + $0x18] sm:$0xff]  }
  0xb2   :  { %v1083_v19 = vunpack.c.l.bf16 %v1143_v14 }
  0xb3   :  { %v698_v23 = vadd.f32 %v1072_v18, %v628_v21  ;;  %v1084_v21 = vunpack.c.h.bf16 %v1143_v14 }
  0xb5   :  { %v1104_v25 = vpack.c.bf16 %v698_v23, %v697_v22 }
  0xb6   :  { %v581_v26 = vpop.f32.mrf.mxu2  ;;  %v485_v29 = vpop.f32.mrf.mxu0 }
  0xb7   :  { %v630_v27 = vpop.f32.mrf.mxu3  ;;  %1105 = vst [vmem:[%s1542_s4] sm:$0xff] %v1104_v25   ;;  %v534_v30 = vpop.f32.mrf.mxu1  ;;  %v486_v31 = vadd.f32 %v1472_v0, %v485_v29  ;;  %v582_v32 = vadd.f32 %v581_v26, %v533_v28 }
  0xb9   :  { %v535_v34 = vadd.f32 %v534_v30, %v486_v31  ;;  %v631_v37 = vadd.f32 %v630_v27, %v582_v32 }
  0xbb   :  { %v699_v44 = vadd.f32 %v1075_v38, %v631_v37 }
  0xbe   :  { %v583_v35 = vpop.f32.mrf.mxu2  ;;  %v488_v41 = vpop.f32.mrf.mxu0 }
  0xbf   :  { %v632_v36 = vpop.f32.mrf.mxu3  ;;  %v584_v39 = vadd.f32 %v583_v35, %v535_v34  ;;  %v537_v42 = vpop.f32.mrf.mxu1  ;;  %v489_v46 = vadd.f32 %v1472_v0, %v488_v41 }
  0xc1   :  { %v633_v43 = vadd.f32 %v632_v36, %v584_v39  ;;  %v538_v50 = vadd.f32 %v537_v42, %v489_v46  ;;  %v1144_v36 = vld [vmem:[%s1541_s3 + $0x20] sm:$0xff]  }
  0xc2   :  { %v1087_v41 = vunpack.c.l.bf16 %v1144_v36 }
  0xc3   :  { %v700_v45 = vadd.f32 %v1076_v40, %v633_v43  ;;  %v1088_v43 = vunpack.c.h.bf16 %v1144_v36 }
  0xc5   :  { %v1109_v47 = vpack.c.bf16 %v700_v45, %v699_v44 }
  0xc6   :  { %v586_v48 = vpop.f32.mrf.mxu2  ;;  %v490_v51 = vpop.f32.mrf.mxu0 }
  0xc7   :  { %v635_v49 = vpop.f32.mrf.mxu3  ;;  %1148 = vst [vmem:[%s1542_s4 + $0x8] sm:$0xff] %v1109_v47   ;;  %v539_v52 = vpop.f32.mrf.mxu1  ;;  %v491_v53 = vadd.f32 %v1472_v0, %v490_v51  ;;  %v587_v54 = vadd.f32 %v586_v48, %v538_v50 }
  0xc9   :  { %v540_v56 = vadd.f32 %v539_v52, %v491_v53  ;;  %v636_v59 = vadd.f32 %v635_v49, %v587_v54 }
  0xcb   :  { %v701_v3 = vadd.f32 %v1079_v60, %v636_v59 }
  0xce   :  { %v588_v57 = vpop.f32.mrf.mxu2  ;;  %v493_v63 = vpop.f32.mrf.mxu0 }
  0xcf   :  { %v637_v58 = vpop.f32.mrf.mxu3  ;;  %v589_v61 = vadd.f32 %v588_v57, %v540_v56  ;;  %v542_v1 = vpop.f32.mrf.mxu1  ;;  %v494_v5 = vadd.f32 %v1472_v0, %v493_v63 }
  0xd1   :  { %v638_v2 = vadd.f32 %v637_v58, %v589_v61  ;;  %v543_v9 = vadd.f32 %v542_v1, %v494_v5  ;;  %v1145_v58 = vld [vmem:[%s1541_s3 + $0x28] sm:$0xff]  }
  0xd2   :  { %v1091_v63 = vunpack.c.l.bf16 %v1145_v58 }
  0xd3   :  { %v702_v4 = vadd.f32 %v1080_v62, %v638_v2  ;;  %v1092_v2 = vunpack.c.h.bf16 %v1145_v58 }
  0xd5   :  { %v1114_v6 = vpack.c.bf16 %v702_v4, %v701_v3 }
  0xd6   :  { %v591_v7 = vpop.f32.mrf.mxu2  ;;  %v495_v10 = vpop.f32.mrf.mxu0 }
  0xd7   :  { %v640_v8 = vpop.f32.mrf.mxu3  ;;  %1149 = vst [vmem:[%s1542_s4 + $0x10] sm:$0xff] %v1114_v6   ;;  %v544_v11 = vpop.f32.mrf.mxu1  ;;  %v496_v12 = vadd.f32 %v1472_v0, %v495_v10  ;;  %v592_v13 = vadd.f32 %v591_v7, %v543_v9 }
  0xd9   :  { %v545_v15 = vadd.f32 %v544_v11, %v496_v12  ;;  %v641_v18 = vadd.f32 %v640_v8, %v592_v13 }
  0xdb   :  { %v703_v25 = vadd.f32 %v1083_v19, %v641_v18 }
  0xde   :  { %v593_v16 = vpop.f32.mrf.mxu2  ;;  %v498_v22 = vpop.f32.mrf.mxu0 }
  0xdf   :  { %v642_v17 = vpop.f32.mrf.mxu3  ;;  %v594_v20 = vadd.f32 %v593_v16, %v545_v15  ;;  %v547_v23 = vpop.f32.mrf.mxu1  ;;  %v499_v27 = vadd.f32 %v1472_v0, %v498_v22 }
  0xe1   :  { %v643_v24 = vadd.f32 %v642_v17, %v594_v20  ;;  %v548_v31 = vadd.f32 %v547_v23, %v499_v27  ;;  %v1146_v17 = vld [vmem:[%s1541_s3 + $0x30] sm:$0xff]  }
  0xe2   :  { %v1095_v22 = vunpack.c.l.bf16 %v1146_v17 }
  0xe3   :  { %v704_v26 = vadd.f32 %v1084_v21, %v643_v24  ;;  %v1096_v24 = vunpack.c.h.bf16 %v1146_v17 }
  0xe5   :  { %v1119_v28 = vpack.c.bf16 %v704_v26, %v703_v25 }
  0xe6   :  { %v596_v29 = vpop.f32.mrf.mxu2  ;;  %v500_v32 = vpop.f32.mrf.mxu0 }
  0xe7   :  { %v645_v30 = vpop.f32.mrf.mxu3  ;;  %1150 = vst [vmem:[%s1542_s4 + $0x18] sm:$0xff] %v1119_v28   ;;  %v549_v33 = vpop.f32.mrf.mxu1  ;;  %v501_v34 = vadd.f32 %v1472_v0, %v500_v32  ;;  %v597_v35 = vadd.f32 %v596_v29, %v548_v31 }
  0xe9   :  { %v550_v37 = vadd.f32 %v549_v33, %v501_v34  ;;  %v646_v40 = vadd.f32 %v645_v30, %v597_v35 }
  0xeb   :  { %v705_v47 = vadd.f32 %v1087_v41, %v646_v40 }
  0xee   :  { %v598_v38 = vpop.f32.mrf.mxu2  ;;  %v503_v44 = vpop.f32.mrf.mxu0 }
  0xef   :  { %v647_v39 = vpop.f32.mrf.mxu3  ;;  %v599_v42 = vadd.f32 %v598_v38, %v550_v37  ;;  %v552_v45 = vpop.f32.mrf.mxu1  ;;  %v504_v49 = vadd.f32 %v1472_v0, %v503_v44  ;;  %v1147_v38 = vld [vmem:[%s1541_s3 + $0x38] sm:$0xff]  }
  0xf1   :  { %v648_v46 = vadd.f32 %v647_v39, %v599_v42  ;;  %v553_v53 = vadd.f32 %v552_v45, %v504_v49  ;;  %v1100_v45 = vunpack.c.h.bf16 %v1147_v38 }
  0xf3   :  { %v706_v48 = vadd.f32 %v1088_v43, %v648_v46  ;;  %v1099_v43 = vunpack.c.l.bf16 %v1147_v38 }
  0xf5   :  { %v1124_v50 = vpack.c.bf16 %v706_v48, %v705_v47 }
  0xf6   :  { %v601_v51 = vpop.f32.mrf.mxu2  ;;  %v505_v54 = vpop.f32.mrf.mxu0 }
  0xf7   :  { %v650_v52 = vpop.f32.mrf.mxu3  ;;  %1151 = vst [vmem:[%s1542_s4 + $0x20] sm:$0xff] %v1124_v50   ;;  %v554_v55 = vpop.f32.mrf.mxu1  ;;  %v506_v56 = vadd.f32 %v1472_v0, %v505_v54  ;;  %v602_v57 = vadd.f32 %v601_v51, %v553_v53 }
  0xf9   :  { %v555_v59 = vadd.f32 %v554_v55, %v506_v56  ;;  %v651_v62 = vadd.f32 %v650_v52, %v602_v57 }
  0xfb   :  { %v707_v6 = vadd.f32 %v1091_v63, %v651_v62 }
  0xfe   :  { %v603_v60 = vpop.f32.mrf.mxu2  ;;  %v508_v3 = vpop.f32.mrf.mxu0 }
  0xff   :  { %v652_v61 = vpop.f32.mrf.mxu3  ;;  %v604_v1 = vadd.f32 %v603_v60, %v555_v59  ;;  %v557_v4 = vpop.f32.mrf.mxu1  ;;  %v509_v8 = vadd.f32 %v1472_v0, %v508_v3 }
 0x101   :  { %v653_v5 = vadd.f32 %v652_v61, %v604_v1  ;;  %v558_v12 = vadd.f32 %v557_v4, %v509_v8 }
 0x103   :  { %v708_v7 = vadd.f32 %v1092_v2, %v653_v5 }
 0x105   :  { %v1129_v9 = vpack.c.bf16 %v708_v7, %v707_v6 }
 0x106   :  { %v606_v10 = vpop.f32.mrf.mxu2  ;;  %v510_v13 = vpop.f32.mrf.mxu0 }
 0x107   :  { %v655_v11 = vpop.f32.mrf.mxu3  ;;  %1152 = vst [vmem:[%s1542_s4 + $0x28] sm:$0xff] %v1129_v9   ;;  %v559_v14 = vpop.f32.mrf.mxu1  ;;  %v511_v15 = vadd.f32 %v1472_v0, %v510_v13  ;;  %v607_v16 = vadd.f32 %v606_v10, %v558_v12 }
 0x109   :  { %v560_v18 = vadd.f32 %v559_v14, %v511_v15  ;;  %v656_v21 = vadd.f32 %v655_v11, %v607_v16 }
 0x10b   :  { %v709_v28 = vadd.f32 %v1095_v22, %v656_v21 }
 0x10e   :  { %v608_v19 = vpop.f32.mrf.mxu2  ;;  %v513_v25 = vpop.f32.mrf.mxu0 }
 0x10f   :  { %v657_v20 = vpop.f32.mrf.mxu3  ;;  %v609_v23 = vadd.f32 %v608_v19, %v560_v18  ;;  %v562_v27 = vpop.f32.mrf.mxu1  ;;  %v514_v30 = vadd.f32 %v1472_v0, %v513_v25 }
 0x111   :  { %v658_v26 = vadd.f32 %v657_v20, %v609_v23  ;;  %v563_v34 = vadd.f32 %v562_v27, %v514_v30 }
 0x113   :  { %v710_v29 = vadd.f32 %v1096_v24, %v658_v26 }
 0x115   :  { %v1134_v31 = vpack.c.bf16 %v710_v29, %v709_v28 }
 0x116   :  { %v611_v32 = vpop.f32.mrf.mxu2  ;;  %v515_v35 = vpop.f32.mrf.mxu0 }
 0x117   :  { %v660_v33 = vpop.f32.mrf.mxu3  ;;  %1153 = vst [vmem:[%s1542_s4 + $0x30] sm:$0xff] %v1134_v31   ;;  %v516_v36 = vadd.f32 %v1472_v0, %v515_v35  ;;  %v612_v37 = vadd.f32 %v611_v32, %v563_v34  ;;  %v564_v39 = vpop.f32.mrf.mxu1 }
 0x119   :  { %v565_v40 = vadd.f32 %v564_v39, %v516_v36  ;;  %v661_v42 = vadd.f32 %v660_v33, %v612_v37 }
 0x11b   :  { %v711_v48 = vadd.f32 %v1099_v43, %v661_v42 }
 0x11e   :  { %v613_v41 = vpop.f32.mrf.mxu2 }
 0x11f   :  { %v614_v44 = vadd.f32 %v613_v41, %v565_v40  ;;  %v662_v46 = vpop.f32.mrf.mxu3 }
 0x121   :  { %v663_v47 = vadd.f32 %v662_v46, %v614_v44 }
 0x123   :  { %v712_v49 = vadd.f32 %v1100_v45, %v663_v47 }
 0x125   :  { %v1139_v50 = vpack.c.bf16 %v712_v49, %v711_v48 }
 0x127   :  { %1154 = vst [vmem:[%s1542_s4 + $0x38] sm:$0xff] %v1139_v50  }

// kernel: eva_forward.15
= control target key start
LH: loop header
LB: loop body
LE: loop exit
PB: predicated region body
PF: predicated region fallthrough
CT: control target
= control target key end

     0   :  { %v2014_v11 = vmov 128.0   ;;  %s3187_s0 = inlined_call_operand.vmem [shape: bf16[128,128], index: 0, kind: input, shape index: {}]   ;;  %s3188_s1 = inlined_call_operand.vmem [shape: f32[1,128], index: 1, kind: input, shape index: {}]   ;;  %s3189_s2 = inlined_call_operand.vmem [shape: f32[1,128], index: 2, kind: input, shape index: {}]   ;;  %s3190_s3 = inlined_call_operand.vmem [shape: bf16[128,512], index: 3, kind: input, shape index: {}]   ;;  %s3191_s4 = inlined_call_operand.vmem [shape: f32[1,512], index: 4, kind: input, shape index: {}]   ;;  %s3192_s5 = inlined_call_operand.vmem [shape: bf16[128,512], index: 5, kind: output, shape index: {}]  }
   0x1   :  { %v1833_v0 = vld [vmem:[%s3187_s0 + $0x8] sm:$0xff]   ;;  %v1762_v1 = vld [vmem:[%s3187_s0] sm:$0xff]   ;;  %v1834_v2 = vld [vmem:[%s3187_s0 + $0x10] sm:$0xff]   ;;  %1850 = vrcp.f32 %v2014_v11 }
   0x2   :  { %v1767_v3 = vunpack.c.l.bf16 %v1833_v0  ;;  %v1763_v4 = vunpack.c.l.bf16 %v1762_v1  ;;  %v1771_v5 = vunpack.c.l.bf16 %v1834_v2  ;;  %v1768_v6 = vunpack.c.h.bf16 %v1833_v0  ;;  %v2057_v9 = vld [vmem:[%s3187_s0 + $0x18] sm:$0xff]   ;;  %v2089_v38 = vld [vmem:[%s3187_s0 + $0x20] sm:$0xff]   ;;  %v2104_v44 = vld [vmem:[%s3187_s0 + $0x28] sm:$0xff]  }
   0x3   :  { %v1764_v7 = vunpack.c.h.bf16 %v1762_v1  ;;  %v1772_v8 = vunpack.c.h.bf16 %v1834_v2  ;;  %v1775_v10 = vunpack.c.l.bf16 %v2057_v9  ;;  %v1776_v30 = vunpack.c.h.bf16 %v2057_v9  ;;  %v2120_v51 = vld [vmem:[%s3187_s0 + $0x30] sm:$0xff]   ;;  %v2136_v56 = vld [vmem:[%s3187_s0 + $0x38] sm:$0xff]   ;;  %v1707_v58 = vld [vmem:[%s3190_s3 + $0xe0] sm:$0xf] }
   0x4   :  { %60 = vadd.xlane.f32.xlu1 %v1767_v3  ;;  %56 = vadd.xlane.f32.xlu0 %v1763_v4  ;;  %v1779_v40 = vunpack.c.l.bf16 %v2089_v38  ;;  %v1784_v46 = vunpack.c.h.bf16 %v2104_v44  ;;  %v1780_v49 = vunpack.c.h.bf16 %v2089_v38  ;;  %v1787_v52 = vunpack.c.l.bf16 %v2120_v51  ;;  %v1759_v59 = vld [vmem:[%s3190_s3 + $0xec] sm:$0xf0]  ;;  %v1757_v60 = vld [vmem:[%s3190_s3 + $0xe4] sm:$0xf]  ;;  %v1709_v62 = vld [vmem:[%s3190_s3 + $0xf0] sm:$0xf0] }
   0x5   :  { %64 = vadd.xlane.f32.xlu2 %v1771_v5  ;;  %v1783_v54 = vunpack.c.l.bf16 %v2104_v44  ;;  %v1788_v55 = vunpack.c.h.bf16 %v2120_v51  ;;  %v1791_v57 = vunpack.c.l.bf16 %v2136_v56  ;;  %v1708_v61 = vor.u32 %v1759_v59, %v1707_v58  ;;  %v1715_v63 = vld [vmem:[%s3190_s3 + $0xe8] sm:$0xf]  ;;  %v1760_v0 = vld [vmem:[%s3190_s3 + $0xf4] sm:$0xf0]  ;;  %v1693_v11 = vld [vmem:[%s3190_s3 + $0xd0] sm:$0xf0] }
   0x6   :  { %v1712_v1 = vor.u32 %v1757_v60, %v1709_v62  ;;  %v1716_v2 = vor.u32 %v1760_v0, %v1715_v63  ;;  %v1746_v60 = vld [vmem:[%s3190_s3 + $0x8c] sm:$0xf]  ;;  %v1643_v0 = vld [vmem:[%s3190_s3 + $0x60] sm:$0xf] }
   0x7   :  { %v1851_v12 = vpop.eup %1850  ;;  %721 = vmatpush.bf16.msra.mxu0 %v1708_v61  ;;  %v1669_v61 = vld [vmem:[%s3190_s3 + $0x98] sm:$0xf0] }
   0x8   :  { %v89_v13 = vmul.f32 128.0, %v1851_v12  ;;  %vm93_vm0 = vweird.f32 %v1851_v12  ;;  %770 = vmatpush.bf16.msra.mxu1 %v1712_v1  ;;  %819 = vmatpush.bf16.msra.mxu2 %v1716_v2  ;;  %v1672_v62 = vor.u32 %v1746_v60, %v1669_v61  ;;  %v1743_v1 = vld [vmem:[%s3190_s3 + $0x6c] sm:$0xf0]  ;;  %v1741_v2 = vld [vmem:[%s3190_s3 + $0x64] sm:$0xf] }
   0xa   :  { %v90_v14 = vsub.f32 1.0, %v89_v13  ;;  %v1756_v13 = vld [vmem:[%s3190_s3 + $0xd4] sm:$0xf0] }
   0xc   :  { %62 = vadd.xlane.f32.xlu1 %v1768_v6  ;;  %58 = vadd.xlane.f32.xlu0 %v1764_v7  ;;  %v91_v15 = vmul.f32 %v1851_v12, %v90_v14 }
   0xd   :  { %66 = vadd.xlane.f32.xlu2 %v1772_v8 }
   0xe   :  { %v92_v16 = vadd.f32 %v1851_v12, %v91_v15 }
  0x10   :  { %v2060_v17 = vsel %vm93_vm0, %v1851_v12, %v92_v16  ;;  %v1699_v12 = vld [vmem:[%s3190_s3 + $0xc8] sm:$0xf]  ;;  %v1754_v16 = vld [vmem:[%s3190_s3 + $0xcc] sm:$0xf] }
  0x11   :  { %v1700_v15 = vor.u32 %v1756_v13, %v1699_v12  ;;  %v1653_v12 = vld [vmem:[%s3190_s3 + $0x78] sm:$0xf0] }
  0x13   :  { %820 = vmatpush.bf16.msra.mxu2 %v1700_v15  ;;  %v1627_v15 = vld [vmem:[%s3190_s3 + $0x40] sm:$0xf] }
  0x15   :  { %68 = vadd.xlane.f32.xlu2 %v1775_v10 }
  0x77   :  { %v61_v18 = vpop.xlane.xlu1 %60  ;;  %v57_v19 = vpop.xlane.xlu0 %56 }
  0x78   :  { %v95_v20 = vmul.f32 %v2060_v17, %v57_v19  ;;  %v65_v22 = vpop.xlane.xlu2 %64  ;;  %v97_v32 = vmul.f32 %v2060_v17, %v61_v18  ;;  %v1701_v18 = vld [vmem:[%s3190_s3 + $0xd8] sm:$0xf0] }
  0x79   :  { %v99_v31 = vmul.f32 %v2060_v17, %v65_v22  ;;  %v1704_v19 = vor.u32 %v1754_v16, %v1701_v18  ;;  %v1751_v22 = vld [vmem:[%s3190_s3 + $0xac] sm:$0xf0]  ;;  %v1737_v18 = vld [vmem:[%s3190_s3 + $0x44] sm:$0xf] }
  0x7a   :  { %v2063_v21 = vsub.f32 %v1763_v4, %v95_v20  ;;  %v2084_v37 = vsub.f32 %v1767_v3, %v97_v32  ;;  %v1758_v3 = vld [vmem:[%s3190_s3 + $0xec] sm:$0xf]  ;;  %v1717_v4 = vld [vmem:[%s3190_s3 + $0xf8] sm:$0xf0]  ;;  %v1675_v20 = vld [vmem:[%s3190_s3 + $0xa0] sm:$0xf] }
  0x7b   :  { %v2082_v36 = vsub.f32 %v1771_v5, %v99_v31  ;;  %v1720_v5 = vor.u32 %v1758_v3, %v1717_v4  ;;  %v1644_v4 = vor.u32 %v1743_v1, %v1643_v0  ;;  %v1739_v16 = vld [vmem:[%s3190_s3 + $0x4c] sm:$0xf0] }
  0x7c   :  { %v127_v23 = vmul.f32 %v2063_v21, %v2063_v21  ;;  %v129_v42 = vmul.f32 %v2084_v37, %v2084_v37 }
  0x7d   :  { %v131_v39 = vmul.f32 %v2082_v36, %v2082_v36  ;;  %868 = vmatpush.bf16.msra.mxu3 %v1720_v5  ;;  %v1645_v5 = vld [vmem:[%s3190_s3 + $0x70] sm:$0xf0] }
  0x7e   :  { %143 = vadd.xlane.f32.xlu0 %v127_v23  ;;  %v1749_v23 = vld [vmem:[%s3190_s3 + $0xa4] sm:$0xf] }
  0x7f   :  { %v63_v24 = vpop.xlane.xlu1 %62  ;;  %v59_v25 = vpop.xlane.xlu0 %58 }
  0x80   :  { %v98_v26 = vmul.f32 %v2060_v17, %v63_v24  ;;  %v96_v27 = vmul.f32 %v2060_v17, %v59_v25  ;;  %v67_v35 = vpop.xlane.xlu2 %66  ;;  %v1676_v24 = vor.u32 %v1751_v22, %v1675_v20  ;;  %v1677_v25 = vld [vmem:[%s3190_s3 + $0xb0] sm:$0xf0]  ;;  %v1635_v22 = vld [vmem:[%s3190_s3 + $0x48] sm:$0xf] }
  0x81   :  { %v100_v41 = vmul.f32 %v2060_v17, %v67_v35  ;;  %869 = vmatpush.bf16.msra.mxu3 %v1704_v19  ;;  %v1680_v31 = vor.u32 %v1749_v23, %v1677_v25  ;;  %v1628_v19 = vor.u32 %v1739_v16, %v1627_v15  ;;  %v1629_v20 = vld [vmem:[%s3190_s3 + $0x50] sm:$0xf0]  ;;  %v1740_v23 = vld [vmem:[%s3190_s3 + $0x54] sm:$0xf0]  ;;  %v1730_v16 = vld [vmem:[%s3190_s3 + $0xc] sm:$0xf] }
  0x82   :  { %v2069_v28 = vsub.f32 %v1768_v6, %v98_v26  ;;  %v2071_v29 = vsub.f32 %v1764_v7, %v96_v27  ;;  %v1691_v6 = vld [vmem:[%s3190_s3 + $0xc0] sm:$0xf]  ;;  %v1755_v7 = vld [vmem:[%s3190_s3 + $0xcc] sm:$0xf0]  ;;  %v1683_v26 = vld [vmem:[%s3190_s3 + $0xa8] sm:$0xf]  ;;  %v1636_v25 = vor.u32 %v1740_v23, %v1635_v22 }
  0x83   :  { %v2099_v43 = vsub.f32 %v1772_v8, %v100_v41  ;;  %v1753_v8 = vld [vmem:[%s3190_s3 + $0xc4] sm:$0xf]  ;;  %v1752_v27 = vld [vmem:[%s3190_s3 + $0xb4] sm:$0xf0]  ;;  %v1747_v41 = vld [vmem:[%s3190_s3 + $0x8c] sm:$0xf0] }
  0x84   :  { %v130_v33 = vmul.f32 %v2069_v28, %v2069_v28  ;;  %v128_v34 = vmul.f32 %v2071_v29, %v2071_v29  ;;  %v1696_v14 = vor.u32 %v1753_v8, %v1693_v11  ;;  %v1684_v32 = vor.u32 %v1752_v27, %v1683_v26  ;;  %v1742_v11 = vld [vmem:[%s3190_s3 + $0x6c] sm:$0xf]  ;;  %v1637_v27 = vld [vmem:[%s3190_s3 + $0x58] sm:$0xf0]  ;;  %v1732_v15 = vld [vmem:[%s3190_s3 + $0x14] sm:$0xf0] }
  0x85   :  { %v132_v47 = vmul.f32 %v2099_v43, %v2099_v43  ;;  %v1648_v8 = vor.u32 %v1741_v2, %v1645_v5  ;;  %v1738_v26 = vld [vmem:[%s3190_s3 + $0x4c] sm:$0xf] }
  0x86   :  { %149 = vadd.xlane.f32.xlu2 %v130_v33  ;;  %70 = vadd.xlane.f32.xlu0 %v1776_v30  ;;  %v1750_v33 = vld [vmem:[%s3190_s3 + $0xac] sm:$0xf] }
  0x87   :  { %145 = vadd.xlane.f32.xlu1 %v128_v34  ;;  %771 = vmatpush.bf16.msra.mxu1 %v1696_v14  ;;  %v1685_v34 = vld [vmem:[%s3190_s3 + $0xb8] sm:$0xf0]  ;;  %v1656_v14 = vor.u32 %v1742_v11, %v1653_v12 }
  0x88   :  { %v69_v45 = vpop.xlane.xlu2 %68  ;;  %v1688_v35 = vor.u32 %v1750_v33, %v1685_v34  ;;  %821 = vmatpush.bf16.msra.mxu2 %v1684_v32  ;;  %v1611_v34 = vld [vmem:[%s3190_s3 + $0x20] sm:$0xf] }
  0x89   :  { %v101_v48 = vmul.f32 %v2060_v17, %v69_v45 }
  0x8a   :  { %870 = vmatpush.bf16.msra.mxu3 %v1688_v35  ;;  %v1735_v35 = vld [vmem:[%s3190_s3 + $0x2c] sm:$0xf0] }
  0x8b   :  { %v2113_v50 = vsub.f32 %v1775_v10, %v101_v48  ;;  %v1692_v10 = vor.u32 %v1755_v7, %v1691_v6  ;;  %772 = vmatpush.bf16.msra.mxu1 %v1680_v31  ;;  %v1667_v48 = vld [vmem:[%s3190_s3 + $0x88] sm:$0xf]  ;;  %v1744_v7 = vld [vmem:[%s3190_s3 + $0x74] sm:$0xf0]  ;;  %v1640_v31 = vor.u32 %v1738_v26, %v1637_v27 }
  0x8c   :  { %v1651_v6 = vld [vmem:[%s3190_s3 + $0x68] sm:$0xf] }
  0x8d   :  { %v133_v53 = vmul.f32 %v2113_v50, %v2113_v50  ;;  %722 = vmatpush.bf16.msra.mxu0 %v1692_v10  ;;  %v1652_v10 = vor.u32 %v1744_v7, %v1651_v6  ;;  %v1595_v6 = vld [vmem:[%s3190_s3] sm:$0xf]  ;;  %v1731_v7 = vld [vmem:[%s3190_s3 + $0xc] sm:$0xf0] }
  0x8e   :  { %151 = vadd.xlane.f32.xlu2 %v131_v39  ;;  %72 = vadd.xlane.f32.xlu0 %v1779_v40  ;;  %v1659_v39 = vld [vmem:[%s3190_s3 + $0x80] sm:$0xf] }
  0x8f   :  { %147 = vadd.xlane.f32.xlu1 %v129_v42  ;;  %v1745_v42 = vld [vmem:[%s3190_s3 + $0x84] sm:$0xf]  ;;  %v1660_v45 = vor.u32 %v1747_v41, %v1659_v39  ;;  %871 = vmatpush.bf16.msra.mxu3 %v1672_v62  ;;  %v1734_v62 = vld [vmem:[%s3190_s3 + $0x2c] sm:$0xf] }
  0x90   :  { %v1733_v39 = vld [vmem:[%s3190_s3 + $0x24] sm:$0xf] }
  0x91   :  { %723 = vmatpush.bf16.msra.mxu0 %v1676_v24  ;;  %v1632_v24 = vor.u32 %v1737_v18, %v1629_v20 }
  0x93   :  { %872 = vmatpush.bf16.msra.mxu3 %v1656_v14  ;;  %v1603_v14 = vld [vmem:[%s3190_s3 + $0x8] sm:$0xf] }
  0x94   :  { %v1604_v18 = vor.u32 %v1732_v15, %v1603_v14 }
  0x95   :  { %724 = vmatpush.bf16.msra.mxu0 %v1660_v45 }
  0x96   :  { %78 = vadd.xlane.f32.xlu2 %v1784_v46  ;;  %153 = vadd.xlane.f32.xlu0 %v132_v47  ;;  %v1661_v47 = vld [vmem:[%s3190_s3 + $0x90] sm:$0xf0] }
  0x97   :  { %74 = vadd.xlane.f32.xlu1 %v1780_v49  ;;  %v1664_v58 = vor.u32 %v1745_v42, %v1661_v47  ;;  %873 = vmatpush.bf16.msra.mxu3 %v1640_v31  ;;  %v1612_v47 = vor.u32 %v1735_v35, %v1611_v34 }
  0x99   :  { %773 = vmatpush.bf16.msra.mxu1 %v1664_v58  ;;  %725 = vmatpush.bf16.msra.mxu0 %v1644_v4  ;;  %v1736_v58 = vld [vmem:[%s3190_s3 + $0x34] sm:$0xf0] }
  0x9d   :  { %774 = vmatpush.bf16.msra.mxu1 %v1648_v8  ;;  %726 = vmatpush.bf16.msra.mxu0 %v1628_v19  ;;  %v1729_v8 = vld [vmem:[%s3190_s3 + $0x4] sm:$0xf]  ;;  %v1605_v19 = vld [vmem:[%s3190_s3 + $0x18] sm:$0xf0] }
  0x9e   :  { %80 = vadd.xlane.f32.xlu2 %v1787_v52  ;;  %155 = vadd.xlane.f32.xlu0 %v133_v53  ;;  %v1748_v53 = vld [vmem:[%s3190_s3 + $0x94] sm:$0xf0] }
  0x9f   :  { %76 = vadd.xlane.f32.xlu1 %v1783_v54  ;;  %v1668_v59 = vor.u32 %v1748_v53, %v1667_v48  ;;  %v1613_v48 = vld [vmem:[%s3190_s3 + $0x30] sm:$0xf0]  ;;  %v1619_v53 = vld [vmem:[%s3190_s3 + $0x28] sm:$0xf] }
  0xa0   :  { %v1616_v60 = vor.u32 %v1733_v39, %v1613_v48  ;;  %v1620_v61 = vor.u32 %v1736_v58, %v1619_v53 }
  0xa1   :  { %822 = vmatpush.bf16.msra.mxu2 %v1668_v59  ;;  %775 = vmatpush.bf16.msra.mxu1 %v1632_v24  ;;  %v1608_v24 = vor.u32 %v1730_v16, %v1605_v19 }
  0xa2   :  { %727 = vmatpush.bf16.msra.mxu0 %v1612_v47 }
  0xa5   :  { %823 = vmatpush.bf16.msra.mxu2 %v1652_v10  ;;  %776 = vmatpush.bf16.msra.mxu1 %v1616_v60  ;;  %v1597_v10 = vld [vmem:[%s3190_s3 + $0x10] sm:$0xf0] }
  0xa6   :  { %82 = vadd.xlane.f32.xlu0 %v1788_v55  ;;  %v1600_v12 = vor.u32 %v1729_v8, %v1597_v10 }
  0xa9   :  { %824 = vmatpush.bf16.msra.mxu2 %v1636_v25  ;;  %777 = vmatpush.bf16.msra.mxu1 %v1600_v12 }
  0xad   :  { %825 = vmatpush.bf16.msra.mxu2 %v1620_v61 }
  0xae   :  { %84 = vadd.xlane.f32.xlu0 %v1791_v57 }
  0xb1   :  { %826 = vmatpush.bf16.msra.mxu2 %v1604_v18 }
  0xf1   :  { %v144_v63 = vpop.xlane.xlu0 %143 }
  0xf2   :  { %v175_v3 = vmul.f32 %v144_v63, %v2060_v17  ;;  %v1621_v63 = vld [vmem:[%s3190_s3 + $0x38] sm:$0xf0] }
  0xf4   :  { %v2262_v13 = vadd.f32 1e-06, %v175_v3  ;;  %v1624_v3 = vor.u32 %v1734_v62, %v1621_v63 }
  0xf6   :  { %1852 = vrsqrt.f32 %v2262_v13  ;;  %874 = vmatpush.bf16.msra.mxu3 %v1624_v3  ;;  %vm213_vm2 = vweird.f32 %v2262_v13 }
  0xf9   :  { %v150_v32 = vpop.xlane.xlu2 %149  ;;  %v71_v33 = vpop.xlane.xlu0 %70 }
  0xfa   :  { %v178_v41 = vmul.f32 %v150_v32, %v2060_v17  ;;  %v146_v42 = vpop.xlane.xlu1 %145  ;;  %v102_v45 = vmul.f32 %v2060_v17, %v71_v33  ;;  %875 = vmatpush.bf16.msra.mxu3 %v1608_v24 }
  0xfb   :  { %v176_v59 = vmul.f32 %v146_v42, %v2060_v17 }
  0xfc   :  { %v2316_v0 = vpop.eup %1852  ;;  %v2318_v1 = vadd.f32 1e-06, %v178_v41  ;;  %v2322_v2 = vsub.f32 %v1776_v30, %v102_v45  ;;  %v1596_v30 = vor.u32 %v1731_v7, %v1595_v6 }
  0xfd   :  { %v208_v4 = vmul.f32 %v2316_v0, %v2262_v13  ;;  %v2326_v5 = vadd.f32 1e-06, %v176_v59  ;;  %vm214_vm1 = vweird.f32 %v2316_v0 }
  0xfe   :  { %1854 = vrsqrt.f32 %v2318_v1  ;;  %v134_v9 = vmul.f32 %v2322_v2, %v2322_v2  ;;  %728 = vmatpush.bf16.msra.mxu0 %v1596_v30  ;;  %vm2381_vm3 = vmor %vm213_vm2, %vm214_vm1  ;;  %vm243_vm6 = vweird.f32 %v2318_v1 }
  0xff   :  { %v209_v11 = vmul.f32 %v2316_v0, %v208_v4  ;;  %1856 = vrsqrt.f32 %v2326_v5  ;;  %vm223_vm4 = vweird.f32 %v2326_v5 }
 0x100   :  { %157 = vadd.xlane.f32.xlu1 %v134_v9 }
 0x101   :  { %v210_v20 = vmul.f32 0.5, %v209_v11  ;;  %v152_v22 = vpop.xlane.xlu2 %151  ;;  %v73_v23 = vpop.xlane.xlu0 %72  ;;  %v2405_v11 = vld [vmem:[%s3188_s1] ss:$0 sm:$0xff] }
 0x102   :  { %v179_v25 = vmul.f32 %v152_v22, %v2060_v17  ;;  %v148_v26 = vpop.xlane.xlu1 %147  ;;  %v103_v27 = vmul.f32 %v2060_v17, %v73_v23  ;;  %v2440_v23 = vld [vmem:[%s3189_s2] ss:$0 sm:$0xff] }
 0x103   :  { %v211_v31 = vsub.f32 1.5, %v210_v20  ;;  %v177_v32 = vmul.f32 %v148_v26, %v2060_v17 }
 0x104   :  { %v2360_v33 = vpop.eup %1854  ;;  %v2362_v34 = vadd.f32 1e-06, %v179_v25  ;;  %v2366_v35 = vsub.f32 %v1779_v40, %v103_v27 }
 0x105   :  { %v1857_v39 = vpop.eup %1856  ;;  %v238_v41 = vmul.f32 %v2360_v33, %v2318_v1  ;;  %v2370_v42 = vadd.f32 1e-06, %v177_v32  ;;  %v212_v45 = vmul.f32 %v2316_v0, %v211_v31  ;;  %vm244_vm7 = vweird.f32 %v2360_v33 }
 0x106   :  { %v218_v47 = vmul.f32 %v1857_v39, %v2326_v5  ;;  %1858 = vrsqrt.f32 %v2362_v34  ;;  %v135_v53 = vmul.f32 %v2366_v35, %v2366_v35  ;;  %vm224_vm5 = vweird.f32 %v1857_v39  ;;  %vm2422_vm9 = vmor %vm243_vm6, %vm244_vm7 }
 0x107   :  { %v239_v48 = vmul.f32 %v2360_v33, %v238_v41  ;;  %1860 = vrsqrt.f32 %v2370_v42  ;;  %v216_v62 = vsel %vm2381_vm3, %v2316_v0, %v212_v45  ;;  %vm2412_vm8 = vmor %vm223_vm4, %vm224_vm5  ;;  %v1792_v5 = vunpack.c.h.bf16 %v2136_v56 }
 0x108   :  { %v219_v40 = vmul.f32 %v1857_v39, %v218_v47  ;;  %159 = vadd.xlane.f32.xlu1 %v135_v53  ;;  %v367_v1 = vmul.f32 %v216_v62, %v2063_v21  ;;  %vm253_vm10 = vweird.f32 %v2362_v34  ;;  %vm233_vm11 = vweird.f32 %v2370_v42 }
 0x109   :  { %v240_v59 = vmul.f32 0.5, %v239_v48  ;;  %v79_v60 = vpop.xlane.xlu2 %78  ;;  %v154_v61 = vpop.xlane.xlu0 %153 }
 0x10a   :  { %v220_v63 = vmul.f32 0.5, %v219_v40  ;;  %v106_v13 = vmul.f32 %v2060_v17, %v79_v60  ;;  %v75_v3 = vpop.xlane.xlu1 %74  ;;  %v180_v4 = vmul.f32 %v154_v61, %v2060_v17  ;;  %v387_v24 = vmul.f32 %v2405_v11, %v367_v1 }
 0x10b   :  { %v241_v6 = vsub.f32 1.5, %v240_v59  ;;  %v104_v7 = vmul.f32 %v2060_v17, %v75_v3 }
 0x10c   :  { %v2394_v9 = vpop.eup %1858  ;;  %v221_v30 = vsub.f32 1.5, %v220_v63  ;;  %v2398_v0 = vsub.f32 %v1784_v46, %v106_v13  ;;  %v2400_v8 = vadd.f32 1e-06, %v180_v4  ;;  %v407_v59 = vadd.f32 %v2440_v23, %v387_v24 }
 0x10d   :  { %v1861_v10 = vpop.eup %1860  ;;  %v242_v12 = vmul.f32 %v2360_v33, %v241_v6  ;;  %v248_v46 = vmul.f32 %v2394_v9, %v2362_v34  ;;  %v2420_v15 = vsub.f32 %v1780_v49, %v104_v7  ;;  %vm254_vm13 = vweird.f32 %v2394_v9 }
 0x10e   :  { %v222_v21 = vmul.f32 %v1857_v39, %v221_v30  ;;  %v228_v18 = vmul.f32 %v1861_v10, %v2370_v42  ;;  %1862 = vrsqrt.f32 %v2400_v8  ;;  %v138_v20 = vmul.f32 %v2398_v0, %v2398_v0  ;;  %vm2470_vm15 = vmor %vm253_vm10, %vm254_vm13 }
 0x10f   :  { %v249_v19 = vmul.f32 %v2394_v9, %v248_v46  ;;  %v136_v22 = vmul.f32 %v2420_v15, %v2420_v15  ;;  %v246_v25 = vsel %vm2422_vm9, %v2360_v33, %v242_v12  ;;  %vm234_vm12 = vweird.f32 %v1861_v10 }
 0x110   :  { %v226_v38 = vsel %vm2412_vm8, %v1857_v39, %v222_v21  ;;  %v229_v49 = vmul.f32 %v1861_v10, %v228_v18  ;;  %165 = vadd.xlane.f32.xlu0 %v138_v20  ;;  %86 = vadd.xlane.f32.xlu1 %v1792_v5  ;;  %v370_v40 = vmul.f32 %v246_v25, %v2069_v28  ;;  %vm235_vm14 = vmor %vm233_vm11, %vm234_vm12  ;;  %vm263_vm0 = vweird.f32 %v2400_v8 }
 0x111   :  { %v368_v26 = vmul.f32 %v226_v38, %v2071_v29  ;;  %v250_v27 = vmul.f32 0.5, %v249_v19  ;;  %v81_v31 = vpop.xlane.xlu2 %80  ;;  %v2447_v32 = vpop.xlane.xlu0 %155  ;;  %161 = vadd.xlane.f32.xlu2 %v136_v22 }
 0x112   :  { %v230_v39 = vmul.f32 0.5, %v229_v49  ;;  %v107_v41 = vmul.f32 %v2060_v17, %v81_v31  ;;  %v77_v45 = vpop.xlane.xlu1 %76  ;;  %v390_v42 = vmul.f32 %v2405_v11, %v370_v40 }
 0x113   :  { %v388_v33 = vmul.f32 %v2405_v11, %v368_v26  ;;  %v251_v47 = vsub.f32 1.5, %v250_v27  ;;  %v105_v29 = vmul.f32 %v2060_v17, %v77_v45 }
 0x114   :  { %v1863_v48 = vpop.eup %1862  ;;  %v231_v53 = vsub.f32 1.5, %v230_v39  ;;  %v2459_v58 = vsub.f32 %v1787_v52, %v107_v41 }
 0x115   :  { %v408_v60 = vadd.f32 %v2440_v23, %v388_v33  ;;  %v252_v61 = vmul.f32 %v2394_v9, %v251_v47  ;;  %v258_v62 = vmul.f32 %v1863_v48, %v2400_v8  ;;  %v2476_v63 = vsub.f32 %v1783_v54, %v105_v29 }
 0x116   :  { %v232_v52 = vmul.f32 %v1861_v10, %v231_v53  ;;  %v139_v4 = vmul.f32 %v2459_v58, %v2459_v58  ;;  %vm264_vm1 = vweird.f32 %v1863_v48 }
 0x117   :  { %v1796_v13 = vpack.c.bf16 %v408_v60, %v407_v59  ;;  %v259_v3 = vmul.f32 %v1863_v48, %v258_v62  ;;  %v137_v34 = vmul.f32 %v2476_v63, %v2476_v63  ;;  %v256_v44 = vsel %vm2470_vm15, %v2394_v9, %v252_v61  ;;  %vm265_vm2 = vmor %vm263_vm0, %vm264_vm1 }
 0x118   :  { %v236_v6 = vsel %vm235_vm14, %v1861_v10, %v232_v52  ;;  %167 = vadd.xlane.f32.xlu1 %v139_v4  ;;  %v371_v12 = vmul.f32 %v256_v44, %v2082_v36  ;;  %v410_v9 = vadd.f32 %v2440_v23, %v390_v42 }
 0x119   :  { %1797 = vst [vmem:[#allocation2 + $0x30] sm:$0xff] %v1796_v13   ;;  %v369_v54 = vmul.f32 %v236_v6, %v2084_v37  ;;  %v260_v7 = vmul.f32 0.5, %v259_v3  ;;  %v83_v30 = vpop.xlane.xlu0 %82  ;;  %163 = vadd.xlane.f32.xlu2 %v137_v34 }
 0x11a   :  { %v108_v1 = vmul.f32 %v2060_v17, %v83_v30  ;;  %v391_v19 = vmul.f32 %v2405_v11, %v371_v12 }
 0x11b   :  { %v389_v10 = vmul.f32 %v2405_v11, %v369_v54  ;;  %v261_v8 = vsub.f32 1.5, %v260_v7 }
 0x11c   :  { %v2493_v14 = vsub.f32 %v1788_v55, %v108_v1  ;;  %v411_v49 = vadd.f32 %v2440_v23, %v391_v19 }
 0x11d   :  { %v409_v37 = vadd.f32 %v2440_v23, %v389_v10  ;;  %v262_v46 = vmul.f32 %v1863_v48, %v261_v8 }
 0x11e   :  { %v140_v16 = vmul.f32 %v2493_v14, %v2493_v14 }
 0x11f   :  { %v1801_v21 = vpack.c.bf16 %v410_v9, %v409_v37  ;;  %v266_v18 = vsel %vm265_vm2, %v1863_v48, %v262_v46 }
 0x120   :  { %v372_v20 = vmul.f32 %v266_v18, %v2099_v43  ;;  %v1721_v36 = vld [vmem:[#allocation2 + $0x30] sm:$0xff] }
 0x121   :  { %1840 = vst [vmem:[#allocation2] sm:$0xff] %v1801_v21   ;;  %v85_v38 = vpop.xlane.xlu0 %84  ;;  %169 = vadd.xlane.f32.xlu2 %v140_v16  ;;  %729 = vmatmul.bf16.vlgmr.msra.gmra.mxu0 %v1721_v36 }
 0x122   :  { %v392_v51 = vmul.f32 %v2405_v11, %v372_v20  ;;  %v109_v55 = vmul.f32 %v2060_v17, %v85_v38  ;;  %778 = vmatmul.bf16.vlgmr.msra.gmra.mxu1 %v1721_v36  ;;  %827 = vmatmul.bf16.vlgmr.msra.gmra.mxu2 %v1721_v36 }
 0x123   :  { %876 = vmatmul.bf16.vlgmr.msra.gmra.mxu3 %v1721_v36 }
 0x124   :  { %v412_v22 = vadd.f32 %v2440_v23, %v392_v51  ;;  %v2507_v24 = vsub.f32 %v1791_v57, %v109_v55  ;;  %v181_v57 = vmul.f32 %v2447_v32, %v2060_v17 }
 0x126   :  { %v1806_v43 = vpack.c.bf16 %v412_v22, %v411_v49  ;;  %v141_v25 = vmul.f32 %v2507_v24, %v2507_v24  ;;  %v197_v31 = vadd.f32 1e-06, %v181_v57 }
 0x128   :  { %1841 = vst [vmem:[#allocation2 + $0x18] sm:$0xff] %v1806_v43   ;;  %171 = vadd.xlane.f32.xlu0 %v141_v25  ;;  %v1722_v26 = vld [vmem:[#allocation2] sm:$0xff]  ;;  %1864 = vrsqrt.f32 %v197_v31  ;;  %vm273_vm3 = vweird.f32 %v197_v31 }
 0x12e   :  { %v1865_v39 = vpop.eup %1864 }
 0x12f   :  { %v1723_v27 = vld [vmem:[#allocation2 + $0x18] sm:$0xff]  ;;  %v268_v41 = vmul.f32 %v1865_v39, %v197_v31  ;;  %vm274_vm4 = vweird.f32 %v1865_v39 }
 0x130   :  { %vm275_vm5 = vmor %vm273_vm3, %vm274_vm4 }
 0x131   :  { %734 = vmatmul.bf16.gmra.mxu0 %v1722_v26  ;;  %v269_v45 = vmul.f32 %v1865_v39, %v268_v41 }
 0x132   :  { %783 = vmatmul.bf16.gmra.mxu1 %v1722_v26  ;;  %832 = vmatmul.bf16.gmra.mxu2 %v1722_v26 }
 0x133   :  { %881 = vmatmul.bf16.gmra.mxu3 %v1722_v26  ;;  %v270_v48 = vmul.f32 0.5, %v269_v45 }
 0x135   :  { %v271_v40 = vsub.f32 1.5, %v270_v48 }
 0x137   :  { %v272_v61 = vmul.f32 %v1865_v39, %v271_v40 }
 0x139   :  { %v276_v52 = vsel %vm275_vm5, %v1865_v39, %v272_v61 }
 0x13a   :  { %v373_v44 = vmul.f32 %v276_v52, %v2113_v50 }
 0x13c   :  { %v393_v46 = vmul.f32 %v2405_v11, %v373_v44 }
 0x141   :  { %739 = vmatmul.bf16.gmra.mxu0 %v1723_v27 }
 0x142   :  { %788 = vmatmul.bf16.gmra.mxu1 %v1723_v27  ;;  %837 = vmatmul.bf16.gmra.mxu2 %v1723_v27 }
 0x143   :  { %886 = vmatmul.bf16.gmra.mxu3 %v1723_v27 }
 0x173   :  { %v158_v33 = vpop.xlane.xlu1 %157 }
 0x174   :  { %v182_v47 = vmul.f32 %v158_v33, %v2060_v17 }
 0x176   :  { %v198_v29 = vadd.f32 1e-06, %v182_v47 }
 0x178   :  { %1866 = vrsqrt.f32 %v198_v29  ;;  %vm283_vm7 = vweird.f32 %v198_v29 }
 0x17b   :  { %v160_v53 = vpop.xlane.xlu1 %159 }
 0x17c   :  { %v183_v60 = vmul.f32 %v160_v53, %v2060_v17 }
 0x17e   :  { %v1867_v59 = vpop.eup %1866  ;;  %v199_v62 = vadd.f32 1e-06, %v183_v60 }
 0x17f   :  { %v278_v32 = vmul.f32 %v1867_v59, %v198_v29  ;;  %vm284_vm6 = vweird.f32 %v1867_v59 }
 0x180   :  { %1868 = vrsqrt.f32 %v199_v62  ;;  %vm285_vm8 = vmor %vm283_vm7, %vm284_vm6  ;;  %vm293_vm10 = vweird.f32 %v199_v62 }
 0x181   :  { %v279_v28 = vmul.f32 %v1867_v59, %v278_v32 }
 0x183   :  { %v280_v13 = vmul.f32 0.5, %v279_v28  ;;  %v166_v3 = vpop.xlane.xlu0 %165  ;;  %v87_v6 = vpop.xlane.xlu1 %86 }
 0x184   :  { %v162_v42 = vpop.xlane.xlu2 %161  ;;  %v186_v34 = vmul.f32 %v166_v3, %v2060_v17  ;;  %v110_v7 = vmul.f32 %v2060_v17, %v87_v6 }
 0x185   :  { %v281_v4 = vsub.f32 1.5, %v280_v13  ;;  %v184_v54 = vmul.f32 %v162_v42, %v2060_v17 }
 0x186   :  { %v202_v1 = vadd.f32 1e-06, %v186_v34  ;;  %v1869_v10 = vpop.eup %1868  ;;  %v2521_v12 = vsub.f32 %v1792_v5, %v110_v7  ;;  %v413_v5 = vadd.f32 %v2440_v23, %v393_v46 }
 0x187   :  { %v282_v30 = vmul.f32 %v1867_v59, %v281_v4  ;;  %v200_v8 = vadd.f32 1e-06, %v184_v54  ;;  %v288_v37 = vmul.f32 %v1869_v10, %v199_v62  ;;  %vm294_vm9 = vweird.f32 %v1869_v10 }
 0x188   :  { %1870 = vrsqrt.f32 %v202_v1  ;;  %v142_v21 = vmul.f32 %v2521_v12, %v2521_v12  ;;  %vm295_vm11 = vmor %vm293_vm10, %vm294_vm9  ;;  %vm323_vm14 = vweird.f32 %v202_v1 }
 0x189   :  { %v286_v9 = vsel %vm285_vm8, %v1867_v59, %v282_v30  ;;  %1872 = vrsqrt.f32 %v200_v8  ;;  %v289_v16 = vmul.f32 %v1869_v10, %v288_v37  ;;  %vm303_vm12 = vweird.f32 %v200_v8 }
 0x18a   :  { %v374_v50 = vmul.f32 %v286_v9, %v2322_v2  ;;  %173 = vadd.xlane.f32.xlu1 %v142_v21 }
 0x18b   :  { %v290_v19 = vmul.f32 0.5, %v289_v16  ;;  %v168_v56 = vpop.xlane.xlu1 %167 }
 0x18c   :  { %v394_v18 = vmul.f32 %v2405_v11, %v374_v50  ;;  %v164_v20 = vpop.xlane.xlu2 %163  ;;  %v187_v51 = vmul.f32 %v168_v56, %v2060_v17 }
 0x18d   :  { %v185_v38 = vmul.f32 %v164_v20, %v2060_v17  ;;  %v291_v55 = vsub.f32 1.5, %v290_v19 }
 0x18e   :  { %v414_v36 = vadd.f32 %v2440_v23, %v394_v18  ;;  %v1871_v2 = vpop.eup %1870  ;;  %v203_v57 = vadd.f32 1e-06, %v187_v51 }
 0x18f   :  { %v1873_v49 = vpop.eup %1872  ;;  %v318_v43 = vmul.f32 %v1871_v2, %v202_v1  ;;  %v201_v25 = vadd.f32 1e-06, %v185_v38  ;;  %v292_v26 = vmul.f32 %v1869_v10, %v291_v55  ;;  %vm324_vm15 = vweird.f32 %v1871_v2 }
 0x190   :  { %v1811_v22 = vpack.c.bf16 %v414_v36, %v413_v5  ;;  %v298_v27 = vmul.f32 %v1873_v49, %v200_v8  ;;  %vm304_vm13 = vweird.f32 %v1873_v49  ;;  %vm2540_vm1 = vmor %vm323_vm14, %vm324_vm15  ;;  %vm333_vm4 = vweird.f32 %v203_v57 }
 0x191   :  { %v319_v31 = vmul.f32 %v1871_v2, %v318_v43  ;;  %1874 = vrsqrt.f32 %v201_v25  ;;  %v296_v41 = vsel %vm295_vm11, %v1869_v10, %v292_v26  ;;  %vm2534_vm0 = vmor %vm303_vm12, %vm304_vm13  ;;  %vm313_vm2 = vweird.f32 %v201_v25 }
 0x192   :  { %1842 = vst [vmem:[#allocation2 + $0x10] sm:$0xff] %v1811_v22   ;;  %v299_v39 = vmul.f32 %v1873_v49, %v298_v27  ;;  %1876 = vrsqrt.f32 %v203_v57  ;;  %v375_v40 = vmul.f32 %v296_v41, %v2366_v35  ;;  %v503_v35 = vld [vmem:[%s3191_s4] sm:$0xf] }
 0x193   :  { %v320_v45 = vmul.f32 0.5, %v319_v31  ;;  %v2554_v30 = vperm.slane %v503_v35, 0  ;;  %v2556_v10 = vperm.slane %v503_v35, 1  ;;  %v2577_v55 = vperm.slane %v503_v35, 2 }
 0x194   :  { %v300_v33 = vmul.f32 0.5, %v299_v39  ;;  %v170_v47 = vpop.xlane.xlu2 %169  ;;  %v395_v42 = vmul.f32 %v2405_v11, %v375_v40  ;;  %v2589_v31 = vperm.slane %v503_v35, 3 }
 0x195   :  { %v321_v29 = vsub.f32 1.5, %v320_v45  ;;  %v188_v48 = vmul.f32 %v170_v47, %v2060_v17 }
 0x196   :  { %v301_v53 = vsub.f32 1.5, %v300_v33  ;;  %v415_v16 = vadd.f32 %v2440_v23, %v395_v42 }
 0x197   :  { %v1875_v59 = vpop.eup %1874  ;;  %v322_v61 = vmul.f32 %v1871_v2, %v321_v29  ;;  %v2538_v32 = vadd.f32 1e-06, %v188_v48 }
 0x198   :  { %v1877_v62 = vpop.eup %1876  ;;  %v302_v28 = vmul.f32 %v1873_v49, %v301_v53  ;;  %v308_v13 = vmul.f32 %v1875_v59, %v201_v25  ;;  %vm314_vm3 = vweird.f32 %v1875_v59 }
 0x199   :  { %v1724_v3 = vld [vmem:[#allocation2 + $0x10] sm:$0xff]  ;;  %v328_v4 = vmul.f32 %v1877_v62, %v203_v57  ;;  %1878 = vrsqrt.f32 %v2538_v32  ;;  %v326_v54 = vsel %vm2540_vm1, %v1871_v2, %v322_v61  ;;  %vm334_vm5 = vweird.f32 %v1877_v62  ;;  %vm2562_vm6 = vmor %vm313_vm2, %vm314_vm3 }
 0x19a   :  { %v306_v6 = vsel %vm2534_vm0, %v1873_v49, %v302_v28  ;;  %v309_v34 = vmul.f32 %v1875_v59, %v308_v13  ;;  %744 = vmatmul.bf16.gmra.mxu0 %v1724_v3  ;;  %793 = vmatmul.bf16.gmra.mxu1 %v1724_v3  ;;  %vm2566_vm7 = vmor %vm333_vm4, %vm334_vm5  ;;  %vm343_vm8 = vweird.f32 %v2538_v32 }
 0x19b   :  { %v376_v44 = vmul.f32 %v306_v6, %v2420_v15  ;;  %v329_v7 = vmul.f32 %v1877_v62, %v328_v4  ;;  %842 = vmatmul.bf16.gmra.mxu2 %v1724_v3  ;;  %891 = vmatmul.bf16.gmra.mxu3 %v1724_v3  ;;  %v378_v15 = vmul.f32 %v326_v54, %v2398_v0 }
 0x19c   :  { %v310_v1 = vmul.f32 0.5, %v309_v34 }
 0x19d   :  { %v396_v8 = vmul.f32 %v2405_v11, %v376_v44  ;;  %v330_v9 = vmul.f32 0.5, %v329_v7  ;;  %v398_v49 = vmul.f32 %v2405_v11, %v378_v15 }
 0x19e   :  { %v311_v37 = vsub.f32 1.5, %v310_v1  ;;  %v730_v46 = vpop.f32.mrf.mxu0 }
 0x19f   :  { %v1879_v50 = vpop.eup %1878  ;;  %v416_v21 = vadd.f32 %v2440_v23, %v396_v8  ;;  %v331_v19 = vsub.f32 1.5, %v330_v9  ;;  %v779_v20 = vpop.f32.mrf.mxu1  ;;  %v2572_v36 = vadd.f32 %v730_v46, %v2554_v30 }
 0x1a0   :  { %v312_v56 = vmul.f32 %v1875_v59, %v311_v37  ;;  %v338_v0 = vmul.f32 %v1879_v50, %v2538_v32  ;;  %v2575_v2 = vadd.f32 %v779_v20, %v2556_v10  ;;  %vm344_vm9 = vweird.f32 %v1879_v50 }
 0x1a1   :  { %v1816_v38 = vpack.c.bf16 %v416_v21, %v415_v16  ;;  %v332_v51 = vmul.f32 %v1877_v62, %v331_v19  ;;  %v917_v25 = vmul.f32 %v2572_v36, %v2572_v36  ;;  %vm2598_vm10 = vmor %vm343_vm8, %vm344_vm9 }
 0x1a2   :  { %v316_v22 = vsel %vm2562_vm6, %v1875_v59, %v312_v56  ;;  %v339_v43 = vmul.f32 %v1879_v50, %v338_v0  ;;  %v918_v57 = vmul.f32 %v2575_v2, %v2575_v2 }
 0x1a3   :  { %1843 = vst [vmem:[#allocation2 + $0x8] sm:$0xff] %v1816_v38   ;;  %v377_v26 = vmul.f32 %v316_v22, %v2476_v63  ;;  %v336_v27 = vsel %vm2566_vm7, %v1877_v62, %v332_v51  ;;  %v981_v41 = vmul.f32 %v917_v25, %v2572_v36  ;;  %v418_v63 = vadd.f32 %v2440_v23, %v398_v49 }
 0x1a4   :  { %v340_v39 = vmul.f32 0.5, %v339_v43  ;;  %v982_v33 = vmul.f32 %v918_v57, %v2575_v2  ;;  %v379_v29 = vmul.f32 %v336_v27, %v2459_v58 }
 0x1a5   :  { %v397_v45 = vmul.f32 %v2405_v11, %v377_v26  ;;  %v828_v47 = vpop.f32.mrf.mxu2  ;;  %v1045_v61 = vmul.f32 0.044715, %v981_v41 }
 0x1a6   :  { %v341_v48 = vsub.f32 1.5, %v340_v39  ;;  %v877_v40 = vpop.f32.mrf.mxu3  ;;  %v732_v53 = vpop.f32.mrf.mxu0  ;;  %v1046_v32 = vmul.f32 0.044715, %v982_v33  ;;  %v2603_v62 = vadd.f32 %v828_v47, %v2577_v55  ;;  %v399_v42 = vmul.f32 %v2405_v11, %v379_v29 }
 0x1a7   :  { %v417_v59 = vadd.f32 %v2440_v23, %v397_v45  ;;  %v2606_v52 = vadd.f32 %v877_v40, %v2589_v31  ;;  %v1109_v58 = vadd.f32 %v1045_v61, %v2572_v36  ;;  %v781_v4 = vpop.f32.mrf.mxu1  ;;  %v2618_v44 = vadd.f32 %v732_v53, %v2554_v30 }
 0x1a8   :  { %v342_v28 = vmul.f32 %v1879_v50, %v341_v48  ;;  %v1110_v3 = vadd.f32 %v1046_v32, %v2575_v2  ;;  %v919_v35 = vmul.f32 %v2603_v62, %v2603_v62  ;;  %v2626_v46 = vadd.f32 %v781_v4, %v2556_v10 }
 0x1a9   :  { %v1821_v13 = vpack.c.bf16 %v418_v63, %v417_v59  ;;  %v920_v34 = vmul.f32 %v2606_v52, %v2606_v52  ;;  %v1173_v1 = vmul.f32 0.7978846, %v1109_v58  ;;  %v921_v37 = vmul.f32 %v2618_v44, %v2618_v44 }
 0x1aa   :  { %v346_v6 = vsel %vm2598_vm10, %v1879_v50, %v342_v28  ;;  %v1725_v54 = vld [vmem:[#allocation2 + $0x8] sm:$0xff]  ;;  %v1174_v8 = vmul.f32 0.7978846, %v1110_v3  ;;  %v983_v9 = vmul.f32 %v919_v35, %v2603_v62  ;;  %v419_v21 = vadd.f32 %v2440_v23, %v399_v42 }
 0x1ab   :  { %1844 = vst [vmem:[#allocation2 + $0x20] sm:$0xff] %v1821_v13   ;;  %v380_v7 = vmul.f32 %v346_v6, %v2493_v14  ;;  %v984_v15 = vmul.f32 %v920_v34, %v2606_v52  ;;  %749 = vmatmul.bf16.gmra.mxu0 %v1725_v54  ;;  %798 = vmatmul.bf16.gmra.mxu1 %v1725_v54  ;;  %1880 = vtanh.f32 %v1173_v1 }
 0x1ac   :  { %v1047_v16 = vmul.f32 0.044715, %v983_v9  ;;  %847 = vmatmul.bf16.gmra.mxu2 %v1725_v54  ;;  %896 = vmatmul.bf16.gmra.mxu3 %v1725_v54  ;;  %1882 = vtanh.f32 %v1174_v8  ;;  %v985_v19 = vmul.f32 %v921_v37, %v2618_v44  ;;  %v922_v0 = vmul.f32 %v2626_v46, %v2626_v46 }
 0x1ad   :  { %v400_v50 = vmul.f32 %v2405_v11, %v380_v7  ;;  %v830_v14 = vpop.f32.mrf.mxu2  ;;  %v1048_v18 = vmul.f32 0.044715, %v984_v15 }
 0x1ae   :  { %v879_v20 = vpop.f32.mrf.mxu3  ;;  %v1111_v5 = vadd.f32 %v1047_v16, %v2603_v62  ;;  %v2636_v11 = vadd.f32 %v830_v14, %v2577_v55  ;;  %v1049_v51 = vmul.f32 0.044715, %v985_v19  ;;  %v735_v22 = vpop.f32.mrf.mxu0  ;;  %v986_v26 = vmul.f32 %v922_v0, %v2626_v46 }
 0x1af   :  { %v420_v56 = vadd.f32 %v2440_v23, %v400_v50  ;;  %v1112_v38 = vadd.f32 %v1048_v18, %v2606_v52  ;;  %v2640_v49 = vadd.f32 %v879_v20, %v2589_v31  ;;  %v2649_v33 = vadd.f32 %v735_v22, %v2554_v30  ;;  %v784_v40 = vpop.f32.mrf.mxu1 }
 0x1b0   :  { %v1175_v25 = vmul.f32 0.7978846, %v1111_v5  ;;  %v1113_v27 = vadd.f32 %v1049_v51, %v2618_v44  ;;  %v923_v57 = vmul.f32 %v2636_v11, %v2636_v11  ;;  %v1050_v45 = vmul.f32 0.044715, %v986_v26 }
 0x1b1   :  { %v1826_v43 = vpack.c.bf16 %v420_v56, %v419_v21  ;;  %v1176_v23 = vmul.f32 0.7978846, %v1112_v38  ;;  %v924_v39 = vmul.f32 %v2640_v49, %v2640_v49  ;;  %v1881_v41 = vpop.eup %1880  ;;  %v925_v13 = vmul.f32 %v2649_v33, %v2649_v33 }
 0x1b2   :  { %1884 = vtanh.f32 %v1175_v25  ;;  %v1883_v47 = vpop.eup %1882  ;;  %v1301_v63 = vadd.f32 1.0, %v1881_v41  ;;  %v1177_v29 = vmul.f32 0.7978846, %v1113_v27  ;;  %v987_v48 = vmul.f32 %v923_v57, %v2636_v11  ;;  %v1726_v21 = vld [vmem:[#allocation2 + $0x20] sm:$0xff] }
 0x1b3   :  { %1845 = vst [vmem:[#allocation2 + $0x28] sm:$0xff] %v1826_v43   ;;  %1886 = vtanh.f32 %v1176_v23  ;;  %v1302_v53 = vadd.f32 1.0, %v1883_v47  ;;  %v1114_v59 = vadd.f32 %v1050_v45, %v2626_v46  ;;  %v988_v60 = vmul.f32 %v924_v39, %v2640_v49 }
 0x1b4   :  { %v1365_v32 = vmul.f32 0.5, %v1301_v63  ;;  %1888 = vtanh.f32 %v1177_v29  ;;  %v1051_v28 = vmul.f32 0.044715, %v987_v48  ;;  %v2657_v4 = vadd.f32 %v784_v40, %v2556_v10 }
 0x1b5   :  { %v833_v61 = vpop.f32.mrf.mxu2  ;;  %v1366_v58 = vmul.f32 0.5, %v1302_v53  ;;  %v1178_v3 = vmul.f32 0.7978846, %v1114_v59  ;;  %v1052_v35 = vmul.f32 0.044715, %v988_v60  ;;  %v989_v34 = vmul.f32 %v925_v13, %v2649_v33 }
 0x1b6   :  { %v1429_v42 = vmul.f32 %v1365_v32, %v2572_v36  ;;  %v1115_v6 = vadd.f32 %v1051_v28, %v2636_v11  ;;  %v2663_v54 = vadd.f32 %v833_v61, %v2577_v55  ;;  %v882_v7 = vpop.f32.mrf.mxu3  ;;  %v926_v15 = vmul.f32 %v2657_v4, %v2657_v4 }
 0x1b7   :  { %v1430_v8 = vmul.f32 %v1366_v58, %v2575_v2  ;;  %1890 = vtanh.f32 %v1178_v3  ;;  %v1116_v9 = vadd.f32 %v1052_v35, %v2640_v49  ;;  %v1053_v16 = vmul.f32 0.044715, %v989_v34  ;;  %v737_v2 = vpop.f32.mrf.mxu0  ;;  %v786_v29 = vpop.f32.mrf.mxu1 }
 0x1b8   :  { %v1885_v1 = vpop.eup %1884  ;;  %v1179_v36 = vmul.f32 0.7978846, %v1115_v6  ;;  %v927_v14 = vmul.f32 %v2663_v54, %v2663_v54  ;;  %v990_v56 = vmul.f32 %v926_v15, %v2657_v4  ;;  %v2679_v57 = vadd.f32 %v882_v7, %v2589_v31 }
 0x1b9   :  { %v1887_v37 = vpop.eup %1886  ;;  %v1303_v50 = vadd.f32 1.0, %v1885_v1  ;;  %v1493_v18 = vpack.c.bf16 %v1430_v8, %v1429_v42  ;;  %v1180_v20 = vmul.f32 0.7978846, %v1116_v9  ;;  %v1117_v38 = vadd.f32 %v1053_v16, %v2649_v33 }
 0x1ba   :  { %v1304_v19 = vadd.f32 1.0, %v1887_v37  ;;  %v1889_v5 = vpop.eup %1888  ;;  %1892 = vtanh.f32 %v1179_v36  ;;  %v991_v51 = vmul.f32 %v927_v14, %v2663_v54  ;;  %v1054_v25 = vmul.f32 0.044715, %v990_v56 }
 0x1bb   :  { %v1367_v0 = vmul.f32 0.5, %v1303_v50  ;;  %754 = vmatmul.bf16.gmra.mxu0 %v1726_v21  ;;  %803 = vmatmul.bf16.gmra.mxu1 %v1726_v21  ;;  %1525 = vst [vmem:[%s3192_s5] sm:$0xff] %v1493_v18  ;;  %v1305_v43 = vadd.f32 1.0, %v1889_v5  ;;  %1894 = vtanh.f32 %v1180_v20  ;;  %v1181_v23 = vmul.f32 0.7978846, %v1117_v38 }
 0x1bc   :  { %v1368_v22 = vmul.f32 0.5, %v1304_v19  ;;  %852 = vmatmul.bf16.gmra.mxu2 %v1726_v21  ;;  %901 = vmatmul.bf16.gmra.mxu3 %v1726_v21  ;;  %v1055_v27 = vmul.f32 0.044715, %v991_v51  ;;  %v1118_v47 = vadd.f32 %v1054_v25, %v2657_v4  ;;  %v2684_v63 = vadd.f32 %v737_v2, %v2554_v30 }
 0x1bd   :  { %v1431_v26 = vmul.f32 %v1367_v0, %v2603_v62  ;;  %v1891_v39 = vpop.eup %1890  ;;  %v1369_v45 = vmul.f32 0.5, %v1305_v43  ;;  %1896 = vtanh.f32 %v1181_v23  ;;  %v928_v62 = vmul.f32 %v2679_v57, %v2679_v57  ;;  %v835_v53 = vpop.f32.mrf.mxu2 }
 0x1be   :  { %v1432_v41 = vmul.f32 %v1368_v22, %v2606_v52  ;;  %v1306_v48 = vadd.f32 1.0, %v1891_v39  ;;  %v1119_v40 = vadd.f32 %v1055_v27, %v2663_v54  ;;  %v1182_v61 = vmul.f32 0.7978846, %v1118_v47  ;;  %v884_v35 = vpop.f32.mrf.mxu3  ;;  %v1727_v47 = vld [vmem:[#allocation2 + $0x28] sm:$0xff] }
 0x1bf   :  { %v1433_v60 = vmul.f32 %v1369_v45, %v2618_v44  ;;  %v929_v52 = vmul.f32 %v2684_v63, %v2684_v63  ;;  %v992_v58 = vmul.f32 %v928_v62, %v2679_v57  ;;  %v2694_v3 = vadd.f32 %v786_v29, %v2556_v10  ;;  %v740_v36 = vpop.f32.mrf.mxu0  ;;  %v789_v45 = vpop.f32.mrf.mxu1 }
 0x1c0   :  { %v1494_v59 = vpack.c.bf16 %v1432_v41, %v1431_v26  ;;  %v1893_v32 = vpop.eup %1892  ;;  %v1370_v28 = vmul.f32 0.5, %v1306_v48  ;;  %v1183_v13 = vmul.f32 0.7978846, %v1119_v40  ;;  %1898 = vtanh.f32 %v1182_v61 }
 0x1c1   :  { %v1895_v42 = vpop.eup %1894  ;;  %v1307_v6 = vadd.f32 1.0, %v1893_v32  ;;  %v993_v44 = vmul.f32 %v929_v52, %v2684_v63  ;;  %v2701_v34 = vadd.f32 %v835_v53, %v2577_v55  ;;  %v1056_v8 = vmul.f32 0.044715, %v992_v58 }
 0x1c2   :  { %1526 = vst [vmem:[%s3192_s5 + $0x8] sm:$0xff] %v1494_v59  ;;  %v1434_v7 = vmul.f32 %v1370_v28, %v2626_v46  ;;  %v1308_v1 = vadd.f32 1.0, %v1895_v42  ;;  %1900 = vtanh.f32 %v1183_v13  ;;  %v930_v37 = vmul.f32 %v2694_v3, %v2694_v3 }
 0x1c3   :  { %v1371_v9 = vmul.f32 0.5, %v1307_v6  ;;  %v1057_v15 = vmul.f32 0.044715, %v993_v44  ;;  %v931_v50 = vmul.f32 %v2701_v34, %v2701_v34  ;;  %v1897_v16 = vpop.eup %1896  ;;  %v1120_v18 = vadd.f32 %v1056_v8, %v2679_v57 }
 0x1c4   :  { %v1495_v14 = vpack.c.bf16 %v1434_v7, %v1433_v60  ;;  %v1372_v21 = vmul.f32 0.5, %v1308_v1  ;;  %v2710_v19 = vadd.f32 %v884_v35, %v2589_v31  ;;  %v1309_v20 = vadd.f32 1.0, %v1897_v16 }
 0x1c5   :  { %v1435_v46 = vmul.f32 %v1371_v9, %v2636_v11  ;;  %v1121_v56 = vadd.f32 %v1057_v15, %v2684_v63  ;;  %v994_v2 = vmul.f32 %v930_v37, %v2694_v3  ;;  %v1184_v0 = vmul.f32 0.7978846, %v1120_v18 }
 0x1c6   :  { %1527 = vst [vmem:[%s3192_s5 + $0x10] sm:$0xff] %v1495_v14  ;;  %v1436_v5 = vmul.f32 %v1372_v21, %v2640_v49  ;;  %v995_v38 = vmul.f32 %v931_v50, %v2701_v34  ;;  %v932_v51 = vmul.f32 %v2710_v19, %v2710_v19  ;;  %v1899_v22 = vpop.eup %1898  ;;  %v1373_v43 = vmul.f32 0.5, %v1309_v20  ;;  %v838_v49 = vpop.f32.mrf.mxu2 }
 0x1c7   :  { %v1185_v11 = vmul.f32 0.7978846, %v1121_v56  ;;  %v1058_v25 = vmul.f32 0.044715, %v994_v2  ;;  %v2723_v26 = vadd.f32 %v740_v36, %v2554_v30  ;;  %v1310_v39 = vadd.f32 1.0, %v1899_v22  ;;  %v887_v61 = vpop.f32.mrf.mxu3  ;;  %v742_v1 = vpop.f32.mrf.mxu0 }
 0x1c8   :  { %v1901_v23 = vpop.eup %1900  ;;  %v1496_v27 = vpack.c.bf16 %v1436_v5, %v1435_v46  ;;  %1902 = vtanh.f32 %v1184_v0  ;;  %v1059_v41 = vmul.f32 0.044715, %v995_v38  ;;  %v1437_v29 = vmul.f32 %v1373_v43, %v2649_v33 }
 0x1c9   :  { %v1311_v48 = vadd.f32 1.0, %v1901_v23  ;;  %1904 = vtanh.f32 %v1185_v11  ;;  %v1122_v40 = vadd.f32 %v1058_v25, %v2694_v3  ;;  %v1374_v62 = vmul.f32 0.5, %v1310_v39 }
 0x1ca   :  { %1528 = vst [vmem:[%s3192_s5 + $0x18] sm:$0xff] %v1496_v27  ;;  %v1123_v53 = vadd.f32 %v1059_v41, %v2701_v34  ;;  %v996_v59 = vmul.f32 %v932_v51, %v2710_v19  ;;  %v933_v60 = vmul.f32 %v2723_v26, %v2723_v26  ;;  %v2735_v32 = vadd.f32 %v789_v45, %v2556_v10  ;;  %v791_v27 = vpop.f32.mrf.mxu1 }
 0x1cb   :  { %759 = vmatmul.bf16.gmra.mxu0 %v1727_v47  ;;  %v1375_v52 = vmul.f32 0.5, %v1311_v48  ;;  %v1186_v33 = vmul.f32 0.7978846, %v1122_v40  ;;  %v2738_v28 = vadd.f32 %v838_v49, %v2577_v55  ;;  %808 = vmatmul.bf16.gmra.mxu1 %v1727_v47  ;;  %v1438_v13 = vmul.f32 %v1374_v62, %v2657_v4 }
 0x1cc   :  { %857 = vmatmul.bf16.gmra.mxu2 %v1727_v47  ;;  %v1187_v58 = vmul.f32 0.7978846, %v1123_v53  ;;  %v1060_v35 = vmul.f32 0.044715, %v996_v59  ;;  %v997_v42 = vmul.f32 %v933_v60, %v2723_v26  ;;  %906 = vmatmul.bf16.gmra.mxu3 %v1727_v47  ;;  %v934_v44 = vmul.f32 %v2735_v32, %v2735_v32 }
 0x1cd   :  { %v1439_v6 = vmul.f32 %v1375_v52, %v2663_v54  ;;  %1906 = vtanh.f32 %v1186_v33  ;;  %v935_v7 = vmul.f32 %v2738_v28, %v2738_v28  ;;  %v1497_v9 = vpack.c.bf16 %v1438_v13, %v1437_v29 }
 0x1ce   :  { %v1903_v8 = vpop.eup %1902  ;;  %1908 = vtanh.f32 %v1187_v58  ;;  %v1124_v4 = vadd.f32 %v1060_v35, %v2710_v19  ;;  %v1061_v15 = vmul.f32 0.044715, %v997_v42  ;;  %v998_v36 = vmul.f32 %v934_v44, %v2735_v32  ;;  %v840_v47 = vpop.f32.mrf.mxu2 }
 0x1cf   :  { %v1905_v37 = vpop.eup %1904  ;;  %v1312_v50 = vadd.f32 1.0, %v1903_v8  ;;  %v999_v54 = vmul.f32 %v935_v7, %v2738_v28  ;;  %v2751_v16 = vadd.f32 %v887_v61, %v2589_v31  ;;  %1529 = vst [vmem:[%s3192_s5 + $0x20] sm:$0xff] %v1497_v9  ;;  %v2758_v46 = vadd.f32 %v742_v1, %v2554_v30  ;;  %v889_v29 = vpop.f32.mrf.mxu3 }
 0x1d0   :  { %v1313_v14 = vadd.f32 1.0, %v1905_v37  ;;  %v1188_v21 = vmul.f32 0.7978846, %v1124_v4  ;;  %v1125_v18 = vadd.f32 %v1061_v15, %v2723_v26  ;;  %v1062_v56 = vmul.f32 0.044715, %v998_v36 }
 0x1d1   :  { %v1376_v20 = vmul.f32 0.5, %v1312_v50  ;;  %v1063_v2 = vmul.f32 0.044715, %v999_v54  ;;  %v936_v5 = vmul.f32 %v2751_v16, %v2751_v16  ;;  %v937_v51 = vmul.f32 %v2758_v46, %v2758_v46 }
 0x1d2   :  { %v1377_v0 = vmul.f32 0.5, %v1313_v14  ;;  %1910 = vtanh.f32 %v1188_v21  ;;  %v1189_v38 = vmul.f32 0.7978846, %v1125_v18  ;;  %v1126_v11 = vadd.f32 %v1062_v56, %v2735_v32 }
 0x1d3   :  { %v1907_v22 = vpop.eup %1906  ;;  %v1440_v43 = vmul.f32 %v1376_v20, %v2679_v57  ;;  %v1127_v25 = vadd.f32 %v1063_v2, %v2738_v28  ;;  %v1000_v23 = vmul.f32 %v936_v5, %v2751_v16  ;;  %v1001_v49 = vmul.f32 %v937_v51, %v2758_v46 }
 0x1d4   :  { %v1909_v39 = vpop.eup %1908  ;;  %v1441_v41 = vmul.f32 %v1377_v0, %v2684_v63  ;;  %v1314_v45 = vadd.f32 1.0, %v1907_v22  ;;  %1912 = vtanh.f32 %v1189_v38  ;;  %v1190_v62 = vmul.f32 0.7978846, %v1126_v11 }
 0x1d5   :  { %v1498_v48 = vpack.c.bf16 %v1440_v43, %v1439_v6  ;;  %v1315_v40 = vadd.f32 1.0, %v1909_v39  ;;  %v1191_v57 = vmul.f32 0.7978846, %v1127_v25  ;;  %v1064_v59 = vmul.f32 0.044715, %v1000_v23 }
 0x1d6   :  { %v1378_v53 = vmul.f32 0.5, %v1314_v45  ;;  %v1065_v60 = vmul.f32 0.044715, %v1001_v49  ;;  %v2771_v61 = vadd.f32 %v791_v27, %v2556_v10  ;;  %1914 = vtanh.f32 %v1190_v62 }
 0x1d7   :  { %1530 = vst [vmem:[%s3192_s5 + $0x28] sm:$0xff] %v1498_v48  ;;  %v1379_v63 = vmul.f32 0.5, %v1315_v40  ;;  %v2777_v52 = vadd.f32 %v840_v47, %v2577_v55  ;;  %v2780_v33 = vadd.f32 %v889_v29, %v2589_v31  ;;  %1916 = vtanh.f32 %v1191_v57  ;;  %v172_v40 = vpop.xlane.xlu0 %171 }
 0x1d8   :  { %v1911_v13 = vpop.eup %1910  ;;  %v1442_v58 = vmul.f32 %v1378_v53, %v2694_v3  ;;  %v1128_v35 = vadd.f32 %v1064_v59, %v2751_v16  ;;  %v1129_v42 = vadd.f32 %v1065_v60, %v2758_v46  ;;  %v938_v7 = vmul.f32 %v2771_v61, %v2771_v61 }
 0x1d9   :  { %v1443_v6 = vmul.f32 %v1379_v63, %v2701_v34  ;;  %v1316_v44 = vadd.f32 1.0, %v1911_v13  ;;  %v939_v1 = vmul.f32 %v2777_v52, %v2777_v52  ;;  %v940_v3 = vmul.f32 %v2780_v33, %v2780_v33 }
 0x1da   :  { %v1913_v8 = vpop.eup %1912  ;;  %v1499_v9 = vpack.c.bf16 %v1442_v58, %v1441_v41  ;;  %v1192_v4 = vmul.f32 0.7978846, %v1128_v35  ;;  %v1193_v15 = vmul.f32 0.7978846, %v1129_v42  ;;  %v1002_v36 = vmul.f32 %v938_v7, %v2771_v61 }
 0x1db   :  { %v1380_v37 = vmul.f32 0.5, %v1316_v44  ;;  %v1317_v50 = vadd.f32 1.0, %v1913_v8  ;;  %v1003_v34 = vmul.f32 %v939_v1, %v2777_v52  ;;  %v1004_v54 = vmul.f32 %v940_v3, %v2780_v33 }
 0x1dc   :  { %1531 = vst [vmem:[%s3192_s5 + $0x30] sm:$0xff] %v1499_v9  ;;  %1918 = vtanh.f32 %v1192_v4  ;;  %v1915_v14 = vpop.eup %1914  ;;  %v1066_v20 = vmul.f32 0.044715, %v1002_v36 }
 0x1dd   :  { %v1444_v21 = vmul.f32 %v1380_v37, %v2710_v19  ;;  %v1381_v18 = vmul.f32 0.5, %v1317_v50  ;;  %1920 = vtanh.f32 %v1193_v15  ;;  %v1917_v56 = vpop.eup %1916  ;;  %v1318_v2 = vadd.f32 1.0, %v1915_v14 }
 0x1de   :  { %v1067_v5 = vmul.f32 0.044715, %v1003_v34  ;;  %v1068_v0 = vmul.f32 0.044715, %v1004_v54  ;;  %v1319_v51 = vadd.f32 1.0, %v1917_v56  ;;  %v1130_v22 = vadd.f32 %v1066_v20, %v2771_v61 }
 0x1df   :  { %v1500_v38 = vpack.c.bf16 %v1444_v21, %v1443_v6  ;;  %v1445_v43 = vmul.f32 %v1381_v18, %v2723_v26  ;;  %v1382_v11 = vmul.f32 0.5, %v1318_v2 }
 0x1e0   :  { %v1131_v25 = vadd.f32 %v1067_v5, %v2777_v52  ;;  %v1132_v23 = vadd.f32 %v1068_v0, %v2780_v33  ;;  %v1383_v19 = vmul.f32 0.5, %v1319_v51  ;;  %v1194_v27 = vmul.f32 0.7978846, %v1130_v22 }
 0x1e1   :  { %1532 = vst [vmem:[%s3192_s5 + $0x38] sm:$0xff] %v1500_v38  ;;  %v1446_v41 = vmul.f32 %v1382_v11, %v2735_v32  ;;  %v189_v32 = vmul.f32 %v172_v40, %v2060_v17  ;;  %v2012_v38 = vld [vmem:[%s3188_s1] ss:$0 sm:$0xff] }
 0x1e2   :  { %v1919_v39 = vpop.eup %1918  ;;  %v1195_v45 = vmul.f32 0.7978846, %v1131_v25  ;;  %v1196_v49 = vmul.f32 0.7978846, %v1132_v23  ;;  %1922 = vtanh.f32 %v1194_v27  ;;  %v1447_v62 = vmul.f32 %v1383_v19, %v2738_v28 }
 0x1e3   :  { %v1921_v47 = vpop.eup %1920  ;;  %v1320_v29 = vadd.f32 1.0, %v1919_v39  ;;  %v1501_v26 = vpack.c.bf16 %v1446_v41, %v1445_v43  ;;  %v205_v42 = vadd.f32 1e-06, %v189_v32 }
 0x1e4   :  { %v1321_v48 = vadd.f32 1.0, %v1921_v47  ;;  %1924 = vtanh.f32 %v1195_v45 }
 0x1e5   :  { %v1384_v57 = vmul.f32 0.5, %v1320_v29  ;;  %1926 = vtanh.f32 %v1196_v49  ;;  %1533 = vst [vmem:[%s3192_s5 + $0x40] sm:$0xff] %v1501_v26  ;;  %vm353_vm11 = vweird.f32 %v205_v42 }
 0x1e6   :  { %v1385_v59 = vmul.f32 0.5, %v1321_v48  ;;  %1928 = vrsqrt.f32 %v205_v42 }
 0x1e7   :  { %v1448_v53 = vmul.f32 %v1384_v57, %v2751_v16 }
 0x1e8   :  { %v1923_v60 = vpop.eup %1922  ;;  %v1449_v6 = vmul.f32 %v1385_v59, %v2758_v46 }
 0x1e9   :  { %v1502_v63 = vpack.c.bf16 %v1448_v53, %v1447_v62  ;;  %v1322_v58 = vadd.f32 1.0, %v1923_v60 }
 0x1ea   :  { %v1925_v13 = vpop.eup %1924 }
 0x1eb   :  { %v1927_v35 = vpop.eup %1926  ;;  %1534 = vst [vmem:[%s3192_s5 + $0x48] sm:$0xff] %v1502_v63  ;;  %v1323_v28 = vadd.f32 1.0, %v1925_v13  ;;  %v1386_v44 = vmul.f32 0.5, %v1322_v58 }
 0x1ec   :  { %v1324_v7 = vadd.f32 1.0, %v1927_v35  ;;  %v1929_v46 = vpop.eup %1928 }
 0x1ed   :  { %v1387_v1 = vmul.f32 0.5, %v1323_v28  ;;  %v1450_v16 = vmul.f32 %v1386_v44, %v2771_v61  ;;  %v348_v37 = vmul.f32 %v1929_v46, %v205_v42  ;;  %vm354_vm12 = vweird.f32 %v1929_v46 }
 0x1ee   :  { %v1388_v8 = vmul.f32 0.5, %v1324_v7  ;;  %vm355_vm13 = vmor %vm353_vm11, %vm354_vm12 }
 0x1ef   :  { %v1451_v9 = vmul.f32 %v1387_v1, %v2777_v52  ;;  %v1503_v4 = vpack.c.bf16 %v1450_v16, %v1449_v6  ;;  %v349_v50 = vmul.f32 %v1929_v46, %v348_v37 }
 0x1f0   :  { %v1452_v15 = vmul.f32 %v1388_v8, %v2780_v33 }
 0x1f1   :  { %1535 = vst [vmem:[%s3192_s5 + $0x50] sm:$0xff] %v1503_v4  ;;  %v350_v34 = vmul.f32 0.5, %v349_v50 }
 0x1f2   :  { %v1504_v3 = vpack.c.bf16 %v1452_v15, %v1451_v9 }
 0x1f3   :  { %v351_v54 = vsub.f32 1.5, %v350_v34 }
 0x1f4   :  { %1536 = vst [vmem:[%s3192_s5 + $0x58] sm:$0xff] %v1504_v3 }
 0x1f5   :  { %v352_v14 = vmul.f32 %v1929_v46, %v351_v54 }
 0x1f7   :  { %v356_v20 = vsel %vm355_vm13, %v1929_v46, %v352_v14 }
 0x1f8   :  { %v381_v5 = vmul.f32 %v356_v20, %v2507_v24  ;;  %v2013_v24 = vld [vmem:[%s3189_s2] ss:$0 sm:$0xff] }
 0x1fa   :  { %v401_v51 = vmul.f32 %v2012_v38, %v381_v5 }
 0x1fc   :  { %v421_v27 = vadd.f32 %v2013_v24, %v401_v51 }
 0x1fd   :  { %v174_v61 = vpop.xlane.xlu1 %173 }
 0x1fe   :  { %v190_v36 = vmul.f32 %v174_v61, %v2060_v17 }
 0x200   :  { %v206_v52 = vadd.f32 1e-06, %v190_v36 }
 0x202   :  { %1930 = vrsqrt.f32 %v206_v52  ;;  %vm363_vm15 = vweird.f32 %v206_v52 }
 0x208   :  { %v1931_v33 = vpop.eup %1930 }
 0x209   :  { %v358_v21 = vmul.f32 %v1931_v33, %v206_v52  ;;  %vm364_vm14 = vweird.f32 %v1931_v33 }
 0x20a   :  { %vm365_vm0 = vmor %vm363_vm15, %vm364_vm14 }
 0x20b   :  { %v359_v18 = vmul.f32 %v1931_v33, %v358_v21 }
 0x20d   :  { %v360_v56 = vmul.f32 0.5, %v359_v18 }
 0x20f   :  { %v361_v2 = vsub.f32 1.5, %v360_v56 }
 0x211   :  { %v362_v0 = vmul.f32 %v1931_v33, %v361_v2 }
 0x213   :  { %v366_v17 = vsel %vm365_vm0, %v1931_v33, %v362_v0 }
 0x214   :  { %v382_v22 = vmul.f32 %v366_v17, %v2521_v12 }
 0x216   :  { %v402_v25 = vmul.f32 %v2012_v38, %v382_v22 }
 0x217   :  { %v745_v43 = vpop.f32.mrf.mxu0  ;;  %v794_v11 = vpop.f32.mrf.mxu1 }
 0x218   :  { %v2833_v23 = vadd.f32 %v745_v43, %v2554_v30  ;;  %v2836_v19 = vadd.f32 %v794_v11, %v2556_v10  ;;  %v422_v39 = vadd.f32 %v2013_v24, %v402_v25 }
 0x21a   :  { %v941_v41 = vmul.f32 %v2833_v23, %v2833_v23  ;;  %v942_v12 = vmul.f32 %v2836_v19, %v2836_v19  ;;  %v1831_v45 = vpack.c.bf16 %v422_v39, %v421_v27 }
 0x21c   :  { %v1005_v49 = vmul.f32 %v941_v41, %v2833_v23  ;;  %v1006_v47 = vmul.f32 %v942_v12, %v2836_v19  ;;  %1846 = vst [vmem:[#allocation2 + $0x38] sm:$0xff] %v1831_v45  }
 0x21e   :  { %v1069_v29 = vmul.f32 0.044715, %v1005_v49  ;;  %v1070_v26 = vmul.f32 0.044715, %v1006_v47  ;;  %v843_v48 = vpop.f32.mrf.mxu2  ;;  %v892_v40 = vpop.f32.mrf.mxu3 }
 0x21f   :  { %v2848_v62 = vadd.f32 %v843_v48, %v2577_v55  ;;  %v2851_v57 = vadd.f32 %v892_v40, %v2589_v31  ;;  %v747_v53 = vpop.f32.mrf.mxu0  ;;  %v796_v32 = vpop.f32.mrf.mxu1 }
 0x220   :  { %v1133_v59 = vadd.f32 %v1069_v29, %v2833_v23  ;;  %v1134_v60 = vadd.f32 %v1070_v26, %v2836_v19  ;;  %v2856_v63 = vadd.f32 %v747_v53, %v2554_v30  ;;  %v2859_v13 = vadd.f32 %v796_v32, %v2556_v10 }
 0x221   :  { %v943_v58 = vmul.f32 %v2848_v62, %v2848_v62  ;;  %v944_v35 = vmul.f32 %v2851_v57, %v2851_v57 }
 0x222   :  { %v1197_v28 = vmul.f32 0.7978846, %v1133_v59  ;;  %v1198_v42 = vmul.f32 0.7978846, %v1134_v60  ;;  %v945_v6 = vmul.f32 %v2856_v63, %v2856_v63  ;;  %v946_v44 = vmul.f32 %v2859_v13, %v2859_v13 }
 0x223   :  { %v1007_v7 = vmul.f32 %v943_v58, %v2848_v62  ;;  %v1008_v1 = vmul.f32 %v944_v35, %v2851_v57  ;;  %v1728_v15 = vld [vmem:[#allocation2 + $0x38] sm:$0xff] }
 0x224   :  { %1932 = vtanh.f32 %v1197_v28  ;;  %v1009_v16 = vmul.f32 %v945_v6, %v2856_v63  ;;  %v1010_v8 = vmul.f32 %v946_v44, %v2859_v13  ;;  %764 = vmatmul.bf16.gmra.mxu0 %v1728_v15  ;;  %813 = vmatmul.bf16.gmra.mxu1 %v1728_v15 }
 0x225   :  { %1934 = vtanh.f32 %v1198_v42  ;;  %v1071_v9 = vmul.f32 0.044715, %v1007_v7  ;;  %v1072_v4 = vmul.f32 0.044715, %v1008_v1  ;;  %862 = vmatmul.bf16.gmra.mxu2 %v1728_v15  ;;  %911 = vmatmul.bf16.gmra.mxu3 %v1728_v15 }
 0x226   :  { %v1073_v3 = vmul.f32 0.044715, %v1009_v16  ;;  %v1074_v46 = vmul.f32 0.044715, %v1010_v8  ;;  %v845_v37 = vpop.f32.mrf.mxu2  ;;  %v894_v50 = vpop.f32.mrf.mxu3 }
 0x227   :  { %v1135_v61 = vadd.f32 %v1071_v9, %v2848_v62  ;;  %v1136_v36 = vadd.f32 %v1072_v4, %v2851_v57  ;;  %v2876_v52 = vadd.f32 %v845_v37, %v2577_v55  ;;  %v2881_v33 = vadd.f32 %v894_v50, %v2589_v31 }
 0x228   :  { %v1137_v34 = vadd.f32 %v1073_v3, %v2856_v63  ;;  %v1138_v54 = vadd.f32 %v1074_v46, %v2859_v13  ;;  %v750_v20 = vpop.f32.mrf.mxu0  ;;  %v799_v56 = vpop.f32.mrf.mxu1 }
 0x229   :  { %v1199_v14 = vmul.f32 0.7978846, %v1135_v61  ;;  %v1200_v21 = vmul.f32 0.7978846, %v1136_v36  ;;  %v947_v18 = vmul.f32 %v2876_v52, %v2876_v52  ;;  %v948_v17 = vmul.f32 %v2881_v33, %v2881_v33 }
 0x22a   :  { %v1933_v2 = vpop.eup %1932  ;;  %v1201_v5 = vmul.f32 0.7978846, %v1137_v34  ;;  %v1202_v0 = vmul.f32 0.7978846, %v1138_v54  ;;  %v2888_v38 = vadd.f32 %v750_v20, %v2554_v30  ;;  %v2892_v11 = vadd.f32 %v799_v56, %v2556_v10 }
 0x22b   :  { %v1935_v51 = vpop.eup %1934  ;;  %v1325_v22 = vadd.f32 1.0, %v1933_v2  ;;  %1936 = vtanh.f32 %v1199_v14  ;;  %v1011_v43 = vmul.f32 %v947_v18, %v2876_v52  ;;  %v1012_v24 = vmul.f32 %v948_v17, %v2881_v33 }
 0x22c   :  { %v1326_v25 = vadd.f32 1.0, %v1935_v51  ;;  %1938 = vtanh.f32 %v1200_v21  ;;  %v949_v27 = vmul.f32 %v2888_v38, %v2888_v38  ;;  %v950_v12 = vmul.f32 %v2892_v11, %v2892_v11 }
 0x22d   :  { %v1389_v39 = vmul.f32 0.5, %v1325_v22  ;;  %1940 = vtanh.f32 %v1201_v5  ;;  %v1075_v41 = vmul.f32 0.044715, %v1011_v43  ;;  %v1076_v49 = vmul.f32 0.044715, %v1012_v24 }
 0x22e   :  { %v1390_v45 = vmul.f32 0.5, %v1326_v25  ;;  %1942 = vtanh.f32 %v1202_v0  ;;  %v1013_v47 = vmul.f32 %v949_v27, %v2888_v38  ;;  %v1014_v48 = vmul.f32 %v950_v12, %v2892_v11 }
 0x22f   :  { %v1453_v29 = vmul.f32 %v1389_v39, %v2833_v23  ;;  %v1139_v26 = vadd.f32 %v1075_v41, %v2876_v52  ;;  %v1140_v53 = vadd.f32 %v1076_v49, %v2881_v33  ;;  %v848_v59 = vpop.f32.mrf.mxu2  ;;  %v897_v60 = vpop.f32.mrf.mxu3 }
 0x230   :  { %v1454_v40 = vmul.f32 %v1390_v45, %v2836_v19  ;;  %v1077_v32 = vmul.f32 0.044715, %v1013_v47  ;;  %v1078_v28 = vmul.f32 0.044715, %v1014_v48  ;;  %v2906_v42 = vadd.f32 %v848_v59, %v2577_v55  ;;  %v752_v23 = vpop.f32.mrf.mxu0  ;;  %v801_v8 = vpop.f32.mrf.mxu1 }
 0x231   :  { %v1937_v58 = vpop.eup %1936  ;;  %v1203_v35 = vmul.f32 0.7978846, %v1139_v26  ;;  %v2909_v6 = vadd.f32 %v897_v60, %v2589_v31  ;;  %v1204_v16 = vmul.f32 0.7978846, %v1140_v53  ;;  %v2926_v51 = vadd.f32 %v752_v23, %v2554_v30 }
 0x232   :  { %v1939_v44 = vpop.eup %1938  ;;  %v1505_v7 = vpack.c.bf16 %v1454_v40, %v1453_v29  ;;  %v1327_v1 = vadd.f32 1.0, %v1937_v58  ;;  %v1141_v19 = vadd.f32 %v1077_v32, %v2888_v38  ;;  %v1142_v15 = vadd.f32 %v1078_v28, %v2892_v11 }
 0x233   :  { %v1941_v9 = vpop.eup %1940  ;;  %v1328_v4 = vadd.f32 1.0, %v1939_v44  ;;  %1944 = vtanh.f32 %v1203_v35  ;;  %v951_v3 = vmul.f32 %v2906_v42, %v2906_v42  ;;  %v952_v20 = vmul.f32 %v2909_v6, %v2909_v6 }
 0x234   :  { %v1943_v46 = vpop.eup %1942  ;;  %1537 = vst [vmem:[%s3192_s5 + $0x60] sm:$0xff] %v1505_v7  ;;  %v1391_v37 = vmul.f32 0.5, %v1327_v1  ;;  %v1329_v50 = vadd.f32 1.0, %v1941_v9  ;;  %1946 = vtanh.f32 %v1204_v16  ;;  %v1205_v61 = vmul.f32 0.7978846, %v1141_v19 }
 0x235   :  { %v1392_v36 = vmul.f32 0.5, %v1328_v4  ;;  %v1330_v34 = vadd.f32 1.0, %v1943_v46  ;;  %v1206_v54 = vmul.f32 0.7978846, %v1142_v15  ;;  %v1015_v14 = vmul.f32 %v951_v3, %v2906_v42 }
 0x236   :  { %v1455_v21 = vmul.f32 %v1391_v37, %v2848_v62  ;;  %v1393_v18 = vmul.f32 0.5, %v1329_v50  ;;  %1948 = vtanh.f32 %v1205_v61  ;;  %v1016_v17 = vmul.f32 %v952_v20, %v2909_v6 }
 0x237   :  { %v1456_v56 = vmul.f32 %v1392_v36, %v2851_v57  ;;  %v1394_v2 = vmul.f32 0.5, %v1330_v34  ;;  %1950 = vtanh.f32 %v1206_v54  ;;  %v1079_v5 = vmul.f32 0.044715, %v1015_v14  ;;  %v850_v62 = vpop.f32.mrf.mxu2  ;;  %v899_v39 = vpop.f32.mrf.mxu3 }
 0x238   :  { %v1457_v0 = vmul.f32 %v1393_v18, %v2856_v63  ;;  %v2929_v22 = vadd.f32 %v801_v8, %v2556_v10  ;;  %v2934_v27 = vadd.f32 %v850_v62, %v2577_v55  ;;  %v1080_v12 = vmul.f32 0.044715, %v1016_v17  ;;  %v755_v48 = vpop.f32.mrf.mxu0  ;;  %v804_v58 = vpop.f32.mrf.mxu1 }
 0x239   :  { %v1945_v43 = vpop.eup %1944  ;;  %v1506_v25 = vpack.c.bf16 %v1456_v56, %v1455_v21  ;;  %v1458_v24 = vmul.f32 %v1394_v2, %v2859_v13  ;;  %v1143_v57 = vadd.f32 %v1079_v5, %v2906_v42  ;;  %v953_v45 = vmul.f32 %v2926_v51, %v2926_v51 }
 0x23a   :  { %v1947_v63 = vpop.eup %1946  ;;  %v1331_v41 = vadd.f32 1.0, %v1945_v43  ;;  %v954_v49 = vmul.f32 %v2929_v22, %v2929_v22  ;;  %v955_v26 = vmul.f32 %v2934_v27, %v2934_v27  ;;  %v1144_v32 = vadd.f32 %v1080_v12, %v2909_v6 }
 0x23b   :  { %1538 = vst [vmem:[%s3192_s5 + $0x68] sm:$0xff] %v1506_v25  ;;  %v1507_v13 = vpack.c.bf16 %v1458_v24, %v1457_v0  ;;  %v1332_v47 = vadd.f32 1.0, %v1947_v63  ;;  %v1207_v29 = vmul.f32 0.7978846, %v1143_v57  ;;  %v1017_v59 = vmul.f32 %v953_v45, %v2926_v51 }
 0x23c   :  { %v1949_v40 = vpop.eup %1948  ;;  %v1395_v53 = vmul.f32 0.5, %v1331_v41  ;;  %v1018_v60 = vmul.f32 %v954_v49, %v2929_v22  ;;  %v1019_v44 = vmul.f32 %v955_v26, %v2934_v27  ;;  %v1208_v16 = vmul.f32 0.7978846, %v1144_v32 }
 0x23d   :  { %v1951_v35 = vpop.eup %1950  ;;  %1539 = vst [vmem:[%s3192_s5 + $0x70] sm:$0xff] %v1507_v13  ;;  %v1396_v28 = vmul.f32 0.5, %v1332_v47  ;;  %v1333_v23 = vadd.f32 1.0, %v1949_v40  ;;  %1952 = vtanh.f32 %v1207_v29  ;;  %v1081_v19 = vmul.f32 0.044715, %v1017_v59 }
 0x23e   :  { %v1459_v7 = vmul.f32 %v1395_v53, %v2876_v52  ;;  %v1334_v1 = vadd.f32 1.0, %v1951_v35  ;;  %v1082_v4 = vmul.f32 0.044715, %v1018_v60  ;;  %v1083_v15 = vmul.f32 0.044715, %v1019_v44 }
 0x23f   :  { %v1460_v8 = vmul.f32 %v1396_v28, %v2881_v33  ;;  %v1397_v9 = vmul.f32 0.5, %v1333_v23  ;;  %1954 = vtanh.f32 %v1208_v16  ;;  %v1145_v46 = vadd.f32 %v1081_v19, %v2926_v51  ;;  %v853_v50 = vpop.f32.mrf.mxu2 }
 0x240   :  { %v1398_v3 = vmul.f32 0.5, %v1334_v1  ;;  %v2956_v37 = vadd.f32 %v899_v39, %v2589_v31  ;;  %v1146_v52 = vadd.f32 %v1082_v4, %v2929_v22  ;;  %v1147_v34 = vadd.f32 %v1083_v15, %v2934_v27  ;;  %v757_v24 = vpop.f32.mrf.mxu0  ;;  %v806_v12 = vpop.f32.mrf.mxu1 }
 0x241   :  { %v1508_v61 = vpack.c.bf16 %v1460_v8, %v1459_v7  ;;  %v1461_v36 = vmul.f32 %v1397_v9, %v2888_v38  ;;  %v1209_v54 = vmul.f32 0.7978846, %v1145_v46  ;;  %v2965_v21 = vadd.f32 %v755_v48, %v2554_v30 }
 0x242   :  { %v1462_v33 = vmul.f32 %v1398_v3, %v2892_v11  ;;  %v956_v14 = vmul.f32 %v2956_v37, %v2956_v37  ;;  %v1210_v20 = vmul.f32 0.7978846, %v1146_v52  ;;  %v1211_v38 = vmul.f32 0.7978846, %v1147_v34  ;;  %v902_v11 = vpop.f32.mrf.mxu3 }
 0x243   :  { %v1953_v18 = vpop.eup %1952  ;;  %1540 = vst [vmem:[%s3192_s5 + $0x78] sm:$0xff] %v1508_v61  ;;  %v2971_v56 = vadd.f32 %v804_v58, %v2556_v10  ;;  %v2974_v2 = vadd.f32 %v853_v50, %v2577_v55  ;;  %1956 = vtanh.f32 %v1209_v54  ;;  %v957_v62 = vmul.f32 %v2965_v21, %v2965_v21 }
 0x244   :  { %v1509_v5 = vpack.c.bf16 %v1462_v33, %v1461_v36  ;;  %v1335_v0 = vadd.f32 1.0, %v1953_v18  ;;  %v1020_v17 = vmul.f32 %v956_v14, %v2956_v37  ;;  %1958 = vtanh.f32 %v1210_v20 }
 0x245   :  { %v958_v43 = vmul.f32 %v2971_v56, %v2971_v56  ;;  %v959_v25 = vmul.f32 %v2974_v2, %v2974_v2  ;;  %v1955_v57 = vpop.eup %1954  ;;  %1960 = vtanh.f32 %v1211_v38  ;;  %v2987_v41 = vadd.f32 %v902_v11, %v2589_v31 }
 0x246   :  { %1541 = vst [vmem:[%s3192_s5 + $0x80] sm:$0xff] %v1509_v5  ;;  %v1399_v39 = vmul.f32 0.5, %v1335_v0  ;;  %v1084_v63 = vmul.f32 0.044715, %v1020_v17  ;;  %v1336_v45 = vadd.f32 1.0, %v1955_v57  ;;  %v1021_v49 = vmul.f32 %v957_v62, %v2965_v21 }
 0x247   :  { %v1022_v13 = vmul.f32 %v958_v43, %v2971_v56  ;;  %v1023_v47 = vmul.f32 %v959_v25, %v2974_v2  ;;  %v960_v48 = vmul.f32 %v2987_v41, %v2987_v41  ;;  %v2997_v40 = vadd.f32 %v757_v24, %v2554_v30  ;;  %v855_v53 = vpop.f32.mrf.mxu2 }
 0x248   :  { %v1463_v29 = vmul.f32 %v1399_v39, %v2906_v42  ;;  %v1148_v26 = vadd.f32 %v1084_v63, %v2956_v37  ;;  %v1400_v32 = vmul.f32 0.5, %v1336_v45  ;;  %v1085_v59 = vmul.f32 0.044715, %v1021_v49  ;;  %v760_v0 = vpop.f32.mrf.mxu0 }
 0x249   :  { %v1086_v60 = vmul.f32 0.044715, %v1022_v13  ;;  %v3000_v58 = vadd.f32 %v806_v12, %v2556_v10  ;;  %v1957_v35 = vpop.eup %1956  ;;  %v1087_v23 = vmul.f32 0.044715, %v1023_v47  ;;  %v1024_v42 = vmul.f32 %v960_v48, %v2987_v41 }
 0x24a   :  { %v1212_v28 = vmul.f32 0.7978846, %v1148_v26  ;;  %v961_v44 = vmul.f32 %v2997_v40, %v2997_v40  ;;  %v1959_v7 = vpop.eup %1958  ;;  %v1464_v1 = vmul.f32 %v1400_v32, %v2909_v6  ;;  %v1337_v16 = vadd.f32 1.0, %v1957_v35  ;;  %v904_v20 = vpop.f32.mrf.mxu3 }
 0x24b   :  { %v1149_v19 = vadd.f32 %v1085_v59, %v2965_v21  ;;  %v1150_v8 = vadd.f32 %v1086_v60, %v2971_v56  ;;  %v1961_v9 = vpop.eup %1960  ;;  %v1338_v4 = vadd.f32 1.0, %v1959_v7  ;;  %v1151_v15 = vadd.f32 %v1087_v23, %v2974_v2 }
 0x24c   :  { %1962 = vtanh.f32 %v1212_v28  ;;  %v1088_v3 = vmul.f32 0.044715, %v1024_v42  ;;  %v1510_v46 = vpack.c.bf16 %v1464_v1, %v1463_v29  ;;  %v1401_v50 = vmul.f32 0.5, %v1337_v16 }
 0x24d   :  { %v1339_v61 = vadd.f32 1.0, %v1961_v9  ;;  %v1213_v36 = vmul.f32 0.7978846, %v1149_v19  ;;  %v1402_v52 = vmul.f32 0.5, %v1338_v4  ;;  %v1214_v34 = vmul.f32 0.7978846, %v1150_v8 }
 0x24e   :  { %v1215_v33 = vmul.f32 0.7978846, %v1151_v15  ;;  %v1152_v6 = vadd.f32 %v1088_v3, %v2987_v41  ;;  %1542 = vst [vmem:[%s3192_s5 + $0x88] sm:$0xff] %v1510_v46  ;;  %v1465_v54 = vmul.f32 %v1401_v50, %v2926_v51  ;;  %v1025_v18 = vmul.f32 %v961_v44, %v2997_v40  ;;  %v809_v51 = vpop.f32.mrf.mxu1 }
 0x24f   :  { %v1403_v14 = vmul.f32 0.5, %v1339_v61  ;;  %1964 = vtanh.f32 %v1213_v36  ;;  %v1466_v38 = vmul.f32 %v1402_v52, %v2929_v22  ;;  %v962_v5 = vmul.f32 %v3000_v58, %v3000_v58  ;;  %v858_v25 = vpop.f32.mrf.mxu2 }
 0x250   :  { %1966 = vtanh.f32 %v1214_v34  ;;  %v1216_v11 = vmul.f32 0.7978846, %v1152_v6  ;;  %v1089_v62 = vmul.f32 0.044715, %v1025_v18  ;;  %v3020_v43 = vadd.f32 %v855_v53, %v2577_v55 }
 0x251   :  { %v1467_v17 = vmul.f32 %v1403_v14, %v2934_v27  ;;  %1968 = vtanh.f32 %v1215_v33  ;;  %v1511_v57 = vpack.c.bf16 %v1466_v38, %v1465_v54  ;;  %v1026_v22 = vmul.f32 %v962_v5, %v3000_v58 }
 0x252   :  { %v1963_v24 = vpop.eup %1962  ;;  %1970 = vtanh.f32 %v1216_v11  ;;  %v3024_v39 = vadd.f32 %v904_v20, %v2589_v31  ;;  %v1153_v12 = vadd.f32 %v1089_v62, %v2997_v40  ;;  %v963_v27 = vmul.f32 %v3020_v43, %v3020_v43  ;;  %v907_v14 = vpop.f32.mrf.mxu3 }
 0x253   :  { %v1340_v63 = vadd.f32 1.0, %v1963_v24  ;;  %v3030_v45 = vadd.f32 %v760_v0, %v2554_v30  ;;  %1543 = vst [vmem:[%s3192_s5 + $0x90] sm:$0xff] %v1511_v57  ;;  %v1090_v49 = vmul.f32 0.044715, %v1026_v22  ;;  %v3038_v47 = vadd.f32 %v809_v51, %v2556_v10  ;;  %v762_v11 = vpop.f32.mrf.mxu0 }
 0x254   :  { %v964_v13 = vmul.f32 %v3024_v39, %v3024_v39  ;;  %v3041_v29 = vadd.f32 %v858_v25, %v2577_v55  ;;  %v1217_v53 = vmul.f32 0.7978846, %v1153_v12  ;;  %v1027_v32 = vmul.f32 %v963_v27, %v3020_v43 }
 0x255   :  { %v1965_v26 = vpop.eup %1964  ;;  %v1404_v48 = vmul.f32 0.5, %v1340_v63  ;;  %v965_v59 = vmul.f32 %v3030_v45, %v3030_v45  ;;  %v1154_v28 = vadd.f32 %v1090_v49, %v3000_v58  ;;  %v966_v42 = vmul.f32 %v3038_v47, %v3038_v47 }
 0x256   :  { %v1967_v60 = vpop.eup %1966  ;;  %v1341_v35 = vadd.f32 1.0, %v1965_v26  ;;  %v1028_v23 = vmul.f32 %v964_v13, %v3024_v39  ;;  %1972 = vtanh.f32 %v1217_v53  ;;  %v1091_v16 = vmul.f32 0.044715, %v1027_v32  ;;  %v811_v62 = vpop.f32.mrf.mxu1 }
 0x257   :  { %v1969_v44 = vpop.eup %1968  ;;  %v1468_v7 = vmul.f32 %v1404_v48, %v2956_v37  ;;  %v1342_v1 = vadd.f32 1.0, %v1967_v60  ;;  %v1218_v4 = vmul.f32 0.7978846, %v1154_v28  ;;  %v1029_v54 = vmul.f32 %v965_v59, %v3030_v45 }
 0x258   :  { %v1971_v19 = vpop.eup %1970  ;;  %v1405_v8 = vmul.f32 0.5, %v1341_v35  ;;  %v1343_v9 = vadd.f32 1.0, %v1969_v44  ;;  %v1092_v15 = vmul.f32 0.044715, %v1028_v23  ;;  %v1155_v61 = vadd.f32 %v1091_v16, %v3020_v43 }
 0x259   :  { %v1512_v3 = vpack.c.bf16 %v1468_v7, %v1467_v17  ;;  %v1406_v46 = vmul.f32 0.5, %v1342_v1  ;;  %v1344_v50 = vadd.f32 1.0, %v1971_v19  ;;  %1974 = vtanh.f32 %v1218_v4  ;;  %v860_v1 = vpop.f32.mrf.mxu2 }
 0x25a   :  { %v1469_v36 = vmul.f32 %v1405_v8, %v2965_v21  ;;  %v1407_v52 = vmul.f32 0.5, %v1343_v9  ;;  %v1156_v34 = vadd.f32 %v1092_v15, %v3024_v39  ;;  %v1219_v6 = vmul.f32 0.7978846, %v1155_v61 }
 0x25b   :  { %1544 = vst [vmem:[%s3192_s5 + $0x98] sm:$0xff] %v1512_v3  ;;  %v1470_v37 = vmul.f32 %v1406_v46, %v2971_v56  ;;  %v1408_v33 = vmul.f32 0.5, %v1344_v50  ;;  %v1030_v21 = vmul.f32 %v966_v42, %v3038_v47  ;;  %v967_v38 = vmul.f32 %v3041_v29, %v3041_v29  ;;  %v909_v46 = vpop.f32.mrf.mxu3 }
 0x25c   :  { %v1471_v18 = vmul.f32 %v1407_v52, %v2974_v2  ;;  %v1220_v20 = vmul.f32 0.7978846, %v1156_v34  ;;  %v1973_v5 = vpop.eup %1972  ;;  %1976 = vtanh.f32 %v1219_v6  ;;  %v1093_v56 = vmul.f32 0.044715, %v1029_v54 }
 0x25d   :  { %v1513_v0 = vpack.c.bf16 %v1470_v37, %v1469_v36  ;;  %v1472_v17 = vmul.f32 %v1408_v33, %v2987_v41  ;;  %v1345_v51 = vadd.f32 1.0, %v1973_v5  ;;  %v1094_v25 = vmul.f32 0.044715, %v1030_v21 }
 0x25e   :  { %1978 = vtanh.f32 %v1220_v20  ;;  %v1031_v24 = vmul.f32 %v967_v38, %v3041_v29  ;;  %v1157_v57 = vadd.f32 %v1093_v56, %v3030_v45  ;;  %v3070_v22 = vadd.f32 %v907_v14, %v2589_v31 }
 0x25f   :  { %1545 = vst [vmem:[%s3192_s5 + $0xa0] sm:$0xff] %v1513_v0  ;;  %v1514_v2 = vpack.c.bf16 %v1472_v17, %v1471_v18  ;;  %v3073_v41 = vadd.f32 %v762_v11, %v2554_v30  ;;  %v1975_v63 = vpop.eup %1974  ;;  %v1409_v12 = vmul.f32 0.5, %v1345_v51  ;;  %v1158_v27 = vadd.f32 %v1094_v25, %v3038_v47 }
 0x260   :  { %v1095_v49 = vmul.f32 0.044715, %v1031_v24  ;;  %v3077_v13 = vadd.f32 %v811_v62, %v2556_v10  ;;  %v1346_v26 = vadd.f32 1.0, %v1975_v63  ;;  %v1221_v48 = vmul.f32 0.7978846, %v1157_v57 }
 0x261   :  { %1546 = vst [vmem:[%s3192_s5 + $0xa8] sm:$0xff] %v1514_v2  ;;  %v968_v53 = vmul.f32 %v3070_v22, %v3070_v22  ;;  %v969_v32 = vmul.f32 %v3073_v41, %v3073_v41  ;;  %v1473_v59 = vmul.f32 %v1409_v12, %v2997_v40  ;;  %v1222_v60 = vmul.f32 0.7978846, %v1158_v27 }
 0x262   :  { %v1159_v35 = vadd.f32 %v1095_v49, %v3041_v29  ;;  %v970_v28 = vmul.f32 %v3077_v13, %v3077_v13  ;;  %v1977_v23 = vpop.eup %1976  ;;  %v1410_v42 = vmul.f32 0.5, %v1346_v26  ;;  %1980 = vtanh.f32 %v1221_v48 }
 0x263   :  { %v1032_v44 = vmul.f32 %v968_v53, %v3070_v22  ;;  %v1033_v7 = vmul.f32 %v969_v32, %v3073_v41  ;;  %v1347_v19 = vadd.f32 1.0, %v1977_v23  ;;  %1982 = vtanh.f32 %v1222_v60 }
 0x264   :  { %v1979_v16 = vpop.eup %1978  ;;  %v1223_v8 = vmul.f32 0.7978846, %v1159_v35  ;;  %v1034_v40 = vmul.f32 %v970_v28, %v3077_v13  ;;  %v1474_v9 = vmul.f32 %v1410_v42, %v3000_v58  ;;  %v3095_v36 = vadd.f32 %v860_v1, %v2577_v55 }
 0x265   :  { %v1348_v4 = vadd.f32 1.0, %v1979_v16  ;;  %v1096_v15 = vmul.f32 0.044715, %v1032_v44  ;;  %v1097_v3 = vmul.f32 0.044715, %v1033_v7  ;;  %v1411_v50 = vmul.f32 0.5, %v1347_v19 }
 0x266   :  { %1984 = vtanh.f32 %v1223_v8  ;;  %v1098_v61 = vmul.f32 0.044715, %v1034_v40  ;;  %v1515_v52 = vpack.c.bf16 %v1474_v9, %v1473_v59  ;;  %v971_v54 = vmul.f32 %v3095_v36, %v3095_v36 }
 0x267   :  { %v1412_v34 = vmul.f32 0.5, %v1348_v4  ;;  %v1160_v37 = vadd.f32 %v1096_v15, %v3070_v22  ;;  %v1161_v33 = vadd.f32 %v1097_v3, %v3073_v41  ;;  %v1475_v6 = vmul.f32 %v1411_v50, %v3020_v43 }
 0x268   :  { %v1162_v58 = vadd.f32 %v1098_v61, %v3077_v13  ;;  %v910_v14 = vadd.f32 %v909_v46, %v2589_v31  ;;  %v1981_v18 = vpop.eup %1980  ;;  %1547 = vst [vmem:[%s3192_s5 + $0xb0] sm:$0xff] %v1515_v52  ;;  %v1035_v43 = vmul.f32 %v971_v54, %v3095_v36 }
 0x269   :  { %v1476_v20 = vmul.f32 %v1412_v34, %v3024_v39  ;;  %v1224_v21 = vmul.f32 0.7978846, %v1160_v37  ;;  %v1225_v38 = vmul.f32 0.7978846, %v1161_v33  ;;  %v1983_v11 = vpop.eup %1982  ;;  %v1349_v5 = vadd.f32 1.0, %v1981_v18 }
 0x26a   :  { %v1226_v0 = vmul.f32 0.7978846, %v1162_v58  ;;  %v972_v17 = vmul.f32 %v910_v14, %v910_v14  ;;  %v1350_v62 = vadd.f32 1.0, %v1983_v11  ;;  %v1099_v24 = vmul.f32 0.044715, %v1035_v43 }
 0x26b   :  { %v1516_v56 = vpack.c.bf16 %v1476_v20, %v1475_v6  ;;  %1986 = vtanh.f32 %v1224_v21  ;;  %v1413_v25 = vmul.f32 0.5, %v1349_v5 }
 0x26c   :  { %v1985_v51 = vpop.eup %1984  ;;  %1988 = vtanh.f32 %v1225_v38  ;;  %v1036_v2 = vmul.f32 %v972_v17, %v910_v14  ;;  %v1414_v39 = vmul.f32 0.5, %v1350_v62  ;;  %v1163_v12 = vadd.f32 %v1099_v24, %v3095_v36 }
 0x26d   :  { %1548 = vst [vmem:[%s3192_s5 + $0xb8] sm:$0xff] %v1516_v56  ;;  %v1351_v57 = vadd.f32 1.0, %v1985_v51  ;;  %1990 = vtanh.f32 %v1226_v0  ;;  %v1477_v63 = vmul.f32 %v1413_v25, %v3030_v45 }
 0x26e   :  { %v1100_v27 = vmul.f32 0.044715, %v1036_v2  ;;  %v1478_v49 = vmul.f32 %v1414_v39, %v3038_v47  ;;  %v1227_v48 = vmul.f32 0.7978846, %v1163_v12 }
 0x26f   :  { %v1415_v26 = vmul.f32 0.5, %v1351_v57 }
 0x270   :  { %v1164_v53 = vadd.f32 %v1100_v27, %v910_v14  ;;  %v1517_v59 = vpack.c.bf16 %v1478_v49, %v1477_v63  ;;  %1992 = vtanh.f32 %v1227_v48 }
 0x271   :  { %v1987_v32 = vpop.eup %1986  ;;  %v1479_v42 = vmul.f32 %v1415_v26, %v3041_v29 }
 0x272   :  { %v1989_v60 = vpop.eup %1988  ;;  %v1352_v35 = vadd.f32 1.0, %v1987_v32  ;;  %v1228_v28 = vmul.f32 0.7978846, %v1164_v53  ;;  %1549 = vst [vmem:[%s3192_s5 + $0xc0] sm:$0xff] %v1517_v59 }
 0x273   :  { %v1991_v23 = vpop.eup %1990  ;;  %v1353_v45 = vadd.f32 1.0, %v1989_v60 }
 0x274   :  { %v1416_v44 = vmul.f32 0.5, %v1352_v35  ;;  %v1354_v7 = vadd.f32 1.0, %v1991_v23  ;;  %1994 = vtanh.f32 %v1228_v28 }
 0x275   :  { %v1417_v47 = vmul.f32 0.5, %v1353_v45 }
 0x276   :  { %v1480_v1 = vmul.f32 %v1416_v44, %v3070_v22  ;;  %v1418_v16 = vmul.f32 0.5, %v1354_v7  ;;  %v1993_v8 = vpop.eup %1992 }
 0x277   :  { %v1481_v19 = vmul.f32 %v1417_v47, %v3073_v41  ;;  %v1355_v4 = vadd.f32 1.0, %v1993_v8 }
 0x278   :  { %v1518_v40 = vpack.c.bf16 %v1480_v1, %v1479_v42  ;;  %v1482_v9 = vmul.f32 %v1418_v16, %v3077_v13 }
 0x279   :  { %v1419_v3 = vmul.f32 0.5, %v1355_v4 }
 0x27a   :  { %v1995_v15 = vpop.eup %1994  ;;  %1550 = vst [vmem:[%s3192_s5 + $0xc8] sm:$0xff] %v1518_v40  ;;  %v1519_v29 = vpack.c.bf16 %v1482_v9, %v1481_v19 }
 0x27b   :  { %v1356_v46 = vadd.f32 1.0, %v1995_v15  ;;  %v1483_v22 = vmul.f32 %v1419_v3, %v3095_v36 }
 0x27c   :  { %1551 = vst [vmem:[%s3192_s5 + $0xd0] sm:$0xff] %v1519_v29 }
 0x27d   :  { %v1420_v41 = vmul.f32 0.5, %v1356_v46 }
 0x27f   :  { %v1484_v50 = vmul.f32 %v1420_v41, %v910_v14 }
 0x281   :  { %v1520_v61 = vpack.c.bf16 %v1484_v50, %v1483_v22 }
 0x283   :  { %1552 = vst [vmem:[%s3192_s5 + $0xd8] sm:$0xff] %v1520_v61 }
 0x2a1   :  { %v765_v13 = vpop.f32.mrf.mxu0  ;;  %v814_v52 = vpop.f32.mrf.mxu1 }
 0x2a2   :  { %v766_v34 = vadd.f32 %v765_v13, %v2554_v30  ;;  %v3134_v37 = vadd.f32 %v814_v52, %v2556_v10 }
 0x2a4   :  { %v973_v33 = vmul.f32 %v766_v34, %v766_v34  ;;  %v974_v6 = vmul.f32 %v3134_v37, %v3134_v37 }
 0x2a6   :  { %v1037_v58 = vmul.f32 %v973_v33, %v766_v34  ;;  %v1038_v36 = vmul.f32 %v974_v6, %v3134_v37 }
 0x2a8   :  { %v1101_v54 = vmul.f32 0.044715, %v1037_v58  ;;  %v1102_v14 = vmul.f32 0.044715, %v1038_v36  ;;  %v863_v18 = vpop.f32.mrf.mxu2  ;;  %v912_v20 = vpop.f32.mrf.mxu3 }
 0x2a9   :  { %v3140_v21 = vadd.f32 %v863_v18, %v2577_v55  ;;  %v3143_v38 = vadd.f32 %v912_v20, %v2589_v31  ;;  %v767_v11 = vpop.f32.mrf.mxu0  ;;  %v816_v5 = vpop.f32.mrf.mxu1 }
 0x2aa   :  { %v1165_v0 = vadd.f32 %v1101_v54, %v766_v34  ;;  %v1166_v43 = vadd.f32 %v1102_v14, %v3134_v37  ;;  %v3147_v17 = vadd.f32 %v767_v11, %v2554_v30  ;;  %v3150_v56 = vadd.f32 %v816_v5, %v2556_v10 }
 0x2ab   :  { %v975_v62 = vmul.f32 %v3140_v21, %v3140_v21  ;;  %v976_v51 = vmul.f32 %v3143_v38, %v3143_v38 }
 0x2ac   :  { %v1229_v25 = vmul.f32 0.7978846, %v1165_v0  ;;  %v1230_v24 = vmul.f32 0.7978846, %v1166_v43  ;;  %v977_v2 = vmul.f32 %v3147_v17, %v3147_v17  ;;  %v978_v39 = vmul.f32 %v3150_v56, %v3150_v56 }
 0x2ad   :  { %v1039_v30 = vmul.f32 %v975_v62, %v3140_v21  ;;  %v1040_v57 = vmul.f32 %v976_v51, %v3143_v38 }
 0x2ae   :  { %1996 = vtanh.f32 %v1229_v25  ;;  %v1041_v10 = vmul.f32 %v977_v2, %v3147_v17  ;;  %v1042_v63 = vmul.f32 %v978_v39, %v3150_v56 }
 0x2af   :  { %1998 = vtanh.f32 %v1230_v24  ;;  %v1103_v12 = vmul.f32 0.044715, %v1039_v30  ;;  %v1104_v27 = vmul.f32 0.044715, %v1040_v57 }
 0x2b0   :  { %v1105_v49 = vmul.f32 0.044715, %v1041_v10  ;;  %v1106_v26 = vmul.f32 0.044715, %v1042_v63  ;;  %v865_v48 = vpop.f32.mrf.mxu2  ;;  %v914_v53 = vpop.f32.mrf.mxu3 }
 0x2b1   :  { %v1167_v32 = vadd.f32 %v1103_v12, %v3140_v21  ;;  %v1168_v59 = vadd.f32 %v1104_v27, %v3143_v38  ;;  %v866_v60 = vadd.f32 %v865_v48, %v2577_v55  ;;  %v915_v35 = vadd.f32 %v914_v53, %v2589_v31 }
 0x2b2   :  { %v1169_v28 = vadd.f32 %v1105_v49, %v3147_v17  ;;  %v1170_v23 = vadd.f32 %v1106_v26, %v3150_v56 }
 0x2b3   :  { %v1231_v45 = vmul.f32 0.7978846, %v1167_v32  ;;  %v1232_v42 = vmul.f32 0.7978846, %v1168_v59  ;;  %v979_v44 = vmul.f32 %v866_v60, %v866_v60  ;;  %v980_v7 = vmul.f32 %v915_v35, %v915_v35 }
 0x2b4   :  { %v1997_v47 = vpop.eup %1996  ;;  %v1233_v1 = vmul.f32 0.7978846, %v1169_v28  ;;  %v1234_v16 = vmul.f32 0.7978846, %v1170_v23 }
 0x2b5   :  { %v1999_v19 = vpop.eup %1998  ;;  %v1357_v8 = vadd.f32 1.0, %v1997_v47  ;;  %2000 = vtanh.f32 %v1231_v45  ;;  %v1043_v40 = vmul.f32 %v979_v44, %v866_v60  ;;  %v1044_v9 = vmul.f32 %v980_v7, %v915_v35 }
 0x2b6   :  { %v1358_v4 = vadd.f32 1.0, %v1999_v19  ;;  %2002 = vtanh.f32 %v1232_v42 }
 0x2b7   :  { %v1421_v55 = vmul.f32 0.5, %v1357_v8  ;;  %2004 = vtanh.f32 %v1233_v1  ;;  %v1107_v31 = vmul.f32 0.044715, %v1043_v40  ;;  %v1108_v15 = vmul.f32 0.044715, %v1044_v9 }
 0x2b8   :  { %v1422_v29 = vmul.f32 0.5, %v1358_v4  ;;  %2006 = vtanh.f32 %v1234_v16 }
 0x2b9   :  { %v1485_v3 = vmul.f32 %v1421_v55, %v766_v34  ;;  %v1171_v46 = vadd.f32 %v1107_v31, %v866_v60  ;;  %v1172_v22 = vadd.f32 %v1108_v15, %v915_v35 }
 0x2ba   :  { %v1486_v41 = vmul.f32 %v1422_v29, %v3134_v37 }
 0x2bb   :  { %v2001_v50 = vpop.eup %2000  ;;  %v1235_v61 = vmul.f32 0.7978846, %v1171_v46  ;;  %v1236_v13 = vmul.f32 0.7978846, %v1172_v22 }
 0x2bc   :  { %v2003_v52 = vpop.eup %2002  ;;  %v1521_v33 = vpack.c.bf16 %v1486_v41, %v1485_v3  ;;  %v1359_v6 = vadd.f32 1.0, %v2001_v50 }
 0x2bd   :  { %v2005_v58 = vpop.eup %2004  ;;  %v1360_v36 = vadd.f32 1.0, %v2003_v52  ;;  %2008 = vtanh.f32 %v1235_v61 }
 0x2be   :  { %v2007_v54 = vpop.eup %2006  ;;  %1553 = vst [vmem:[%s3192_s5 + $0xe0] sm:$0xff] %v1521_v33  ;;  %v1423_v14 = vmul.f32 0.5, %v1359_v6  ;;  %v1361_v34 = vadd.f32 1.0, %v2005_v58  ;;  %2010 = vtanh.f32 %v1236_v13 }
 0x2bf   :  { %v1424_v18 = vmul.f32 0.5, %v1360_v36  ;;  %v1362_v20 = vadd.f32 1.0, %v2007_v54 }
 0x2c0   :  { %v1487_v37 = vmul.f32 %v1423_v14, %v3140_v21  ;;  %v1425_v11 = vmul.f32 0.5, %v1361_v34 }
 0x2c1   :  { %v1488_v5 = vmul.f32 %v1424_v18, %v3143_v38  ;;  %v1426_v0 = vmul.f32 0.5, %v1362_v20 }
 0x2c2   :  { %v1489_v43 = vmul.f32 %v1425_v11, %v3147_v17 }
 0x2c3   :  { %v2009_v62 = vpop.eup %2008  ;;  %v1522_v51 = vpack.c.bf16 %v1488_v5, %v1487_v37  ;;  %v1490_v25 = vmul.f32 %v1426_v0, %v3150_v56 }
 0x2c4   :  { %v2011_v24 = vpop.eup %2010  ;;  %v1363_v2 = vadd.f32 1.0, %v2009_v62 }
 0x2c5   :  { %1554 = vst [vmem:[%s3192_s5 + $0xe8] sm:$0xff] %v1522_v51  ;;  %v1523_v39 = vpack.c.bf16 %v1490_v25, %v1489_v43  ;;  %v1364_v30 = vadd.f32 1.0, %v2011_v24 }
 0x2c6   :  { %v1427_v57 = vmul.f32 0.5, %v1363_v2 }
 0x2c7   :  { %1555 = vst [vmem:[%s3192_s5 + $0xf0] sm:$0xff] %v1523_v39  ;;  %v1428_v21 = vmul.f32 0.5, %v1364_v30 }
 0x2c8   :  { %v1491_v38 = vmul.f32 %v1427_v57, %v866_v60 }
 0x2c9   :  { %v1492_v17 = vmul.f32 %v1428_v21, %v915_v35 }
 0x2cb   :  { %v1524_v10 = vpack.c.bf16 %v1492_v17, %v1491_v38 }
 0x2cd   :  { %1556 = vst [vmem:[%s3192_s5 + $0xf8] sm:$0xff] %v1524_v10 }

// kernel: eva_forward.20
= control target key start
LH: loop header
LB: loop body
LE: loop exit
PB: predicated region body
PF: predicated region fallthrough
CT: control target
= control target key end

     0   :  { %10 = vsyncpa [#allocation4], 0  ;;  %s2060_s21 = smov [#allocation3]   ;;  %s2061_s23 = smov 256   ;;  %s3047_s0 = inlined_call_operand.vmem [shape: bf16[128,128], index: 0, kind: input, shape index: {}]   ;;  %s3048_s1 = inlined_call_operand.vmem [shape: f32[1,128], index: 1, kind: input, shape index: {}]   ;;  %s3049_s2 = inlined_call_operand.vmem [shape: f32[1,128], index: 2, kind: input, shape index: {}]   ;;  %s3050_s3 = inlined_call_operand.hbm [shape: bf16[128,512], index: 3, kind: input, shape index: {}]   ;;  %s3051_s4 = inlined_call_operand.vmem [shape: f32[1,512], index: 4, kind: input, shape index: {}]   ;;  %s3052_s5 = inlined_call_operand.vmem [shape: bf16[128,512], index: 5, kind: output, shape index: {}]  }
   0x1   :  { %s21_s20 = sshll.u32 %s3050_s3, 4  ;;  %s23_s22 = sshll.u32 %s2060_s21, 4  ;;  %s22_s20 = int_to_ptr.hbm [resolvable:$true] %s21_s20  ;;  %s24_s22 = int_to_ptr.vmem [resolvable:$true] %s23_s22 }
   0x2   :  { %s2062_s24 = smov 16  }
   0x3   :  { %29 = dma.hbm_to_vmem [thread:$0]  %s22_s20, 4096, %s24_s22, [#allocation4], %s2061_s23, %s2061_s23, %s2062_s24  }
   0x4   :  { %2058 = dma.done.wait [#allocation4], 4096  }
   0x5   :  { %2059 = vsyncadd [#allocation4], 4294963200  ;;  %v1850_v0 = vld [vmem:[%s3047_s0 + $0x8] sm:$0xff]   ;;  %v1779_v1 = vld [vmem:[%s3047_s0] sm:$0xff]   ;;  %v2063_v11 = vmov 128.0  }
   0x6   :  { %v1851_v2 = vld [vmem:[%s3047_s0 + $0x10] sm:$0xff]   ;;  %v1784_v3 = vunpack.c.l.bf16 %v1850_v0  ;;  %v1780_v4 = vunpack.c.l.bf16 %v1779_v1  ;;  %v1785_v6 = vunpack.c.h.bf16 %v1850_v0  ;;  %v1781_v7 = vunpack.c.h.bf16 %v1779_v1  ;;  %v2109_v9 = vld [vmem:[%s3047_s0 + $0x18] sm:$0xff]   ;;  %v2141_v38 = vld [vmem:[%s3047_s0 + $0x20] sm:$0xff]  }
   0x7   :  { %v1788_v5 = vunpack.c.l.bf16 %v1851_v2  ;;  %v1789_v8 = vunpack.c.h.bf16 %v1851_v2  ;;  %v1792_v10 = vunpack.c.l.bf16 %v2109_v9  ;;  %1870 = vrcp.f32 %v2063_v11  ;;  %v2156_v44 = vld [vmem:[%s3047_s0 + $0x28] sm:$0xff]   ;;  %v2172_v51 = vld [vmem:[%s3047_s0 + $0x30] sm:$0xff]   ;;  %v2188_v56 = vld [vmem:[%s3047_s0 + $0x38] sm:$0xff]  }
   0x8   :  { %76 = vadd.xlane.f32.xlu1 %v1784_v3  ;;  %72 = vadd.xlane.f32.xlu0 %v1780_v4  ;;  %v1793_v30 = vunpack.c.h.bf16 %v2109_v9  ;;  %v1796_v40 = vunpack.c.l.bf16 %v2141_v38  ;;  %v1801_v46 = vunpack.c.h.bf16 %v2156_v44  ;;  %v1797_v49 = vunpack.c.h.bf16 %v2141_v38  ;;  %v1724_v58 = vld [vmem:[#allocation3 + $0xe0] sm:$0xf]  ;;  %v1776_v59 = vld [vmem:[#allocation3 + $0xec] sm:$0xf0]  ;;  %v1774_v60 = vld [vmem:[#allocation3 + $0xe4] sm:$0xf] }
   0x9   :  { %80 = vadd.xlane.f32.xlu2 %v1788_v5  ;;  %v1804_v52 = vunpack.c.l.bf16 %v2172_v51  ;;  %v1800_v54 = vunpack.c.l.bf16 %v2156_v44  ;;  %v1805_v55 = vunpack.c.h.bf16 %v2172_v51  ;;  %v1808_v57 = vunpack.c.l.bf16 %v2188_v56  ;;  %v1726_v62 = vld [vmem:[#allocation3 + $0xf0] sm:$0xf0]  ;;  %v1732_v63 = vld [vmem:[#allocation3 + $0xe8] sm:$0xf]  ;;  %v1777_v0 = vld [vmem:[#allocation3 + $0xf4] sm:$0xf0] }
   0xa   :  { %v1725_v61 = vor.u32 %v1776_v59, %v1724_v58  ;;  %v1729_v1 = vor.u32 %v1774_v60, %v1726_v62  ;;  %v1733_v2 = vor.u32 %v1777_v0, %v1732_v63  ;;  %v1710_v11 = vld [vmem:[#allocation3 + $0xd0] sm:$0xf0]  ;;  %v1763_v60 = vld [vmem:[#allocation3 + $0x8c] sm:$0xf]  ;;  %v1660_v0 = vld [vmem:[#allocation3 + $0x60] sm:$0xf] }
   0xc   :  { %737 = vmatpush.bf16.msra.mxu0 %v1725_v61  ;;  %786 = vmatpush.bf16.msra.mxu1 %v1729_v1  ;;  %v1686_v61 = vld [vmem:[#allocation3 + $0x98] sm:$0xf0]  ;;  %v1760_v1 = vld [vmem:[#allocation3 + $0x6c] sm:$0xf0] }
   0xd   :  { %v1871_v12 = vpop.eup %1870  ;;  %835 = vmatpush.bf16.msra.mxu2 %v1733_v2  ;;  %v1689_v62 = vor.u32 %v1763_v60, %v1686_v61  ;;  %v1758_v2 = vld [vmem:[#allocation3 + $0x64] sm:$0xf] }
   0xe   :  { %v105_v13 = vmul.f32 128.0, %v1871_v12  ;;  %vm109_vm0 = vweird.f32 %v1871_v12 }
  0x10   :  { %78 = vadd.xlane.f32.xlu1 %v1785_v6  ;;  %74 = vadd.xlane.f32.xlu0 %v1781_v7  ;;  %v106_v14 = vsub.f32 1.0, %v105_v13  ;;  %v1773_v13 = vld [vmem:[#allocation3 + $0xd4] sm:$0xf0] }
  0x11   :  { %82 = vadd.xlane.f32.xlu2 %v1789_v8 }
  0x12   :  { %v107_v15 = vmul.f32 %v1871_v12, %v106_v14 }
  0x14   :  { %v108_v16 = vadd.f32 %v1871_v12, %v107_v15 }
  0x16   :  { %v2112_v17 = vsel %vm109_vm0, %v1871_v12, %v108_v16  ;;  %v1716_v12 = vld [vmem:[#allocation3 + $0xc8] sm:$0xf]  ;;  %v1771_v16 = vld [vmem:[#allocation3 + $0xcc] sm:$0xf] }
  0x17   :  { %v1717_v15 = vor.u32 %v1773_v13, %v1716_v12  ;;  %v1670_v12 = vld [vmem:[#allocation3 + $0x78] sm:$0xf0] }
  0x19   :  { %84 = vadd.xlane.f32.xlu2 %v1792_v10  ;;  %836 = vmatpush.bf16.msra.mxu2 %v1717_v15  ;;  %v1644_v15 = vld [vmem:[#allocation3 + $0x40] sm:$0xf] }
  0x7b   :  { %v77_v18 = vpop.xlane.xlu1 %76  ;;  %v73_v19 = vpop.xlane.xlu0 %72 }
  0x7c   :  { %v111_v20 = vmul.f32 %v2112_v17, %v73_v19  ;;  %v81_v22 = vpop.xlane.xlu2 %80  ;;  %v113_v32 = vmul.f32 %v2112_v17, %v77_v18  ;;  %v1718_v18 = vld [vmem:[#allocation3 + $0xd8] sm:$0xf0] }
  0x7d   :  { %v115_v31 = vmul.f32 %v2112_v17, %v81_v22  ;;  %v1721_v19 = vor.u32 %v1771_v16, %v1718_v18  ;;  %v1768_v22 = vld [vmem:[#allocation3 + $0xac] sm:$0xf0]  ;;  %v1754_v18 = vld [vmem:[#allocation3 + $0x44] sm:$0xf] }
  0x7e   :  { %v2115_v21 = vsub.f32 %v1780_v4, %v111_v20  ;;  %v2136_v37 = vsub.f32 %v1784_v3, %v113_v32  ;;  %v1775_v3 = vld [vmem:[#allocation3 + $0xec] sm:$0xf]  ;;  %v1734_v4 = vld [vmem:[#allocation3 + $0xf8] sm:$0xf0]  ;;  %v1692_v20 = vld [vmem:[#allocation3 + $0xa0] sm:$0xf] }
  0x7f   :  { %v2134_v36 = vsub.f32 %v1788_v5, %v115_v31  ;;  %v1737_v5 = vor.u32 %v1775_v3, %v1734_v4  ;;  %v1661_v4 = vor.u32 %v1760_v1, %v1660_v0  ;;  %v1756_v16 = vld [vmem:[#allocation3 + $0x4c] sm:$0xf0] }
  0x80   :  { %v143_v23 = vmul.f32 %v2115_v21, %v2115_v21  ;;  %v145_v42 = vmul.f32 %v2136_v37, %v2136_v37 }
  0x81   :  { %v147_v39 = vmul.f32 %v2134_v36, %v2134_v36  ;;  %884 = vmatpush.bf16.msra.mxu3 %v1737_v5  ;;  %v1662_v5 = vld [vmem:[#allocation3 + $0x70] sm:$0xf0] }
  0x82   :  { %159 = vadd.xlane.f32.xlu0 %v143_v23  ;;  %v1766_v23 = vld [vmem:[#allocation3 + $0xa4] sm:$0xf] }
  0x83   :  { %v79_v24 = vpop.xlane.xlu1 %78  ;;  %v75_v25 = vpop.xlane.xlu0 %74 }
  0x84   :  { %v114_v26 = vmul.f32 %v2112_v17, %v79_v24  ;;  %v112_v27 = vmul.f32 %v2112_v17, %v75_v25  ;;  %v83_v35 = vpop.xlane.xlu2 %82  ;;  %v1693_v24 = vor.u32 %v1768_v22, %v1692_v20  ;;  %v1694_v25 = vld [vmem:[#allocation3 + $0xb0] sm:$0xf0]  ;;  %v1652_v22 = vld [vmem:[#allocation3 + $0x48] sm:$0xf] }
  0x85   :  { %v116_v41 = vmul.f32 %v2112_v17, %v83_v35  ;;  %885 = vmatpush.bf16.msra.mxu3 %v1721_v19  ;;  %v1697_v31 = vor.u32 %v1766_v23, %v1694_v25  ;;  %v1645_v19 = vor.u32 %v1756_v16, %v1644_v15  ;;  %v1646_v20 = vld [vmem:[#allocation3 + $0x50] sm:$0xf0]  ;;  %v1757_v23 = vld [vmem:[#allocation3 + $0x54] sm:$0xf0]  ;;  %v1747_v16 = vld [vmem:[#allocation3 + $0xc] sm:$0xf] }
  0x86   :  { %v2121_v28 = vsub.f32 %v1785_v6, %v114_v26  ;;  %v2123_v29 = vsub.f32 %v1781_v7, %v112_v27  ;;  %v1708_v6 = vld [vmem:[#allocation3 + $0xc0] sm:$0xf]  ;;  %v1772_v7 = vld [vmem:[#allocation3 + $0xcc] sm:$0xf0]  ;;  %v1700_v26 = vld [vmem:[#allocation3 + $0xa8] sm:$0xf]  ;;  %v1653_v25 = vor.u32 %v1757_v23, %v1652_v22 }
  0x87   :  { %v2151_v43 = vsub.f32 %v1789_v8, %v116_v41  ;;  %v1770_v8 = vld [vmem:[#allocation3 + $0xc4] sm:$0xf]  ;;  %v1769_v27 = vld [vmem:[#allocation3 + $0xb4] sm:$0xf0]  ;;  %v1764_v41 = vld [vmem:[#allocation3 + $0x8c] sm:$0xf0] }
  0x88   :  { %v146_v33 = vmul.f32 %v2121_v28, %v2121_v28  ;;  %v144_v34 = vmul.f32 %v2123_v29, %v2123_v29  ;;  %v1713_v14 = vor.u32 %v1770_v8, %v1710_v11  ;;  %v1701_v32 = vor.u32 %v1769_v27, %v1700_v26  ;;  %v1759_v11 = vld [vmem:[#allocation3 + $0x6c] sm:$0xf]  ;;  %v1654_v27 = vld [vmem:[#allocation3 + $0x58] sm:$0xf0]  ;;  %v1749_v15 = vld [vmem:[#allocation3 + $0x14] sm:$0xf0] }
  0x89   :  { %v148_v47 = vmul.f32 %v2151_v43, %v2151_v43  ;;  %v1665_v8 = vor.u32 %v1758_v2, %v1662_v5  ;;  %v1755_v26 = vld [vmem:[#allocation3 + $0x4c] sm:$0xf] }
  0x8a   :  { %165 = vadd.xlane.f32.xlu2 %v146_v33  ;;  %86 = vadd.xlane.f32.xlu0 %v1793_v30  ;;  %v1767_v33 = vld [vmem:[#allocation3 + $0xac] sm:$0xf] }
  0x8b   :  { %161 = vadd.xlane.f32.xlu1 %v144_v34  ;;  %787 = vmatpush.bf16.msra.mxu1 %v1713_v14  ;;  %v1702_v34 = vld [vmem:[#allocation3 + $0xb8] sm:$0xf0]  ;;  %v1673_v14 = vor.u32 %v1759_v11, %v1670_v12 }
  0x8c   :  { %v85_v45 = vpop.xlane.xlu2 %84  ;;  %v1705_v35 = vor.u32 %v1767_v33, %v1702_v34  ;;  %837 = vmatpush.bf16.msra.mxu2 %v1701_v32  ;;  %v1628_v34 = vld [vmem:[#allocation3 + $0x20] sm:$0xf] }
  0x8d   :  { %v117_v48 = vmul.f32 %v2112_v17, %v85_v45 }
  0x8e   :  { %886 = vmatpush.bf16.msra.mxu3 %v1705_v35  ;;  %v1752_v35 = vld [vmem:[#allocation3 + $0x2c] sm:$0xf0] }
  0x8f   :  { %v2165_v50 = vsub.f32 %v1792_v10, %v117_v48  ;;  %v1709_v10 = vor.u32 %v1772_v7, %v1708_v6  ;;  %788 = vmatpush.bf16.msra.mxu1 %v1697_v31  ;;  %v1684_v48 = vld [vmem:[#allocation3 + $0x88] sm:$0xf]  ;;  %v1761_v7 = vld [vmem:[#allocation3 + $0x74] sm:$0xf0]  ;;  %v1657_v31 = vor.u32 %v1755_v26, %v1654_v27 }
  0x90   :  { %v1668_v6 = vld [vmem:[#allocation3 + $0x68] sm:$0xf] }
  0x91   :  { %v149_v53 = vmul.f32 %v2165_v50, %v2165_v50  ;;  %738 = vmatpush.bf16.msra.mxu0 %v1709_v10  ;;  %v1669_v10 = vor.u32 %v1761_v7, %v1668_v6  ;;  %v1612_v6 = vld [vmem:[#allocation3] sm:$0xf]  ;;  %v1748_v7 = vld [vmem:[#allocation3 + $0xc] sm:$0xf0] }
  0x92   :  { %167 = vadd.xlane.f32.xlu2 %v147_v39  ;;  %88 = vadd.xlane.f32.xlu0 %v1796_v40  ;;  %v1676_v39 = vld [vmem:[#allocation3 + $0x80] sm:$0xf]  ;;  %v1613_v9 = vor.u32 %v1748_v7, %v1612_v6 }
  0x93   :  { %163 = vadd.xlane.f32.xlu1 %v145_v42  ;;  %v1762_v42 = vld [vmem:[#allocation3 + $0x84] sm:$0xf]  ;;  %v1677_v45 = vor.u32 %v1764_v41, %v1676_v39  ;;  %887 = vmatpush.bf16.msra.mxu3 %v1689_v62  ;;  %v1751_v62 = vld [vmem:[#allocation3 + $0x2c] sm:$0xf] }
  0x94   :  { %v1750_v39 = vld [vmem:[#allocation3 + $0x24] sm:$0xf] }
  0x95   :  { %739 = vmatpush.bf16.msra.mxu0 %v1693_v24  ;;  %v1649_v24 = vor.u32 %v1754_v18, %v1646_v20 }
  0x97   :  { %888 = vmatpush.bf16.msra.mxu3 %v1673_v14  ;;  %v1620_v14 = vld [vmem:[#allocation3 + $0x8] sm:$0xf] }
  0x98   :  { %v1621_v18 = vor.u32 %v1749_v15, %v1620_v14 }
  0x99   :  { %740 = vmatpush.bf16.msra.mxu0 %v1677_v45 }
  0x9a   :  { %94 = vadd.xlane.f32.xlu2 %v1801_v46  ;;  %169 = vadd.xlane.f32.xlu0 %v148_v47  ;;  %v1678_v47 = vld [vmem:[#allocation3 + $0x90] sm:$0xf0] }
  0x9b   :  { %90 = vadd.xlane.f32.xlu1 %v1797_v49  ;;  %v1681_v58 = vor.u32 %v1762_v42, %v1678_v47  ;;  %889 = vmatpush.bf16.msra.mxu3 %v1657_v31  ;;  %v1629_v47 = vor.u32 %v1752_v35, %v1628_v34 }
  0x9d   :  { %789 = vmatpush.bf16.msra.mxu1 %v1681_v58  ;;  %741 = vmatpush.bf16.msra.mxu0 %v1661_v4  ;;  %v1753_v58 = vld [vmem:[#allocation3 + $0x34] sm:$0xf0] }
  0xa1   :  { %790 = vmatpush.bf16.msra.mxu1 %v1665_v8  ;;  %742 = vmatpush.bf16.msra.mxu0 %v1645_v19  ;;  %v1622_v19 = vld [vmem:[#allocation3 + $0x18] sm:$0xf0] }
  0xa2   :  { %96 = vadd.xlane.f32.xlu2 %v1804_v52  ;;  %171 = vadd.xlane.f32.xlu0 %v149_v53  ;;  %v1765_v53 = vld [vmem:[#allocation3 + $0x94] sm:$0xf0] }
  0xa3   :  { %92 = vadd.xlane.f32.xlu1 %v1800_v54  ;;  %v1685_v59 = vor.u32 %v1765_v53, %v1684_v48  ;;  %v1630_v48 = vld [vmem:[#allocation3 + $0x30] sm:$0xf0]  ;;  %v1636_v53 = vld [vmem:[#allocation3 + $0x28] sm:$0xf] }
  0xa4   :  { %v1633_v60 = vor.u32 %v1750_v39, %v1630_v48  ;;  %v1637_v61 = vor.u32 %v1753_v58, %v1636_v53 }
  0xa5   :  { %838 = vmatpush.bf16.msra.mxu2 %v1685_v59  ;;  %791 = vmatpush.bf16.msra.mxu1 %v1649_v24  ;;  %v1625_v24 = vor.u32 %v1747_v16, %v1622_v19 }
  0xa6   :  { %743 = vmatpush.bf16.msra.mxu0 %v1629_v47 }
  0xa9   :  { %839 = vmatpush.bf16.msra.mxu2 %v1669_v10  ;;  %792 = vmatpush.bf16.msra.mxu1 %v1633_v60  ;;  %v1614_v10 = vld [vmem:[#allocation3 + $0x10] sm:$0xf0] }
  0xaa   :  { %98 = vadd.xlane.f32.xlu0 %v1805_v55  ;;  %744 = vmatpush.bf16.msra.mxu0 %v1613_v9 }
  0xad   :  { %840 = vmatpush.bf16.msra.mxu2 %v1653_v25 }
  0xb1   :  { %841 = vmatpush.bf16.msra.mxu2 %v1637_v61 }
  0xb2   :  { %100 = vadd.xlane.f32.xlu0 %v1808_v57 }
  0xb5   :  { %842 = vmatpush.bf16.msra.mxu2 %v1621_v18 }
  0xf5   :  { %v160_v63 = vpop.xlane.xlu0 %159 }
  0xf6   :  { %v191_v3 = vmul.f32 %v160_v63, %v2112_v17  ;;  %v1638_v63 = vld [vmem:[#allocation3 + $0x38] sm:$0xf0] }
  0xf8   :  { %v2194_v13 = vadd.f32 1e-06, %v191_v3  ;;  %v1641_v3 = vor.u32 %v1751_v62, %v1638_v63 }
  0xfa   :  { %1872 = vrsqrt.f32 %v2194_v13  ;;  %890 = vmatpush.bf16.msra.mxu3 %v1641_v3  ;;  %vm229_vm2 = vweird.f32 %v2194_v13 }
  0xfd   :  { %v166_v32 = vpop.xlane.xlu2 %165  ;;  %v87_v33 = vpop.xlane.xlu0 %86 }
  0xfe   :  { %v194_v41 = vmul.f32 %v166_v32, %v2112_v17  ;;  %v162_v42 = vpop.xlane.xlu1 %161  ;;  %v118_v45 = vmul.f32 %v2112_v17, %v87_v33  ;;  %891 = vmatpush.bf16.msra.mxu3 %v1625_v24 }
  0xff   :  { %v192_v59 = vmul.f32 %v162_v42, %v2112_v17 }
 0x100   :  { %v2200_v0 = vpop.eup %1872  ;;  %v2202_v1 = vadd.f32 1e-06, %v194_v41  ;;  %v2206_v2 = vsub.f32 %v1793_v30, %v118_v45  ;;  %v1746_v30 = vld [vmem:[#allocation3 + $0x4] sm:$0xf] }
 0x101   :  { %v224_v4 = vmul.f32 %v2200_v0, %v2194_v13  ;;  %v2210_v5 = vadd.f32 1e-06, %v192_v59  ;;  %v1617_v12 = vor.u32 %v1746_v30, %v1614_v10  ;;  %vm230_vm1 = vweird.f32 %v2200_v0 }
 0x102   :  { %1874 = vrsqrt.f32 %v2202_v1  ;;  %v150_v8 = vmul.f32 %v2206_v2, %v2206_v2  ;;  %vm2241_vm3 = vmor %vm229_vm2, %vm230_vm1  ;;  %vm259_vm6 = vweird.f32 %v2202_v1 }
 0x103   :  { %v225_v11 = vmul.f32 %v2200_v0, %v224_v4  ;;  %1876 = vrsqrt.f32 %v2210_v5  ;;  %793 = vmatpush.bf16.msra.mxu1 %v1617_v12  ;;  %vm239_vm4 = vweird.f32 %v2210_v5 }
 0x104   :  { %173 = vadd.xlane.f32.xlu1 %v150_v8 }
 0x105   :  { %v226_v20 = vmul.f32 0.5, %v225_v11  ;;  %v168_v22 = vpop.xlane.xlu2 %167  ;;  %v89_v23 = vpop.xlane.xlu0 %88  ;;  %v2265_v11 = vld [vmem:[%s3048_s1] ss:$0 sm:$0xff] }
 0x106   :  { %v195_v25 = vmul.f32 %v168_v22, %v2112_v17  ;;  %v164_v26 = vpop.xlane.xlu1 %163  ;;  %v119_v27 = vmul.f32 %v2112_v17, %v89_v23  ;;  %v2300_v23 = vld [vmem:[%s3049_s2] ss:$0 sm:$0xff] }
 0x107   :  { %v227_v31 = vsub.f32 1.5, %v226_v20  ;;  %v193_v32 = vmul.f32 %v164_v26, %v2112_v17 }
 0x108   :  { %v2220_v33 = vpop.eup %1874  ;;  %v2222_v34 = vadd.f32 1e-06, %v195_v25  ;;  %v2226_v35 = vsub.f32 %v1796_v40, %v119_v27 }
 0x109   :  { %v1877_v39 = vpop.eup %1876  ;;  %v254_v41 = vmul.f32 %v2220_v33, %v2202_v1  ;;  %v2230_v42 = vadd.f32 1e-06, %v193_v32  ;;  %v228_v45 = vmul.f32 %v2200_v0, %v227_v31  ;;  %vm260_vm7 = vweird.f32 %v2220_v33 }
 0x10a   :  { %v234_v47 = vmul.f32 %v1877_v39, %v2210_v5  ;;  %1878 = vrsqrt.f32 %v2222_v34  ;;  %v151_v53 = vmul.f32 %v2226_v35, %v2226_v35  ;;  %vm240_vm5 = vweird.f32 %v1877_v39  ;;  %vm2282_vm9 = vmor %vm259_vm6, %vm260_vm7 }
 0x10b   :  { %v255_v48 = vmul.f32 %v2220_v33, %v254_v41  ;;  %1880 = vrsqrt.f32 %v2230_v42  ;;  %v232_v62 = vsel %vm2241_vm3, %v2200_v0, %v228_v45  ;;  %vm2272_vm8 = vmor %vm239_vm4, %vm240_vm5  ;;  %v1809_v5 = vunpack.c.h.bf16 %v2188_v56 }
 0x10c   :  { %v235_v40 = vmul.f32 %v1877_v39, %v234_v47  ;;  %175 = vadd.xlane.f32.xlu1 %v151_v53  ;;  %v383_v1 = vmul.f32 %v232_v62, %v2115_v21  ;;  %vm269_vm10 = vweird.f32 %v2222_v34  ;;  %vm249_vm11 = vweird.f32 %v2230_v42 }
 0x10d   :  { %v256_v59 = vmul.f32 0.5, %v255_v48  ;;  %v95_v60 = vpop.xlane.xlu2 %94  ;;  %v170_v61 = vpop.xlane.xlu0 %169 }
 0x10e   :  { %v236_v63 = vmul.f32 0.5, %v235_v40  ;;  %v122_v13 = vmul.f32 %v2112_v17, %v95_v60  ;;  %v91_v3 = vpop.xlane.xlu1 %90  ;;  %v196_v4 = vmul.f32 %v170_v61, %v2112_v17  ;;  %v403_v24 = vmul.f32 %v2265_v11, %v383_v1 }
 0x10f   :  { %v257_v6 = vsub.f32 1.5, %v256_v59  ;;  %v120_v7 = vmul.f32 %v2112_v17, %v91_v3 }
 0x110   :  { %v2254_v8 = vpop.eup %1878  ;;  %v237_v9 = vsub.f32 1.5, %v236_v63  ;;  %v2258_v0 = vsub.f32 %v1801_v46, %v122_v13  ;;  %v2260_v30 = vadd.f32 1e-06, %v196_v4  ;;  %v423_v59 = vadd.f32 %v2300_v23, %v403_v24 }
 0x111   :  { %v1881_v10 = vpop.eup %1880  ;;  %v258_v12 = vmul.f32 %v2220_v33, %v257_v6  ;;  %v264_v46 = vmul.f32 %v2254_v8, %v2222_v34  ;;  %v2280_v15 = vsub.f32 %v1797_v49, %v120_v7  ;;  %vm270_vm13 = vweird.f32 %v2254_v8 }
 0x112   :  { %v238_v21 = vmul.f32 %v1877_v39, %v237_v9  ;;  %v244_v18 = vmul.f32 %v1881_v10, %v2230_v42  ;;  %1882 = vrsqrt.f32 %v2260_v30  ;;  %v154_v20 = vmul.f32 %v2258_v0, %v2258_v0  ;;  %vm2330_vm15 = vmor %vm269_vm10, %vm270_vm13 }
 0x113   :  { %v265_v19 = vmul.f32 %v2254_v8, %v264_v46  ;;  %v152_v22 = vmul.f32 %v2280_v15, %v2280_v15  ;;  %v262_v25 = vsel %vm2282_vm9, %v2220_v33, %v258_v12  ;;  %vm250_vm12 = vweird.f32 %v1881_v10 }
 0x114   :  { %v242_v38 = vsel %vm2272_vm8, %v1877_v39, %v238_v21  ;;  %v245_v49 = vmul.f32 %v1881_v10, %v244_v18  ;;  %181 = vadd.xlane.f32.xlu0 %v154_v20  ;;  %102 = vadd.xlane.f32.xlu1 %v1809_v5  ;;  %v386_v40 = vmul.f32 %v262_v25, %v2121_v28  ;;  %vm251_vm14 = vmor %vm249_vm11, %vm250_vm12  ;;  %vm279_vm0 = vweird.f32 %v2260_v30 }
 0x115   :  { %v384_v26 = vmul.f32 %v242_v38, %v2123_v29  ;;  %v266_v27 = vmul.f32 0.5, %v265_v19  ;;  %v97_v31 = vpop.xlane.xlu2 %96  ;;  %v2307_v32 = vpop.xlane.xlu0 %171  ;;  %177 = vadd.xlane.f32.xlu2 %v152_v22 }
 0x116   :  { %v246_v39 = vmul.f32 0.5, %v245_v49  ;;  %v123_v41 = vmul.f32 %v2112_v17, %v97_v31  ;;  %v93_v45 = vpop.xlane.xlu1 %92  ;;  %v406_v42 = vmul.f32 %v2265_v11, %v386_v40 }
 0x117   :  { %v404_v33 = vmul.f32 %v2265_v11, %v384_v26  ;;  %v267_v47 = vsub.f32 1.5, %v266_v27  ;;  %v121_v29 = vmul.f32 %v2112_v17, %v93_v45 }
 0x118   :  { %v1883_v48 = vpop.eup %1882  ;;  %v247_v53 = vsub.f32 1.5, %v246_v39  ;;  %v2319_v58 = vsub.f32 %v1804_v52, %v123_v41 }
 0x119   :  { %v424_v60 = vadd.f32 %v2300_v23, %v404_v33  ;;  %v268_v61 = vmul.f32 %v2254_v8, %v267_v47  ;;  %v274_v62 = vmul.f32 %v1883_v48, %v2260_v30  ;;  %v2336_v63 = vsub.f32 %v1800_v54, %v121_v29 }
 0x11a   :  { %v248_v52 = vmul.f32 %v1881_v10, %v247_v53  ;;  %v155_v4 = vmul.f32 %v2319_v58, %v2319_v58  ;;  %vm280_vm1 = vweird.f32 %v1883_v48 }
 0x11b   :  { %v1813_v13 = vpack.c.bf16 %v424_v60, %v423_v59  ;;  %v275_v3 = vmul.f32 %v1883_v48, %v274_v62  ;;  %v153_v34 = vmul.f32 %v2336_v63, %v2336_v63  ;;  %v272_v44 = vsel %vm2330_vm15, %v2254_v8, %v268_v61  ;;  %vm281_vm2 = vmor %vm279_vm0, %vm280_vm1 }
 0x11c   :  { %v252_v6 = vsel %vm251_vm14, %v1881_v10, %v248_v52  ;;  %183 = vadd.xlane.f32.xlu1 %v155_v4  ;;  %v387_v12 = vmul.f32 %v272_v44, %v2134_v36  ;;  %v426_v8 = vadd.f32 %v2300_v23, %v406_v42 }
 0x11d   :  { %1814 = vst [vmem:[#allocation2 + $0x30] sm:$0xff] %v1813_v13   ;;  %v385_v54 = vmul.f32 %v252_v6, %v2136_v37  ;;  %v276_v7 = vmul.f32 0.5, %v275_v3  ;;  %v99_v9 = vpop.xlane.xlu0 %98  ;;  %179 = vadd.xlane.f32.xlu2 %v153_v34 }
 0x11e   :  { %v124_v1 = vmul.f32 %v2112_v17, %v99_v9  ;;  %v407_v19 = vmul.f32 %v2265_v11, %v387_v12 }
 0x11f   :  { %v405_v10 = vmul.f32 %v2265_v11, %v385_v54  ;;  %v277_v30 = vsub.f32 1.5, %v276_v7 }
 0x120   :  { %v2353_v14 = vsub.f32 %v1805_v55, %v124_v1  ;;  %v427_v49 = vadd.f32 %v2300_v23, %v407_v19 }
 0x121   :  { %v425_v37 = vadd.f32 %v2300_v23, %v405_v10  ;;  %v278_v46 = vmul.f32 %v1883_v48, %v277_v30 }
 0x122   :  { %v156_v16 = vmul.f32 %v2353_v14, %v2353_v14 }
 0x123   :  { %v1818_v21 = vpack.c.bf16 %v426_v8, %v425_v37  ;;  %v282_v18 = vsel %vm281_vm2, %v1883_v48, %v278_v46 }
 0x124   :  { %v388_v20 = vmul.f32 %v282_v18, %v2151_v43  ;;  %v1738_v36 = vld [vmem:[#allocation2 + $0x30] sm:$0xff] }
 0x125   :  { %1857 = vst [vmem:[#allocation2] sm:$0xff] %v1818_v21   ;;  %v101_v38 = vpop.xlane.xlu0 %100  ;;  %185 = vadd.xlane.f32.xlu2 %v156_v16  ;;  %745 = vmatmul.bf16.vlgmr.msra.gmra.mxu0 %v1738_v36 }
 0x126   :  { %v408_v51 = vmul.f32 %v2265_v11, %v388_v20  ;;  %v125_v55 = vmul.f32 %v2112_v17, %v101_v38  ;;  %794 = vmatmul.bf16.vlgmr.msra.gmra.mxu1 %v1738_v36  ;;  %843 = vmatmul.bf16.vlgmr.msra.gmra.mxu2 %v1738_v36 }
 0x127   :  { %892 = vmatmul.bf16.vlgmr.msra.gmra.mxu3 %v1738_v36 }
 0x128   :  { %v428_v22 = vadd.f32 %v2300_v23, %v408_v51  ;;  %v2367_v24 = vsub.f32 %v1808_v57, %v125_v55  ;;  %v197_v57 = vmul.f32 %v2307_v32, %v2112_v17 }
 0x12a   :  { %v1823_v43 = vpack.c.bf16 %v428_v22, %v427_v49  ;;  %v157_v25 = vmul.f32 %v2367_v24, %v2367_v24  ;;  %v213_v31 = vadd.f32 1e-06, %v197_v57 }
 0x12c   :  { %1858 = vst [vmem:[#allocation2 + $0x18] sm:$0xff] %v1823_v43   ;;  %187 = vadd.xlane.f32.xlu0 %v157_v25  ;;  %v1739_v26 = vld [vmem:[#allocation2] sm:$0xff]  ;;  %1884 = vrsqrt.f32 %v213_v31  ;;  %vm289_vm3 = vweird.f32 %v213_v31 }
 0x132   :  { %v1885_v39 = vpop.eup %1884 }
 0x133   :  { %v1740_v27 = vld [vmem:[#allocation2 + $0x18] sm:$0xff]  ;;  %v284_v41 = vmul.f32 %v1885_v39, %v213_v31  ;;  %vm290_vm4 = vweird.f32 %v1885_v39 }
 0x134   :  { %vm291_vm5 = vmor %vm289_vm3, %vm290_vm4 }
 0x135   :  { %750 = vmatmul.bf16.gmra.mxu0 %v1739_v26  ;;  %v285_v45 = vmul.f32 %v1885_v39, %v284_v41 }
 0x136   :  { %799 = vmatmul.bf16.gmra.mxu1 %v1739_v26  ;;  %848 = vmatmul.bf16.gmra.mxu2 %v1739_v26 }
 0x137   :  { %897 = vmatmul.bf16.gmra.mxu3 %v1739_v26  ;;  %v286_v48 = vmul.f32 0.5, %v285_v45 }
 0x139   :  { %v287_v40 = vsub.f32 1.5, %v286_v48 }
 0x13b   :  { %v288_v61 = vmul.f32 %v1885_v39, %v287_v40 }
 0x13d   :  { %v292_v52 = vsel %vm291_vm5, %v1885_v39, %v288_v61 }
 0x13e   :  { %v389_v44 = vmul.f32 %v292_v52, %v2165_v50 }
 0x140   :  { %v409_v46 = vmul.f32 %v2265_v11, %v389_v44 }
 0x145   :  { %755 = vmatmul.bf16.gmra.mxu0 %v1740_v27 }
 0x146   :  { %804 = vmatmul.bf16.gmra.mxu1 %v1740_v27  ;;  %853 = vmatmul.bf16.gmra.mxu2 %v1740_v27 }
 0x147   :  { %902 = vmatmul.bf16.gmra.mxu3 %v1740_v27 }
 0x177   :  { %v174_v33 = vpop.xlane.xlu1 %173 }
 0x178   :  { %v198_v47 = vmul.f32 %v174_v33, %v2112_v17 }
 0x17a   :  { %v214_v29 = vadd.f32 1e-06, %v198_v47 }
 0x17c   :  { %1886 = vrsqrt.f32 %v214_v29  ;;  %vm299_vm7 = vweird.f32 %v214_v29 }
 0x17f   :  { %v176_v53 = vpop.xlane.xlu1 %175 }
 0x180   :  { %v199_v60 = vmul.f32 %v176_v53, %v2112_v17 }
 0x182   :  { %v1887_v59 = vpop.eup %1886  ;;  %v215_v62 = vadd.f32 1e-06, %v199_v60 }
 0x183   :  { %v294_v32 = vmul.f32 %v1887_v59, %v214_v29  ;;  %vm300_vm6 = vweird.f32 %v1887_v59 }
 0x184   :  { %1888 = vrsqrt.f32 %v215_v62  ;;  %vm301_vm8 = vmor %vm299_vm7, %vm300_vm6  ;;  %vm309_vm10 = vweird.f32 %v215_v62 }
 0x185   :  { %v295_v28 = vmul.f32 %v1887_v59, %v294_v32 }
 0x187   :  { %v296_v13 = vmul.f32 0.5, %v295_v28  ;;  %v182_v3 = vpop.xlane.xlu0 %181  ;;  %v103_v6 = vpop.xlane.xlu1 %102 }
 0x188   :  { %v178_v42 = vpop.xlane.xlu2 %177  ;;  %v202_v34 = vmul.f32 %v182_v3, %v2112_v17  ;;  %v126_v7 = vmul.f32 %v2112_v17, %v103_v6 }
 0x189   :  { %v297_v4 = vsub.f32 1.5, %v296_v13  ;;  %v200_v54 = vmul.f32 %v178_v42, %v2112_v17 }
 0x18a   :  { %v218_v1 = vadd.f32 1e-06, %v202_v34  ;;  %v1889_v10 = vpop.eup %1888  ;;  %v2381_v12 = vsub.f32 %v1809_v5, %v126_v7  ;;  %v429_v5 = vadd.f32 %v2300_v23, %v409_v46 }
 0x18b   :  { %v298_v9 = vmul.f32 %v1887_v59, %v297_v4  ;;  %v216_v30 = vadd.f32 1e-06, %v200_v54  ;;  %v304_v37 = vmul.f32 %v1889_v10, %v215_v62  ;;  %vm310_vm9 = vweird.f32 %v1889_v10 }
 0x18c   :  { %1890 = vrsqrt.f32 %v218_v1  ;;  %v158_v21 = vmul.f32 %v2381_v12, %v2381_v12  ;;  %vm311_vm11 = vmor %vm309_vm10, %vm310_vm9  ;;  %vm339_vm14 = vweird.f32 %v218_v1 }
 0x18d   :  { %v302_v8 = vsel %vm301_vm8, %v1887_v59, %v298_v9  ;;  %1892 = vrsqrt.f32 %v216_v30  ;;  %v305_v16 = vmul.f32 %v1889_v10, %v304_v37  ;;  %vm319_vm12 = vweird.f32 %v216_v30 }
 0x18e   :  { %v390_v50 = vmul.f32 %v302_v8, %v2206_v2  ;;  %189 = vadd.xlane.f32.xlu1 %v158_v21 }
 0x18f   :  { %v306_v19 = vmul.f32 0.5, %v305_v16  ;;  %v184_v56 = vpop.xlane.xlu1 %183 }
 0x190   :  { %v410_v18 = vmul.f32 %v2265_v11, %v390_v50  ;;  %v180_v20 = vpop.xlane.xlu2 %179  ;;  %v203_v51 = vmul.f32 %v184_v56, %v2112_v17 }
 0x191   :  { %v201_v38 = vmul.f32 %v180_v20, %v2112_v17  ;;  %v307_v55 = vsub.f32 1.5, %v306_v19 }
 0x192   :  { %v430_v36 = vadd.f32 %v2300_v23, %v410_v18  ;;  %v1891_v2 = vpop.eup %1890  ;;  %v219_v57 = vadd.f32 1e-06, %v203_v51 }
 0x193   :  { %v1893_v49 = vpop.eup %1892  ;;  %v334_v43 = vmul.f32 %v1891_v2, %v218_v1  ;;  %v217_v25 = vadd.f32 1e-06, %v201_v38  ;;  %v308_v26 = vmul.f32 %v1889_v10, %v307_v55  ;;  %vm340_vm15 = vweird.f32 %v1891_v2 }
 0x194   :  { %v1828_v22 = vpack.c.bf16 %v430_v36, %v429_v5  ;;  %v314_v27 = vmul.f32 %v1893_v49, %v216_v30  ;;  %vm320_vm13 = vweird.f32 %v1893_v49  ;;  %vm2400_vm1 = vmor %vm339_vm14, %vm340_vm15  ;;  %vm349_vm4 = vweird.f32 %v219_v57 }
 0x195   :  { %v335_v31 = vmul.f32 %v1891_v2, %v334_v43  ;;  %1894 = vrsqrt.f32 %v217_v25  ;;  %v312_v41 = vsel %vm311_vm11, %v1889_v10, %v308_v26  ;;  %vm2394_vm0 = vmor %vm319_vm12, %vm320_vm13  ;;  %vm329_vm2 = vweird.f32 %v217_v25 }
 0x196   :  { %1859 = vst [vmem:[#allocation2 + $0x10] sm:$0xff] %v1828_v22   ;;  %v315_v39 = vmul.f32 %v1893_v49, %v314_v27  ;;  %1896 = vrsqrt.f32 %v219_v57  ;;  %v391_v40 = vmul.f32 %v312_v41, %v2226_v35  ;;  %v519_v35 = vld [vmem:[%s3051_s4] sm:$0xf] }
 0x197   :  { %v336_v45 = vmul.f32 0.5, %v335_v31  ;;  %v2414_v9 = vperm.slane %v519_v35, 0  ;;  %v2416_v10 = vperm.slane %v519_v35, 1  ;;  %v2437_v55 = vperm.slane %v519_v35, 2 }
 0x198   :  { %v316_v33 = vmul.f32 0.5, %v315_v39  ;;  %v186_v47 = vpop.xlane.xlu2 %185  ;;  %v411_v42 = vmul.f32 %v2265_v11, %v391_v40  ;;  %v2449_v31 = vperm.slane %v519_v35, 3 }
 0x199   :  { %v337_v29 = vsub.f32 1.5, %v336_v45  ;;  %v204_v48 = vmul.f32 %v186_v47, %v2112_v17 }
 0x19a   :  { %v317_v53 = vsub.f32 1.5, %v316_v33  ;;  %v431_v16 = vadd.f32 %v2300_v23, %v411_v42 }
 0x19b   :  { %v1895_v59 = vpop.eup %1894  ;;  %v338_v61 = vmul.f32 %v1891_v2, %v337_v29  ;;  %v2398_v32 = vadd.f32 1e-06, %v204_v48 }
 0x19c   :  { %v1897_v62 = vpop.eup %1896  ;;  %v318_v28 = vmul.f32 %v1893_v49, %v317_v53  ;;  %v324_v13 = vmul.f32 %v1895_v59, %v217_v25  ;;  %vm330_vm3 = vweird.f32 %v1895_v59 }
 0x19d   :  { %v1741_v3 = vld [vmem:[#allocation2 + $0x10] sm:$0xff]  ;;  %v344_v4 = vmul.f32 %v1897_v62, %v219_v57  ;;  %1898 = vrsqrt.f32 %v2398_v32  ;;  %v342_v54 = vsel %vm2400_vm1, %v1891_v2, %v338_v61  ;;  %vm350_vm5 = vweird.f32 %v1897_v62  ;;  %vm2422_vm6 = vmor %vm329_vm2, %vm330_vm3 }
 0x19e   :  { %v322_v6 = vsel %vm2394_vm0, %v1893_v49, %v318_v28  ;;  %v325_v34 = vmul.f32 %v1895_v59, %v324_v13  ;;  %760 = vmatmul.bf16.gmra.mxu0 %v1741_v3  ;;  %809 = vmatmul.bf16.gmra.mxu1 %v1741_v3  ;;  %vm2426_vm7 = vmor %vm349_vm4, %vm350_vm5  ;;  %vm359_vm8 = vweird.f32 %v2398_v32 }
 0x19f   :  { %v392_v44 = vmul.f32 %v322_v6, %v2280_v15  ;;  %v345_v7 = vmul.f32 %v1897_v62, %v344_v4  ;;  %858 = vmatmul.bf16.gmra.mxu2 %v1741_v3  ;;  %907 = vmatmul.bf16.gmra.mxu3 %v1741_v3  ;;  %v394_v15 = vmul.f32 %v342_v54, %v2258_v0 }
 0x1a0   :  { %v326_v1 = vmul.f32 0.5, %v325_v34 }
 0x1a1   :  { %v412_v30 = vmul.f32 %v2265_v11, %v392_v44  ;;  %v346_v8 = vmul.f32 0.5, %v345_v7  ;;  %v414_v49 = vmul.f32 %v2265_v11, %v394_v15 }
 0x1a2   :  { %v327_v37 = vsub.f32 1.5, %v326_v1  ;;  %v746_v46 = vpop.f32.mrf.mxu0 }
 0x1a3   :  { %v1899_v50 = vpop.eup %1898  ;;  %v432_v21 = vadd.f32 %v2300_v23, %v412_v30  ;;  %v347_v19 = vsub.f32 1.5, %v346_v8  ;;  %v795_v20 = vpop.f32.mrf.mxu1  ;;  %v2432_v36 = vadd.f32 %v746_v46, %v2414_v9 }
 0x1a4   :  { %v328_v56 = vmul.f32 %v1895_v59, %v327_v37  ;;  %v354_v0 = vmul.f32 %v1899_v50, %v2398_v32  ;;  %v2435_v2 = vadd.f32 %v795_v20, %v2416_v10  ;;  %vm360_vm9 = vweird.f32 %v1899_v50 }
 0x1a5   :  { %v1833_v38 = vpack.c.bf16 %v432_v21, %v431_v16  ;;  %v348_v51 = vmul.f32 %v1897_v62, %v347_v19  ;;  %v933_v25 = vmul.f32 %v2432_v36, %v2432_v36  ;;  %vm2458_vm10 = vmor %vm359_vm8, %vm360_vm9 }
 0x1a6   :  { %v332_v22 = vsel %vm2422_vm6, %v1895_v59, %v328_v56  ;;  %v355_v43 = vmul.f32 %v1899_v50, %v354_v0  ;;  %v934_v57 = vmul.f32 %v2435_v2, %v2435_v2 }
 0x1a7   :  { %1860 = vst [vmem:[#allocation2 + $0x8] sm:$0xff] %v1833_v38   ;;  %v393_v26 = vmul.f32 %v332_v22, %v2336_v63  ;;  %v352_v27 = vsel %vm2426_vm7, %v1897_v62, %v348_v51  ;;  %v997_v41 = vmul.f32 %v933_v25, %v2432_v36  ;;  %v434_v63 = vadd.f32 %v2300_v23, %v414_v49 }
 0x1a8   :  { %v356_v39 = vmul.f32 0.5, %v355_v43  ;;  %v998_v33 = vmul.f32 %v934_v57, %v2435_v2  ;;  %v395_v29 = vmul.f32 %v352_v27, %v2319_v58 }
 0x1a9   :  { %v413_v45 = vmul.f32 %v2265_v11, %v393_v26  ;;  %v844_v47 = vpop.f32.mrf.mxu2  ;;  %v1061_v61 = vmul.f32 0.044715, %v997_v41 }
 0x1aa   :  { %v357_v48 = vsub.f32 1.5, %v356_v39  ;;  %v893_v40 = vpop.f32.mrf.mxu3  ;;  %v748_v53 = vpop.f32.mrf.mxu0  ;;  %v1062_v32 = vmul.f32 0.044715, %v998_v33  ;;  %v2463_v62 = vadd.f32 %v844_v47, %v2437_v55  ;;  %v415_v42 = vmul.f32 %v2265_v11, %v395_v29 }
 0x1ab   :  { %v433_v59 = vadd.f32 %v2300_v23, %v413_v45  ;;  %v2466_v52 = vadd.f32 %v893_v40, %v2449_v31  ;;  %v1125_v58 = vadd.f32 %v1061_v61, %v2432_v36  ;;  %v797_v4 = vpop.f32.mrf.mxu1  ;;  %v2478_v44 = vadd.f32 %v748_v53, %v2414_v9 }
 0x1ac   :  { %v358_v28 = vmul.f32 %v1899_v50, %v357_v48  ;;  %v1126_v3 = vadd.f32 %v1062_v32, %v2435_v2  ;;  %v935_v35 = vmul.f32 %v2463_v62, %v2463_v62  ;;  %v2486_v46 = vadd.f32 %v797_v4, %v2416_v10 }
 0x1ad   :  { %v1838_v13 = vpack.c.bf16 %v434_v63, %v433_v59  ;;  %v936_v34 = vmul.f32 %v2466_v52, %v2466_v52  ;;  %v1189_v1 = vmul.f32 0.7978846, %v1125_v58  ;;  %v937_v37 = vmul.f32 %v2478_v44, %v2478_v44 }
 0x1ae   :  { %v362_v6 = vsel %vm2458_vm10, %v1899_v50, %v358_v28  ;;  %v1742_v54 = vld [vmem:[#allocation2 + $0x8] sm:$0xff]  ;;  %v1190_v30 = vmul.f32 0.7978846, %v1126_v3  ;;  %v999_v8 = vmul.f32 %v935_v35, %v2463_v62  ;;  %v435_v21 = vadd.f32 %v2300_v23, %v415_v42 }
 0x1af   :  { %1861 = vst [vmem:[#allocation2 + $0x20] sm:$0xff] %v1838_v13   ;;  %v396_v7 = vmul.f32 %v362_v6, %v2353_v14  ;;  %v1000_v15 = vmul.f32 %v936_v34, %v2466_v52  ;;  %765 = vmatmul.bf16.gmra.mxu0 %v1742_v54  ;;  %814 = vmatmul.bf16.gmra.mxu1 %v1742_v54  ;;  %1900 = vtanh.f32 %v1189_v1 }
 0x1b0   :  { %v1063_v16 = vmul.f32 0.044715, %v999_v8  ;;  %863 = vmatmul.bf16.gmra.mxu2 %v1742_v54  ;;  %912 = vmatmul.bf16.gmra.mxu3 %v1742_v54  ;;  %1902 = vtanh.f32 %v1190_v30  ;;  %v1001_v19 = vmul.f32 %v937_v37, %v2478_v44  ;;  %v938_v0 = vmul.f32 %v2486_v46, %v2486_v46 }
 0x1b1   :  { %v416_v50 = vmul.f32 %v2265_v11, %v396_v7  ;;  %v846_v14 = vpop.f32.mrf.mxu2  ;;  %v1064_v18 = vmul.f32 0.044715, %v1000_v15 }
 0x1b2   :  { %v895_v20 = vpop.f32.mrf.mxu3  ;;  %v1127_v5 = vadd.f32 %v1063_v16, %v2463_v62  ;;  %v2496_v11 = vadd.f32 %v846_v14, %v2437_v55  ;;  %v1065_v51 = vmul.f32 0.044715, %v1001_v19  ;;  %v751_v22 = vpop.f32.mrf.mxu0  ;;  %v1002_v26 = vmul.f32 %v938_v0, %v2486_v46 }
 0x1b3   :  { %v436_v56 = vadd.f32 %v2300_v23, %v416_v50  ;;  %v1128_v38 = vadd.f32 %v1064_v18, %v2466_v52  ;;  %v2500_v49 = vadd.f32 %v895_v20, %v2449_v31  ;;  %v2509_v33 = vadd.f32 %v751_v22, %v2414_v9  ;;  %v800_v40 = vpop.f32.mrf.mxu1 }
 0x1b4   :  { %v1191_v25 = vmul.f32 0.7978846, %v1127_v5  ;;  %v1129_v27 = vadd.f32 %v1065_v51, %v2478_v44  ;;  %v939_v57 = vmul.f32 %v2496_v11, %v2496_v11  ;;  %v1066_v45 = vmul.f32 0.044715, %v1002_v26 }
 0x1b5   :  { %v1843_v43 = vpack.c.bf16 %v436_v56, %v435_v21  ;;  %v1192_v23 = vmul.f32 0.7978846, %v1128_v38  ;;  %v940_v39 = vmul.f32 %v2500_v49, %v2500_v49  ;;  %v1901_v41 = vpop.eup %1900  ;;  %v941_v13 = vmul.f32 %v2509_v33, %v2509_v33 }
 0x1b6   :  { %1904 = vtanh.f32 %v1191_v25  ;;  %v1903_v47 = vpop.eup %1902  ;;  %v1317_v63 = vadd.f32 1.0, %v1901_v41  ;;  %v1193_v29 = vmul.f32 0.7978846, %v1129_v27  ;;  %v1003_v48 = vmul.f32 %v939_v57, %v2496_v11  ;;  %v1743_v21 = vld [vmem:[#allocation2 + $0x20] sm:$0xff] }
 0x1b7   :  { %1862 = vst [vmem:[#allocation2 + $0x28] sm:$0xff] %v1843_v43   ;;  %1906 = vtanh.f32 %v1192_v23  ;;  %v1318_v53 = vadd.f32 1.0, %v1903_v47  ;;  %v1130_v59 = vadd.f32 %v1066_v45, %v2486_v46  ;;  %v1004_v60 = vmul.f32 %v940_v39, %v2500_v49 }
 0x1b8   :  { %v1381_v32 = vmul.f32 0.5, %v1317_v63  ;;  %1908 = vtanh.f32 %v1193_v29  ;;  %v1067_v28 = vmul.f32 0.044715, %v1003_v48  ;;  %v2517_v4 = vadd.f32 %v800_v40, %v2416_v10 }
 0x1b9   :  { %v849_v61 = vpop.f32.mrf.mxu2  ;;  %v1382_v58 = vmul.f32 0.5, %v1318_v53  ;;  %v1194_v3 = vmul.f32 0.7978846, %v1130_v59  ;;  %v1068_v35 = vmul.f32 0.044715, %v1004_v60  ;;  %v1005_v34 = vmul.f32 %v941_v13, %v2509_v33 }
 0x1ba   :  { %v1445_v42 = vmul.f32 %v1381_v32, %v2432_v36  ;;  %v1131_v6 = vadd.f32 %v1067_v28, %v2496_v11  ;;  %v2523_v54 = vadd.f32 %v849_v61, %v2437_v55  ;;  %v898_v7 = vpop.f32.mrf.mxu3  ;;  %v942_v15 = vmul.f32 %v2517_v4, %v2517_v4 }
 0x1bb   :  { %v1446_v30 = vmul.f32 %v1382_v58, %v2435_v2  ;;  %1910 = vtanh.f32 %v1194_v3  ;;  %v1132_v8 = vadd.f32 %v1068_v35, %v2500_v49  ;;  %v1069_v16 = vmul.f32 0.044715, %v1005_v34  ;;  %v753_v2 = vpop.f32.mrf.mxu0  ;;  %v802_v29 = vpop.f32.mrf.mxu1 }
 0x1bc   :  { %v1905_v1 = vpop.eup %1904  ;;  %v1195_v36 = vmul.f32 0.7978846, %v1131_v6  ;;  %v943_v14 = vmul.f32 %v2523_v54, %v2523_v54  ;;  %v1006_v56 = vmul.f32 %v942_v15, %v2517_v4  ;;  %v2539_v57 = vadd.f32 %v898_v7, %v2449_v31 }
 0x1bd   :  { %v1907_v37 = vpop.eup %1906  ;;  %v1319_v50 = vadd.f32 1.0, %v1905_v1  ;;  %v1509_v18 = vpack.c.bf16 %v1446_v30, %v1445_v42  ;;  %v1196_v20 = vmul.f32 0.7978846, %v1132_v8  ;;  %v1133_v38 = vadd.f32 %v1069_v16, %v2509_v33 }
 0x1be   :  { %v1320_v19 = vadd.f32 1.0, %v1907_v37  ;;  %v1909_v5 = vpop.eup %1908  ;;  %1912 = vtanh.f32 %v1195_v36  ;;  %v1007_v51 = vmul.f32 %v943_v14, %v2523_v54  ;;  %v1070_v25 = vmul.f32 0.044715, %v1006_v56 }
 0x1bf   :  { %v1383_v0 = vmul.f32 0.5, %v1319_v50  ;;  %770 = vmatmul.bf16.gmra.mxu0 %v1743_v21  ;;  %819 = vmatmul.bf16.gmra.mxu1 %v1743_v21  ;;  %1541 = vst [vmem:[%s3052_s5] sm:$0xff] %v1509_v18  ;;  %v1321_v43 = vadd.f32 1.0, %v1909_v5  ;;  %1914 = vtanh.f32 %v1196_v20  ;;  %v1197_v23 = vmul.f32 0.7978846, %v1133_v38 }
 0x1c0   :  { %v1384_v22 = vmul.f32 0.5, %v1320_v19  ;;  %868 = vmatmul.bf16.gmra.mxu2 %v1743_v21  ;;  %917 = vmatmul.bf16.gmra.mxu3 %v1743_v21  ;;  %v1071_v27 = vmul.f32 0.044715, %v1007_v51  ;;  %v1134_v47 = vadd.f32 %v1070_v25, %v2517_v4  ;;  %v2544_v63 = vadd.f32 %v753_v2, %v2414_v9 }
 0x1c1   :  { %v1447_v26 = vmul.f32 %v1383_v0, %v2463_v62  ;;  %v1911_v39 = vpop.eup %1910  ;;  %v1385_v45 = vmul.f32 0.5, %v1321_v43  ;;  %1916 = vtanh.f32 %v1197_v23  ;;  %v944_v62 = vmul.f32 %v2539_v57, %v2539_v57  ;;  %v851_v53 = vpop.f32.mrf.mxu2 }
 0x1c2   :  { %v1448_v41 = vmul.f32 %v1384_v22, %v2466_v52  ;;  %v1322_v48 = vadd.f32 1.0, %v1911_v39  ;;  %v1135_v40 = vadd.f32 %v1071_v27, %v2523_v54  ;;  %v1198_v61 = vmul.f32 0.7978846, %v1134_v47  ;;  %v900_v35 = vpop.f32.mrf.mxu3  ;;  %v1744_v47 = vld [vmem:[#allocation2 + $0x28] sm:$0xff] }
 0x1c3   :  { %v1449_v60 = vmul.f32 %v1385_v45, %v2478_v44  ;;  %v945_v52 = vmul.f32 %v2544_v63, %v2544_v63  ;;  %v1008_v58 = vmul.f32 %v944_v62, %v2539_v57  ;;  %v2554_v3 = vadd.f32 %v802_v29, %v2416_v10  ;;  %v756_v36 = vpop.f32.mrf.mxu0  ;;  %v805_v45 = vpop.f32.mrf.mxu1 }
 0x1c4   :  { %v1510_v59 = vpack.c.bf16 %v1448_v41, %v1447_v26  ;;  %v1913_v32 = vpop.eup %1912  ;;  %v1386_v28 = vmul.f32 0.5, %v1322_v48  ;;  %v1199_v13 = vmul.f32 0.7978846, %v1135_v40  ;;  %1918 = vtanh.f32 %v1198_v61 }
 0x1c5   :  { %v1915_v42 = vpop.eup %1914  ;;  %v1323_v6 = vadd.f32 1.0, %v1913_v32  ;;  %v1009_v44 = vmul.f32 %v945_v52, %v2544_v63  ;;  %v2561_v34 = vadd.f32 %v851_v53, %v2437_v55  ;;  %v1072_v30 = vmul.f32 0.044715, %v1008_v58 }
 0x1c6   :  { %1542 = vst [vmem:[%s3052_s5 + $0x8] sm:$0xff] %v1510_v59  ;;  %v1450_v7 = vmul.f32 %v1386_v28, %v2486_v46  ;;  %v1324_v1 = vadd.f32 1.0, %v1915_v42  ;;  %1920 = vtanh.f32 %v1199_v13  ;;  %v946_v37 = vmul.f32 %v2554_v3, %v2554_v3 }
 0x1c7   :  { %v1387_v8 = vmul.f32 0.5, %v1323_v6  ;;  %v1073_v15 = vmul.f32 0.044715, %v1009_v44  ;;  %v947_v50 = vmul.f32 %v2561_v34, %v2561_v34  ;;  %v1917_v16 = vpop.eup %1916  ;;  %v1136_v18 = vadd.f32 %v1072_v30, %v2539_v57 }
 0x1c8   :  { %v1511_v14 = vpack.c.bf16 %v1450_v7, %v1449_v60  ;;  %v1388_v21 = vmul.f32 0.5, %v1324_v1  ;;  %v2570_v19 = vadd.f32 %v900_v35, %v2449_v31  ;;  %v1325_v20 = vadd.f32 1.0, %v1917_v16 }
 0x1c9   :  { %v1451_v46 = vmul.f32 %v1387_v8, %v2496_v11  ;;  %v1137_v56 = vadd.f32 %v1073_v15, %v2544_v63  ;;  %v1010_v2 = vmul.f32 %v946_v37, %v2554_v3  ;;  %v1200_v0 = vmul.f32 0.7978846, %v1136_v18 }
 0x1ca   :  { %1543 = vst [vmem:[%s3052_s5 + $0x10] sm:$0xff] %v1511_v14  ;;  %v1452_v5 = vmul.f32 %v1388_v21, %v2500_v49  ;;  %v1011_v38 = vmul.f32 %v947_v50, %v2561_v34  ;;  %v948_v51 = vmul.f32 %v2570_v19, %v2570_v19  ;;  %v1919_v22 = vpop.eup %1918  ;;  %v1389_v43 = vmul.f32 0.5, %v1325_v20  ;;  %v854_v49 = vpop.f32.mrf.mxu2 }
 0x1cb   :  { %v1201_v11 = vmul.f32 0.7978846, %v1137_v56  ;;  %v1074_v25 = vmul.f32 0.044715, %v1010_v2  ;;  %v2583_v26 = vadd.f32 %v756_v36, %v2414_v9  ;;  %v1326_v39 = vadd.f32 1.0, %v1919_v22  ;;  %v903_v61 = vpop.f32.mrf.mxu3  ;;  %v758_v1 = vpop.f32.mrf.mxu0 }
 0x1cc   :  { %v1921_v23 = vpop.eup %1920  ;;  %v1512_v27 = vpack.c.bf16 %v1452_v5, %v1451_v46  ;;  %1922 = vtanh.f32 %v1200_v0  ;;  %v1075_v41 = vmul.f32 0.044715, %v1011_v38  ;;  %v1453_v29 = vmul.f32 %v1389_v43, %v2509_v33 }
 0x1cd   :  { %v1327_v48 = vadd.f32 1.0, %v1921_v23  ;;  %1924 = vtanh.f32 %v1201_v11  ;;  %v1138_v40 = vadd.f32 %v1074_v25, %v2554_v3  ;;  %v1390_v62 = vmul.f32 0.5, %v1326_v39 }
 0x1ce   :  { %1544 = vst [vmem:[%s3052_s5 + $0x18] sm:$0xff] %v1512_v27  ;;  %v1139_v53 = vadd.f32 %v1075_v41, %v2561_v34  ;;  %v1012_v59 = vmul.f32 %v948_v51, %v2570_v19  ;;  %v949_v60 = vmul.f32 %v2583_v26, %v2583_v26  ;;  %v2595_v32 = vadd.f32 %v805_v45, %v2416_v10  ;;  %v807_v27 = vpop.f32.mrf.mxu1 }
 0x1cf   :  { %775 = vmatmul.bf16.gmra.mxu0 %v1744_v47  ;;  %v1391_v52 = vmul.f32 0.5, %v1327_v48  ;;  %v1202_v33 = vmul.f32 0.7978846, %v1138_v40  ;;  %v2598_v28 = vadd.f32 %v854_v49, %v2437_v55  ;;  %824 = vmatmul.bf16.gmra.mxu1 %v1744_v47  ;;  %v1454_v13 = vmul.f32 %v1390_v62, %v2517_v4 }
 0x1d0   :  { %873 = vmatmul.bf16.gmra.mxu2 %v1744_v47  ;;  %v1203_v58 = vmul.f32 0.7978846, %v1139_v53  ;;  %v1076_v35 = vmul.f32 0.044715, %v1012_v59  ;;  %v1013_v42 = vmul.f32 %v949_v60, %v2583_v26  ;;  %922 = vmatmul.bf16.gmra.mxu3 %v1744_v47  ;;  %v950_v44 = vmul.f32 %v2595_v32, %v2595_v32 }
 0x1d1   :  { %v1455_v6 = vmul.f32 %v1391_v52, %v2523_v54  ;;  %1926 = vtanh.f32 %v1202_v33  ;;  %v951_v7 = vmul.f32 %v2598_v28, %v2598_v28  ;;  %v1513_v8 = vpack.c.bf16 %v1454_v13, %v1453_v29 }
 0x1d2   :  { %v1923_v30 = vpop.eup %1922  ;;  %1928 = vtanh.f32 %v1203_v58  ;;  %v1140_v4 = vadd.f32 %v1076_v35, %v2570_v19  ;;  %v1077_v15 = vmul.f32 0.044715, %v1013_v42  ;;  %v1014_v36 = vmul.f32 %v950_v44, %v2595_v32  ;;  %v856_v47 = vpop.f32.mrf.mxu2 }
 0x1d3   :  { %v1925_v37 = vpop.eup %1924  ;;  %v1328_v50 = vadd.f32 1.0, %v1923_v30  ;;  %v1015_v54 = vmul.f32 %v951_v7, %v2598_v28  ;;  %v2611_v16 = vadd.f32 %v903_v61, %v2449_v31  ;;  %1545 = vst [vmem:[%s3052_s5 + $0x20] sm:$0xff] %v1513_v8  ;;  %v2618_v46 = vadd.f32 %v758_v1, %v2414_v9  ;;  %v905_v29 = vpop.f32.mrf.mxu3 }
 0x1d4   :  { %v1329_v14 = vadd.f32 1.0, %v1925_v37  ;;  %v1204_v21 = vmul.f32 0.7978846, %v1140_v4  ;;  %v1141_v18 = vadd.f32 %v1077_v15, %v2583_v26  ;;  %v1078_v56 = vmul.f32 0.044715, %v1014_v36 }
 0x1d5   :  { %v1392_v20 = vmul.f32 0.5, %v1328_v50  ;;  %v1079_v2 = vmul.f32 0.044715, %v1015_v54  ;;  %v952_v5 = vmul.f32 %v2611_v16, %v2611_v16  ;;  %v953_v51 = vmul.f32 %v2618_v46, %v2618_v46 }
 0x1d6   :  { %v1393_v0 = vmul.f32 0.5, %v1329_v14  ;;  %1930 = vtanh.f32 %v1204_v21  ;;  %v1205_v38 = vmul.f32 0.7978846, %v1141_v18  ;;  %v1142_v11 = vadd.f32 %v1078_v56, %v2595_v32 }
 0x1d7   :  { %v1927_v22 = vpop.eup %1926  ;;  %v1456_v43 = vmul.f32 %v1392_v20, %v2539_v57  ;;  %v1143_v25 = vadd.f32 %v1079_v2, %v2598_v28  ;;  %v1016_v23 = vmul.f32 %v952_v5, %v2611_v16  ;;  %v1017_v49 = vmul.f32 %v953_v51, %v2618_v46 }
 0x1d8   :  { %v1929_v39 = vpop.eup %1928  ;;  %v1457_v41 = vmul.f32 %v1393_v0, %v2544_v63  ;;  %v1330_v45 = vadd.f32 1.0, %v1927_v22  ;;  %1932 = vtanh.f32 %v1205_v38  ;;  %v1206_v62 = vmul.f32 0.7978846, %v1142_v11 }
 0x1d9   :  { %v1514_v48 = vpack.c.bf16 %v1456_v43, %v1455_v6  ;;  %v1331_v40 = vadd.f32 1.0, %v1929_v39  ;;  %v1207_v57 = vmul.f32 0.7978846, %v1143_v25  ;;  %v1080_v59 = vmul.f32 0.044715, %v1016_v23 }
 0x1da   :  { %v1394_v53 = vmul.f32 0.5, %v1330_v45  ;;  %v1081_v60 = vmul.f32 0.044715, %v1017_v49  ;;  %v2631_v61 = vadd.f32 %v807_v27, %v2416_v10  ;;  %1934 = vtanh.f32 %v1206_v62 }
 0x1db   :  { %1546 = vst [vmem:[%s3052_s5 + $0x28] sm:$0xff] %v1514_v48  ;;  %v1395_v63 = vmul.f32 0.5, %v1331_v40  ;;  %v2637_v52 = vadd.f32 %v856_v47, %v2437_v55  ;;  %v2640_v33 = vadd.f32 %v905_v29, %v2449_v31  ;;  %1936 = vtanh.f32 %v1207_v57  ;;  %v188_v40 = vpop.xlane.xlu0 %187 }
 0x1dc   :  { %v1931_v13 = vpop.eup %1930  ;;  %v1458_v58 = vmul.f32 %v1394_v53, %v2554_v3  ;;  %v1144_v35 = vadd.f32 %v1080_v59, %v2611_v16  ;;  %v1145_v42 = vadd.f32 %v1081_v60, %v2618_v46  ;;  %v954_v7 = vmul.f32 %v2631_v61, %v2631_v61 }
 0x1dd   :  { %v1459_v6 = vmul.f32 %v1395_v63, %v2561_v34  ;;  %v1332_v44 = vadd.f32 1.0, %v1931_v13  ;;  %v955_v1 = vmul.f32 %v2637_v52, %v2637_v52  ;;  %v956_v3 = vmul.f32 %v2640_v33, %v2640_v33 }
 0x1de   :  { %v1933_v30 = vpop.eup %1932  ;;  %v1515_v8 = vpack.c.bf16 %v1458_v58, %v1457_v41  ;;  %v1208_v4 = vmul.f32 0.7978846, %v1144_v35  ;;  %v1209_v15 = vmul.f32 0.7978846, %v1145_v42  ;;  %v1018_v36 = vmul.f32 %v954_v7, %v2631_v61 }
 0x1df   :  { %v1396_v37 = vmul.f32 0.5, %v1332_v44  ;;  %v1333_v50 = vadd.f32 1.0, %v1933_v30  ;;  %v1019_v34 = vmul.f32 %v955_v1, %v2637_v52  ;;  %v1020_v54 = vmul.f32 %v956_v3, %v2640_v33 }
 0x1e0   :  { %1547 = vst [vmem:[%s3052_s5 + $0x30] sm:$0xff] %v1515_v8  ;;  %1938 = vtanh.f32 %v1208_v4  ;;  %v1935_v14 = vpop.eup %1934  ;;  %v1082_v20 = vmul.f32 0.044715, %v1018_v36 }
 0x1e1   :  { %v1460_v21 = vmul.f32 %v1396_v37, %v2570_v19  ;;  %v1397_v18 = vmul.f32 0.5, %v1333_v50  ;;  %1940 = vtanh.f32 %v1209_v15  ;;  %v1937_v56 = vpop.eup %1936  ;;  %v1334_v2 = vadd.f32 1.0, %v1935_v14 }
 0x1e2   :  { %v1083_v5 = vmul.f32 0.044715, %v1019_v34  ;;  %v1084_v0 = vmul.f32 0.044715, %v1020_v54  ;;  %v1335_v51 = vadd.f32 1.0, %v1937_v56  ;;  %v1146_v22 = vadd.f32 %v1082_v20, %v2631_v61 }
 0x1e3   :  { %v1516_v38 = vpack.c.bf16 %v1460_v21, %v1459_v6  ;;  %v1461_v43 = vmul.f32 %v1397_v18, %v2583_v26  ;;  %v1398_v11 = vmul.f32 0.5, %v1334_v2 }
 0x1e4   :  { %v1147_v25 = vadd.f32 %v1083_v5, %v2637_v52  ;;  %v1148_v23 = vadd.f32 %v1084_v0, %v2640_v33  ;;  %v1399_v19 = vmul.f32 0.5, %v1335_v51  ;;  %v1210_v27 = vmul.f32 0.7978846, %v1146_v22 }
 0x1e5   :  { %1548 = vst [vmem:[%s3052_s5 + $0x38] sm:$0xff] %v1516_v38  ;;  %v1462_v41 = vmul.f32 %v1398_v11, %v2595_v32  ;;  %v205_v32 = vmul.f32 %v188_v40, %v2112_v17  ;;  %v2032_v38 = vld [vmem:[%s3048_s1] ss:$0 sm:$0xff] }
 0x1e6   :  { %v1939_v39 = vpop.eup %1938  ;;  %v1211_v45 = vmul.f32 0.7978846, %v1147_v25  ;;  %v1212_v49 = vmul.f32 0.7978846, %v1148_v23  ;;  %1942 = vtanh.f32 %v1210_v27  ;;  %v1463_v62 = vmul.f32 %v1399_v19, %v2598_v28 }
 0x1e7   :  { %v1941_v47 = vpop.eup %1940  ;;  %v1336_v29 = vadd.f32 1.0, %v1939_v39  ;;  %v1517_v26 = vpack.c.bf16 %v1462_v41, %v1461_v43  ;;  %v221_v42 = vadd.f32 1e-06, %v205_v32 }
 0x1e8   :  { %v1337_v48 = vadd.f32 1.0, %v1941_v47  ;;  %1944 = vtanh.f32 %v1211_v45 }
 0x1e9   :  { %v1400_v57 = vmul.f32 0.5, %v1336_v29  ;;  %1946 = vtanh.f32 %v1212_v49  ;;  %1549 = vst [vmem:[%s3052_s5 + $0x40] sm:$0xff] %v1517_v26  ;;  %vm369_vm11 = vweird.f32 %v221_v42 }
 0x1ea   :  { %v1401_v59 = vmul.f32 0.5, %v1337_v48  ;;  %1948 = vrsqrt.f32 %v221_v42 }
 0x1eb   :  { %v1464_v53 = vmul.f32 %v1400_v57, %v2611_v16 }
 0x1ec   :  { %v1943_v60 = vpop.eup %1942  ;;  %v1465_v6 = vmul.f32 %v1401_v59, %v2618_v46 }
 0x1ed   :  { %v1518_v63 = vpack.c.bf16 %v1464_v53, %v1463_v62  ;;  %v1338_v58 = vadd.f32 1.0, %v1943_v60 }
 0x1ee   :  { %v1945_v13 = vpop.eup %1944 }
 0x1ef   :  { %v1947_v35 = vpop.eup %1946  ;;  %1550 = vst [vmem:[%s3052_s5 + $0x48] sm:$0xff] %v1518_v63  ;;  %v1339_v28 = vadd.f32 1.0, %v1945_v13  ;;  %v1402_v44 = vmul.f32 0.5, %v1338_v58 }
 0x1f0   :  { %v1340_v7 = vadd.f32 1.0, %v1947_v35  ;;  %v1949_v46 = vpop.eup %1948 }
 0x1f1   :  { %v1403_v1 = vmul.f32 0.5, %v1339_v28  ;;  %v1466_v16 = vmul.f32 %v1402_v44, %v2631_v61  ;;  %v364_v37 = vmul.f32 %v1949_v46, %v221_v42  ;;  %vm370_vm12 = vweird.f32 %v1949_v46 }
 0x1f2   :  { %v1404_v30 = vmul.f32 0.5, %v1340_v7  ;;  %vm371_vm13 = vmor %vm369_vm11, %vm370_vm12 }
 0x1f3   :  { %v1467_v8 = vmul.f32 %v1403_v1, %v2637_v52  ;;  %v1519_v4 = vpack.c.bf16 %v1466_v16, %v1465_v6  ;;  %v365_v50 = vmul.f32 %v1949_v46, %v364_v37 }
 0x1f4   :  { %v1468_v15 = vmul.f32 %v1404_v30, %v2640_v33 }
 0x1f5   :  { %1551 = vst [vmem:[%s3052_s5 + $0x50] sm:$0xff] %v1519_v4  ;;  %v366_v34 = vmul.f32 0.5, %v365_v50 }
 0x1f6   :  { %v1520_v3 = vpack.c.bf16 %v1468_v15, %v1467_v8 }
 0x1f7   :  { %v367_v54 = vsub.f32 1.5, %v366_v34 }
 0x1f8   :  { %1552 = vst [vmem:[%s3052_s5 + $0x58] sm:$0xff] %v1520_v3 }
 0x1f9   :  { %v368_v14 = vmul.f32 %v1949_v46, %v367_v54 }
 0x1fb   :  { %v372_v20 = vsel %vm371_vm13, %v1949_v46, %v368_v14 }
 0x1fc   :  { %v397_v5 = vmul.f32 %v372_v20, %v2367_v24  ;;  %v2033_v24 = vld [vmem:[%s3049_s2] ss:$0 sm:$0xff] }
 0x1fe   :  { %v417_v51 = vmul.f32 %v2032_v38, %v397_v5 }
 0x200   :  { %v437_v27 = vadd.f32 %v2033_v24, %v417_v51 }
 0x201   :  { %v190_v61 = vpop.xlane.xlu1 %189 }
 0x202   :  { %v206_v36 = vmul.f32 %v190_v61, %v2112_v17 }
 0x204   :  { %v222_v52 = vadd.f32 1e-06, %v206_v36 }
 0x206   :  { %1950 = vrsqrt.f32 %v222_v52  ;;  %vm379_vm15 = vweird.f32 %v222_v52 }
 0x20c   :  { %v1951_v33 = vpop.eup %1950 }
 0x20d   :  { %v374_v21 = vmul.f32 %v1951_v33, %v222_v52  ;;  %vm380_vm14 = vweird.f32 %v1951_v33 }
 0x20e   :  { %vm381_vm0 = vmor %vm379_vm15, %vm380_vm14 }
 0x20f   :  { %v375_v18 = vmul.f32 %v1951_v33, %v374_v21 }
 0x211   :  { %v376_v56 = vmul.f32 0.5, %v375_v18 }
 0x213   :  { %v377_v2 = vsub.f32 1.5, %v376_v56 }
 0x215   :  { %v378_v0 = vmul.f32 %v1951_v33, %v377_v2 }
 0x217   :  { %v382_v17 = vsel %vm381_vm0, %v1951_v33, %v378_v0 }
 0x218   :  { %v398_v22 = vmul.f32 %v382_v17, %v2381_v12 }
 0x21a   :  { %v418_v25 = vmul.f32 %v2032_v38, %v398_v22 }
 0x21b   :  { %v761_v43 = vpop.f32.mrf.mxu0  ;;  %v810_v11 = vpop.f32.mrf.mxu1 }
 0x21c   :  { %v2693_v23 = vadd.f32 %v761_v43, %v2414_v9  ;;  %v2696_v19 = vadd.f32 %v810_v11, %v2416_v10  ;;  %v438_v39 = vadd.f32 %v2033_v24, %v418_v25 }
 0x21e   :  { %v957_v41 = vmul.f32 %v2693_v23, %v2693_v23  ;;  %v958_v12 = vmul.f32 %v2696_v19, %v2696_v19  ;;  %v1848_v45 = vpack.c.bf16 %v438_v39, %v437_v27 }
 0x220   :  { %v1021_v49 = vmul.f32 %v957_v41, %v2693_v23  ;;  %v1022_v47 = vmul.f32 %v958_v12, %v2696_v19  ;;  %1863 = vst [vmem:[#allocation2 + $0x38] sm:$0xff] %v1848_v45  }
 0x222   :  { %v1085_v29 = vmul.f32 0.044715, %v1021_v49  ;;  %v1086_v26 = vmul.f32 0.044715, %v1022_v47  ;;  %v859_v48 = vpop.f32.mrf.mxu2  ;;  %v908_v40 = vpop.f32.mrf.mxu3 }
 0x223   :  { %v2708_v62 = vadd.f32 %v859_v48, %v2437_v55  ;;  %v2711_v57 = vadd.f32 %v908_v40, %v2449_v31  ;;  %v763_v53 = vpop.f32.mrf.mxu0  ;;  %v812_v32 = vpop.f32.mrf.mxu1 }
 0x224   :  { %v1149_v59 = vadd.f32 %v1085_v29, %v2693_v23  ;;  %v1150_v60 = vadd.f32 %v1086_v26, %v2696_v19  ;;  %v2716_v63 = vadd.f32 %v763_v53, %v2414_v9  ;;  %v2719_v13 = vadd.f32 %v812_v32, %v2416_v10 }
 0x225   :  { %v959_v58 = vmul.f32 %v2708_v62, %v2708_v62  ;;  %v960_v35 = vmul.f32 %v2711_v57, %v2711_v57 }
 0x226   :  { %v1213_v28 = vmul.f32 0.7978846, %v1149_v59  ;;  %v1214_v42 = vmul.f32 0.7978846, %v1150_v60  ;;  %v961_v6 = vmul.f32 %v2716_v63, %v2716_v63  ;;  %v962_v44 = vmul.f32 %v2719_v13, %v2719_v13 }
 0x227   :  { %v1023_v7 = vmul.f32 %v959_v58, %v2708_v62  ;;  %v1024_v1 = vmul.f32 %v960_v35, %v2711_v57  ;;  %v1745_v15 = vld [vmem:[#allocation2 + $0x38] sm:$0xff] }
 0x228   :  { %1952 = vtanh.f32 %v1213_v28  ;;  %v1025_v16 = vmul.f32 %v961_v6, %v2716_v63  ;;  %v1026_v30 = vmul.f32 %v962_v44, %v2719_v13  ;;  %780 = vmatmul.bf16.gmra.mxu0 %v1745_v15  ;;  %829 = vmatmul.bf16.gmra.mxu1 %v1745_v15 }
 0x229   :  { %1954 = vtanh.f32 %v1214_v42  ;;  %v1087_v8 = vmul.f32 0.044715, %v1023_v7  ;;  %v1088_v4 = vmul.f32 0.044715, %v1024_v1  ;;  %878 = vmatmul.bf16.gmra.mxu2 %v1745_v15  ;;  %927 = vmatmul.bf16.gmra.mxu3 %v1745_v15 }
 0x22a   :  { %v1089_v3 = vmul.f32 0.044715, %v1025_v16  ;;  %v1090_v46 = vmul.f32 0.044715, %v1026_v30  ;;  %v861_v37 = vpop.f32.mrf.mxu2  ;;  %v910_v50 = vpop.f32.mrf.mxu3 }
 0x22b   :  { %v1151_v61 = vadd.f32 %v1087_v8, %v2708_v62  ;;  %v1152_v36 = vadd.f32 %v1088_v4, %v2711_v57  ;;  %v2736_v52 = vadd.f32 %v861_v37, %v2437_v55  ;;  %v2741_v33 = vadd.f32 %v910_v50, %v2449_v31 }
 0x22c   :  { %v1153_v34 = vadd.f32 %v1089_v3, %v2716_v63  ;;  %v1154_v54 = vadd.f32 %v1090_v46, %v2719_v13  ;;  %v766_v20 = vpop.f32.mrf.mxu0  ;;  %v815_v56 = vpop.f32.mrf.mxu1 }
 0x22d   :  { %v1215_v14 = vmul.f32 0.7978846, %v1151_v61  ;;  %v1216_v21 = vmul.f32 0.7978846, %v1152_v36  ;;  %v963_v18 = vmul.f32 %v2736_v52, %v2736_v52  ;;  %v964_v17 = vmul.f32 %v2741_v33, %v2741_v33 }
 0x22e   :  { %v1953_v2 = vpop.eup %1952  ;;  %v1217_v5 = vmul.f32 0.7978846, %v1153_v34  ;;  %v1218_v0 = vmul.f32 0.7978846, %v1154_v54  ;;  %v2748_v38 = vadd.f32 %v766_v20, %v2414_v9  ;;  %v2752_v11 = vadd.f32 %v815_v56, %v2416_v10 }
 0x22f   :  { %v1955_v51 = vpop.eup %1954  ;;  %v1341_v22 = vadd.f32 1.0, %v1953_v2  ;;  %1956 = vtanh.f32 %v1215_v14  ;;  %v1027_v43 = vmul.f32 %v963_v18, %v2736_v52  ;;  %v1028_v24 = vmul.f32 %v964_v17, %v2741_v33 }
 0x230   :  { %v1342_v25 = vadd.f32 1.0, %v1955_v51  ;;  %1958 = vtanh.f32 %v1216_v21  ;;  %v965_v27 = vmul.f32 %v2748_v38, %v2748_v38  ;;  %v966_v12 = vmul.f32 %v2752_v11, %v2752_v11 }
 0x231   :  { %v1405_v39 = vmul.f32 0.5, %v1341_v22  ;;  %1960 = vtanh.f32 %v1217_v5  ;;  %v1091_v41 = vmul.f32 0.044715, %v1027_v43  ;;  %v1092_v49 = vmul.f32 0.044715, %v1028_v24 }
 0x232   :  { %v1406_v45 = vmul.f32 0.5, %v1342_v25  ;;  %1962 = vtanh.f32 %v1218_v0  ;;  %v1029_v47 = vmul.f32 %v965_v27, %v2748_v38  ;;  %v1030_v48 = vmul.f32 %v966_v12, %v2752_v11 }
 0x233   :  { %v1469_v29 = vmul.f32 %v1405_v39, %v2693_v23  ;;  %v1155_v26 = vadd.f32 %v1091_v41, %v2736_v52  ;;  %v1156_v53 = vadd.f32 %v1092_v49, %v2741_v33  ;;  %v864_v59 = vpop.f32.mrf.mxu2  ;;  %v913_v60 = vpop.f32.mrf.mxu3 }
 0x234   :  { %v1470_v40 = vmul.f32 %v1406_v45, %v2696_v19  ;;  %v1093_v32 = vmul.f32 0.044715, %v1029_v47  ;;  %v1094_v28 = vmul.f32 0.044715, %v1030_v48  ;;  %v2766_v42 = vadd.f32 %v864_v59, %v2437_v55  ;;  %v768_v23 = vpop.f32.mrf.mxu0  ;;  %v817_v30 = vpop.f32.mrf.mxu1 }
 0x235   :  { %v1957_v58 = vpop.eup %1956  ;;  %v1219_v35 = vmul.f32 0.7978846, %v1155_v26  ;;  %v2769_v6 = vadd.f32 %v913_v60, %v2449_v31  ;;  %v1220_v16 = vmul.f32 0.7978846, %v1156_v53  ;;  %v2786_v51 = vadd.f32 %v768_v23, %v2414_v9 }
 0x236   :  { %v1959_v44 = vpop.eup %1958  ;;  %v1521_v7 = vpack.c.bf16 %v1470_v40, %v1469_v29  ;;  %v1343_v1 = vadd.f32 1.0, %v1957_v58  ;;  %v1157_v19 = vadd.f32 %v1093_v32, %v2748_v38  ;;  %v1158_v15 = vadd.f32 %v1094_v28, %v2752_v11 }
 0x237   :  { %v1961_v8 = vpop.eup %1960  ;;  %v1344_v4 = vadd.f32 1.0, %v1959_v44  ;;  %1964 = vtanh.f32 %v1219_v35  ;;  %v967_v3 = vmul.f32 %v2766_v42, %v2766_v42  ;;  %v968_v20 = vmul.f32 %v2769_v6, %v2769_v6 }
 0x238   :  { %v1963_v46 = vpop.eup %1962  ;;  %1553 = vst [vmem:[%s3052_s5 + $0x60] sm:$0xff] %v1521_v7  ;;  %v1407_v37 = vmul.f32 0.5, %v1343_v1  ;;  %v1345_v50 = vadd.f32 1.0, %v1961_v8  ;;  %1966 = vtanh.f32 %v1220_v16  ;;  %v1221_v61 = vmul.f32 0.7978846, %v1157_v19 }
 0x239   :  { %v1408_v36 = vmul.f32 0.5, %v1344_v4  ;;  %v1346_v34 = vadd.f32 1.0, %v1963_v46  ;;  %v1222_v54 = vmul.f32 0.7978846, %v1158_v15  ;;  %v1031_v14 = vmul.f32 %v967_v3, %v2766_v42 }
 0x23a   :  { %v1471_v21 = vmul.f32 %v1407_v37, %v2708_v62  ;;  %v1409_v18 = vmul.f32 0.5, %v1345_v50  ;;  %1968 = vtanh.f32 %v1221_v61  ;;  %v1032_v17 = vmul.f32 %v968_v20, %v2769_v6 }
 0x23b   :  { %v1472_v56 = vmul.f32 %v1408_v36, %v2711_v57  ;;  %v1410_v2 = vmul.f32 0.5, %v1346_v34  ;;  %1970 = vtanh.f32 %v1222_v54  ;;  %v1095_v5 = vmul.f32 0.044715, %v1031_v14  ;;  %v866_v62 = vpop.f32.mrf.mxu2  ;;  %v915_v39 = vpop.f32.mrf.mxu3 }
 0x23c   :  { %v1473_v0 = vmul.f32 %v1409_v18, %v2716_v63  ;;  %v2789_v22 = vadd.f32 %v817_v30, %v2416_v10  ;;  %v2794_v27 = vadd.f32 %v866_v62, %v2437_v55  ;;  %v1096_v12 = vmul.f32 0.044715, %v1032_v17  ;;  %v771_v48 = vpop.f32.mrf.mxu0  ;;  %v820_v58 = vpop.f32.mrf.mxu1 }
 0x23d   :  { %v1965_v43 = vpop.eup %1964  ;;  %v1522_v25 = vpack.c.bf16 %v1472_v56, %v1471_v21  ;;  %v1474_v24 = vmul.f32 %v1410_v2, %v2719_v13  ;;  %v1159_v57 = vadd.f32 %v1095_v5, %v2766_v42  ;;  %v969_v45 = vmul.f32 %v2786_v51, %v2786_v51 }
 0x23e   :  { %v1967_v63 = vpop.eup %1966  ;;  %v1347_v41 = vadd.f32 1.0, %v1965_v43  ;;  %v970_v49 = vmul.f32 %v2789_v22, %v2789_v22  ;;  %v971_v26 = vmul.f32 %v2794_v27, %v2794_v27  ;;  %v1160_v32 = vadd.f32 %v1096_v12, %v2769_v6 }
 0x23f   :  { %1554 = vst [vmem:[%s3052_s5 + $0x68] sm:$0xff] %v1522_v25  ;;  %v1523_v13 = vpack.c.bf16 %v1474_v24, %v1473_v0  ;;  %v1348_v47 = vadd.f32 1.0, %v1967_v63  ;;  %v1223_v29 = vmul.f32 0.7978846, %v1159_v57  ;;  %v1033_v59 = vmul.f32 %v969_v45, %v2786_v51 }
 0x240   :  { %v1969_v40 = vpop.eup %1968  ;;  %v1411_v53 = vmul.f32 0.5, %v1347_v41  ;;  %v1034_v60 = vmul.f32 %v970_v49, %v2789_v22  ;;  %v1035_v44 = vmul.f32 %v971_v26, %v2794_v27  ;;  %v1224_v16 = vmul.f32 0.7978846, %v1160_v32 }
 0x241   :  { %v1971_v35 = vpop.eup %1970  ;;  %1555 = vst [vmem:[%s3052_s5 + $0x70] sm:$0xff] %v1523_v13  ;;  %v1412_v28 = vmul.f32 0.5, %v1348_v47  ;;  %v1349_v23 = vadd.f32 1.0, %v1969_v40  ;;  %1972 = vtanh.f32 %v1223_v29  ;;  %v1097_v19 = vmul.f32 0.044715, %v1033_v59 }
 0x242   :  { %v1475_v7 = vmul.f32 %v1411_v53, %v2736_v52  ;;  %v1350_v1 = vadd.f32 1.0, %v1971_v35  ;;  %v1098_v4 = vmul.f32 0.044715, %v1034_v60  ;;  %v1099_v15 = vmul.f32 0.044715, %v1035_v44 }
 0x243   :  { %v1476_v30 = vmul.f32 %v1412_v28, %v2741_v33  ;;  %v1413_v8 = vmul.f32 0.5, %v1349_v23  ;;  %1974 = vtanh.f32 %v1224_v16  ;;  %v1161_v46 = vadd.f32 %v1097_v19, %v2786_v51  ;;  %v869_v50 = vpop.f32.mrf.mxu2 }
 0x244   :  { %v1414_v3 = vmul.f32 0.5, %v1350_v1  ;;  %v2816_v37 = vadd.f32 %v915_v39, %v2449_v31  ;;  %v1162_v52 = vadd.f32 %v1098_v4, %v2789_v22  ;;  %v1163_v34 = vadd.f32 %v1099_v15, %v2794_v27  ;;  %v773_v24 = vpop.f32.mrf.mxu0  ;;  %v822_v12 = vpop.f32.mrf.mxu1 }
 0x245   :  { %v1524_v61 = vpack.c.bf16 %v1476_v30, %v1475_v7  ;;  %v1477_v36 = vmul.f32 %v1413_v8, %v2748_v38  ;;  %v1225_v54 = vmul.f32 0.7978846, %v1161_v46  ;;  %v2825_v21 = vadd.f32 %v771_v48, %v2414_v9 }
 0x246   :  { %v1478_v33 = vmul.f32 %v1414_v3, %v2752_v11  ;;  %v972_v14 = vmul.f32 %v2816_v37, %v2816_v37  ;;  %v1226_v20 = vmul.f32 0.7978846, %v1162_v52  ;;  %v1227_v38 = vmul.f32 0.7978846, %v1163_v34  ;;  %v918_v11 = vpop.f32.mrf.mxu3 }
 0x247   :  { %v1973_v18 = vpop.eup %1972  ;;  %1556 = vst [vmem:[%s3052_s5 + $0x78] sm:$0xff] %v1524_v61  ;;  %v2831_v56 = vadd.f32 %v820_v58, %v2416_v10  ;;  %v2834_v2 = vadd.f32 %v869_v50, %v2437_v55  ;;  %1976 = vtanh.f32 %v1225_v54  ;;  %v973_v62 = vmul.f32 %v2825_v21, %v2825_v21 }
 0x248   :  { %v1525_v5 = vpack.c.bf16 %v1478_v33, %v1477_v36  ;;  %v1351_v0 = vadd.f32 1.0, %v1973_v18  ;;  %v1036_v17 = vmul.f32 %v972_v14, %v2816_v37  ;;  %1978 = vtanh.f32 %v1226_v20 }
 0x249   :  { %v974_v43 = vmul.f32 %v2831_v56, %v2831_v56  ;;  %v975_v25 = vmul.f32 %v2834_v2, %v2834_v2  ;;  %v1975_v57 = vpop.eup %1974  ;;  %1980 = vtanh.f32 %v1227_v38  ;;  %v2847_v41 = vadd.f32 %v918_v11, %v2449_v31 }
 0x24a   :  { %1557 = vst [vmem:[%s3052_s5 + $0x80] sm:$0xff] %v1525_v5  ;;  %v1415_v39 = vmul.f32 0.5, %v1351_v0  ;;  %v1100_v63 = vmul.f32 0.044715, %v1036_v17  ;;  %v1352_v45 = vadd.f32 1.0, %v1975_v57  ;;  %v1037_v49 = vmul.f32 %v973_v62, %v2825_v21 }
 0x24b   :  { %v1038_v13 = vmul.f32 %v974_v43, %v2831_v56  ;;  %v1039_v47 = vmul.f32 %v975_v25, %v2834_v2  ;;  %v976_v48 = vmul.f32 %v2847_v41, %v2847_v41  ;;  %v2857_v40 = vadd.f32 %v773_v24, %v2414_v9  ;;  %v871_v53 = vpop.f32.mrf.mxu2 }
 0x24c   :  { %v1479_v29 = vmul.f32 %v1415_v39, %v2766_v42  ;;  %v1164_v26 = vadd.f32 %v1100_v63, %v2816_v37  ;;  %v1416_v32 = vmul.f32 0.5, %v1352_v45  ;;  %v1101_v59 = vmul.f32 0.044715, %v1037_v49  ;;  %v776_v0 = vpop.f32.mrf.mxu0 }
 0x24d   :  { %v1102_v60 = vmul.f32 0.044715, %v1038_v13  ;;  %v2860_v58 = vadd.f32 %v822_v12, %v2416_v10  ;;  %v1977_v35 = vpop.eup %1976  ;;  %v1103_v23 = vmul.f32 0.044715, %v1039_v47  ;;  %v1040_v42 = vmul.f32 %v976_v48, %v2847_v41 }
 0x24e   :  { %v1228_v28 = vmul.f32 0.7978846, %v1164_v26  ;;  %v977_v44 = vmul.f32 %v2857_v40, %v2857_v40  ;;  %v1979_v7 = vpop.eup %1978  ;;  %v1480_v1 = vmul.f32 %v1416_v32, %v2769_v6  ;;  %v1353_v16 = vadd.f32 1.0, %v1977_v35  ;;  %v920_v20 = vpop.f32.mrf.mxu3 }
 0x24f   :  { %v1165_v19 = vadd.f32 %v1101_v59, %v2825_v21  ;;  %v1166_v30 = vadd.f32 %v1102_v60, %v2831_v56  ;;  %v1981_v8 = vpop.eup %1980  ;;  %v1354_v4 = vadd.f32 1.0, %v1979_v7  ;;  %v1167_v15 = vadd.f32 %v1103_v23, %v2834_v2 }
 0x250   :  { %1982 = vtanh.f32 %v1228_v28  ;;  %v1104_v3 = vmul.f32 0.044715, %v1040_v42  ;;  %v1526_v46 = vpack.c.bf16 %v1480_v1, %v1479_v29  ;;  %v1417_v50 = vmul.f32 0.5, %v1353_v16 }
 0x251   :  { %v1355_v61 = vadd.f32 1.0, %v1981_v8  ;;  %v1229_v36 = vmul.f32 0.7978846, %v1165_v19  ;;  %v1418_v52 = vmul.f32 0.5, %v1354_v4  ;;  %v1230_v34 = vmul.f32 0.7978846, %v1166_v30 }
 0x252   :  { %v1231_v33 = vmul.f32 0.7978846, %v1167_v15  ;;  %v1168_v6 = vadd.f32 %v1104_v3, %v2847_v41  ;;  %1558 = vst [vmem:[%s3052_s5 + $0x88] sm:$0xff] %v1526_v46  ;;  %v1481_v54 = vmul.f32 %v1417_v50, %v2786_v51  ;;  %v1041_v18 = vmul.f32 %v977_v44, %v2857_v40  ;;  %v825_v51 = vpop.f32.mrf.mxu1 }
 0x253   :  { %v1419_v14 = vmul.f32 0.5, %v1355_v61  ;;  %1984 = vtanh.f32 %v1229_v36  ;;  %v1482_v38 = vmul.f32 %v1418_v52, %v2789_v22  ;;  %v978_v5 = vmul.f32 %v2860_v58, %v2860_v58  ;;  %v874_v25 = vpop.f32.mrf.mxu2 }
 0x254   :  { %1986 = vtanh.f32 %v1230_v34  ;;  %v1232_v11 = vmul.f32 0.7978846, %v1168_v6  ;;  %v1105_v62 = vmul.f32 0.044715, %v1041_v18  ;;  %v2880_v43 = vadd.f32 %v871_v53, %v2437_v55 }
 0x255   :  { %v1483_v17 = vmul.f32 %v1419_v14, %v2794_v27  ;;  %1988 = vtanh.f32 %v1231_v33  ;;  %v1527_v57 = vpack.c.bf16 %v1482_v38, %v1481_v54  ;;  %v1042_v22 = vmul.f32 %v978_v5, %v2860_v58 }
 0x256   :  { %v1983_v24 = vpop.eup %1982  ;;  %1990 = vtanh.f32 %v1232_v11  ;;  %v2884_v39 = vadd.f32 %v920_v20, %v2449_v31  ;;  %v1169_v12 = vadd.f32 %v1105_v62, %v2857_v40  ;;  %v979_v27 = vmul.f32 %v2880_v43, %v2880_v43  ;;  %v923_v14 = vpop.f32.mrf.mxu3 }
 0x257   :  { %v1356_v63 = vadd.f32 1.0, %v1983_v24  ;;  %v2890_v45 = vadd.f32 %v776_v0, %v2414_v9  ;;  %1559 = vst [vmem:[%s3052_s5 + $0x90] sm:$0xff] %v1527_v57  ;;  %v1106_v49 = vmul.f32 0.044715, %v1042_v22  ;;  %v2898_v47 = vadd.f32 %v825_v51, %v2416_v10  ;;  %v778_v11 = vpop.f32.mrf.mxu0 }
 0x258   :  { %v980_v13 = vmul.f32 %v2884_v39, %v2884_v39  ;;  %v2901_v29 = vadd.f32 %v874_v25, %v2437_v55  ;;  %v1233_v53 = vmul.f32 0.7978846, %v1169_v12  ;;  %v1043_v32 = vmul.f32 %v979_v27, %v2880_v43 }
 0x259   :  { %v1985_v26 = vpop.eup %1984  ;;  %v1420_v48 = vmul.f32 0.5, %v1356_v63  ;;  %v981_v59 = vmul.f32 %v2890_v45, %v2890_v45  ;;  %v1170_v28 = vadd.f32 %v1106_v49, %v2860_v58  ;;  %v982_v42 = vmul.f32 %v2898_v47, %v2898_v47 }
 0x25a   :  { %v1987_v60 = vpop.eup %1986  ;;  %v1357_v35 = vadd.f32 1.0, %v1985_v26  ;;  %v1044_v23 = vmul.f32 %v980_v13, %v2884_v39  ;;  %1992 = vtanh.f32 %v1233_v53  ;;  %v1107_v16 = vmul.f32 0.044715, %v1043_v32  ;;  %v827_v62 = vpop.f32.mrf.mxu1 }
 0x25b   :  { %v1989_v44 = vpop.eup %1988  ;;  %v1484_v7 = vmul.f32 %v1420_v48, %v2816_v37  ;;  %v1358_v1 = vadd.f32 1.0, %v1987_v60  ;;  %v1234_v4 = vmul.f32 0.7978846, %v1170_v28  ;;  %v1045_v54 = vmul.f32 %v981_v59, %v2890_v45 }
 0x25c   :  { %v1991_v19 = vpop.eup %1990  ;;  %v1421_v30 = vmul.f32 0.5, %v1357_v35  ;;  %v1359_v8 = vadd.f32 1.0, %v1989_v44  ;;  %v1108_v15 = vmul.f32 0.044715, %v1044_v23  ;;  %v1171_v61 = vadd.f32 %v1107_v16, %v2880_v43 }
 0x25d   :  { %v1528_v3 = vpack.c.bf16 %v1484_v7, %v1483_v17  ;;  %v1422_v46 = vmul.f32 0.5, %v1358_v1  ;;  %v1360_v50 = vadd.f32 1.0, %v1991_v19  ;;  %1994 = vtanh.f32 %v1234_v4  ;;  %v876_v1 = vpop.f32.mrf.mxu2 }
 0x25e   :  { %v1485_v36 = vmul.f32 %v1421_v30, %v2825_v21  ;;  %v1423_v52 = vmul.f32 0.5, %v1359_v8  ;;  %v1172_v34 = vadd.f32 %v1108_v15, %v2884_v39  ;;  %v1235_v6 = vmul.f32 0.7978846, %v1171_v61 }
 0x25f   :  { %1560 = vst [vmem:[%s3052_s5 + $0x98] sm:$0xff] %v1528_v3  ;;  %v1486_v37 = vmul.f32 %v1422_v46, %v2831_v56  ;;  %v1424_v33 = vmul.f32 0.5, %v1360_v50  ;;  %v1046_v21 = vmul.f32 %v982_v42, %v2898_v47  ;;  %v983_v38 = vmul.f32 %v2901_v29, %v2901_v29  ;;  %v925_v46 = vpop.f32.mrf.mxu3 }
 0x260   :  { %v1487_v18 = vmul.f32 %v1423_v52, %v2834_v2  ;;  %v1236_v20 = vmul.f32 0.7978846, %v1172_v34  ;;  %v1993_v5 = vpop.eup %1992  ;;  %1996 = vtanh.f32 %v1235_v6  ;;  %v1109_v56 = vmul.f32 0.044715, %v1045_v54 }
 0x261   :  { %v1529_v0 = vpack.c.bf16 %v1486_v37, %v1485_v36  ;;  %v1488_v17 = vmul.f32 %v1424_v33, %v2847_v41  ;;  %v1361_v51 = vadd.f32 1.0, %v1993_v5  ;;  %v1110_v25 = vmul.f32 0.044715, %v1046_v21 }
 0x262   :  { %1998 = vtanh.f32 %v1236_v20  ;;  %v1047_v24 = vmul.f32 %v983_v38, %v2901_v29  ;;  %v1173_v57 = vadd.f32 %v1109_v56, %v2890_v45  ;;  %v2930_v22 = vadd.f32 %v923_v14, %v2449_v31 }
 0x263   :  { %1561 = vst [vmem:[%s3052_s5 + $0xa0] sm:$0xff] %v1529_v0  ;;  %v1530_v2 = vpack.c.bf16 %v1488_v17, %v1487_v18  ;;  %v2933_v41 = vadd.f32 %v778_v11, %v2414_v9  ;;  %v1995_v63 = vpop.eup %1994  ;;  %v1425_v12 = vmul.f32 0.5, %v1361_v51  ;;  %v1174_v27 = vadd.f32 %v1110_v25, %v2898_v47 }
 0x264   :  { %v1111_v49 = vmul.f32 0.044715, %v1047_v24  ;;  %v2937_v13 = vadd.f32 %v827_v62, %v2416_v10  ;;  %v1362_v26 = vadd.f32 1.0, %v1995_v63  ;;  %v1237_v48 = vmul.f32 0.7978846, %v1173_v57 }
 0x265   :  { %1562 = vst [vmem:[%s3052_s5 + $0xa8] sm:$0xff] %v1530_v2  ;;  %v984_v53 = vmul.f32 %v2930_v22, %v2930_v22  ;;  %v985_v32 = vmul.f32 %v2933_v41, %v2933_v41  ;;  %v1489_v59 = vmul.f32 %v1425_v12, %v2857_v40  ;;  %v1238_v60 = vmul.f32 0.7978846, %v1174_v27 }
 0x266   :  { %v1175_v35 = vadd.f32 %v1111_v49, %v2901_v29  ;;  %v986_v28 = vmul.f32 %v2937_v13, %v2937_v13  ;;  %v1997_v23 = vpop.eup %1996  ;;  %v1426_v42 = vmul.f32 0.5, %v1362_v26  ;;  %2000 = vtanh.f32 %v1237_v48 }
 0x267   :  { %v1048_v44 = vmul.f32 %v984_v53, %v2930_v22  ;;  %v1049_v7 = vmul.f32 %v985_v32, %v2933_v41  ;;  %v1363_v19 = vadd.f32 1.0, %v1997_v23  ;;  %2002 = vtanh.f32 %v1238_v60 }
 0x268   :  { %v1999_v16 = vpop.eup %1998  ;;  %v1239_v30 = vmul.f32 0.7978846, %v1175_v35  ;;  %v1050_v40 = vmul.f32 %v986_v28, %v2937_v13  ;;  %v1490_v8 = vmul.f32 %v1426_v42, %v2860_v58  ;;  %v2955_v36 = vadd.f32 %v876_v1, %v2437_v55 }
 0x269   :  { %v1364_v4 = vadd.f32 1.0, %v1999_v16  ;;  %v1112_v15 = vmul.f32 0.044715, %v1048_v44  ;;  %v1113_v3 = vmul.f32 0.044715, %v1049_v7  ;;  %v1427_v50 = vmul.f32 0.5, %v1363_v19 }
 0x26a   :  { %2004 = vtanh.f32 %v1239_v30  ;;  %v1114_v61 = vmul.f32 0.044715, %v1050_v40  ;;  %v1531_v52 = vpack.c.bf16 %v1490_v8, %v1489_v59  ;;  %v987_v54 = vmul.f32 %v2955_v36, %v2955_v36 }
 0x26b   :  { %v1428_v34 = vmul.f32 0.5, %v1364_v4  ;;  %v1176_v37 = vadd.f32 %v1112_v15, %v2930_v22  ;;  %v1177_v33 = vadd.f32 %v1113_v3, %v2933_v41  ;;  %v1491_v6 = vmul.f32 %v1427_v50, %v2880_v43 }
 0x26c   :  { %v1178_v58 = vadd.f32 %v1114_v61, %v2937_v13  ;;  %v926_v14 = vadd.f32 %v925_v46, %v2449_v31  ;;  %v2001_v18 = vpop.eup %2000  ;;  %1563 = vst [vmem:[%s3052_s5 + $0xb0] sm:$0xff] %v1531_v52  ;;  %v1051_v43 = vmul.f32 %v987_v54, %v2955_v36 }
 0x26d   :  { %v1492_v20 = vmul.f32 %v1428_v34, %v2884_v39  ;;  %v1240_v21 = vmul.f32 0.7978846, %v1176_v37  ;;  %v1241_v38 = vmul.f32 0.7978846, %v1177_v33  ;;  %v2003_v11 = vpop.eup %2002  ;;  %v1365_v5 = vadd.f32 1.0, %v2001_v18 }
 0x26e   :  { %v1242_v0 = vmul.f32 0.7978846, %v1178_v58  ;;  %v988_v17 = vmul.f32 %v926_v14, %v926_v14  ;;  %v1366_v62 = vadd.f32 1.0, %v2003_v11  ;;  %v1115_v24 = vmul.f32 0.044715, %v1051_v43 }
 0x26f   :  { %v1532_v56 = vpack.c.bf16 %v1492_v20, %v1491_v6  ;;  %2006 = vtanh.f32 %v1240_v21  ;;  %v1429_v25 = vmul.f32 0.5, %v1365_v5 }
 0x270   :  { %v2005_v51 = vpop.eup %2004  ;;  %2008 = vtanh.f32 %v1241_v38  ;;  %v1052_v2 = vmul.f32 %v988_v17, %v926_v14  ;;  %v1430_v39 = vmul.f32 0.5, %v1366_v62  ;;  %v1179_v12 = vadd.f32 %v1115_v24, %v2955_v36 }
 0x271   :  { %1564 = vst [vmem:[%s3052_s5 + $0xb8] sm:$0xff] %v1532_v56  ;;  %v1367_v57 = vadd.f32 1.0, %v2005_v51  ;;  %2010 = vtanh.f32 %v1242_v0  ;;  %v1493_v63 = vmul.f32 %v1429_v25, %v2890_v45 }
 0x272   :  { %v1116_v27 = vmul.f32 0.044715, %v1052_v2  ;;  %v1494_v49 = vmul.f32 %v1430_v39, %v2898_v47  ;;  %v1243_v48 = vmul.f32 0.7978846, %v1179_v12 }
 0x273   :  { %v1431_v26 = vmul.f32 0.5, %v1367_v57 }
 0x274   :  { %v1180_v53 = vadd.f32 %v1116_v27, %v926_v14  ;;  %v1533_v59 = vpack.c.bf16 %v1494_v49, %v1493_v63  ;;  %2012 = vtanh.f32 %v1243_v48 }
 0x275   :  { %v2007_v32 = vpop.eup %2006  ;;  %v1495_v42 = vmul.f32 %v1431_v26, %v2901_v29 }
 0x276   :  { %v2009_v60 = vpop.eup %2008  ;;  %v1368_v35 = vadd.f32 1.0, %v2007_v32  ;;  %v1244_v28 = vmul.f32 0.7978846, %v1180_v53  ;;  %1565 = vst [vmem:[%s3052_s5 + $0xc0] sm:$0xff] %v1533_v59 }
 0x277   :  { %v2011_v23 = vpop.eup %2010  ;;  %v1369_v45 = vadd.f32 1.0, %v2009_v60 }
 0x278   :  { %v1432_v44 = vmul.f32 0.5, %v1368_v35  ;;  %v1370_v7 = vadd.f32 1.0, %v2011_v23  ;;  %2014 = vtanh.f32 %v1244_v28 }
 0x279   :  { %v1433_v47 = vmul.f32 0.5, %v1369_v45 }
 0x27a   :  { %v1496_v1 = vmul.f32 %v1432_v44, %v2930_v22  ;;  %v1434_v16 = vmul.f32 0.5, %v1370_v7  ;;  %v2013_v30 = vpop.eup %2012 }
 0x27b   :  { %v1497_v19 = vmul.f32 %v1433_v47, %v2933_v41  ;;  %v1371_v4 = vadd.f32 1.0, %v2013_v30 }
 0x27c   :  { %v1534_v40 = vpack.c.bf16 %v1496_v1, %v1495_v42  ;;  %v1498_v8 = vmul.f32 %v1434_v16, %v2937_v13 }
 0x27d   :  { %v1435_v3 = vmul.f32 0.5, %v1371_v4 }
 0x27e   :  { %v2015_v15 = vpop.eup %2014  ;;  %1566 = vst [vmem:[%s3052_s5 + $0xc8] sm:$0xff] %v1534_v40  ;;  %v1535_v29 = vpack.c.bf16 %v1498_v8, %v1497_v19 }
 0x27f   :  { %v1372_v46 = vadd.f32 1.0, %v2015_v15  ;;  %v1499_v22 = vmul.f32 %v1435_v3, %v2955_v36 }
 0x280   :  { %1567 = vst [vmem:[%s3052_s5 + $0xd0] sm:$0xff] %v1535_v29 }
 0x281   :  { %v1436_v41 = vmul.f32 0.5, %v1372_v46 }
 0x283   :  { %v1500_v50 = vmul.f32 %v1436_v41, %v926_v14 }
 0x285   :  { %v1536_v61 = vpack.c.bf16 %v1500_v50, %v1499_v22 }
 0x287   :  { %1568 = vst [vmem:[%s3052_s5 + $0xd8] sm:$0xff] %v1536_v61 }
 0x2a5   :  { %v781_v13 = vpop.f32.mrf.mxu0  ;;  %v830_v52 = vpop.f32.mrf.mxu1 }
 0x2a6   :  { %v782_v34 = vadd.f32 %v781_v13, %v2414_v9  ;;  %v2994_v37 = vadd.f32 %v830_v52, %v2416_v10 }
 0x2a8   :  { %v989_v33 = vmul.f32 %v782_v34, %v782_v34  ;;  %v990_v6 = vmul.f32 %v2994_v37, %v2994_v37 }
 0x2aa   :  { %v1053_v58 = vmul.f32 %v989_v33, %v782_v34  ;;  %v1054_v36 = vmul.f32 %v990_v6, %v2994_v37 }
 0x2ac   :  { %v1117_v54 = vmul.f32 0.044715, %v1053_v58  ;;  %v1118_v14 = vmul.f32 0.044715, %v1054_v36  ;;  %v879_v18 = vpop.f32.mrf.mxu2  ;;  %v928_v20 = vpop.f32.mrf.mxu3 }
 0x2ad   :  { %v3000_v21 = vadd.f32 %v879_v18, %v2437_v55  ;;  %v3003_v38 = vadd.f32 %v928_v20, %v2449_v31  ;;  %v783_v11 = vpop.f32.mrf.mxu0  ;;  %v832_v5 = vpop.f32.mrf.mxu1 }
 0x2ae   :  { %v1181_v0 = vadd.f32 %v1117_v54, %v782_v34  ;;  %v1182_v43 = vadd.f32 %v1118_v14, %v2994_v37  ;;  %v3007_v17 = vadd.f32 %v783_v11, %v2414_v9  ;;  %v3010_v56 = vadd.f32 %v832_v5, %v2416_v10 }
 0x2af   :  { %v991_v62 = vmul.f32 %v3000_v21, %v3000_v21  ;;  %v992_v51 = vmul.f32 %v3003_v38, %v3003_v38 }
 0x2b0   :  { %v1245_v25 = vmul.f32 0.7978846, %v1181_v0  ;;  %v1246_v24 = vmul.f32 0.7978846, %v1182_v43  ;;  %v993_v2 = vmul.f32 %v3007_v17, %v3007_v17  ;;  %v994_v39 = vmul.f32 %v3010_v56, %v3010_v56 }
 0x2b1   :  { %v1055_v9 = vmul.f32 %v991_v62, %v3000_v21  ;;  %v1056_v57 = vmul.f32 %v992_v51, %v3003_v38 }
 0x2b2   :  { %2016 = vtanh.f32 %v1245_v25  ;;  %v1057_v10 = vmul.f32 %v993_v2, %v3007_v17  ;;  %v1058_v63 = vmul.f32 %v994_v39, %v3010_v56 }
 0x2b3   :  { %2018 = vtanh.f32 %v1246_v24  ;;  %v1119_v12 = vmul.f32 0.044715, %v1055_v9  ;;  %v1120_v27 = vmul.f32 0.044715, %v1056_v57 }
 0x2b4   :  { %v1121_v49 = vmul.f32 0.044715, %v1057_v10  ;;  %v1122_v26 = vmul.f32 0.044715, %v1058_v63  ;;  %v881_v48 = vpop.f32.mrf.mxu2  ;;  %v930_v53 = vpop.f32.mrf.mxu3 }
 0x2b5   :  { %v1183_v32 = vadd.f32 %v1119_v12, %v3000_v21  ;;  %v1184_v59 = vadd.f32 %v1120_v27, %v3003_v38  ;;  %v882_v60 = vadd.f32 %v881_v48, %v2437_v55  ;;  %v931_v35 = vadd.f32 %v930_v53, %v2449_v31 }
 0x2b6   :  { %v1185_v28 = vadd.f32 %v1121_v49, %v3007_v17  ;;  %v1186_v23 = vadd.f32 %v1122_v26, %v3010_v56 }
 0x2b7   :  { %v1247_v45 = vmul.f32 0.7978846, %v1183_v32  ;;  %v1248_v42 = vmul.f32 0.7978846, %v1184_v59  ;;  %v995_v44 = vmul.f32 %v882_v60, %v882_v60  ;;  %v996_v7 = vmul.f32 %v931_v35, %v931_v35 }
 0x2b8   :  { %v2017_v47 = vpop.eup %2016  ;;  %v1249_v1 = vmul.f32 0.7978846, %v1185_v28  ;;  %v1250_v16 = vmul.f32 0.7978846, %v1186_v23 }
 0x2b9   :  { %v2019_v19 = vpop.eup %2018  ;;  %v1373_v30 = vadd.f32 1.0, %v2017_v47  ;;  %2020 = vtanh.f32 %v1247_v45  ;;  %v1059_v40 = vmul.f32 %v995_v44, %v882_v60  ;;  %v1060_v8 = vmul.f32 %v996_v7, %v931_v35 }
 0x2ba   :  { %v1374_v4 = vadd.f32 1.0, %v2019_v19  ;;  %2022 = vtanh.f32 %v1248_v42 }
 0x2bb   :  { %v1437_v55 = vmul.f32 0.5, %v1373_v30  ;;  %2024 = vtanh.f32 %v1249_v1  ;;  %v1123_v31 = vmul.f32 0.044715, %v1059_v40  ;;  %v1124_v15 = vmul.f32 0.044715, %v1060_v8 }
 0x2bc   :  { %v1438_v29 = vmul.f32 0.5, %v1374_v4  ;;  %2026 = vtanh.f32 %v1250_v16 }
 0x2bd   :  { %v1501_v3 = vmul.f32 %v1437_v55, %v782_v34  ;;  %v1187_v46 = vadd.f32 %v1123_v31, %v882_v60  ;;  %v1188_v22 = vadd.f32 %v1124_v15, %v931_v35 }
 0x2be   :  { %v1502_v41 = vmul.f32 %v1438_v29, %v2994_v37 }
 0x2bf   :  { %v2021_v50 = vpop.eup %2020  ;;  %v1251_v61 = vmul.f32 0.7978846, %v1187_v46  ;;  %v1252_v13 = vmul.f32 0.7978846, %v1188_v22 }
 0x2c0   :  { %v2023_v52 = vpop.eup %2022  ;;  %v1537_v33 = vpack.c.bf16 %v1502_v41, %v1501_v3  ;;  %v1375_v6 = vadd.f32 1.0, %v2021_v50 }
 0x2c1   :  { %v2025_v58 = vpop.eup %2024  ;;  %v1376_v36 = vadd.f32 1.0, %v2023_v52  ;;  %2028 = vtanh.f32 %v1251_v61 }
 0x2c2   :  { %v2027_v54 = vpop.eup %2026  ;;  %1569 = vst [vmem:[%s3052_s5 + $0xe0] sm:$0xff] %v1537_v33  ;;  %v1439_v14 = vmul.f32 0.5, %v1375_v6  ;;  %v1377_v34 = vadd.f32 1.0, %v2025_v58  ;;  %2030 = vtanh.f32 %v1252_v13 }
 0x2c3   :  { %v1440_v18 = vmul.f32 0.5, %v1376_v36  ;;  %v1378_v20 = vadd.f32 1.0, %v2027_v54 }
 0x2c4   :  { %v1503_v37 = vmul.f32 %v1439_v14, %v3000_v21  ;;  %v1441_v11 = vmul.f32 0.5, %v1377_v34 }
 0x2c5   :  { %v1504_v5 = vmul.f32 %v1440_v18, %v3003_v38  ;;  %v1442_v0 = vmul.f32 0.5, %v1378_v20 }
 0x2c6   :  { %v1505_v43 = vmul.f32 %v1441_v11, %v3007_v17 }
 0x2c7   :  { %v2029_v62 = vpop.eup %2028  ;;  %v1538_v51 = vpack.c.bf16 %v1504_v5, %v1503_v37  ;;  %v1506_v25 = vmul.f32 %v1442_v0, %v3010_v56 }
 0x2c8   :  { %v2031_v24 = vpop.eup %2030  ;;  %v1379_v2 = vadd.f32 1.0, %v2029_v62 }
 0x2c9   :  { %1570 = vst [vmem:[%s3052_s5 + $0xe8] sm:$0xff] %v1538_v51  ;;  %v1539_v39 = vpack.c.bf16 %v1506_v25, %v1505_v43  ;;  %v1380_v9 = vadd.f32 1.0, %v2031_v24 }
 0x2ca   :  { %v1443_v57 = vmul.f32 0.5, %v1379_v2 }
 0x2cb   :  { %1571 = vst [vmem:[%s3052_s5 + $0xf0] sm:$0xff] %v1539_v39  ;;  %v1444_v21 = vmul.f32 0.5, %v1380_v9 }
 0x2cc   :  { %v1507_v38 = vmul.f32 %v1443_v57, %v882_v60 }
 0x2cd   :  { %v1508_v17 = vmul.f32 %v1444_v21, %v931_v35 }
 0x2cf   :  { %v1540_v10 = vpack.c.bf16 %v1508_v17, %v1507_v38 }
 0x2d1   :  { %1572 = vst [vmem:[%s3052_s5 + $0xf8] sm:$0xff] %v1540_v10 }
 0x2d2   :  { %1577 = vsyncpa [#allocation4], 1 }

// kernel: eva_forward.21
= control target key start
LH: loop header
LB: loop body
LE: loop exit
PB: predicated region body
PF: predicated region fallthrough
CT: control target
= control target key end

     0   :  { %9 = vsyncpa [#allocation3], 0  ;;  %s1202_s18 = smov [#allocation2]   ;;  %s1203_s20 = smov 64   ;;  %s1494_s0 = inlined_call_operand.vmem [shape: bf16[128,512], index: 0, kind: input, shape index: {}]   ;;  %s1495_s1 = inlined_call_operand.hbm [shape: bf16[512,128], index: 1, kind: input, shape index: {}]   ;;  %s1496_s2 = inlined_call_operand.vmem [shape: f32[1,128], index: 2, kind: input, shape index: {}]   ;;  %s1497_s3 = inlined_call_operand.vmem [shape: bf16[128,128], index: 3, kind: input, shape index: {}]   ;;  %s1498_s4 = inlined_call_operand.vmem [shape: bf16[128,128], index: 4, kind: output, shape index: {}]  }
   0x1   :  { %s16_s17 = sshll.u32 %s1495_s1, 4  ;;  %s18_s19 = sshll.u32 %s1202_s18, 4  ;;  %s17_s17 = int_to_ptr.hbm [resolvable:$true] %s16_s17  ;;  %s19_s19 = int_to_ptr.vmem [resolvable:$true] %s18_s19 }
   0x2   :  { %s1204_s21 = smov 4  }
   0x3   :  { %24 = dma.hbm_to_vmem [thread:$0]  %s17_s17, 4096, %s19_s19, [#allocation3], %s1203_s20, %s1203_s20, %s1204_s21  }
   0x4   :  { %1200 = dma.done.wait [#allocation3], 4096  }
   0x5   :  { %1201 = vsyncadd [#allocation3], 4294963200  ;;  %v1061_v0 = vld [vmem:[#allocation2 + $0x38] sm:$0xff]  ;;  %v1060_v4 = vld [vmem:[#allocation2 + $0x30] sm:$0xff] }
   0x6   :  { %v1069_v1 = vld [vmem:[#allocation2 + $0x78] sm:$0xff]  ;;  %485 = vmatpush.bf16.msra.mxu0 %v1061_v0  ;;  %v1068_v5 = vld [vmem:[#allocation2 + $0x70] sm:$0xff]  ;;  %v1059_v8 = vld [vmem:[#allocation2 + $0x28] sm:$0xff] }
   0x7   :  { %v1077_v2 = vld [vmem:[#allocation2 + $0xb8] sm:$0xff]  ;;  %534 = vmatpush.bf16.msra.mxu1 %v1069_v1  ;;  %v1076_v6 = vld [vmem:[#allocation2 + $0xb0] sm:$0xff]  ;;  %v1067_v9 = vld [vmem:[#allocation2 + $0x68] sm:$0xff] }
   0x8   :  { %v1085_v3 = vld [vmem:[#allocation2 + $0xf8] sm:$0xff]  ;;  %583 = vmatpush.bf16.msra.mxu2 %v1077_v2  ;;  %v1084_v7 = vld [vmem:[#allocation2 + $0xf0] sm:$0xff]  ;;  %v1075_v10 = vld [vmem:[#allocation2 + $0xa8] sm:$0xff] }
   0x9   :  { %632 = vmatpush.bf16.msra.mxu3 %v1085_v3  ;;  %v1083_v11 = vld [vmem:[#allocation2 + $0xe8] sm:$0xff]  ;;  %v1058_v12 = vld [vmem:[#allocation2 + $0x20] sm:$0xff]  ;;  %v1057_v16 = vld [vmem:[#allocation2 + $0x18] sm:$0xff] }
   0xa   :  { %486 = vmatpush.bf16.msra.mxu0 %v1060_v4  ;;  %v1066_v13 = vld [vmem:[#allocation2 + $0x60] sm:$0xff]  ;;  %v1065_v17 = vld [vmem:[#allocation2 + $0x58] sm:$0xff]  ;;  %v1056_v20 = vld [vmem:[#allocation2 + $0x10] sm:$0xff] }
   0xb   :  { %535 = vmatpush.bf16.msra.mxu1 %v1068_v5  ;;  %v1074_v14 = vld [vmem:[#allocation2 + $0xa0] sm:$0xff]  ;;  %v1073_v18 = vld [vmem:[#allocation2 + $0x98] sm:$0xff]  ;;  %v1064_v21 = vld [vmem:[#allocation2 + $0x50] sm:$0xff] }
   0xc   :  { %584 = vmatpush.bf16.msra.mxu2 %v1076_v6  ;;  %v1082_v15 = vld [vmem:[#allocation2 + $0xe0] sm:$0xff]  ;;  %v1081_v19 = vld [vmem:[#allocation2 + $0xd8] sm:$0xff]  ;;  %v1072_v22 = vld [vmem:[#allocation2 + $0x90] sm:$0xff] }
   0xd   :  { %633 = vmatpush.bf16.msra.mxu3 %v1084_v7  ;;  %v1080_v23 = vld [vmem:[#allocation2 + $0xd0] sm:$0xff]  ;;  %v1055_v24 = vld [vmem:[#allocation2 + $0x8] sm:$0xff]  ;;  %v1054_v28 = vld [vmem:[#allocation2] sm:$0xff] }
   0xe   :  { %487 = vmatpush.bf16.msra.mxu0 %v1059_v8  ;;  %v1063_v25 = vld [vmem:[#allocation2 + $0x48] sm:$0xff]  ;;  %v1062_v29 = vld [vmem:[#allocation2 + $0x40] sm:$0xff]  ;;  %v1024_v33 = vld [vmem:[%s1494_s0 + $0xc] sm:$0xf0] }
   0xf   :  { %536 = vmatpush.bf16.msra.mxu1 %v1067_v9  ;;  %v1071_v26 = vld [vmem:[#allocation2 + $0x88] sm:$0xff]  ;;  %v1070_v30 = vld [vmem:[#allocation2 + $0x80] sm:$0xff]  ;;  %v770_v35 = vld [vmem:[%s1494_s0 + $0x10] sm:$0xf0] }
  0x10   :  { %585 = vmatpush.bf16.msra.mxu2 %v1075_v10  ;;  %v1079_v27 = vld [vmem:[#allocation2 + $0xc8] sm:$0xff]  ;;  %v1078_v31 = vld [vmem:[#allocation2 + $0xc0] sm:$0xff]  ;;  %v1025_v37 = vld [vmem:[%s1494_s0 + $0x14] sm:$0xf0] }
  0x11   :  { %634 = vmatpush.bf16.msra.mxu3 %v1083_v11  ;;  %v768_v32 = vld [vmem:[%s1494_s0] sm:$0xf]  ;;  %v1022_v34 = vld [vmem:[%s1494_s0 + $0x4] sm:$0xf]  ;;  %v776_v36 = vld [vmem:[%s1494_s0 + $0x8] sm:$0xf] }
  0x12   :  { %488 = vmatpush.bf16.msra.mxu0 %v1058_v12  ;;  %v1023_v38 = vld [vmem:[%s1494_s0 + $0xc] sm:$0xf]  ;;  %v778_v39 = vld [vmem:[%s1494_s0 + $0x18] sm:$0xf0]  ;;  %v769_v40 = vor.u32 %v1024_v33, %v768_v32  ;;  %v773_v41 = vor.u32 %v1022_v34, %v770_v35  ;;  %v777_v42 = vor.u32 %v1025_v37, %v776_v36  ;;  %v784_v44 = vld [vmem:[%s1494_s0 + $0x20] sm:$0xf] }
  0x13   :  { %537 = vmatpush.bf16.msra.mxu1 %v1066_v13  ;;  %v781_v43 = vor.u32 %v1023_v38, %v778_v39  ;;  %v1028_v45 = vld [vmem:[%s1494_s0 + $0x2c] sm:$0xf0]  ;;  %v1026_v46 = vld [vmem:[%s1494_s0 + $0x24] sm:$0xf]  ;;  %v786_v47 = vld [vmem:[%s1494_s0 + $0x30] sm:$0xf0] }
  0x14   :  { %586 = vmatpush.bf16.msra.mxu2 %v1074_v14  ;;  %v792_v48 = vld [vmem:[%s1494_s0 + $0x28] sm:$0xf]  ;;  %v1029_v49 = vld [vmem:[%s1494_s0 + $0x34] sm:$0xf0]  ;;  %v1027_v50 = vld [vmem:[%s1494_s0 + $0x2c] sm:$0xf]  ;;  %v785_v52 = vor.u32 %v1028_v45, %v784_v44  ;;  %v789_v53 = vor.u32 %v1026_v46, %v786_v47 }
  0x15   :  { %635 = vmatpush.bf16.msra.mxu3 %v1082_v15  ;;  %v794_v51 = vld [vmem:[%s1494_s0 + $0x38] sm:$0xf0]  ;;  %v793_v54 = vor.u32 %v1029_v49, %v792_v48  ;;  %v800_v56 = vld [vmem:[%s1494_s0 + $0x40] sm:$0xf]  ;;  %v1032_v57 = vld [vmem:[%s1494_s0 + $0x4c] sm:$0xf0] }
  0x16   :  { %489 = vmatpush.bf16.msra.mxu0 %v1057_v16  ;;  %v797_v55 = vor.u32 %v1027_v50, %v794_v51  ;;  %v1030_v58 = vld [vmem:[%s1494_s0 + $0x44] sm:$0xf]  ;;  %v802_v59 = vld [vmem:[%s1494_s0 + $0x50] sm:$0xf0]  ;;  %v808_v60 = vld [vmem:[%s1494_s0 + $0x48] sm:$0xf]  ;;  %v801_v0 = vor.u32 %v1032_v57, %v800_v56 }
  0x17   :  { %538 = vmatpush.bf16.msra.mxu1 %v1065_v17  ;;  %v1033_v61 = vld [vmem:[%s1494_s0 + $0x54] sm:$0xf0]  ;;  %v1031_v62 = vld [vmem:[%s1494_s0 + $0x4c] sm:$0xf]  ;;  %v810_v63 = vld [vmem:[%s1494_s0 + $0x58] sm:$0xf0]  ;;  %v805_v1 = vor.u32 %v1030_v58, %v802_v59 }
  0x18   :  { %587 = vmatpush.bf16.msra.mxu2 %v1073_v18  ;;  %v809_v2 = vor.u32 %v1033_v61, %v808_v60  ;;  %v813_v3 = vor.u32 %v1031_v62, %v810_v63  ;;  %v816_v4 = vld [vmem:[%s1494_s0 + $0x60] sm:$0xf]  ;;  %v1036_v5 = vld [vmem:[%s1494_s0 + $0x6c] sm:$0xf0]  ;;  %v1034_v6 = vld [vmem:[%s1494_s0 + $0x64] sm:$0xf] }
  0x19   :  { %636 = vmatpush.bf16.msra.mxu3 %v1081_v19  ;;  %v818_v7 = vld [vmem:[%s1494_s0 + $0x70] sm:$0xf0]  ;;  %v824_v8 = vld [vmem:[%s1494_s0 + $0x68] sm:$0xf]  ;;  %v1037_v9 = vld [vmem:[%s1494_s0 + $0x74] sm:$0xf0]  ;;  %v817_v12 = vor.u32 %v1036_v5, %v816_v4 }
  0x1a   :  { %490 = vmatpush.bf16.msra.mxu0 %v1056_v20  ;;  %v1035_v10 = vld [vmem:[%s1494_s0 + $0x6c] sm:$0xf]  ;;  %v826_v11 = vld [vmem:[%s1494_s0 + $0x78] sm:$0xf0]  ;;  %v821_v13 = vor.u32 %v1034_v6, %v818_v7  ;;  %v825_v14 = vor.u32 %v1037_v9, %v824_v8  ;;  %v832_v16 = vld [vmem:[%s1494_s0 + $0x80] sm:$0xf] }
  0x1b   :  { %539 = vmatpush.bf16.msra.mxu1 %v1064_v21  ;;  %v829_v15 = vor.u32 %v1035_v10, %v826_v11  ;;  %v1040_v17 = vld [vmem:[%s1494_s0 + $0x8c] sm:$0xf0]  ;;  %v1038_v18 = vld [vmem:[%s1494_s0 + $0x84] sm:$0xf]  ;;  %v834_v19 = vld [vmem:[%s1494_s0 + $0x90] sm:$0xf0] }
  0x1c   :  { %588 = vmatpush.bf16.msra.mxu2 %v1072_v22  ;;  %v840_v20 = vld [vmem:[%s1494_s0 + $0x88] sm:$0xf]  ;;  %v1041_v21 = vld [vmem:[%s1494_s0 + $0x94] sm:$0xf0]  ;;  %v1039_v22 = vld [vmem:[%s1494_s0 + $0x8c] sm:$0xf] }
  0x1d   :  { %637 = vmatpush.bf16.msra.mxu3 %v1080_v23  ;;  %v842_v23 = vld [vmem:[%s1494_s0 + $0x98] sm:$0xf0]  ;;  %v856_v32 = vld [vmem:[%s1494_s0 + $0xa8] sm:$0xf]  ;;  %v1045_v33 = vld [vmem:[%s1494_s0 + $0xb4] sm:$0xf0] }
  0x1e   :  { %491 = vmatpush.bf16.msra.mxu0 %v1055_v24  ;;  %v833_v24 = vor.u32 %v1040_v17, %v832_v16  ;;  %v1043_v34 = vld [vmem:[%s1494_s0 + $0xac] sm:$0xf]  ;;  %v858_v35 = vld [vmem:[%s1494_s0 + $0xb8] sm:$0xf0]  ;;  %v857_v38 = vor.u32 %v1045_v33, %v856_v32  ;;  %v872_v44 = vld [vmem:[%s1494_s0 + $0xc8] sm:$0xf] }
  0x1f   :  { %540 = vmatpush.bf16.msra.mxu1 %v1063_v25  ;;  %v837_v25 = vor.u32 %v1038_v18, %v834_v19  ;;  %v861_v39 = vor.u32 %v1043_v34, %v858_v35  ;;  %v1049_v45 = vld [vmem:[%s1494_s0 + $0xd4] sm:$0xf0]  ;;  %v1047_v46 = vld [vmem:[%s1494_s0 + $0xcc] sm:$0xf]  ;;  %v874_v47 = vld [vmem:[%s1494_s0 + $0xd8] sm:$0xf0] }
  0x20   :  { %589 = vmatpush.bf16.msra.mxu2 %v1071_v26  ;;  %v841_v26 = vor.u32 %v1041_v21, %v840_v20  ;;  %v873_v50 = vor.u32 %v1049_v45, %v872_v44  ;;  %v877_v51 = vor.u32 %v1047_v46, %v874_v47  ;;  %v888_v56 = vld [vmem:[%s1494_s0 + $0xe8] sm:$0xf]  ;;  %v1053_v57 = vld [vmem:[%s1494_s0 + $0xf4] sm:$0xf0]  ;;  %v1051_v58 = vld [vmem:[%s1494_s0 + $0xec] sm:$0xf] }
  0x21   :  { %638 = vmatpush.bf16.msra.mxu3 %v1079_v27  ;;  %v845_v27 = vor.u32 %v1039_v22, %v842_v23  ;;  %v890_v59 = vld [vmem:[%s1494_s0 + $0xf8] sm:$0xf0]  ;;  %v889_v62 = vor.u32 %v1053_v57, %v888_v56  ;;  %v1087_v11 = vld [vmem:[%s1497_s3] sm:$0xff]   ;;  %v1158_v33 = vld [vmem:[%s1497_s3 + $0x8] sm:$0xff]  }
  0x22   :  { %492 = vmatpush.bf16.msra.mxu0 %v1054_v28  ;;  %v848_v28 = vld [vmem:[%s1494_s0 + $0xa0] sm:$0xf]  ;;  %v893_v63 = vor.u32 %v1051_v58, %v890_v59  ;;  %v1088_v16 = vunpack.c.l.bf16 %v1087_v11  ;;  %v1089_v18 = vunpack.c.h.bf16 %v1087_v11 }
  0x23   :  { %541 = vmatpush.bf16.msra.mxu1 %v1062_v29  ;;  %v1044_v29 = vld [vmem:[%s1494_s0 + $0xac] sm:$0xf0] }
  0x24   :  { %590 = vmatpush.bf16.msra.mxu2 %v1070_v30  ;;  %v1042_v30 = vld [vmem:[%s1494_s0 + $0xa4] sm:$0xf]  ;;  %v849_v36 = vor.u32 %v1044_v29, %v848_v28 }
  0x25   :  { %639 = vmatpush.bf16.msra.mxu3 %v1078_v31  ;;  %493 = vmatmul.bf16.vlgmr.msra.gmra.mxu0 %v769_v40  ;;  %v850_v31 = vld [vmem:[%s1494_s0 + $0xb0] sm:$0xf0]  ;;  %v864_v40 = vld [vmem:[%s1494_s0 + $0xc0] sm:$0xf] }
  0x26   :  { %542 = vmatmul.bf16.vlgmr.msra.gmra.mxu1 %v773_v41  ;;  %v853_v37 = vor.u32 %v1042_v30, %v850_v31  ;;  %v1048_v41 = vld [vmem:[%s1494_s0 + $0xcc] sm:$0xf0] }
  0x27   :  { %591 = vmatmul.bf16.vlgmr.msra.gmra.mxu2 %v777_v42  ;;  %v1046_v42 = vld [vmem:[%s1494_s0 + $0xc4] sm:$0xf]  ;;  %v865_v48 = vor.u32 %v1048_v41, %v864_v40  ;;  %v1093_v40 = vunpack.c.h.bf16 %v1158_v33 }
  0x28   :  { %640 = vmatmul.bf16.vlgmr.msra.gmra.mxu3 %v781_v43  ;;  %v866_v43 = vld [vmem:[%s1494_s0 + $0xd0] sm:$0xf0] }
  0x29   :  { %v869_v49 = vor.u32 %v1046_v42, %v866_v43 }
  0x35   :  { %498 = vmatmul.bf16.gmra.mxu0 %v785_v52  ;;  %v880_v52 = vld [vmem:[%s1494_s0 + $0xe0] sm:$0xf] }
  0x36   :  { %547 = vmatmul.bf16.gmra.mxu1 %v789_v53  ;;  %v1052_v53 = vld [vmem:[%s1494_s0 + $0xec] sm:$0xf0] }
  0x37   :  { %596 = vmatmul.bf16.gmra.mxu2 %v793_v54  ;;  %v1050_v54 = vld [vmem:[%s1494_s0 + $0xe4] sm:$0xf]  ;;  %v881_v60 = vor.u32 %v1052_v53, %v880_v52 }
  0x38   :  { %645 = vmatmul.bf16.gmra.mxu3 %v797_v55  ;;  %v882_v55 = vld [vmem:[%s1494_s0 + $0xf0] sm:$0xf0] }
  0x39   :  { %v885_v61 = vor.u32 %v1050_v54, %v882_v55  ;;  %v1159_v55 = vld [vmem:[%s1497_s3 + $0x10] sm:$0xff]  }
  0x45   :  { %503 = vmatmul.bf16.gmra.mxu0 %v801_v0  ;;  %v1428_v0 = vld [vmem:[%s1496_s2] ss:$0 sm:$0xff] }
  0x46   :  { %552 = vmatmul.bf16.gmra.mxu1 %v805_v1 }
  0x47   :  { %601 = vmatmul.bf16.gmra.mxu2 %v809_v2 }
  0x48   :  { %650 = vmatmul.bf16.gmra.mxu3 %v813_v3 }
  0x55   :  { %508 = vmatmul.bf16.gmra.mxu0 %v817_v12 }
  0x56   :  { %557 = vmatmul.bf16.gmra.mxu1 %v821_v13 }
  0x57   :  { %606 = vmatmul.bf16.gmra.mxu2 %v825_v14 }
  0x58   :  { %655 = vmatmul.bf16.gmra.mxu3 %v829_v15 }
  0x65   :  { %513 = vmatmul.bf16.gmra.mxu0 %v833_v24 }
  0x66   :  { %562 = vmatmul.bf16.gmra.mxu1 %v837_v25 }
  0x67   :  { %611 = vmatmul.bf16.gmra.mxu2 %v841_v26 }
  0x68   :  { %660 = vmatmul.bf16.gmra.mxu3 %v845_v27 }
  0x75   :  { %518 = vmatmul.bf16.gmra.mxu0 %v849_v36 }
  0x76   :  { %567 = vmatmul.bf16.gmra.mxu1 %v853_v37 }
  0x77   :  { %616 = vmatmul.bf16.gmra.mxu2 %v857_v38  ;;  %v1092_v38 = vunpack.c.l.bf16 %v1158_v33 }
  0x78   :  { %665 = vmatmul.bf16.gmra.mxu3 %v861_v39 }
  0x85   :  { %523 = vmatmul.bf16.gmra.mxu0 %v865_v48 }
  0x86   :  { %572 = vmatmul.bf16.gmra.mxu1 %v869_v49 }
  0x87   :  { %621 = vmatmul.bf16.gmra.mxu2 %v873_v50 }
  0x88   :  { %670 = vmatmul.bf16.gmra.mxu3 %v877_v51 }
  0x95   :  { %528 = vmatmul.bf16.gmra.mxu0 %v881_v60  ;;  %v1096_v60 = vunpack.c.l.bf16 %v1159_v55 }
  0x96   :  { %577 = vmatmul.bf16.gmra.mxu1 %v885_v61 }
  0x97   :  { %626 = vmatmul.bf16.gmra.mxu2 %v889_v62  ;;  %v1097_v62 = vunpack.c.h.bf16 %v1159_v55 }
  0x98   :  { %675 = vmatmul.bf16.gmra.mxu3 %v893_v63 }
  0xa2   :  { %v494_v1 = vpop.f32.mrf.mxu0 }
  0xa3   :  { %v543_v2 = vpop.f32.mrf.mxu1  ;;  %v495_v3 = vadd.f32 %v1428_v0, %v494_v1 }
  0xa5   :  { %v544_v6 = vadd.f32 %v543_v2, %v495_v3 }
  0xaa   :  { %v592_v4 = vpop.f32.mrf.mxu2  ;;  %v496_v7 = vpop.f32.mrf.mxu0 }
  0xab   :  { %v641_v5 = vpop.f32.mrf.mxu3  ;;  %v545_v8 = vpop.f32.mrf.mxu1  ;;  %v497_v9 = vadd.f32 %v1428_v0, %v496_v7  ;;  %v593_v10 = vadd.f32 %v592_v4, %v544_v6 }
  0xad   :  { %v546_v12 = vadd.f32 %v545_v8, %v497_v9  ;;  %v642_v15 = vadd.f32 %v641_v5, %v593_v10 }
  0xaf   :  { %v713_v22 = vadd.f32 %v1088_v16, %v642_v15 }
  0xb2   :  { %v594_v13 = vpop.f32.mrf.mxu2  ;;  %v499_v19 = vpop.f32.mrf.mxu0 }
  0xb3   :  { %v643_v14 = vpop.f32.mrf.mxu3  ;;  %v595_v17 = vadd.f32 %v594_v13, %v546_v12  ;;  %v548_v20 = vpop.f32.mrf.mxu1  ;;  %v500_v24 = vadd.f32 %v1428_v0, %v499_v19 }
  0xb5   :  { %v644_v21 = vadd.f32 %v643_v14, %v595_v17  ;;  %v549_v28 = vadd.f32 %v548_v20, %v500_v24  ;;  %v1160_v14 = vld [vmem:[%s1497_s3 + $0x18] sm:$0xff]  }
  0xb6   :  { %v1100_v19 = vunpack.c.l.bf16 %v1160_v14 }
  0xb7   :  { %v714_v23 = vadd.f32 %v1089_v18, %v644_v21  ;;  %v1101_v21 = vunpack.c.h.bf16 %v1160_v14 }
  0xb9   :  { %v1121_v25 = vpack.c.bf16 %v714_v23, %v713_v22 }
  0xba   :  { %v597_v26 = vpop.f32.mrf.mxu2  ;;  %v501_v29 = vpop.f32.mrf.mxu0 }
  0xbb   :  { %v646_v27 = vpop.f32.mrf.mxu3  ;;  %1122 = vst [vmem:[%s1498_s4] sm:$0xff] %v1121_v25   ;;  %v550_v30 = vpop.f32.mrf.mxu1  ;;  %v502_v31 = vadd.f32 %v1428_v0, %v501_v29  ;;  %v598_v32 = vadd.f32 %v597_v26, %v549_v28 }
  0xbd   :  { %v551_v34 = vadd.f32 %v550_v30, %v502_v31  ;;  %v647_v37 = vadd.f32 %v646_v27, %v598_v32 }
  0xbf   :  { %v715_v44 = vadd.f32 %v1092_v38, %v647_v37 }
  0xc2   :  { %v599_v35 = vpop.f32.mrf.mxu2  ;;  %v504_v41 = vpop.f32.mrf.mxu0 }
  0xc3   :  { %v648_v36 = vpop.f32.mrf.mxu3  ;;  %v600_v39 = vadd.f32 %v599_v35, %v551_v34  ;;  %v553_v42 = vpop.f32.mrf.mxu1  ;;  %v505_v46 = vadd.f32 %v1428_v0, %v504_v41 }
  0xc5   :  { %v649_v43 = vadd.f32 %v648_v36, %v600_v39  ;;  %v554_v50 = vadd.f32 %v553_v42, %v505_v46  ;;  %v1161_v36 = vld [vmem:[%s1497_s3 + $0x20] sm:$0xff]  }
  0xc6   :  { %v1104_v41 = vunpack.c.l.bf16 %v1161_v36 }
  0xc7   :  { %v716_v45 = vadd.f32 %v1093_v40, %v649_v43  ;;  %v1105_v43 = vunpack.c.h.bf16 %v1161_v36 }
  0xc9   :  { %v1126_v47 = vpack.c.bf16 %v716_v45, %v715_v44 }
  0xca   :  { %v602_v48 = vpop.f32.mrf.mxu2  ;;  %v506_v51 = vpop.f32.mrf.mxu0 }
  0xcb   :  { %v651_v49 = vpop.f32.mrf.mxu3  ;;  %1165 = vst [vmem:[%s1498_s4 + $0x8] sm:$0xff] %v1126_v47   ;;  %v555_v52 = vpop.f32.mrf.mxu1  ;;  %v507_v53 = vadd.f32 %v1428_v0, %v506_v51  ;;  %v603_v54 = vadd.f32 %v602_v48, %v554_v50 }
  0xcd   :  { %v556_v56 = vadd.f32 %v555_v52, %v507_v53  ;;  %v652_v59 = vadd.f32 %v651_v49, %v603_v54 }
  0xcf   :  { %v717_v3 = vadd.f32 %v1096_v60, %v652_v59 }
  0xd2   :  { %v604_v57 = vpop.f32.mrf.mxu2  ;;  %v509_v63 = vpop.f32.mrf.mxu0 }
  0xd3   :  { %v653_v58 = vpop.f32.mrf.mxu3  ;;  %v605_v61 = vadd.f32 %v604_v57, %v556_v56  ;;  %v558_v1 = vpop.f32.mrf.mxu1  ;;  %v510_v5 = vadd.f32 %v1428_v0, %v509_v63 }
  0xd5   :  { %v654_v2 = vadd.f32 %v653_v58, %v605_v61  ;;  %v559_v9 = vadd.f32 %v558_v1, %v510_v5  ;;  %v1162_v58 = vld [vmem:[%s1497_s3 + $0x28] sm:$0xff]  }
  0xd6   :  { %v1108_v63 = vunpack.c.l.bf16 %v1162_v58 }
  0xd7   :  { %v718_v4 = vadd.f32 %v1097_v62, %v654_v2  ;;  %v1109_v2 = vunpack.c.h.bf16 %v1162_v58 }
  0xd9   :  { %v1131_v6 = vpack.c.bf16 %v718_v4, %v717_v3 }
  0xda   :  { %v607_v7 = vpop.f32.mrf.mxu2  ;;  %v511_v10 = vpop.f32.mrf.mxu0 }
  0xdb   :  { %v656_v8 = vpop.f32.mrf.mxu3  ;;  %1166 = vst [vmem:[%s1498_s4 + $0x10] sm:$0xff] %v1131_v6   ;;  %v560_v11 = vpop.f32.mrf.mxu1  ;;  %v512_v12 = vadd.f32 %v1428_v0, %v511_v10  ;;  %v608_v13 = vadd.f32 %v607_v7, %v559_v9 }
  0xdd   :  { %v561_v15 = vadd.f32 %v560_v11, %v512_v12  ;;  %v657_v18 = vadd.f32 %v656_v8, %v608_v13 }
  0xdf   :  { %v719_v25 = vadd.f32 %v1100_v19, %v657_v18 }
  0xe2   :  { %v609_v16 = vpop.f32.mrf.mxu2  ;;  %v514_v22 = vpop.f32.mrf.mxu0 }
  0xe3   :  { %v658_v17 = vpop.f32.mrf.mxu3  ;;  %v610_v20 = vadd.f32 %v609_v16, %v561_v15  ;;  %v563_v23 = vpop.f32.mrf.mxu1  ;;  %v515_v27 = vadd.f32 %v1428_v0, %v514_v22 }
  0xe5   :  { %v659_v24 = vadd.f32 %v658_v17, %v610_v20  ;;  %v564_v31 = vadd.f32 %v563_v23, %v515_v27  ;;  %v1163_v17 = vld [vmem:[%s1497_s3 + $0x30] sm:$0xff]  }
  0xe6   :  { %v1112_v22 = vunpack.c.l.bf16 %v1163_v17 }
  0xe7   :  { %v720_v26 = vadd.f32 %v1101_v21, %v659_v24  ;;  %v1113_v24 = vunpack.c.h.bf16 %v1163_v17 }
  0xe9   :  { %v1136_v28 = vpack.c.bf16 %v720_v26, %v719_v25 }
  0xea   :  { %v612_v29 = vpop.f32.mrf.mxu2  ;;  %v516_v32 = vpop.f32.mrf.mxu0 }
  0xeb   :  { %v661_v30 = vpop.f32.mrf.mxu3  ;;  %1167 = vst [vmem:[%s1498_s4 + $0x18] sm:$0xff] %v1136_v28   ;;  %v565_v33 = vpop.f32.mrf.mxu1  ;;  %v517_v34 = vadd.f32 %v1428_v0, %v516_v32  ;;  %v613_v35 = vadd.f32 %v612_v29, %v564_v31 }
  0xed   :  { %v566_v37 = vadd.f32 %v565_v33, %v517_v34  ;;  %v662_v40 = vadd.f32 %v661_v30, %v613_v35 }
  0xef   :  { %v721_v47 = vadd.f32 %v1104_v41, %v662_v40 }
  0xf2   :  { %v614_v38 = vpop.f32.mrf.mxu2  ;;  %v519_v44 = vpop.f32.mrf.mxu0 }
  0xf3   :  { %v663_v39 = vpop.f32.mrf.mxu3  ;;  %v615_v42 = vadd.f32 %v614_v38, %v566_v37  ;;  %v568_v45 = vpop.f32.mrf.mxu1  ;;  %v520_v49 = vadd.f32 %v1428_v0, %v519_v44  ;;  %v1164_v38 = vld [vmem:[%s1497_s3 + $0x38] sm:$0xff]  }
  0xf5   :  { %v664_v46 = vadd.f32 %v663_v39, %v615_v42  ;;  %v569_v53 = vadd.f32 %v568_v45, %v520_v49  ;;  %v1117_v45 = vunpack.c.h.bf16 %v1164_v38 }
  0xf7   :  { %v722_v48 = vadd.f32 %v1105_v43, %v664_v46  ;;  %v1116_v43 = vunpack.c.l.bf16 %v1164_v38 }
  0xf9   :  { %v1141_v50 = vpack.c.bf16 %v722_v48, %v721_v47 }
  0xfa   :  { %v617_v51 = vpop.f32.mrf.mxu2  ;;  %v521_v54 = vpop.f32.mrf.mxu0 }
  0xfb   :  { %v666_v52 = vpop.f32.mrf.mxu3  ;;  %1168 = vst [vmem:[%s1498_s4 + $0x20] sm:$0xff] %v1141_v50   ;;  %v570_v55 = vpop.f32.mrf.mxu1  ;;  %v522_v56 = vadd.f32 %v1428_v0, %v521_v54  ;;  %v618_v57 = vadd.f32 %v617_v51, %v569_v53 }
  0xfd   :  { %v571_v59 = vadd.f32 %v570_v55, %v522_v56  ;;  %v667_v62 = vadd.f32 %v666_v52, %v618_v57 }
  0xff   :  { %v723_v6 = vadd.f32 %v1108_v63, %v667_v62 }
 0x102   :  { %v619_v60 = vpop.f32.mrf.mxu2  ;;  %v524_v3 = vpop.f32.mrf.mxu0 }
 0x103   :  { %v668_v61 = vpop.f32.mrf.mxu3  ;;  %v620_v1 = vadd.f32 %v619_v60, %v571_v59  ;;  %v573_v4 = vpop.f32.mrf.mxu1  ;;  %v525_v8 = vadd.f32 %v1428_v0, %v524_v3 }
 0x105   :  { %v669_v5 = vadd.f32 %v668_v61, %v620_v1  ;;  %v574_v12 = vadd.f32 %v573_v4, %v525_v8 }
 0x107   :  { %v724_v7 = vadd.f32 %v1109_v2, %v669_v5 }
 0x109   :  { %v1146_v9 = vpack.c.bf16 %v724_v7, %v723_v6 }
 0x10a   :  { %v622_v10 = vpop.f32.mrf.mxu2  ;;  %v526_v13 = vpop.f32.mrf.mxu0 }
 0x10b   :  { %v671_v11 = vpop.f32.mrf.mxu3  ;;  %1169 = vst [vmem:[%s1498_s4 + $0x28] sm:$0xff] %v1146_v9   ;;  %v575_v14 = vpop.f32.mrf.mxu1  ;;  %v527_v15 = vadd.f32 %v1428_v0, %v526_v13  ;;  %v623_v16 = vadd.f32 %v622_v10, %v574_v12 }
 0x10d   :  { %v576_v18 = vadd.f32 %v575_v14, %v527_v15  ;;  %v672_v21 = vadd.f32 %v671_v11, %v623_v16 }
 0x10f   :  { %v725_v28 = vadd.f32 %v1112_v22, %v672_v21 }
 0x112   :  { %v624_v19 = vpop.f32.mrf.mxu2  ;;  %v529_v25 = vpop.f32.mrf.mxu0 }
 0x113   :  { %v673_v20 = vpop.f32.mrf.mxu3  ;;  %v625_v23 = vadd.f32 %v624_v19, %v576_v18  ;;  %v578_v27 = vpop.f32.mrf.mxu1  ;;  %v530_v30 = vadd.f32 %v1428_v0, %v529_v25 }
 0x115   :  { %v674_v26 = vadd.f32 %v673_v20, %v625_v23  ;;  %v579_v34 = vadd.f32 %v578_v27, %v530_v30 }
 0x117   :  { %v726_v29 = vadd.f32 %v1113_v24, %v674_v26 }
 0x119   :  { %v1151_v31 = vpack.c.bf16 %v726_v29, %v725_v28 }
 0x11a   :  { %v627_v32 = vpop.f32.mrf.mxu2  ;;  %v531_v35 = vpop.f32.mrf.mxu0 }
 0x11b   :  { %v676_v33 = vpop.f32.mrf.mxu3  ;;  %1170 = vst [vmem:[%s1498_s4 + $0x30] sm:$0xff] %v1151_v31   ;;  %v532_v36 = vadd.f32 %v1428_v0, %v531_v35  ;;  %v628_v37 = vadd.f32 %v627_v32, %v579_v34  ;;  %v580_v39 = vpop.f32.mrf.mxu1 }
 0x11d   :  { %v581_v40 = vadd.f32 %v580_v39, %v532_v36  ;;  %v677_v42 = vadd.f32 %v676_v33, %v628_v37 }
 0x11f   :  { %v727_v48 = vadd.f32 %v1116_v43, %v677_v42 }
 0x122   :  { %v629_v41 = vpop.f32.mrf.mxu2 }
 0x123   :  { %v630_v44 = vadd.f32 %v629_v41, %v581_v40  ;;  %v678_v46 = vpop.f32.mrf.mxu3 }
 0x125   :  { %v679_v47 = vadd.f32 %v678_v46, %v630_v44 }
 0x127   :  { %v728_v49 = vadd.f32 %v1117_v45, %v679_v47 }
 0x129   :  { %v1156_v50 = vpack.c.bf16 %v728_v49, %v727_v48 }
 0x12b   :  { %1171 = vst [vmem:[%s1498_s4 + $0x38] sm:$0xff] %v1156_v50  }
 0x12c   :  { %765 = vsyncpa [#allocation3], 1 }

</bundles_post_ra>
